<compile_context>
chip_gen: v5e
topology: v5e:2x2
jax: 0.10.0
libtpu: 0.0.40
codegen_flags: <defaults>
</compile_context>

<pallas_src>
import functools

import jax
import jax.numpy as jnp
from jax.experimental import pallas as pl
from jax.experimental.pallas import tpu as pltpu


# ----------------------------------------------------------------------------
# Lane-dense Pallas matmul (every backbone conv via im2col) + bias + ReLU
# ----------------------------------------------------------------------------
def _matmul_kernel(w_ref, a_ref, b_ref, o_ref, *, relu):
    acc = jnp.dot(w_ref[...], a_ref[...], preferred_element_type=jnp.float32)
    acc = acc + b_ref[...]                      # [Cout, 1] broadcasts over lanes
    if relu:
        acc = jnp.maximum(acc, 0.0)
    o_ref[...] = acc


def pallas_conv_matmul(w, a, bias=None, relu=False):
    """out[Cout, N] = w[Cout, K] @ a[K, N]  (+bias, ReLU). bf16 operands."""
    Cout, K = w.shape
    K2, N = a.shape
    assert K == K2
    if bias is None:
        bias = jnp.zeros((Cout,), jnp.float32)
    bias2 = bias.reshape(Cout, 1).astype(jnp.float32)
    w16 = w.astype(jnp.bfloat16)
    a16 = a.astype(jnp.bfloat16)

    # tile the lane axis when it is big enough -> parallel grid axis
    tn = 256 if (N >= 512 and N % 256 == 0) else N
    grid = (N // tn,)
    return pl.pallas_call(
        functools.partial(_matmul_kernel, relu=relu),
        out_shape=jax.ShapeDtypeStruct((Cout, N), jnp.float32),
        grid=grid,
        in_specs=[
            pl.BlockSpec((Cout, K), lambda j: (0, 0)),
            pl.BlockSpec((K, tn), lambda j: (0, j)),
            pl.BlockSpec((Cout, 1), lambda j: (0, 0)),
        ],
        out_specs=pl.BlockSpec((Cout, tn), lambda j: (0, j)),
        compiler_params=pltpu.CompilerParams(
            dimension_semantics=("parallel",)),
    )(w16, a16, bias2)


# ----------------------------------------------------------------------------
# JAX glue: im2col / conv wrappers / upsample
# ----------------------------------------------------------------------------
def unfold3x3(x, dilation):
    """torch.nn.functional.unfold(x, 3, dilation=d, padding=d) -> [B,C,9,H,W]."""
    B, C, H, W = x.shape
    p = dilation
    xp = jnp.pad(x, ((0, 0), (0, 0), (p, p), (p, p)))
    cols = []
    for kh in range(3):
        for kw in range(3):
            cols.append(xp[:, :, kh * dilation:kh * dilation + H,
                           kw * dilation:kw * dilation + W])
    return jnp.stack(cols, axis=2)


def conv2d_3x3(x, weight, bias=None, dilation=1, stride=1, relu=False):
    """NCHW 3x3 conv, padding==dilation, lane-dense im2col + Pallas matmul."""
    B, Cin, H, W = x.shape
    Cout = weight.shape[0]
    patches = unfold3x3(x, dilation)                     # [B, Cin, 9, H, W]
    if stride > 1:
        patches = patches[:, :, :, ::stride, ::stride]
    Ho, Wo = patches.shape[3], patches.shape[4]
    # A[(cin*9 + k), (b*HoWo + p)]  (matches weight.reshape(Cout, Cin*9))
    a = patches.transpose(1, 2, 0, 3, 4).reshape(Cin * 9, B * Ho * Wo)
    wm = weight.reshape(Cout, Cin * 9)
    out = pallas_conv_matmul(wm, a, bias=bias, relu=relu)   # [Cout, B*Ho*Wo]
    return out.reshape(Cout, B, Ho, Wo).transpose(1, 0, 2, 3)


def conv_bn_relu(x, w, bias, bn, stride=1, eps=1e-5):
    """Conv3x3 + BatchNorm(eval) + ReLU, BN folded into the conv weights."""
    scale = bn['gamma'] / jnp.sqrt(bn['var'] + eps)
    wf = w * scale[:, None, None, None]
    b0 = bias if bias is not None else jnp.zeros((w.shape[0],), jnp.float32)
    bf = (b0 - bn['mean']) * scale + bn['beta']
    return conv2d_3x3(x, wf, bf, dilation=1, stride=stride, relu=True)


def upsample_nearest(x, h, w):
    B, C, H, W = x.shape
    hi = (jnp.arange(h) * H) // h
    wi = (jnp.arange(w) * W) // w
    return x[:, :, hi[:, None], wi[None, :]]


# ----------------------------------------------------------------------------
# Fused AttentionGatedMSG kernel (all 3 msg modules, all 3 dilation scales)
# ----------------------------------------------------------------------------
def _fused_msg_kernel(se_ref, sr_ref, mask_ref, ch_ref, cht_ref,
                      wkpse_ref, wkpsr_ref, bkp_ref,
                      wkse_ref, bkse_ref, wksr_ref, bksr_ref,
                      wcomb_ref, bcomb_ref,
                      msg_ref, att_ref,
                      se_unf, sr_unf, msgs,
                      *, C, HW, W, dils):
    f32 = jnp.float32
    se = se_ref[...]                                # [C, HW]
    sr = sr_ref[...]                                # [C, HW]

    for s, d in enumerate(dils):
        mvs = mask_ref[s]                           # [9, HW] boundary masks
        # ---- build the 9 dilated taps in-kernel (tap-major, 8-aligned) ----
        for k in range(9):
            dh = (k // 3 - 1) * d
            dw = (k % 3 - 1) * d
            off = dh * W + dw
            lo, hi = k * C, (k + 1) * C
            if off == 0:
                se_unf[lo:hi, :] = se
                sr_unf[lo:hi, :] = sr
            else:
                sh = (-off) % HW
                m = mvs[k:k + 1, :]
                se_unf[lo:hi, :] = pltpu.roll(se, sh, 1) * m
                sr_unf[lo:hi, :] = pltpu.roll(sr, sh, 1) * m

        # ---- dilated 3x3 convs (kernel prediction) as MXU matmuls ----
        seu = se_unf[...]                           # [9C, HW]
        dyw_se = jnp.dot(wkpse_ref[s], seu, preferred_element_type=f32)
        dkse = jnp.dot(wkse_ref[s], seu, preferred_element_type=f32) + bkse_ref[s]
        sru = sr_unf[...]                           # [9C, HW]
        dyw = (dyw_se
               + jnp.dot(wkpsr_ref[s], sru, preferred_element_type=f32)
               + bkp_ref[s])                        # [9, HW]
        dksr = jnp.dot(wksr_ref[s], sru, preferred_element_type=f32) + bksr_ref[s]

        # ---- dynamic depthwise filtering: (w * unfold(x)).sum(taps) ----
        se_filt = jnp.zeros((C, HW), f32)
        rest = jnp.zeros((C, HW), f32)
        for k in range(9):
            lo, hi = k * C, (k + 1) * C
            blk_se = se_unf[lo:hi, :]
            blk_sr = sr_unf[lo:hi, :]
            se_filt = se_filt + dyw[k:k + 1, :] * blk_se
            rest = rest + dkse[k:k + 1, :] * blk_se + dksr[k:k + 1, :] * blk_sr
        att = sr * se_filt + rest                   # attention_map (this scale)

        # ---- struc_att (rank draws): att * (ch^T @ sigmoid(ch @ att)) ----
        ch = ch_ref[s]                              # [rank, C] (softmaxed)
        cht = cht_ref[s]                            # [C, rank]
        sp = jnp.dot(ch, att, preferred_element_type=f32)        # [rank, HW]
        sig = pl.reciprocal(1.0 + jnp.exp(-sp), approx=True)     # sigmoid (EUP)
        gate = jnp.dot(cht, sig, preferred_element_type=f32)     # [C, HW]
        att_s = att * gate

        msgs[s * C:(s + 1) * C, :] = att_s * se_filt
        if s == 0:
            att_ref[...] = att_s                    # attention_map_1

    # ---- combination_msgs: 1x1 conv + ReLU over the 3 stacked messages ----
    out = (jnp.dot(wcomb_ref[...], msgs[...], preferred_element_type=f32)
           + bcomb_ref[...])
    msg_ref[...] = jnp.maximum(out, 0.0)


def make_unfold_masks(H, W, dils):
    """Zero-padding validity masks for every (dilation, tap): [3, 9, H*W]."""
    hh = jnp.arange(H).reshape(H, 1)
    ww = jnp.arange(W).reshape(1, W)
    per_d = []
    for d in dils:
        per_k = []
        for k in range(9):
            dh = (k // 3 - 1) * d
            dw = (k % 3 - 1) * d
            valid = ((hh + dh >= 0) & (hh + dh < H) &
                     (ww + dw >= 0) & (ww + dw < W))
            per_k.append(valid.reshape(-1))
        per_d.append(jnp.stack(per_k, axis=0))
    return jnp.stack(per_d, axis=0).astype(jnp.float32)


def _reorg_conv_w(w):
    """[O, Cin, 3, 3] -> [O, 9*Cin] with K ordered tap-major (k, cin)."""
    O, Cin = w.shape[0], w.shape[1]
    return w.reshape(O, Cin, 9).transpose(0, 2, 1).reshape(O, 9 * Cin)


def pack_msg_params(params, width):
    """Stack the three AttentionGatedMSG parameter sets for the fused kernel."""
    names = ('msg35', 'msg45', 'msg55')
    acc = {k: [] for k in ('wkpse', 'wkpsr', 'bkp', 'wkse', 'bkse',
                           'wksr', 'bksr', 'wcomb', 'bcomb')}
    for nm in names:
        p = params[nm]
        kpse, kpsr, bkp = [], [], []
        kse, bkse, ksr, bksr = [], [], [], []
        for s in (1, 2, 3):
            wkp = p[f'kp{s}_w']                   # [9, 2C, 3, 3], cat(se, sr)
            kpse.append(_reorg_conv_w(wkp[:, :width]))
            kpsr.append(_reorg_conv_w(wkp[:, width:]))
            bkp.append(p[f'kp{s}_b'].reshape(9, 1))
            kse.append(_reorg_conv_w(p[f'kse{s}_w']))
            bkse.append(p[f'kse{s}_b'].reshape(9, 1))
            ksr.append(_reorg_conv_w(p[f'ksr{s}_w']))
            bksr.append(p[f'ksr{s}_b'].reshape(9, 1))
        acc['wkpse'].append(jnp.stack(kpse))
        acc['wkpsr'].append(jnp.stack(kpsr))
        acc['bkp'].append(jnp.stack(bkp))
        acc['wkse'].append(jnp.stack(kse))
        acc['bkse'].append(jnp.stack(bkse))
        acc['wksr'].append(jnp.stack(ksr))
        acc['bksr'].append(jnp.stack(bksr))
        acc['wcomb'].append(p['comb_w'].reshape(width, 3 * width))
        acc['bcomb'].append(p['comb_b'].reshape(width, 1))
    return {k: jnp.stack(v) for k, v in acc.items()}


def fused_attention_msgs(packed, se_stack, sr, rng_key, rank=3):
    """Run all three AttentionGatedMSG modules in one pallas_call.

    se_stack: [3, B, C, H, W]   (se input per msg: f3, f4_up, f5_up)
    sr:       [B, C, H, W]      (shared sr input: f5_up)
    returns:  (messages [3, B, C, H, W], attention_map_1 [3, B, C, H, W])
    """
    S, B, C, H, W = se_stack.shape
    HW = H * W
    dils = (1, 4, 8)
    masks = make_unfold_masks(H, W, dils)                      # [3, 9, HW]
    se_all = se_stack.reshape(S, B, C, HW)
    sr_flat = sr.reshape(B, C, HW)

    # struc_att channel weights: deterministic stand-in for torch.randn(bs, C)
    rand = jax.random.normal(rng_key, (S, len(dils), rank, B, C), jnp.float32)
    ch = jax.nn.softmax(rand, axis=-1)                         # softmax over C
    ch = jnp.transpose(ch, (0, 3, 1, 2, 4))                    # [3m, B, 3s, r, C]
    cht = jnp.swapaxes(ch, -1, -2)                             # [3m, B, 3s, C, r]

    kernel = functools.partial(_fused_msg_kernel, C=C, HW=HW, W=W, dils=dils)
    msg_out, att_out = pl.pallas_call(
        kernel,
        out_shape=(jax.ShapeDtypeStruct((S, B, C, HW), jnp.float32),
                   jax.ShapeDtypeStruct((S, B, C, HW), jnp.float32)),
        grid=(S, B),
        in_specs=[
            pl.BlockSpec((None, None, C, HW), lambda m, b: (m, b, 0, 0)),      # se
            pl.BlockSpec((None, C, HW), lambda m, b: (b, 0, 0)),               # sr
            pl.BlockSpec((3, 9, HW), lambda m, b: (0, 0, 0)),                  # masks
            pl.BlockSpec((None, None, 3, rank, C), lambda m, b: (m, b, 0, 0, 0)),
            pl.BlockSpec((None, None, 3, C, rank), lambda m, b: (m, b, 0, 0, 0)),
            pl.BlockSpec((None, 3, 9, 9 * C), lambda m, b: (m, 0, 0, 0)),      # wkpse
            pl.BlockSpec((None, 3, 9, 9 * C), lambda m, b: (m, 0, 0, 0)),      # wkpsr
            pl.BlockSpec((None, 3, 9, 1), lambda m, b: (m, 0, 0, 0)),          # bkp
            pl.BlockSpec((None, 3, 9, 9 * C), lambda m, b: (m, 0, 0, 0)),      # wkse
            pl.BlockSpec((None, 3, 9, 1), lambda m, b: (m, 0, 0, 0)),          # bkse
            pl.BlockSpec((None, 3, 9, 9 * C), lambda m, b: (m, 0, 0, 0)),      # wksr
            pl.BlockSpec((None, 3, 9, 1), lambda m, b: (m, 0, 0, 0)),          # bksr
            pl.BlockSpec((None, C, 3 * C), lambda m, b: (m, 0, 0)),            # wcomb
            pl.BlockSpec((None, C, 1), lambda m, b: (m, 0, 0)),                # bcomb
        ],
        out_specs=[
            pl.BlockSpec((None, None, C, HW), lambda m, b: (m, b, 0, 0)),
            pl.BlockSpec((None, None, C, HW), lambda m, b: (m, b, 0, 0)),
        ],
        scratch_shapes=[
            pltpu.VMEM((9 * C, HW), jnp.float32),   # unfold(se), tap-major
            pltpu.VMEM((9 * C, HW), jnp.float32),   # unfold(sr), tap-major
            pltpu.VMEM((3 * C, HW), jnp.float32),   # 3 messages before 1x1 conv
        ],
        compiler_params=pltpu.CompilerParams(
            dimension_semantics=("parallel", "parallel")),
    )(se_all, sr_flat, masks, ch, cht,
      packed['wkpse'], packed['wkpsr'], packed['bkp'],
      packed['wkse'], packed['bkse'], packed['wksr'], packed['bksr'],
      packed['wcomb'], packed['bcomb'])

    return (msg_out.reshape(S, B, C, H, W), att_out.reshape(S, B, C, H, W))


# ----------------------------------------------------------------------------
# AttentionGraphCondKernel_3 forward
# ----------------------------------------------------------------------------
def attention_graph_cond_kernel_3(params, c1, c2, c3, c4, rng, rank=3):
    del c1  # unused in the reference forward
    f5 = conv_bn_relu(c4, params['conv5_w'], None, params['bn5'])
    f4 = conv_bn_relu(c3, params['conv4_w'], None, params['bn4'])
    f3 = conv_bn_relu(c2, params['conv3_w'], None, params['bn3'])
    h, w = f3.shape[2], f3.shape[3]
    f4 = upsample_nearest(f4, h, w)
    f5 = upsample_nearest(f5, h, w)

    width = f5.shape[1]
    packed = pack_msg_params(params, width)
    # msg35: (sr=f5, se=f3); msg45: (sr=f5, se=f4); msg55: (sr=f5, se=f5)
    se_stack = jnp.stack([f3, f4, f5], axis=0)
    msgs, _att_maps = fused_attention_msgs(packed, se_stack, f5, rng, rank)

    x = jnp.concatenate([msgs[0], msgs[1], msgs[2], f5], axis=1)  # [B,4W,h,w]
    x = conv_bn_relu(x, params['c51_w'], params['c51_b'], params['bn51'],
                     stride=2)
    x = conv_bn_relu(x, params['c52_w'], params['c52_b'], params['bn52'],
                     stride=2)
    return x


# ----------------------------------------------------------------------------
# Deterministic parameter init
# ----------------------------------------------------------------------------
def _norm(key, shape, scale=0.1):
    return scale * jax.random.normal(key, shape, dtype=jnp.float32)


def init_msg_params(key, width):
    ks = iter(jax.random.split(key, 32))
    p = {}
    for s in (1, 2, 3):
        p[f'kp{s}_w'] = _norm(next(ks), (9, 2 * width, 3, 3))
        p[f'kp{s}_b'] = _norm(next(ks), (9,))
        p[f'kse{s}_w'] = _norm(next(ks), (9, width, 3, 3))
        p[f'kse{s}_b'] = _norm(next(ks), (9,))
        p[f'ksr{s}_w'] = _norm(next(ks), (9, width, 3, 3))
        p[f'ksr{s}_b'] = _norm(next(ks), (9,))
    p['comb_w'] = _norm(next(ks), (width, 3 * width, 1, 1))
    p['comb_b'] = _norm(next(ks), (width,))
    return p


def init_params(key, ms_featmaps, width):
    ks = iter(jax.random.split(key, 32))

    def bn(c):
        return {'gamma': 1.0 + _norm(next(ks), (c,)),
                'beta': _norm(next(ks), (c,)),
                'mean': jnp.zeros((c,), jnp.float32),
                'var': jnp.ones((c,), jnp.float32)}

    p = {}
    p['conv5_w'] = _norm(next(ks), (width, ms_featmaps[-1], 3, 3))
    p['bn5'] = bn(width)
    p['conv4_w'] = _norm(next(ks), (width, ms_featmaps[-2], 3, 3))
    p['bn4'] = bn(width)
    p['conv3_w'] = _norm(next(ks), (width, ms_featmaps[-3], 3, 3))
    p['bn3'] = bn(width)
    p['msg35'] = init_msg_params(next(ks), width)
    p['msg45'] = init_msg_params(next(ks), width)
    p['msg55'] = init_msg_params(next(ks), width)
    p['c51_w'] = _norm(next(ks), (4 * width, 4 * width, 3, 3))
    p['c51_b'] = _norm(next(ks), (4 * width,))
    p['bn51'] = bn(4 * width)
    p['c52_w'] = _norm(next(ks), (4 * width, 4 * width, 3, 3))
    p['c52_b'] = _norm(next(ks), (4 * width,))
    p['bn52'] = bn(4 * width)
    return p


# ----------------------------------------------------------------------------
if __name__ == "__main__":
    key = jax.random.PRNGKey(0)
    width = 16
    ms_featmaps = [4, 6, 8, 8]   # -3, -2, -1 entries feed conv3/conv4/conv5
    B = 2

    k_in, k_par, k_rng = jax.random.split(key, 3)
    kc = jax.random.split(k_in, 4)
    c1 = jax.random.normal(kc[0], (B, ms_featmaps[0], 32, 32), jnp.float32)  # unused
    c2 = jax.random.normal(kc[1], (B, ms_featmaps[-3], 16, 16), jnp.float32)
    c3 = jax.random.normal(kc[2], (B, ms_featmaps[-2], 8, 8), jnp.float32)
    c4 = jax.random.normal(kc[3], (B, ms_featmaps[-1], 4, 4), jnp.float32)

    params = init_params(k_par, ms_featmaps, width)

    fwd = jax.jit(lambda p, x1, x2, x3, x4, k:
                  attention_graph_cond_kernel_3(p, x1, x2, x3, x4, k, rank=3))
    out = fwd(params, c1, c2, c3, c4, k_rng)
    out = jax.block_until_ready(out)

    assert out.shape == (B, 4 * width, 4, 4), out.shape
    assert jnp.all(jnp.isfinite(out))
    print("KERNEL_OK")
</pallas_src>

<mosaic_0001>
module attributes {stable_mosaic.version = 11 : i64} {
  func.func @_matmul_kernel(%arg0: i32, %arg1: memref<16x72xbf16, #tpu.memory_space<vmem>>, %arg2: memref<72x32xbf16, #tpu.memory_space<vmem>>, %arg3: memref<16x1xf32, #tpu.memory_space<vmem>>, %arg4: memref<16x32xf32, #tpu.memory_space<vmem>>) attributes {dimension_semantics = [#tpu.dimension_semantics<parallel>], iteration_bounds = array<i64: 1>, scalar_prefetch = 0 : i64, scratch_operands = 0 : i64, tpu.core_type = #tpu.core_type<tc>, window_params = [{pipeline_mode = #tpu.pipeline_mode<synchronous>, transform_indices = @transform_0, window_bounds = array<i64: 16, 72>}, {transform_indices = @transform_1, window_bounds = array<i64: 72, 32>}, {pipeline_mode = #tpu.pipeline_mode<synchronous>, transform_indices = @transform_2, window_bounds = array<i64: 16, 1>}, {transform_indices = @transform_3, window_bounds = array<i64: 16, 32>}]} {
    %c0 = arith.constant 0 : index
    %c0_0 = arith.constant 0 : index
    %0 = vector.load %arg1[%c0, %c0_0] : memref<16x72xbf16, #tpu.memory_space<vmem>>, vector<16x72xbf16>
    %c0_1 = arith.constant 0 : index
    %c0_2 = arith.constant 0 : index
    %1 = vector.load %arg2[%c0_1, %c0_2] : memref<72x32xbf16, #tpu.memory_space<vmem>>, vector<72x32xbf16>
    %cst = arith.constant dense<0.000000e+00> : vector<16x32xf32>
    %2 = tpu.matmul %0, %1, %cst {dimension_numbers = #tpu.dot_dimension_numbers<[1], [0], [0], [1], [0, 0, 1, 1], [], []>} : vector<16x72xbf16>, vector<72x32xbf16>, vector<16x32xf32> -> vector<16x32xf32>
    %c0_3 = arith.constant 0 : index
    %c0_4 = arith.constant 0 : index
    %3 = vector.load %arg3[%c0_3, %c0_4] : memref<16x1xf32, #tpu.memory_space<vmem>>, vector<16x1xf32>
    %4 = vector.broadcast %3 : vector<16x1xf32> to vector<16x32xf32>
    %5 = arith.addf %2, %4 : vector<16x32xf32>
    %cst_5 = arith.constant 0.000000e+00 : f32
    %6 = vector.broadcast %cst_5 : f32 to vector<16x32xf32>
    %7 = arith.maximumf %5, %6 : vector<16x32xf32>
    %c0_6 = arith.constant 0 : index
    %c0_7 = arith.constant 0 : index
    %8 = vector.load %arg4[%c0_6, %c0_7] : memref<16x32xf32, #tpu.memory_space<vmem>>, vector<16x32xf32>
    tpu.vector_store %arg4[%c0_6, %c0_7], %7 {strides = array<i32>} : memref<16x32xf32, #tpu.memory_space<vmem>>, vector<16x32xf32>,
    return
  }
  func.func @transform_0(%arg0: i32) -> (i32, i32) {
    %c0_i32 = arith.constant 0 : i32
    %c0_i32_0 = arith.constant 0 : i32
    %c0_i32_1 = arith.constant 0 : i32
    return %c0_i32, %c0_i32_0 : i32, i32
  }
  func.func @transform_1(%arg0: i32) -> (i32, i32) {
    %c0_i32 = arith.constant 0 : i32
    %c0_i32_0 = arith.constant 0 : i32
    return %c0_i32, %arg0 : i32, i32
  }
  func.func @transform_2(%arg0: i32) -> (i32, i32) {
    %c0_i32 = arith.constant 0 : i32
    %c0_i32_0 = arith.constant 0 : i32
    %c0_i32_1 = arith.constant 0 : i32
    return %c0_i32, %c0_i32_0 : i32, i32
  }
  func.func @transform_3(%arg0: i32) -> (i32, i32) {
    %c0_i32 = arith.constant 0 : i32
    %c0_i32_0 = arith.constant 0 : i32
    return %c0_i32, %arg0 : i32, i32
  }
}

module attributes {stable_mosaic.version = 11 : i64} {
  func.func @_matmul_kernel(%arg0: i32, %arg1: memref<16x54xbf16, #tpu.memory_space<vmem>>, %arg2: memref<54x256xbf16, #tpu.memory_space<vmem>>, %arg3: memref<16x1xf32, #tpu.memory_space<vmem>>, %arg4: memref<16x256xf32, #tpu.memory_space<vmem>>) attributes {dimension_semantics = [#tpu.dimension_semantics<parallel>], iteration_bounds = array<i64: 2>, scalar_prefetch = 0 : i64, scratch_operands = 0 : i64, tpu.core_type = #tpu.core_type<tc>, window_params = [{pipeline_mode = #tpu.pipeline_mode<synchronous>, transform_indices = @transform_0, window_bounds = array<i64: 16, 54>}, {transform_indices = @transform_1, window_bounds = array<i64: 54, 256>}, {pipeline_mode = #tpu.pipeline_mode<synchronous>, transform_indices = @transform_2, window_bounds = array<i64: 16, 1>}, {transform_indices = @transform_3, window_bounds = array<i64: 16, 256>}]} {
    %c0 = arith.constant 0 : index
    %c0_0 = arith.constant 0 : index
    %0 = vector.load %arg1[%c0, %c0_0] : memref<16x54xbf16, #tpu.memory_space<vmem>>, vector<16x54xbf16>
    %c0_1 = arith.constant 0 : index
    %c0_2 = arith.constant 0 : index
    %1 = vector.load %arg2[%c0_1, %c0_2] : memref<54x256xbf16, #tpu.memory_space<vmem>>, vector<54x256xbf16>
    %cst = arith.constant dense<0.000000e+00> : vector<16x256xf32>
    %2 = tpu.matmul %0, %1, %cst {dimension_numbers = #tpu.dot_dimension_numbers<[1], [0], [0], [1], [0, 0, 1, 1], [], []>} : vector<16x54xbf16>, vector<54x256xbf16>, vector<16x256xf32> -> vector<16x256xf32>
    %c0_3 = arith.constant 0 : index
    %c0_4 = arith.constant 0 : index
    %3 = vector.load %arg3[%c0_3, %c0_4] : memref<16x1xf32, #tpu.memory_space<vmem>>, vector<16x1xf32>
    %4 = vector.broadcast %3 : vector<16x1xf32> to vector<16x256xf32>
    %5 = arith.addf %2, %4 : vector<16x256xf32>
    %cst_5 = arith.constant 0.000000e+00 : f32
    %6 = vector.broadcast %cst_5 : f32 to vector<16x256xf32>
    %7 = arith.maximumf %5, %6 : vector<16x256xf32>
    %c0_6 = arith.constant 0 : index
    %c0_7 = arith.constant 0 : index
    %8 = vector.load %arg4[%c0_6, %c0_7] : memref<16x256xf32, #tpu.memory_space<vmem>>, vector<16x256xf32>
    tpu.vector_store %arg4[%c0_6, %c0_7], %7 {strides = array<i32>} : memref<16x256xf32, #tpu.memory_space<vmem>>, vector<16x256xf32>,
    return
  }
  func.func @transform_0(%arg0: i32) -> (i32, i32) {
    %c0_i32 = arith.constant 0 : i32
    %c0_i32_0 = arith.constant 0 : i32
    %c0_i32_1 = arith.constant 0 : i32
    return %c0_i32, %c0_i32_0 : i32, i32
  }
  func.func @transform_1(%arg0: i32) -> (i32, i32) {
    %c0_i32 = arith.constant 0 : i32
    %c0_i32_0 = arith.constant 0 : i32
    return %c0_i32, %arg0 : i32, i32
  }
  func.func @transform_2(%arg0: i32) -> (i32, i32) {
    %c0_i32 = arith.constant 0 : i32
    %c0_i32_0 = arith.constant 0 : i32
    %c0_i32_1 = arith.constant 0 : i32
    return %c0_i32, %c0_i32_0 : i32, i32
  }
  func.func @transform_3(%arg0: i32) -> (i32, i32) {
    %c0_i32 = arith.constant 0 : i32
    %c0_i32_0 = arith.constant 0 : i32
    return %c0_i32, %arg0 : i32, i32
  }
}

module attributes {stable_mosaic.version = 11 : i64} {
  func.func @_matmul_kernel(%arg0: i32, %arg1: memref<16x72xbf16, #tpu.memory_space<vmem>>, %arg2: memref<72x128xbf16, #tpu.memory_space<vmem>>, %arg3: memref<16x1xf32, #tpu.memory_space<vmem>>, %arg4: memref<16x128xf32, #tpu.memory_space<vmem>>) attributes {dimension_semantics = [#tpu.dimension_semantics<parallel>], iteration_bounds = array<i64: 1>, scalar_prefetch = 0 : i64, scratch_operands = 0 : i64, tpu.core_type = #tpu.core_type<tc>, window_params = [{pipeline_mode = #tpu.pipeline_mode<synchronous>, transform_indices = @transform_0, window_bounds = array<i64: 16, 72>}, {transform_indices = @transform_1, window_bounds = array<i64: 72, 128>}, {pipeline_mode = #tpu.pipeline_mode<synchronous>, transform_indices = @transform_2, window_bounds = array<i64: 16, 1>}, {transform_indices = @transform_3, window_bounds = array<i64: 16, 128>}]} {
    %c0 = arith.constant 0 : index
    %c0_0 = arith.constant 0 : index
    %0 = vector.load %arg1[%c0, %c0_0] : memref<16x72xbf16, #tpu.memory_space<vmem>>, vector<16x72xbf16>
    %c0_1 = arith.constant 0 : index
    %c0_2 = arith.constant 0 : index
    %1 = vector.load %arg2[%c0_1, %c0_2] : memref<72x128xbf16, #tpu.memory_space<vmem>>, vector<72x128xbf16>
    %cst = arith.constant dense<0.000000e+00> : vector<16x128xf32>
    %2 = tpu.matmul %0, %1, %cst {dimension_numbers = #tpu.dot_dimension_numbers<[1], [0], [0], [1], [0, 0, 1, 1], [], []>} : vector<16x72xbf16>, vector<72x128xbf16>, vector<16x128xf32> -> vector<16x128xf32>
    %c0_3 = arith.constant 0 : index
    %c0_4 = arith.constant 0 : index
    %3 = vector.load %arg3[%c0_3, %c0_4] : memref<16x1xf32, #tpu.memory_space<vmem>>, vector<16x1xf32>
    %4 = vector.broadcast %3 : vector<16x1xf32> to vector<16x128xf32>
    %5 = arith.addf %2, %4 : vector<16x128xf32>
    %cst_5 = arith.constant 0.000000e+00 : f32
    %6 = vector.broadcast %cst_5 : f32 to vector<16x128xf32>
    %7 = arith.maximumf %5, %6 : vector<16x128xf32>
    %c0_6 = arith.constant 0 : index
    %c0_7 = arith.constant 0 : index
    %8 = vector.load %arg4[%c0_6, %c0_7] : memref<16x128xf32, #tpu.memory_space<vmem>>, vector<16x128xf32>
    tpu.vector_store %arg4[%c0_6, %c0_7], %7 {strides = array<i32>} : memref<16x128xf32, #tpu.memory_space<vmem>>, vector<16x128xf32>,
    return
  }
  func.func @transform_0(%arg0: i32) -> (i32, i32) {
    %c0_i32 = arith.constant 0 : i32
    %c0_i32_0 = arith.constant 0 : i32
    %c0_i32_1 = arith.constant 0 : i32
    return %c0_i32, %c0_i32_0 : i32, i32
  }
  func.func @transform_1(%arg0: i32) -> (i32, i32) {
    %c0_i32 = arith.constant 0 : i32
    %c0_i32_0 = arith.constant 0 : i32
    return %c0_i32, %arg0 : i32, i32
  }
  func.func @transform_2(%arg0: i32) -> (i32, i32) {
    %c0_i32 = arith.constant 0 : i32
    %c0_i32_0 = arith.constant 0 : i32
    %c0_i32_1 = arith.constant 0 : i32
    return %c0_i32, %c0_i32_0 : i32, i32
  }
  func.func @transform_3(%arg0: i32) -> (i32, i32) {
    %c0_i32 = arith.constant 0 : i32
    %c0_i32_0 = arith.constant 0 : i32
    return %c0_i32, %arg0 : i32, i32
  }
}

module attributes {stable_mosaic.version = 11 : i64} {
  func.func @_fused_msg_kernel(%arg0: i32, %arg1: i32, %arg2: memref<1x1x16x256xf32, #tpu.memory_space<vmem>>, %arg3: memref<1x16x256xf32, #tpu.memory_space<vmem>>, %arg4: memref<3x9x256xf32, #tpu.memory_space<vmem>>, %arg5: memref<1x1x3x3x16xf32, #tpu.memory_space<vmem>>, %arg6: memref<1x1x3x16x3xf32, #tpu.memory_space<vmem>>, %arg7: memref<1x3x9x144xf32, #tpu.memory_space<vmem>>, %arg8: memref<1x3x9x144xf32, #tpu.memory_space<vmem>>, %arg9: memref<1x3x9x1xf32, #tpu.memory_space<vmem>>, %arg10: memref<1x3x9x144xf32, #tpu.memory_space<vmem>>, %arg11: memref<1x3x9x1xf32, #tpu.memory_space<vmem>>, %arg12: memref<1x3x9x144xf32, #tpu.memory_space<vmem>>, %arg13: memref<1x3x9x1xf32, #tpu.memory_space<vmem>>, %arg14: memref<1x16x48xf32, #tpu.memory_space<vmem>>, %arg15: memref<1x16x1xf32, #tpu.memory_space<vmem>>, %arg16: memref<1x1x16x256xf32, #tpu.memory_space<vmem>>, %arg17: memref<1x1x16x256xf32, #tpu.memory_space<vmem>>, %arg18: memref<144x256xf32, #tpu.memory_space<vmem>>, %arg19: memref<144x256xf32, #tpu.memory_space<vmem>>, %arg20: memref<48x256xf32, #tpu.memory_space<vmem>>) attributes {dimension_semantics = [#tpu.dimension_semantics<parallel>, #tpu.dimension_semantics<parallel>], iteration_bounds = array<i64: 3, 2>, scalar_prefetch = 0 : i64, scratch_operands = 3 : i64, tpu.core_type = #tpu.core_type<tc>, window_params = [{transform_indices = @transform_0, window_bounds = array<i64: 1, 1, 16, 256>}, {transform_indices = @transform_1, window_bounds = array<i64: 1, 16, 256>}, {pipeline_mode = #tpu.pipeline_mode<synchronous>, transform_indices = @transform_2, window_bounds = array<i64: 3, 9, 256>}, {transform_indices = @transform_3, window_bounds = array<i64: 1, 1, 3, 3, 16>}, {transform_indices = @transform_4, window_bounds = array<i64: 1, 1, 3, 16, 3>}, {transform_indices = @transform_5, window_bounds = array<i64: 1, 3, 9, 144>}, {transform_indices = @transform_6, window_bounds = array<i64: 1, 3, 9, 144>}, {transform_indices = @transform_7, window_bounds = array<i64: 1, 3, 9, 1>}, {transform_indices = @transform_8, window_bounds = array<i64: 1, 3, 9, 144>}, {transform_indices = @transform_9, window_bounds = array<i64: 1, 3, 9, 1>}, {transform_indices = @transform_10, window_bounds = array<i64: 1, 3, 9, 144>}, {transform_indices = @transform_11, window_bounds = array<i64: 1, 3, 9, 1>}, {transform_indices = @transform_12, window_bounds = array<i64: 1, 16, 48>}, {transform_indices = @transform_13, window_bounds = array<i64: 1, 16, 1>}, {transform_indices = @transform_14, window_bounds = array<i64: 1, 1, 16, 256>}, {transform_indices = @transform_15, window_bounds = array<i64: 1, 1, 16, 256>}]} {
    %c0 = arith.constant 0 : index
    %c0_0 = arith.constant 0 : index
    %c0_1 = arith.constant 0 : index
    %c0_2 = arith.constant 0 : index
    %0 = vector.load %arg2[%c0, %c0_0, %c0_1, %c0_2] : memref<1x1x16x256xf32, #tpu.memory_space<vmem>>, vector<1x1x16x256xf32>
    %1 = vector.shape_cast %0 : vector<1x1x16x256xf32> to vector<16x256xf32>
    %c0_3 = arith.constant 0 : index
    %c0_4 = arith.constant 0 : index
    %c0_5 = arith.constant 0 : index
    %2 = vector.load %arg3[%c0_3, %c0_4, %c0_5] : memref<1x16x256xf32, #tpu.memory_space<vmem>>, vector<1x16x256xf32>
    %3 = vector.shape_cast %2 : vector<1x16x256xf32> to vector<16x256xf32>
    %c0_6 = arith.constant 0 : index
    %c0_7 = arith.constant 0 : index
    %c0_8 = arith.constant 0 : index
    %4 = vector.load %arg4[%c0_6, %c0_7, %c0_8] : memref<3x9x256xf32, #tpu.memory_space<vmem>>, vector<1x9x256xf32>
    %5 = vector.shape_cast %4 : vector<1x9x256xf32> to vector<9x256xf32>
    %6 = vector.extract_strided_slice %5 {offsets = [0, 0], sizes = [1, 256], strides = [1, 1]} : vector<9x256xf32> to vector<1x256xf32>
    %c17_i32 = arith.constant 17 : i32
    %7 = tpu.dynamic_rotate %1 by %c17_i32 dim 1 : vector<16x256xf32>, i32 -> vector<16x256xf32>
    %8 = vector.broadcast %6 : vector<1x256xf32> to vector<16x256xf32>
    %9 = arith.mulf %7, %8 : vector<16x256xf32>
    %c0_9 = arith.constant 0 : index
    %c0_10 = arith.constant 0 : index
    %10 = vector.load %arg18[%c0_9, %c0_10] : memref<144x256xf32, #tpu.memory_space<vmem>>, vector<16x256xf32>
    tpu.vector_store %arg18[%c0_9, %c0_10], %9 {strides = array<i32>} : memref<144x256xf32, #tpu.memory_space<vmem>>, vector<16x256xf32>,
    %c17_i32_11 = arith.constant 17 : i32
    %11 = tpu.dynamic_rotate %3 by %c17_i32_11 dim 1 : vector<16x256xf32>, i32 -> vector<16x256xf32>
    %12 = vector.broadcast %6 : vector<1x256xf32> to vector<16x256xf32>
    %13 = arith.mulf %11, %12 : vector<16x256xf32>
    %c0_12 = arith.constant 0 : index
    %c0_13 = arith.constant 0 : index
    %14 = vector.load %arg19[%c0_12, %c0_13] : memref<144x256xf32, #tpu.memory_space<vmem>>, vector<16x256xf32>
    tpu.vector_store %arg19[%c0_12, %c0_13], %13 {strides = array<i32>} : memref<144x256xf32, #tpu.memory_space<vmem>>, vector<16x256xf32>,
    %15 = vector.extract_strided_slice %5 {offsets = [1, 0], sizes = [1, 256], strides = [1, 1]} : vector<9x256xf32> to vector<1x256xf32>
    %c16_i32 = arith.constant 16 : i32
    %16 = tpu.dynamic_rotate %1 by %c16_i32 dim 1 : vector<16x256xf32>, i32 -> vector<16x256xf32>
    %17 = vector.broadcast %15 : vector<1x256xf32> to vector<16x256xf32>
    %18 = arith.mulf %16, %17 : vector<16x256xf32>
    %c16 = arith.constant 16 : index
    %c0_14 = arith.constant 0 : index
    %19 = vector.load %arg18[%c16, %c0_14] : memref<144x256xf32, #tpu.memory_space<vmem>>, vector<16x256xf32>
    tpu.vector_store %arg18[%c16, %c0_14], %18 {strides = array<i32>} : memref<144x256xf32, #tpu.memory_space<vmem>>, vector<16x256xf32>,
    %c16_i32_15 = arith.constant 16 : i32
    %20 = tpu.dynamic_rotate %3 by %c16_i32_15 dim 1 : vector<16x256xf32>, i32 -> vector<16x256xf32>
    %21 = vector.broadcast %15 : vector<1x256xf32> to vector<16x256xf32>
    %22 = arith.mulf %20, %21 : vector<16x256xf32>
    %c16_16 = arith.constant 16 : index
    %c0_17 = arith.constant 0 : index
    %23 = vector.load %arg19[%c16_16, %c0_17] : memref<144x256xf32, #tpu.memory_space<vmem>>, vector<16x256xf32>
    tpu.vector_store %arg19[%c16_16, %c0_17], %22 {strides = array<i32>} : memref<144x256xf32, #tpu.memory_space<vmem>>, vector<16x256xf32>,
    %24 = vector.extract_strided_slice %5 {offsets = [2, 0], sizes = [1, 256], strides = [1, 1]} : vector<9x256xf32> to vector<1x256xf32>
    %c15_i32 = arith.constant 15 : i32
    %25 = tpu.dynamic_rotate %1 by %c15_i32 dim 1 : vector<16x256xf32>, i32 -> vector<16x256xf32>
    %26 = vector.broadcast %24 : vector<1x256xf32> to vector<16x256xf32>
    %27 = arith.mulf %25, %26 : vector<16x256xf32>
    %c32 = arith.constant 32 : index
    %c0_18 = arith.constant 0 : index
    %28 = vector.load %arg18[%c32, %c0_18] : memref<144x256xf32, #tpu.memory_space<vmem>>, vector<16x256xf32>
    tpu.vector_store %arg18[%c32, %c0_18], %27 {strides = array<i32>} : memref<144x256xf32, #tpu.memory_space<vmem>>, vector<16x256xf32>,
    %c15_i32_19 = arith.constant 15 : i32
    %29 = tpu.dynamic_rotate %3 by %c15_i32_19 dim 1 : vector<16x256xf32>, i32 -> vector<16x256xf32>
    %30 = vector.broadcast %24 : vector<1x256xf32> to vector<16x256xf32>
    %31 = arith.mulf %29, %30 : vector<16x256xf32>
    %c32_20 = arith.constant 32 : index
    %c0_21 = arith.constant 0 : index
    %32 = vector.load %arg19[%c32_20, %c0_21] : memref<144x256xf32, #tpu.memory_space<vmem>>, vector<16x256xf32>
    tpu.vector_store %arg19[%c32_20, %c0_21], %31 {strides = array<i32>} : memref<144x256xf32, #tpu.memory_space<vmem>>, vector<16x256xf32>,
    %33 = vector.extract_strided_slice %5 {offsets = [3, 0], sizes = [1, 256], strides = [1, 1]} : vector<9x256xf32> to vector<1x256xf32>
    %c1_i32 = arith.constant 1 : i32
    %34 = tpu.dynamic_rotate %1 by %c1_i32 dim 1 : vector<16x256xf32>, i32 -> vector<16x256xf32>
    %35 = vector.broadcast %33 : vector<1x256xf32> to vector<16x256xf32>
    %36 = arith.mulf %34, %35 : vector<16x256xf32>
    %c48 = arith.constant 48 : index
    %c0_22 = arith.constant 0 : index
    %37 = vector.load %arg18[%c48, %c0_22] : memref<144x256xf32, #tpu.memory_space<vmem>>, vector<16x256xf32>
    tpu.vector_store %arg18[%c48, %c0_22], %36 {strides = array<i32>} : memref<144x256xf32, #tpu.memory_space<vmem>>, vector<16x256xf32>,
    %c1_i32_23 = arith.constant 1 : i32
    %38 = tpu.dynamic_rotate %3 by %c1_i32_23 dim 1 : vector<16x256xf32>, i32 -> vector<16x256xf32>
    %39 = vector.broadcast %33 : vector<1x256xf32> to vector<16x256xf32>
    %40 = arith.mulf %38, %39 : vector<16x256xf32>
    %c48_24 = arith.constant 48 : index
    %c0_25 = arith.constant 0 : index
    %41 = vector.load %arg19[%c48_24, %c0_25] : memref<144x256xf32, #tpu.memory_space<vmem>>, vector<16x256xf32>
    tpu.vector_store %arg19[%c48_24, %c0_25], %40 {strides = array<i32>} : memref<144x256xf32, #tpu.memory_space<vmem>>, vector<16x256xf32>,
    %c64 = arith.constant 64 : index
    %c0_26 = arith.constant 0 : index
    %42 = vector.load %arg18[%c64, %c0_26] : memref<144x256xf32, #tpu.memory_space<vmem>>, vector<16x256xf32>
    tpu.vector_store %arg18[%c64, %c0_26], %1 {strides = array<i32>} : memref<144x256xf32, #tpu.memory_space<vmem>>, vector<16x256xf32>,
    %c64_27 = arith.constant 64 : index
    %c0_28 = arith.constant 0 : index
    %43 = vector.load %arg19[%c64_27, %c0_28] : memref<144x256xf32, #tpu.memory_space<vmem>>, vector<16x256xf32>
    tpu.vector_store %arg19[%c64_27, %c0_28], %3 {strides = array<i32>} : memref<144x256xf32, #tpu.memory_space<vmem>>, vector<16x256xf32>,
    %44 = vector.extract_strided_slice %5 {offsets = [5, 0], sizes = [1, 256], strides = [1, 1]} : vector<9x256xf32> to vector<1x256xf32>
    %c255_i32 = arith.constant 255 : i32
    %45 = tpu.dynamic_rotate %1 by %c255_i32 dim 1 : vector<16x256xf32>, i32 -> vector<16x256xf32>
    %46 = vector.broadcast %44 : vector<1x256xf32> to vector<16x256xf32>
    %47 = arith.mulf %45, %46 : vector<16x256xf32>
    %c80 = arith.constant 80 : index
    %c0_29 = arith.constant 0 : index
    %48 = vector.load %arg18[%c80, %c0_29] : memref<144x256xf32, #tpu.memory_space<vmem>>, vector<16x256xf32>
    tpu.vector_store %arg18[%c80, %c0_29], %47 {strides = array<i32>} : memref<144x256xf32, #tpu.memory_space<vmem>>, vector<16x256xf32>,
    %c255_i32_30 = arith.constant 255 : i32
    %49 = tpu.dynamic_rotate %3 by %c255_i32_30 dim 1 : vector<16x256xf32>, i32 -> vector<16x256xf32>
    %50 = vector.broadcast %44 : vector<1x256xf32> to vector<16x256xf32>
    %51 = arith.mulf %49, %50 : vector<16x256xf32>
    %c80_31 = arith.constant 80 : index
    %c0_32 = arith.constant 0 : index
    %52 = vector.load %arg19[%c80_31, %c0_32] : memref<144x256xf32, #tpu.memory_space<vmem>>, vector<16x256xf32>
    tpu.vector_store %arg19[%c80_31, %c0_32], %51 {strides = array<i32>} : memref<144x256xf32, #tpu.memory_space<vmem>>, vector<16x256xf32>,
    %53 = vector.extract_strided_slice %5 {offsets = [6, 0], sizes = [1, 256], strides = [1, 1]} : vector<9x256xf32> to vector<1x256xf32>
    %c241_i32 = arith.constant 241 : i32
    %54 = tpu.dynamic_rotate %1 by %c241_i32 dim 1 : vector<16x256xf32>, i32 -> vector<16x256xf32>
    %55 = vector.broadcast %53 : vector<1x256xf32> to vector<16x256xf32>
    %56 = arith.mulf %54, %55 : vector<16x256xf32>
    %c96 = arith.constant 96 : index
    %c0_33 = arith.constant 0 : index
    %57 = vector.load %arg18[%c96, %c0_33] : memref<144x256xf32, #tpu.memory_space<vmem>>, vector<16x256xf32>
    tpu.vector_store %arg18[%c96, %c0_33], %56 {strides = array<i32>} : memref<144x256xf32, #tpu.memory_space<vmem>>, vector<16x256xf32>,
    %c241_i32_34 = arith.constant 241 : i32
    %58 = tpu.dynamic_rotate %3 by %c241_i32_34 dim 1 : vector<16x256xf32>, i32 -> vector<16x256xf32>
    %59 = vector.broadcast %53 : vector<1x256xf32> to vector<16x256xf32>
    %60 = arith.mulf %58, %59 : vector<16x256xf32>
    %c96_35 = arith.constant 96 : index
    %c0_36 = arith.constant 0 : index
    %61 = vector.load %arg19[%c96_35, %c0_36] : memref<144x256xf32, #tpu.memory_space<vmem>>, vector<16x256xf32>
    tpu.vector_store %arg19[%c96_35, %c0_36], %60 {strides = array<i32>} : memref<144x256xf32, #tpu.memory_space<vmem>>, vector<16x256xf32>,
    %62 = vector.extract_strided_slice %5 {offsets = [7, 0], sizes = [1, 256], strides = [1, 1]} : vector<9x256xf32> to vector<1x256xf32>
    %c240_i32 = arith.constant 240 : i32
    %63 = tpu.dynamic_rotate %1 by %c240_i32 dim 1 : vector<16x256xf32>, i32 -> vector<16x256xf32>
    %64 = vector.broadcast %62 : vector<1x256xf32> to vector<16x256xf32>
    %65 = arith.mulf %63, %64 : vector<16x256xf32>
    %c112 = arith.constant 112 : index
    %c0_37 = arith.constant 0 : index
    %66 = vector.load %arg18[%c112, %c0_37] : memref<144x256xf32, #tpu.memory_space<vmem>>, vector<16x256xf32>
    tpu.vector_store %arg18[%c112, %c0_37], %65 {strides = array<i32>} : memref<144x256xf32, #tpu.memory_space<vmem>>, vector<16x256xf32>,
    %c240_i32_38 = arith.constant 240 : i32
    %67 = tpu.dynamic_rotate %3 by %c240_i32_38 dim 1 : vector<16x256xf32>, i32 -> vector<16x256xf32>
    %68 = vector.broadcast %62 : vector<1x256xf32> to vector<16x256xf32>
    %69 = arith.mulf %67, %68 : vector<16x256xf32>
    %c112_39 = arith.constant 112 : index
    %c0_40 = arith.constant 0 : index
    %70 = vector.load %arg19[%c112_39, %c0_40] : memref<144x256xf32, #tpu.memory_space<vmem>>, vector<16x256xf32>
    tpu.vector_store %arg19[%c112_39, %c0_40], %69 {strides = array<i32>} : memref<144x256xf32, #tpu.memory_space<vmem>>, vector<16x256xf32>,
    %71 = vector.extract_strided_slice %5 {offsets = [8, 0], sizes = [1, 256], strides = [1, 1]} : vector<9x256xf32> to vector<1x256xf32>
    %c239_i32 = arith.constant 239 : i32
    %72 = tpu.dynamic_rotate %1 by %c239_i32 dim 1 : vector<16x256xf32>, i32 -> vector<16x256xf32>
    %73 = vector.broadcast %71 : vector<1x256xf32> to vector<16x256xf32>
    %74 = arith.mulf %72, %73 : vector<16x256xf32>
    %c128 = arith.constant 128 : index
    %c0_41 = arith.constant 0 : index
    %75 = vector.load %arg18[%c128, %c0_41] : memref<144x256xf32, #tpu.memory_space<vmem>>, vector<16x256xf32>
    tpu.vector_store %arg18[%c128, %c0_41], %74 {strides = array<i32>} : memref<144x256xf32, #tpu.memory_space<vmem>>, vector<16x256xf32>,
    %c239_i32_42 = arith.constant 239 : i32
    %76 = tpu.dynamic_rotate %3 by %c239_i32_42 dim 1 : vector<16x256xf32>, i32 -> vector<16x256xf32>
    %77 = vector.broadcast %71 : vector<1x256xf32> to vector<16x256xf32>
    %78 = arith.mulf %76, %77 : vector<16x256xf32>
    %c128_43 = arith.constant 128 : index
    %c0_44 = arith.constant 0 : index
    %79 = vector.load %arg19[%c128_43, %c0_44] : memref<144x256xf32, #tpu.memory_space<vmem>>, vector<16x256xf32>
    tpu.vector_store %arg19[%c128_43, %c0_44], %78 {strides = array<i32>} : memref<144x256xf32, #tpu.memory_space<vmem>>, vector<16x256xf32>,
    %c0_45 = arith.constant 0 : index
    %c0_46 = arith.constant 0 : index
    %80 = vector.load %arg18[%c0_45, %c0_46] : memref<144x256xf32, #tpu.memory_space<vmem>>, vector<144x256xf32>
    %c0_47 = arith.constant 0 : index
    %c0_48 = arith.constant 0 : index
    %c0_49 = arith.constant 0 : index
    %c0_50 = arith.constant 0 : index
    %81 = vector.load %arg7[%c0_47, %c0_48, %c0_49, %c0_50] : memref<1x3x9x144xf32, #tpu.memory_space<vmem>>, vector<1x1x9x144xf32>
    %82 = vector.shape_cast %81 : vector<1x1x9x144xf32> to vector<9x144xf32>
    %cst = arith.constant dense<0.000000e+00> : vector<9x256xf32>
    %83 = tpu.matmul %82, %80, %cst {dimension_numbers = #tpu.dot_dimension_numbers<[1], [0], [0], [1], [0, 0, 1, 1], [], []>} : vector<9x144xf32>, vector<144x256xf32>, vector<9x256xf32> -> vector<9x256xf32>
    %c0_51 = arith.constant 0 : index
    %c0_52 = arith.constant 0 : index
    %c0_53 = arith.constant 0 : index
    %c0_54 = arith.constant 0 : index
    %84 = vector.load %arg10[%c0_51, %c0_52, %c0_53, %c0_54] : memref<1x3x9x144xf32, #tpu.memory_space<vmem>>, vector<1x1x9x144xf32>
    %85 = vector.shape_cast %84 : vector<1x1x9x144xf32> to vector<9x144xf32>
    %cst_55 = arith.constant dense<0.000000e+00> : vector<9x256xf32>
    %86 = tpu.matmul %85, %80, %cst_55 {dimension_numbers = #tpu.dot_dimension_numbers<[1], [0], [0], [1], [0, 0, 1, 1], [], []>} : vector<9x144xf32>, vector<144x256xf32>, vector<9x256xf32> -> vector<9x256xf32>
    %c0_56 = arith.constant 0 : index
    %c0_57 = arith.constant 0 : index
    %c0_58 = arith.constant 0 : index
    %c0_59 = arith.constant 0 : index
    %87 = vector.load %arg11[%c0_56, %c0_57, %c0_58, %c0_59] : memref<1x3x9x1xf32, #tpu.memory_space<vmem>>, vector<1x1x9x1xf32>
    %88 = vector.shape_cast %87 : vector<1x1x9x1xf32> to vector<9x1xf32>
    %89 = vector.broadcast %88 : vector<9x1xf32> to vector<9x256xf32>
    %90 = arith.addf %86, %89 : vector<9x256xf32>
    %c0_60 = arith.constant 0 : index
    %c0_61 = arith.constant 0 : index
    %91 = vector.load %arg19[%c0_60, %c0_61] : memref<144x256xf32, #tpu.memory_space<vmem>>, vector<144x256xf32>
    %c0_62 = arith.constant 0 : index
    %c0_63 = arith.constant 0 : index
    %c0_64 = arith.constant 0 : index
    %c0_65 = arith.constant 0 : index
    %92 = vector.load %arg8[%c0_62, %c0_63, %c0_64, %c0_65] : memref<1x3x9x144xf32, #tpu.memory_space<vmem>>, vector<1x1x9x144xf32>
    %93 = vector.shape_cast %92 : vector<1x1x9x144xf32> to vector<9x144xf32>
    %cst_66 = arith.constant dense<0.000000e+00> : vector<9x256xf32>
    %94 = tpu.matmul %93, %91, %cst_66 {dimension_numbers = #tpu.dot_dimension_numbers<[1], [0], [0], [1], [0, 0, 1, 1], [], []>} : vector<9x144xf32>, vector<144x256xf32>, vector<9x256xf32> -> vector<9x256xf32>
    %95 = arith.addf %83, %94 : vector<9x256xf32>
    %c0_67 = arith.constant 0 : index
    %c0_68 = arith.constant 0 : index
    %c0_69 = arith.constant 0 : index
    %c0_70 = arith.constant 0 : index
    %96 = vector.load %arg9[%c0_67, %c0_68, %c0_69, %c0_70] : memref<1x3x9x1xf32, #tpu.memory_space<vmem>>, vector<1x1x9x1xf32>
    %97 = vector.shape_cast %96 : vector<1x1x9x1xf32> to vector<9x1xf32>
    %98 = vector.broadcast %97 : vector<9x1xf32> to vector<9x256xf32>
    %99 = arith.addf %95, %98 : vector<9x256xf32>
    %c0_71 = arith.constant 0 : index
    %c0_72 = arith.constant 0 : index
    %c0_73 = arith.constant 0 : index
    %c0_74 = arith.constant 0 : index
    %100 = vector.load %arg12[%c0_71, %c0_72, %c0_73, %c0_74] : memref<1x3x9x144xf32, #tpu.memory_space<vmem>>, vector<1x1x9x144xf32>
    %101 = vector.shape_cast %100 : vector<1x1x9x144xf32> to vector<9x144xf32>
    %cst_75 = arith.constant dense<0.000000e+00> : vector<9x256xf32>
    %102 = tpu.matmul %101, %91, %cst_75 {dimension_numbers = #tpu.dot_dimension_numbers<[1], [0], [0], [1], [0, 0, 1, 1], [], []>} : vector<9x144xf32>, vector<144x256xf32>, vector<9x256xf32> -> vector<9x256xf32>
    %c0_76 = arith.constant 0 : index
    %c0_77 = arith.constant 0 : index
    %c0_78 = arith.constant 0 : index
    %c0_79 = arith.constant 0 : index
    %103 = vector.load %arg13[%c0_76, %c0_77, %c0_78, %c0_79] : memref<1x3x9x1xf32, #tpu.memory_space<vmem>>, vector<1x1x9x1xf32>
    %104 = vector.shape_cast %103 : vector<1x1x9x1xf32> to vector<9x1xf32>
    %105 = vector.broadcast %104 : vector<9x1xf32> to vector<9x256xf32>
    %106 = arith.addf %102, %105 : vector<9x256xf32>
    %cst_80 = arith.constant 0.000000e+00 : f32
    %107 = vector.broadcast %cst_80 : f32 to vector<16x256xf32>
    %cst_81 = arith.constant 0.000000e+00 : f32
    %108 = vector.broadcast %cst_81 : f32 to vector<16x256xf32>
    %c0_82 = arith.constant 0 : index
    %c0_83 = arith.constant 0 : index
    %109 = vector.load %arg18[%c0_82, %c0_83] : memref<144x256xf32, #tpu.memory_space<vmem>>, vector<16x256xf32>
    %c0_84 = arith.constant 0 : index
    %c0_85 = arith.constant 0 : index
    %110 = vector.load %arg19[%c0_84, %c0_85] : memref<144x256xf32, #tpu.memory_space<vmem>>, vector<16x256xf32>
    %111 = vector.extract_strided_slice %99 {offsets = [0, 0], sizes = [1, 256], strides = [1, 1]} : vector<9x256xf32> to vector<1x256xf32>
    %112 = vector.broadcast %111 : vector<1x256xf32> to vector<16x256xf32>
    %113 = arith.mulf %112, %109 : vector<16x256xf32>
    %114 = arith.addf %107, %113 : vector<16x256xf32>
    %115 = vector.extract_strided_slice %90 {offsets = [0, 0], sizes = [1, 256], strides = [1, 1]} : vector<9x256xf32> to vector<1x256xf32>
    %116 = vector.broadcast %115 : vector<1x256xf32> to vector<16x256xf32>
    %117 = arith.mulf %116, %109 : vector<16x256xf32>
    %118 = arith.addf %108, %117 : vector<16x256xf32>
    %119 = vector.extract_strided_slice %106 {offsets = [0, 0], sizes = [1, 256], strides = [1, 1]} : vector<9x256xf32> to vector<1x256xf32>
    %120 = vector.broadcast %119 : vector<1x256xf32> to vector<16x256xf32>
    %121 = arith.mulf %120, %110 : vector<16x256xf32>
    %122 = arith.addf %118, %121 : vector<16x256xf32>
    %c16_86 = arith.constant 16 : index
    %c0_87 = arith.constant 0 : index
    %123 = vector.load %arg18[%c16_86, %c0_87] : memref<144x256xf32, #tpu.memory_space<vmem>>, vector<16x256xf32>
    %c16_88 = arith.constant 16 : index
    %c0_89 = arith.constant 0 : index
    %124 = vector.load %arg19[%c16_88, %c0_89] : memref<144x256xf32, #tpu.memory_space<vmem>>, vector<16x256xf32>
    %125 = vector.extract_strided_slice %99 {offsets = [1, 0], sizes = [1, 256], strides = [1, 1]} : vector<9x256xf32> to vector<1x256xf32>
    %126 = vector.broadcast %125 : vector<1x256xf32> to vector<16x256xf32>
    %127 = arith.mulf %126, %123 : vector<16x256xf32>
    %128 = arith.addf %114, %127 : vector<16x256xf32>
    %129 = vector.extract_strided_slice %90 {offsets = [1, 0], sizes = [1, 256], strides = [1, 1]} : vector<9x256xf32> to vector<1x256xf32>
    %130 = vector.broadcast %129 : vector<1x256xf32> to vector<16x256xf32>
    %131 = arith.mulf %130, %123 : vector<16x256xf32>
    %132 = arith.addf %122, %131 : vector<16x256xf32>
    %133 = vector.extract_strided_slice %106 {offsets = [1, 0], sizes = [1, 256], strides = [1, 1]} : vector<9x256xf32> to vector<1x256xf32>
    %134 = vector.broadcast %133 : vector<1x256xf32> to vector<16x256xf32>
    %135 = arith.mulf %134, %124 : vector<16x256xf32>
    %136 = arith.addf %132, %135 : vector<16x256xf32>
    %c32_90 = arith.constant 32 : index
    %c0_91 = arith.constant 0 : index
    %137 = vector.load %arg18[%c32_90, %c0_91] : memref<144x256xf32, #tpu.memory_space<vmem>>, vector<16x256xf32>
    %c32_92 = arith.constant 32 : index
    %c0_93 = arith.constant 0 : index
    %138 = vector.load %arg19[%c32_92, %c0_93] : memref<144x256xf32, #tpu.memory_space<vmem>>, vector<16x256xf32>
    %139 = vector.extract_strided_slice %99 {offsets = [2, 0], sizes = [1, 256], strides = [1, 1]} : vector<9x256xf32> to vector<1x256xf32>
    %140 = vector.broadcast %139 : vector<1x256xf32> to vector<16x256xf32>
    %141 = arith.mulf %140, %137 : vector<16x256xf32>
    %142 = arith.addf %128, %141 : vector<16x256xf32>
    %143 = vector.extract_strided_slice %90 {offsets = [2, 0], sizes = [1, 256], strides = [1, 1]} : vector<9x256xf32> to vector<1x256xf32>
    %144 = vector.broadcast %143 : vector<1x256xf32> to vector<16x256xf32>
    %145 = arith.mulf %144, %137 : vector<16x256xf32>
    %146 = arith.addf %136, %145 : vector<16x256xf32>
    %147 = vector.extract_strided_slice %106 {offsets = [2, 0], sizes = [1, 256], strides = [1, 1]} : vector<9x256xf32> to vector<1x256xf32>
    %148 = vector.broadcast %147 : vector<1x256xf32> to vector<16x256xf32>
    %149 = arith.mulf %148, %138 : vector<16x256xf32>
    %150 = arith.addf %146, %149 : vector<16x256xf32>
    %c48_94 = arith.constant 48 : index
    %c0_95 = arith.constant 0 : index
    %151 = vector.load %arg18[%c48_94, %c0_95] : memref<144x256xf32, #tpu.memory_space<vmem>>, vector<16x256xf32>
    %c48_96 = arith.constant 48 : index
    %c0_97 = arith.constant 0 : index
    %152 = vector.load %arg19[%c48_96, %c0_97] : memref<144x256xf32, #tpu.memory_space<vmem>>, vector<16x256xf32>
    %153 = vector.extract_strided_slice %99 {offsets = [3, 0], sizes = [1, 256], strides = [1, 1]} : vector<9x256xf32> to vector<1x256xf32>
    %154 = vector.broadcast %153 : vector<1x256xf32> to vector<16x256xf32>
    %155 = arith.mulf %154, %151 : vector<16x256xf32>
    %156 = arith.addf %142, %155 : vector<16x256xf32>
    %157 = vector.extract_strided_slice %90 {offsets = [3, 0], sizes = [1, 256], strides = [1, 1]} : vector<9x256xf32> to vector<1x256xf32>
    %158 = vector.broadcast %157 : vector<1x256xf32> to vector<16x256xf32>
    %159 = arith.mulf %158, %151 : vector<16x256xf32>
    %160 = arith.addf %150, %159 : vector<16x256xf32>
    %161 = vector.extract_strided_slice %106 {offsets = [3, 0], sizes = [1, 256], strides = [1, 1]} : vector<9x256xf32> to vector<1x256xf32>
    %162 = vector.broadcast %161 : vector<1x256xf32> to vector<16x256xf32>
    %163 = arith.mulf %162, %152 : vector<16x256xf32>
    %164 = arith.addf %160, %163 : vector<16x256xf32>
    %c64_98 = arith.constant 64 : index
    %c0_99 = arith.constant 0 : index
    %165 = vector.load %arg18[%c64_98, %c0_99] : memref<144x256xf32, #tpu.memory_space<vmem>>, vector<16x256xf32>
    %c64_100 = arith.constant 64 : index
    %c0_101 = arith.constant 0 : index
    %166 = vector.load %arg19[%c64_100, %c0_101] : memref<144x256xf32, #tpu.memory_space<vmem>>, vector<16x256xf32>
    %167 = vector.extract_strided_slice %99 {offsets = [4, 0], sizes = [1, 256], strides = [1, 1]} : vector<9x256xf32> to vector<1x256xf32>
    %168 = vector.broadcast %167 : vector<1x256xf32> to vector<16x256xf32>
    %169 = arith.mulf %168, %165 : vector<16x256xf32>
    %170 = arith.addf %156, %169 : vector<16x256xf32>
    %171 = vector.extract_strided_slice %90 {offsets = [4, 0], sizes = [1, 256], strides = [1, 1]} : vector<9x256xf32> to vector<1x256xf32>
    %172 = vector.broadcast %171 : vector<1x256xf32> to vector<16x256xf32>
    %173 = arith.mulf %172, %165 : vector<16x256xf32>
    %174 = arith.addf %164, %173 : vector<16x256xf32>
    %175 = vector.extract_strided_slice %106 {offsets = [4, 0], sizes = [1, 256], strides = [1, 1]} : vector<9x256xf32> to vector<1x256xf32>
    %176 = vector.broadcast %175 : vector<1x256xf32> to vector<16x256xf32>
    %177 = arith.mulf %176, %166 : vector<16x256xf32>
    %178 = arith.addf %174, %177 : vector<16x256xf32>
    %c80_102 = arith.constant 80 : index
    %c0_103 = arith.constant 0 : index
    %179 = vector.load %arg18[%c80_102, %c0_103] : memref<144x256xf32, #tpu.memory_space<vmem>>, vector<16x256xf32>
    %c80_104 = arith.constant 80 : index
    %c0_105 = arith.constant 0 : index
    %180 = vector.load %arg19[%c80_104, %c0_105] : memref<144x256xf32, #tpu.memory_space<vmem>>, vector<16x256xf32>
    %181 = vector.extract_strided_slice %99 {offsets = [5, 0], sizes = [1, 256], strides = [1, 1]} : vector<9x256xf32> to vector<1x256xf32>
    %182 = vector.broadcast %181 : vector<1x256xf32> to vector<16x256xf32>
    %183 = arith.mulf %182, %179 : vector<16x256xf32>
    %184 = arith.addf %170, %183 : vector<16x256xf32>
    %185 = vector.extract_strided_slice %90 {offsets = [5, 0], sizes = [1, 256], strides = [1, 1]} : vector<9x256xf32> to vector<1x256xf32>
    %186 = vector.broadcast %185 : vector<1x256xf32> to vector<16x256xf32>
    %187 = arith.mulf %186, %179 : vector<16x256xf32>
    %188 = arith.addf %178, %187 : vector<16x256xf32>
    %189 = vector.extract_strided_slice %106 {offsets = [5, 0], sizes = [1, 256], strides = [1, 1]} : vector<9x256xf32> to vector<1x256xf32>
    %190 = vector.broadcast %189 : vector<1x256xf32> to vector<16x256xf32>
    %191 = arith.mulf %190, %180 : vector<16x256xf32>
    %192 = arith.addf %188, %191 : vector<16x256xf32>
    %c96_106 = arith.constant 96 : index
    %c0_107 = arith.constant 0 : index
    %193 = vector.load %arg18[%c96_106, %c0_107] : memref<144x256xf32, #tpu.memory_space<vmem>>, vector<16x256xf32>
    %c96_108 = arith.constant 96 : index
    %c0_109 = arith.constant 0 : index
    %194 = vector.load %arg19[%c96_108, %c0_109] : memref<144x256xf32, #tpu.memory_space<vmem>>, vector<16x256xf32>
    %195 = vector.extract_strided_slice %99 {offsets = [6, 0], sizes = [1, 256], strides = [1, 1]} : vector<9x256xf32> to vector<1x256xf32>
    %196 = vector.broadcast %195 : vector<1x256xf32> to vector<16x256xf32>
    %197 = arith.mulf %196, %193 : vector<16x256xf32>
    %198 = arith.addf %184, %197 : vector<16x256xf32>
    %199 = vector.extract_strided_slice %90 {offsets = [6, 0], sizes = [1, 256], strides = [1, 1]} : vector<9x256xf32> to vector<1x256xf32>
    %200 = vector.broadcast %199 : vector<1x256xf32> to vector<16x256xf32>
    %201 = arith.mulf %200, %193 : vector<16x256xf32>
    %202 = arith.addf %192, %201 : vector<16x256xf32>
    %203 = vector.extract_strided_slice %106 {offsets = [6, 0], sizes = [1, 256], strides = [1, 1]} : vector<9x256xf32> to vector<1x256xf32>
    %204 = vector.broadcast %203 : vector<1x256xf32> to vector<16x256xf32>
    %205 = arith.mulf %204, %194 : vector<16x256xf32>
    %206 = arith.addf %202, %205 : vector<16x256xf32>
    %c112_110 = arith.constant 112 : index
    %c0_111 = arith.constant 0 : index
    %207 = vector.load %arg18[%c112_110, %c0_111] : memref<144x256xf32, #tpu.memory_space<vmem>>, vector<16x256xf32>
    %c112_112 = arith.constant 112 : index
    %c0_113 = arith.constant 0 : index
    %208 = vector.load %arg19[%c112_112, %c0_113] : memref<144x256xf32, #tpu.memory_space<vmem>>, vector<16x256xf32>
    %209 = vector.extract_strided_slice %99 {offsets = [7, 0], sizes = [1, 256], strides = [1, 1]} : vector<9x256xf32> to vector<1x256xf32>
    %210 = vector.broadcast %209 : vector<1x256xf32> to vector<16x256xf32>
    %211 = arith.mulf %210, %207 : vector<16x256xf32>
    %212 = arith.addf %198, %211 : vector<16x256xf32>
    %213 = vector.extract_strided_slice %90 {offsets = [7, 0], sizes = [1, 256], strides = [1, 1]} : vector<9x256xf32> to vector<1x256xf32>
    %214 = vector.broadcast %213 : vector<1x256xf32> to vector<16x256xf32>
    %215 = arith.mulf %214, %207 : vector<16x256xf32>
    %216 = arith.addf %206, %215 : vector<16x256xf32>
    %217 = vector.extract_strided_slice %106 {offsets = [7, 0], sizes = [1, 256], strides = [1, 1]} : vector<9x256xf32> to vector<1x256xf32>
    %218 = vector.broadcast %217 : vector<1x256xf32> to vector<16x256xf32>
    %219 = arith.mulf %218, %208 : vector<16x256xf32>
    %220 = arith.addf %216, %219 : vector<16x256xf32>
    %c128_114 = arith.constant 128 : index
    %c0_115 = arith.constant 0 : index
    %221 = vector.load %arg18[%c128_114, %c0_115] : memref<144x256xf32, #tpu.memory_space<vmem>>, vector<16x256xf32>
    %c128_116 = arith.constant 128 : index
    %c0_117 = arith.constant 0 : index
    %222 = vector.load %arg19[%c128_116, %c0_117] : memref<144x256xf32, #tpu.memory_space<vmem>>, vector<16x256xf32>
    %223 = vector.extract_strided_slice %99 {offsets = [8, 0], sizes = [1, 256], strides = [1, 1]} : vector<9x256xf32> to vector<1x256xf32>
    %224 = vector.broadcast %223 : vector<1x256xf32> to vector<16x256xf32>
    %225 = arith.mulf %224, %221 : vector<16x256xf32>
    %226 = arith.addf %212, %225 : vector<16x256xf32>
    %227 = vector.extract_strided_slice %90 {offsets = [8, 0], sizes = [1, 256], strides = [1, 1]} : vector<9x256xf32> to vector<1x256xf32>
    %228 = vector.broadcast %227 : vector<1x256xf32> to vector<16x256xf32>
    %229 = arith.mulf %228, %221 : vector<16x256xf32>
    %230 = arith.addf %220, %229 : vector<16x256xf32>
    %231 = vector.extract_strided_slice %106 {offsets = [8, 0], sizes = [1, 256], strides = [1, 1]} : vector<9x256xf32> to vector<1x256xf32>
    %232 = vector.broadcast %231 : vector<1x256xf32> to vector<16x256xf32>
    %233 = arith.mulf %232, %222 : vector<16x256xf32>
    %234 = arith.addf %230, %233 : vector<16x256xf32>
    %235 = arith.mulf %3, %226 : vector<16x256xf32>
    %236 = arith.addf %235, %234 : vector<16x256xf32>
    %c0_118 = arith.constant 0 : index
    %c0_119 = arith.constant 0 : index
    %c0_120 = arith.constant 0 : index
    %c0_121 = arith.constant 0 : index
    %c0_122 = arith.constant 0 : index
    %237 = vector.load %arg5[%c0_118, %c0_119, %c0_120, %c0_121, %c0_122] : memref<1x1x3x3x16xf32, #tpu.memory_space<vmem>>, vector<1x1x1x3x16xf32>
    %238 = vector.shape_cast %237 : vector<1x1x1x3x16xf32> to vector<3x16xf32>
    %c0_123 = arith.constant 0 : index
    %c0_124 = arith.constant 0 : index
    %c0_125 = arith.constant 0 : index
    %c0_126 = arith.constant 0 : index
    %c0_127 = arith.constant 0 : index
    %239 = vector.load %arg6[%c0_123, %c0_124, %c0_125, %c0_126, %c0_127] : memref<1x1x3x16x3xf32, #tpu.memory_space<vmem>>, vector<1x1x1x16x3xf32>
    %240 = vector.shape_cast %239 : vector<1x1x1x16x3xf32> to vector<16x3xf32>
    %cst_128 = arith.constant dense<0.000000e+00> : vector<3x256xf32>
    %241 = tpu.matmul %238, %236, %cst_128 {dimension_numbers = #tpu.dot_dimension_numbers<[1], [0], [0], [1], [0, 0, 1, 1], [], []>} : vector<3x16xf32>, vector<16x256xf32>, vector<3x256xf32> -> vector<3x256xf32>
    %cst_129 = arith.constant 0.000000e+00 : f32
    %242 = vector.broadcast %cst_129 : f32 to vector<3x256xf32>
    %243 = arith.subf %242, %241 : vector<3x256xf32>
    %244 = math.exp %243 : vector<3x256xf32>
    %cst_130 = arith.constant 1.000000e+00 : f32
    %245 = vector.broadcast %cst_130 : f32 to vector<3x256xf32>
    %246 = arith.addf %245, %244 : vector<3x256xf32>
    %247 = tpu.reciprocal %246 {approx = true} : vector<3x256xf32> -> vector<3x256xf32>
    %cst_131 = arith.constant dense<0.000000e+00> : vector<16x256xf32>
    %248 = tpu.matmul %240, %247, %cst_131 {dimension_numbers = #tpu.dot_dimension_numbers<[1], [0], [0], [1], [0, 0, 1, 1], [], []>} : vector<16x3xf32>, vector<3x256xf32>, vector<16x256xf32> -> vector<16x256xf32>
    %249 = arith.mulf %236, %248 : vector<16x256xf32>
    %250 = arith.mulf %249, %226 : vector<16x256xf32>
    %c0_132 = arith.constant 0 : index
    %c0_133 = arith.constant 0 : index
    %251 = vector.load %arg20[%c0_132, %c0_133] : memref<48x256xf32, #tpu.memory_space<vmem>>, vector<16x256xf32>
    tpu.vector_store %arg20[%c0_132, %c0_133], %250 {strides = array<i32>} : memref<48x256xf32, #tpu.memory_space<vmem>>, vector<16x256xf32>,
    %c0_134 = arith.constant 0 : index
    %c0_135 = arith.constant 0 : index
    %c0_136 = arith.constant 0 : index
    %c0_137 = arith.constant 0 : index
    %252 = vector.load %arg17[%c0_134, %c0_135, %c0_136, %c0_137] : memref<1x1x16x256xf32, #tpu.memory_space<vmem>>, vector<1x1x16x256xf32>
    %253 = vector.shape_cast %252 : vector<1x1x16x256xf32> to vector<16x256xf32>
    %254 = vector.shape_cast %249 : vector<16x256xf32> to vector<1x1x16x256xf32>
    tpu.vector_store %arg17[%c0_134, %c0_135, %c0_136, %c0_137], %254 {strides = array<i32>} : memref<1x1x16x256xf32, #tpu.memory_space<vmem>>, vector<1x1x16x256xf32>,
    %c1 = arith.constant 1 : index
    %c0_138 = arith.constant 0 : index
    %c0_139 = arith.constant 0 : index
    %255 = vector.load %arg4[%c1, %c0_138, %c0_139] : memref<3x9x256xf32, #tpu.memory_space<vmem>>, vector<1x9x256xf32>
    %256 = vector.shape_cast %255 : vector<1x9x256xf32> to vector<9x256xf32>
    %257 = vector.extract_strided_slice %256 {offsets = [0, 0], sizes = [1, 256], strides = [1, 1]} : vector<9x256xf32> to vector<1x256xf32>
    %c68_i32 = arith.constant 68 : i32
    %258 = tpu.dynamic_rotate %1 by %c68_i32 dim 1 : vector<16x256xf32>, i32 -> vector<16x256xf32>
    %259 = vector.broadcast %257 : vector<1x256xf32> to vector<16x256xf32>
    %260 = arith.mulf %258, %259 : vector<16x256xf32>
    %c0_140 = arith.constant 0 : index
    %c0_141 = arith.constant 0 : index
    %261 = vector.load %arg18[%c0_140, %c0_141] : memref<144x256xf32, #tpu.memory_space<vmem>>, vector<16x256xf32>
    tpu.vector_store %arg18[%c0_140, %c0_141], %260 {strides = array<i32>} : memref<144x256xf32, #tpu.memory_space<vmem>>, vector<16x256xf32>,
    %c68_i32_142 = arith.constant 68 : i32
    %262 = tpu.dynamic_rotate %3 by %c68_i32_142 dim 1 : vector<16x256xf32>, i32 -> vector<16x256xf32>
    %263 = vector.broadcast %257 : vector<1x256xf32> to vector<16x256xf32>
    %264 = arith.mulf %262, %263 : vector<16x256xf32>
    %c0_143 = arith.constant 0 : index
    %c0_144 = arith.constant 0 : index
    %265 = vector.load %arg19[%c0_143, %c0_144] : memref<144x256xf32, #tpu.memory_space<vmem>>, vector<16x256xf32>
    tpu.vector_store %arg19[%c0_143, %c0_144], %264 {strides = array<i32>} : memref<144x256xf32, #tpu.memory_space<vmem>>, vector<16x256xf32>,
    %266 = vector.extract_strided_slice %256 {offsets = [1, 0], sizes = [1, 256], strides = [1, 1]} : vector<9x256xf32> to vector<1x256xf32>
    %c64_i32 = arith.constant 64 : i32
    %267 = tpu.dynamic_rotate %1 by %c64_i32 dim 1 : vector<16x256xf32>, i32 -> vector<16x256xf32>
    %268 = vector.broadcast %266 : vector<1x256xf32> to vector<16x256xf32>
    %269 = arith.mulf %267, %268 : vector<16x256xf32>
    %c16_145 = arith.constant 16 : index
    %c0_146 = arith.constant 0 : index
    %270 = vector.load %arg18[%c16_145, %c0_146] : memref<144x256xf32, #tpu.memory_space<vmem>>, vector<16x256xf32>
    tpu.vector_store %arg18[%c16_145, %c0_146], %269 {strides = array<i32>} : memref<144x256xf32, #tpu.memory_space<vmem>>, vector<16x256xf32>,
    %c64_i32_147 = arith.constant 64 : i32
    %271 = tpu.dynamic_rotate %3 by %c64_i32_147 dim 1 : vector<16x256xf32>, i32 -> vector<16x256xf32>
    %272 = vector.broadcast %266 : vector<1x256xf32> to vector<16x256xf32>
    %273 = arith.mulf %271, %272 : vector<16x256xf32>
    %c16_148 = arith.constant 16 : index
    %c0_149 = arith.constant 0 : index
    %274 = vector.load %arg19[%c16_148, %c0_149] : memref<144x256xf32, #tpu.memory_space<vmem>>, vector<16x256xf32>
    tpu.vector_store %arg19[%c16_148, %c0_149], %273 {strides = array<i32>} : memref<144x256xf32, #tpu.memory_space<vmem>>, vector<16x256xf32>,
    %275 = vector.extract_strided_slice %256 {offsets = [2, 0], sizes = [1, 256], strides = [1, 1]} : vector<9x256xf32> to vector<1x256xf32>
    %c60_i32 = arith.constant 60 : i32
    %276 = tpu.dynamic_rotate %1 by %c60_i32 dim 1 : vector<16x256xf32>, i32 -> vector<16x256xf32>
    %277 = vector.broadcast %275 : vector<1x256xf32> to vector<16x256xf32>
    %278 = arith.mulf %276, %277 : vector<16x256xf32>
    %c32_150 = arith.constant 32 : index
    %c0_151 = arith.constant 0 : index
    %279 = vector.load %arg18[%c32_150, %c0_151] : memref<144x256xf32, #tpu.memory_space<vmem>>, vector<16x256xf32>
    tpu.vector_store %arg18[%c32_150, %c0_151], %278 {strides = array<i32>} : memref<144x256xf32, #tpu.memory_space<vmem>>, vector<16x256xf32>,
    %c60_i32_152 = arith.constant 60 : i32
    %280 = tpu.dynamic_rotate %3 by %c60_i32_152 dim 1 : vector<16x256xf32>, i32 -> vector<16x256xf32>
    %281 = vector.broadcast %275 : vector<1x256xf32> to vector<16x256xf32>
    %282 = arith.mulf %280, %281 : vector<16x256xf32>
    %c32_153 = arith.constant 32 : index
    %c0_154 = arith.constant 0 : index
    %283 = vector.load %arg19[%c32_153, %c0_154] : memref<144x256xf32, #tpu.memory_space<vmem>>, vector<16x256xf32>
    tpu.vector_store %arg19[%c32_153, %c0_154], %282 {strides = array<i32>} : memref<144x256xf32, #tpu.memory_space<vmem>>, vector<16x256xf32>,
    %284 = vector.extract_strided_slice %256 {offsets = [3, 0], sizes = [1, 256], strides = [1, 1]} : vector<9x256xf32> to vector<1x256xf32>
    %c4_i32 = arith.constant 4 : i32
    %285 = tpu.dynamic_rotate %1 by %c4_i32 dim 1 : vector<16x256xf32>, i32 -> vector<16x256xf32>
    %286 = vector.broadcast %284 : vector<1x256xf32> to vector<16x256xf32>
    %287 = arith.mulf %285, %286 : vector<16x256xf32>
    %c48_155 = arith.constant 48 : index
    %c0_156 = arith.constant 0 : index
    %288 = vector.load %arg18[%c48_155, %c0_156] : memref<144x256xf32, #tpu.memory_space<vmem>>, vector<16x256xf32>
    tpu.vector_store %arg18[%c48_155, %c0_156], %287 {strides = array<i32>} : memref<144x256xf32, #tpu.memory_space<vmem>>, vector<16x256xf32>,
    %c4_i32_157 = arith.constant 4 : i32
    %289 = tpu.dynamic_rotate %3 by %c4_i32_157 dim 1 : vector<16x256xf32>, i32 -> vector<16x256xf32>
    %290 = vector.broadcast %284 : vector<1x256xf32> to vector<16x256xf32>
    %291 = arith.mulf %289, %290 : vector<16x256xf32>
    %c48_158 = arith.constant 48 : index
    %c0_159 = arith.constant 0 : index
    %292 = vector.load %arg19[%c48_158, %c0_159] : memref<144x256xf32, #tpu.memory_space<vmem>>, vector<16x256xf32>
    tpu.vector_store %arg19[%c48_158, %c0_159], %291 {strides = array<i32>} : memref<144x256xf32, #tpu.memory_space<vmem>>, vector<16x256xf32>,
    %c64_160 = arith.constant 64 : index
    %c0_161 = arith.constant 0 : index
    %293 = vector.load %arg18[%c64_160, %c0_161] : memref<144x256xf32, #tpu.memory_space<vmem>>, vector<16x256xf32>
    tpu.vector_store %arg18[%c64_160, %c0_161], %1 {strides = array<i32>} : memref<144x256xf32, #tpu.memory_space<vmem>>, vector<16x256xf32>,
    %c64_162 = arith.constant 64 : index
    %c0_163 = arith.constant 0 : index
    %294 = vector.load %arg19[%c64_162, %c0_163] : memref<144x256xf32, #tpu.memory_space<vmem>>, vector<16x256xf32>
    tpu.vector_store %arg19[%c64_162, %c0_163], %3 {strides = array<i32>} : memref<144x256xf32, #tpu.memory_space<vmem>>, vector<16x256xf32>,
    %295 = vector.extract_strided_slice %256 {offsets = [5, 0], sizes = [1, 256], strides = [1, 1]} : vector<9x256xf32> to vector<1x256xf32>
    %c252_i32 = arith.constant 252 : i32
    %296 = tpu.dynamic_rotate %1 by %c252_i32 dim 1 : vector<16x256xf32>, i32 -> vector<16x256xf32>
    %297 = vector.broadcast %295 : vector<1x256xf32> to vector<16x256xf32>
    %298 = arith.mulf %296, %297 : vector<16x256xf32>
    %c80_164 = arith.constant 80 : index
    %c0_165 = arith.constant 0 : index
    %299 = vector.load %arg18[%c80_164, %c0_165] : memref<144x256xf32, #tpu.memory_space<vmem>>, vector<16x256xf32>
    tpu.vector_store %arg18[%c80_164, %c0_165], %298 {strides = array<i32>} : memref<144x256xf32, #tpu.memory_space<vmem>>, vector<16x256xf32>,
    %c252_i32_166 = arith.constant 252 : i32
    %300 = tpu.dynamic_rotate %3 by %c252_i32_166 dim 1 : vector<16x256xf32>, i32 -> vector<16x256xf32>
    %301 = vector.broadcast %295 : vector<1x256xf32> to vector<16x256xf32>
    %302 = arith.mulf %300, %301 : vector<16x256xf32>
    %c80_167 = arith.constant 80 : index
    %c0_168 = arith.constant 0 : index
    %303 = vector.load %arg19[%c80_167, %c0_168] : memref<144x256xf32, #tpu.memory_space<vmem>>, vector<16x256xf32>
    tpu.vector_store %arg19[%c80_167, %c0_168], %302 {strides = array<i32>} : memref<144x256xf32, #tpu.memory_space<vmem>>, vector<16x256xf32>,
    %304 = vector.extract_strided_slice %256 {offsets = [6, 0], sizes = [1, 256], strides = [1, 1]} : vector<9x256xf32> to vector<1x256xf32>
    %c196_i32 = arith.constant 196 : i32
    %305 = tpu.dynamic_rotate %1 by %c196_i32 dim 1 : vector<16x256xf32>, i32 -> vector<16x256xf32>
    %306 = vector.broadcast %304 : vector<1x256xf32> to vector<16x256xf32>
    %307 = arith.mulf %305, %306 : vector<16x256xf32>
    %c96_169 = arith.constant 96 : index
    %c0_170 = arith.constant 0 : index
    %308 = vector.load %arg18[%c96_169, %c0_170] : memref<144x256xf32, #tpu.memory_space<vmem>>, vector<16x256xf32>
    tpu.vector_store %arg18[%c96_169, %c0_170], %307 {strides = array<i32>} : memref<144x256xf32, #tpu.memory_space<vmem>>, vector<16x256xf32>,
    %c196_i32_171 = arith.constant 196 : i32
    %309 = tpu.dynamic_rotate %3 by %c196_i32_171 dim 1 : vector<16x256xf32>, i32 -> vector<16x256xf32>
    %310 = vector.broadcast %304 : vector<1x256xf32> to vector<16x256xf32>
    %311 = arith.mulf %309, %310 : vector<16x256xf32>
    %c96_172 = arith.constant 96 : index
    %c0_173 = arith.constant 0 : index
    %312 = vector.load %arg19[%c96_172, %c0_173] : memref<144x256xf32, #tpu.memory_space<vmem>>, vector<16x256xf32>
    tpu.vector_store %arg19[%c96_172, %c0_173], %311 {strides = array<i32>} : memref<144x256xf32, #tpu.memory_space<vmem>>, vector<16x256xf32>,
    %313 = vector.extract_strided_slice %256 {offsets = [7, 0], sizes = [1, 256], strides = [1, 1]} : vector<9x256xf32> to vector<1x256xf32>
    %c192_i32 = arith.constant 192 : i32
    %314 = tpu.dynamic_rotate %1 by %c192_i32 dim 1 : vector<16x256xf32>, i32 -> vector<16x256xf32>
    %315 = vector.broadcast %313 : vector<1x256xf32> to vector<16x256xf32>
    %316 = arith.mulf %314, %315 : vector<16x256xf32>
    %c112_174 = arith.constant 112 : index
    %c0_175 = arith.constant 0 : index
    %317 = vector.load %arg18[%c112_174, %c0_175] : memref<144x256xf32, #tpu.memory_space<vmem>>, vector<16x256xf32>
    tpu.vector_store %arg18[%c112_174, %c0_175], %316 {strides = array<i32>} : memref<144x256xf32, #tpu.memory_space<vmem>>, vector<16x256xf32>,
    %c192_i32_176 = arith.constant 192 : i32
    %318 = tpu.dynamic_rotate %3 by %c192_i32_176 dim 1 : vector<16x256xf32>, i32 -> vector<16x256xf32>
    %319 = vector.broadcast %313 : vector<1x256xf32> to vector<16x256xf32>
    %320 = arith.mulf %318, %319 : vector<16x256xf32>
    %c112_177 = arith.constant 112 : index
    %c0_178 = arith.constant 0 : index
    %321 = vector.load %arg19[%c112_177, %c0_178] : memref<144x256xf32, #tpu.memory_space<vmem>>, vector<16x256xf32>
    tpu.vector_store %arg19[%c112_177, %c0_178], %320 {strides = array<i32>} : memref<144x256xf32, #tpu.memory_space<vmem>>, vector<16x256xf32>,
    %322 = vector.extract_strided_slice %256 {offsets = [8, 0], sizes = [1, 256], strides = [1, 1]} : vector<9x256xf32> to vector<1x256xf32>
    %c188_i32 = arith.constant 188 : i32
    %323 = tpu.dynamic_rotate %1 by %c188_i32 dim 1 : vector<16x256xf32>, i32 -> vector<16x256xf32>
    %324 = vector.broadcast %322 : vector<1x256xf32> to vector<16x256xf32>
    %325 = arith.mulf %323, %324 : vector<16x256xf32>
    %c128_179 = arith.constant 128 : index
    %c0_180 = arith.constant 0 : index
    %326 = vector.load %arg18[%c128_179, %c0_180] : memref<144x256xf32, #tpu.memory_space<vmem>>, vector<16x256xf32>
    tpu.vector_store %arg18[%c128_179, %c0_180], %325 {strides = array<i32>} : memref<144x256xf32, #tpu.memory_space<vmem>>, vector<16x256xf32>,
    %c188_i32_181 = arith.constant 188 : i32
    %327 = tpu.dynamic_rotate %3 by %c188_i32_181 dim 1 : vector<16x256xf32>, i32 -> vector<16x256xf32>
    %328 = vector.broadcast %322 : vector<1x256xf32> to vector<16x256xf32>
    %329 = arith.mulf %327, %328 : vector<16x256xf32>
    %c128_182 = arith.constant 128 : index
    %c0_183 = arith.constant 0 : index
    %330 = vector.load %arg19[%c128_182, %c0_183] : memref<144x256xf32, #tpu.memory_space<vmem>>, vector<16x256xf32>
    tpu.vector_store %arg19[%c128_182, %c0_183], %329 {strides = array<i32>} : memref<144x256xf32, #tpu.memory_space<vmem>>, vector<16x256xf32>,
    %c0_184 = arith.constant 0 : index
    %c0_185 = arith.constant 0 : index
    %331 = vector.load %arg18[%c0_184, %c0_185] : memref<144x256xf32, #tpu.memory_space<vmem>>, vector<144x256xf32>
    %c0_186 = arith.constant 0 : index
    %c1_187 = arith.constant 1 : index
    %c0_188 = arith.constant 0 : index
    %c0_189 = arith.constant 0 : index
    %332 = vector.load %arg7[%c0_186, %c1_187, %c0_188, %c0_189] : memref<1x3x9x144xf32, #tpu.memory_space<vmem>>, vector<1x1x9x144xf32>
    %333 = vector.shape_cast %332 : vector<1x1x9x144xf32> to vector<9x144xf32>
    %cst_190 = arith.constant dense<0.000000e+00> : vector<9x256xf32>
    %334 = tpu.matmul %333, %331, %cst_190 {dimension_numbers = #tpu.dot_dimension_numbers<[1], [0], [0], [1], [0, 0, 1, 1], [], []>} : vector<9x144xf32>, vector<144x256xf32>, vector<9x256xf32> -> vector<9x256xf32>
    %c0_191 = arith.constant 0 : index
    %c1_192 = arith.constant 1 : index
    %c0_193 = arith.constant 0 : index
    %c0_194 = arith.constant 0 : index
    %335 = vector.load %arg10[%c0_191, %c1_192, %c0_193, %c0_194] : memref<1x3x9x144xf32, #tpu.memory_space<vmem>>, vector<1x1x9x144xf32>
    %336 = vector.shape_cast %335 : vector<1x1x9x144xf32> to vector<9x144xf32>
    %cst_195 = arith.constant dense<0.000000e+00> : vector<9x256xf32>
    %337 = tpu.matmul %336, %331, %cst_195 {dimension_numbers = #tpu.dot_dimension_numbers<[1], [0], [0], [1], [0, 0, 1, 1], [], []>} : vector<9x144xf32>, vector<144x256xf32>, vector<9x256xf32> -> vector<9x256xf32>
    %c0_196 = arith.constant 0 : index
    %c1_197 = arith.constant 1 : index
    %c0_198 = arith.constant 0 : index
    %c0_199 = arith.constant 0 : index
    %338 = vector.load %arg11[%c0_196, %c1_197, %c0_198, %c0_199] : memref<1x3x9x1xf32, #tpu.memory_space<vmem>>, vector<1x1x9x1xf32>
    %339 = vector.shape_cast %338 : vector<1x1x9x1xf32> to vector<9x1xf32>
    %340 = vector.broadcast %339 : vector<9x1xf32> to vector<9x256xf32>
    %341 = arith.addf %337, %340 : vector<9x256xf32>
    %c0_200 = arith.constant 0 : index
    %c0_201 = arith.constant 0 : index
    %342 = vector.load %arg19[%c0_200, %c0_201] : memref<144x256xf32, #tpu.memory_space<vmem>>, vector<144x256xf32>
    %c0_202 = arith.constant 0 : index
    %c1_203 = arith.constant 1 : index
    %c0_204 = arith.constant 0 : index
    %c0_205 = arith.constant 0 : index
    %343 = vector.load %arg8[%c0_202, %c1_203, %c0_204, %c0_205] : memref<1x3x9x144xf32, #tpu.memory_space<vmem>>, vector<1x1x9x144xf32>
    %344 = vector.shape_cast %343 : vector<1x1x9x144xf32> to vector<9x144xf32>
    %cst_206 = arith.constant dense<0.000000e+00> : vector<9x256xf32>
    %345 = tpu.matmul %344, %342, %cst_206 {dimension_numbers = #tpu.dot_dimension_numbers<[1], [0], [0], [1], [0, 0, 1, 1], [], []>} : vector<9x144xf32>, vector<144x256xf32>, vector<9x256xf32> -> vector<9x256xf32>
    %346 = arith.addf %334, %345 : vector<9x256xf32>
    %c0_207 = arith.constant 0 : index
    %c1_208 = arith.constant 1 : index
    %c0_209 = arith.constant 0 : index
    %c0_210 = arith.constant 0 : index
    %347 = vector.load %arg9[%c0_207, %c1_208, %c0_209, %c0_210] : memref<1x3x9x1xf32, #tpu.memory_space<vmem>>, vector<1x1x9x1xf32>
    %348 = vector.shape_cast %347 : vector<1x1x9x1xf32> to vector<9x1xf32>
    %349 = vector.broadcast %348 : vector<9x1xf32> to vector<9x256xf32>
    %350 = arith.addf %346, %349 : vector<9x256xf32>
    %c0_211 = arith.constant 0 : index
    %c1_212 = arith.constant 1 : index
    %c0_213 = arith.constant 0 : index
    %c0_214 = arith.constant 0 : index
    %351 = vector.load %arg12[%c0_211, %c1_212, %c0_213, %c0_214] : memref<1x3x9x144xf32, #tpu.memory_space<vmem>>, vector<1x1x9x144xf32>
    %352 = vector.shape_cast %351 : vector<1x1x9x144xf32> to vector<9x144xf32>
    %cst_215 = arith.constant dense<0.000000e+00> : vector<9x256xf32>
    %353 = tpu.matmul %352, %342, %cst_215 {dimension_numbers = #tpu.dot_dimension_numbers<[1], [0], [0], [1], [0, 0, 1, 1], [], []>} : vector<9x144xf32>, vector<144x256xf32>, vector<9x256xf32> -> vector<9x256xf32>
    %c0_216 = arith.constant 0 : index
    %c1_217 = arith.constant 1 : index
    %c0_218 = arith.constant 0 : index
    %c0_219 = arith.constant 0 : index
    %354 = vector.load %arg13[%c0_216, %c1_217, %c0_218, %c0_219] : memref<1x3x9x1xf32, #tpu.memory_space<vmem>>, vector<1x1x9x1xf32>
    %355 = vector.shape_cast %354 : vector<1x1x9x1xf32> to vector<9x1xf32>
    %356 = vector.broadcast %355 : vector<9x1xf32> to vector<9x256xf32>
    %357 = arith.addf %353, %356 : vector<9x256xf32>
    %cst_220 = arith.constant 0.000000e+00 : f32
    %358 = vector.broadcast %cst_220 : f32 to vector<16x256xf32>
    %cst_221 = arith.constant 0.000000e+00 : f32
    %359 = vector.broadcast %cst_221 : f32 to vector<16x256xf32>
    %c0_222 = arith.constant 0 : index
    %c0_223 = arith.constant 0 : index
    %360 = vector.load %arg18[%c0_222, %c0_223] : memref<144x256xf32, #tpu.memory_space<vmem>>, vector<16x256xf32>
    %c0_224 = arith.constant 0 : index
    %c0_225 = arith.constant 0 : index
    %361 = vector.load %arg19[%c0_224, %c0_225] : memref<144x256xf32, #tpu.memory_space<vmem>>, vector<16x256xf32>
    %362 = vector.extract_strided_slice %350 {offsets = [0, 0], sizes = [1, 256], strides = [1, 1]} : vector<9x256xf32> to vector<1x256xf32>
    %363 = vector.broadcast %362 : vector<1x256xf32> to vector<16x256xf32>
    %364 = arith.mulf %363, %360 : vector<16x256xf32>
    %365 = arith.addf %358, %364 : vector<16x256xf32>
    %366 = vector.extract_strided_slice %341 {offsets = [0, 0], sizes = [1, 256], strides = [1, 1]} : vector<9x256xf32> to vector<1x256xf32>
    %367 = vector.broadcast %366 : vector<1x256xf32> to vector<16x256xf32>
    %368 = arith.mulf %367, %360 : vector<16x256xf32>
    %369 = arith.addf %359, %368 : vector<16x256xf32>
    %370 = vector.extract_strided_slice %357 {offsets = [0, 0], sizes = [1, 256], strides = [1, 1]} : vector<9x256xf32> to vector<1x256xf32>
    %371 = vector.broadcast %370 : vector<1x256xf32> to vector<16x256xf32>
    %372 = arith.mulf %371, %361 : vector<16x256xf32>
    %373 = arith.addf %369, %372 : vector<16x256xf32>
    %c16_226 = arith.constant 16 : index
    %c0_227 = arith.constant 0 : index
    %374 = vector.load %arg18[%c16_226, %c0_227] : memref<144x256xf32, #tpu.memory_space<vmem>>, vector<16x256xf32>
    %c16_228 = arith.constant 16 : index
    %c0_229 = arith.constant 0 : index
    %375 = vector.load %arg19[%c16_228, %c0_229] : memref<144x256xf32, #tpu.memory_space<vmem>>, vector<16x256xf32>
    %376 = vector.extract_strided_slice %350 {offsets = [1, 0], sizes = [1, 256], strides = [1, 1]} : vector<9x256xf32> to vector<1x256xf32>
    %377 = vector.broadcast %376 : vector<1x256xf32> to vector<16x256xf32>
    %378 = arith.mulf %377, %374 : vector<16x256xf32>
    %379 = arith.addf %365, %378 : vector<16x256xf32>
    %380 = vector.extract_strided_slice %341 {offsets = [1, 0], sizes = [1, 256], strides = [1, 1]} : vector<9x256xf32> to vector<1x256xf32>
    %381 = vector.broadcast %380 : vector<1x256xf32> to vector<16x256xf32>
    %382 = arith.mulf %381, %374 : vector<16x256xf32>
    %383 = arith.addf %373, %382 : vector<16x256xf32>
    %384 = vector.extract_strided_slice %357 {offsets = [1, 0], sizes = [1, 256], strides = [1, 1]} : vector<9x256xf32> to vector<1x256xf32>
    %385 = vector.broadcast %384 : vector<1x256xf32> to vector<16x256xf32>
    %386 = arith.mulf %385, %375 : vector<16x256xf32>
    %387 = arith.addf %383, %386 : vector<16x256xf32>
    %c32_230 = arith.constant 32 : index
    %c0_231 = arith.constant 0 : index
    %388 = vector.load %arg18[%c32_230, %c0_231] : memref<144x256xf32, #tpu.memory_space<vmem>>, vector<16x256xf32>
    %c32_232 = arith.constant 32 : index
    %c0_233 = arith.constant 0 : index
    %389 = vector.load %arg19[%c32_232, %c0_233] : memref<144x256xf32, #tpu.memory_space<vmem>>, vector<16x256xf32>
    %390 = vector.extract_strided_slice %350 {offsets = [2, 0], sizes = [1, 256], strides = [1, 1]} : vector<9x256xf32> to vector<1x256xf32>
    %391 = vector.broadcast %390 : vector<1x256xf32> to vector<16x256xf32>
    %392 = arith.mulf %391, %388 : vector<16x256xf32>
    %393 = arith.addf %379, %392 : vector<16x256xf32>
    %394 = vector.extract_strided_slice %341 {offsets = [2, 0], sizes = [1, 256], strides = [1, 1]} : vector<9x256xf32> to vector<1x256xf32>
    %395 = vector.broadcast %394 : vector<1x256xf32> to vector<16x256xf32>
    %396 = arith.mulf %395, %388 : vector<16x256xf32>
    %397 = arith.addf %387, %396 : vector<16x256xf32>
    %398 = vector.extract_strided_slice %357 {offsets = [2, 0], sizes = [1, 256], strides = [1, 1]} : vector<9x256xf32> to vector<1x256xf32>
    %399 = vector.broadcast %398 : vector<1x256xf32> to vector<16x256xf32>
    %400 = arith.mulf %399, %389 : vector<16x256xf32>
    %401 = arith.addf %397, %400 : vector<16x256xf32>
    %c48_234 = arith.constant 48 : index
    %c0_235 = arith.constant 0 : index
    %402 = vector.load %arg18[%c48_234, %c0_235] : memref<144x256xf32, #tpu.memory_space<vmem>>, vector<16x256xf32>
    %c48_236 = arith.constant 48 : index
    %c0_237 = arith.constant 0 : index
    %403 = vector.load %arg19[%c48_236, %c0_237] : memref<144x256xf32, #tpu.memory_space<vmem>>, vector<16x256xf32>
    %404 = vector.extract_strided_slice %350 {offsets = [3, 0], sizes = [1, 256], strides = [1, 1]} : vector<9x256xf32> to vector<1x256xf32>
    %405 = vector.broadcast %404 : vector<1x256xf32> to vector<16x256xf32>
    %406 = arith.mulf %405, %402 : vector<16x256xf32>
    %407 = arith.addf %393, %406 : vector<16x256xf32>
    %408 = vector.extract_strided_slice %341 {offsets = [3, 0], sizes = [1, 256], strides = [1, 1]} : vector<9x256xf32> to vector<1x256xf32>
    %409 = vector.broadcast %408 : vector<1x256xf32> to vector<16x256xf32>
    %410 = arith.mulf %409, %402 : vector<16x256xf32>
    %411 = arith.addf %401, %410 : vector<16x256xf32>
    %412 = vector.extract_strided_slice %357 {offsets = [3, 0], sizes = [1, 256], strides = [1, 1]} : vector<9x256xf32> to vector<1x256xf32>
    %413 = vector.broadcast %412 : vector<1x256xf32> to vector<16x256xf32>
    %414 = arith.mulf %413, %403 : vector<16x256xf32>
    %415 = arith.addf %411, %414 : vector<16x256xf32>
    %c64_238 = arith.constant 64 : index
    %c0_239 = arith.constant 0 : index
    %416 = vector.load %arg18[%c64_238, %c0_239] : memref<144x256xf32, #tpu.memory_space<vmem>>, vector<16x256xf32>
    %c64_240 = arith.constant 64 : index
    %c0_241 = arith.constant 0 : index
    %417 = vector.load %arg19[%c64_240, %c0_241] : memref<144x256xf32, #tpu.memory_space<vmem>>, vector<16x256xf32>
    %418 = vector.extract_strided_slice %350 {offsets = [4, 0], sizes = [1, 256], strides = [1, 1]} : vector<9x256xf32> to vector<1x256xf32>
    %419 = vector.broadcast %418 : vector<1x256xf32> to vector<16x256xf32>
    %420 = arith.mulf %419, %416 : vector<16x256xf32>
    %421 = arith.addf %407, %420 : vector<16x256xf32>
    %422 = vector.extract_strided_slice %341 {offsets = [4, 0], sizes = [1, 256], strides = [1, 1]} : vector<9x256xf32> to vector<1x256xf32>
    %423 = vector.broadcast %422 : vector<1x256xf32> to vector<16x256xf32>
    %424 = arith.mulf %423, %416 : vector<16x256xf32>
    %425 = arith.addf %415, %424 : vector<16x256xf32>
    %426 = vector.extract_strided_slice %357 {offsets = [4, 0], sizes = [1, 256], strides = [1, 1]} : vector<9x256xf32> to vector<1x256xf32>
    %427 = vector.broadcast %426 : vector<1x256xf32> to vector<16x256xf32>
    %428 = arith.mulf %427, %417 : vector<16x256xf32>
    %429 = arith.addf %425, %428 : vector<16x256xf32>
    %c80_242 = arith.constant 80 : index
    %c0_243 = arith.constant 0 : index
    %430 = vector.load %arg18[%c80_242, %c0_243] : memref<144x256xf32, #tpu.memory_space<vmem>>, vector<16x256xf32>
    %c80_244 = arith.constant 80 : index
    %c0_245 = arith.constant 0 : index
    %431 = vector.load %arg19[%c80_244, %c0_245] : memref<144x256xf32, #tpu.memory_space<vmem>>, vector<16x256xf32>
    %432 = vector.extract_strided_slice %350 {offsets = [5, 0], sizes = [1, 256], strides = [1, 1]} : vector<9x256xf32> to vector<1x256xf32>
    %433 = vector.broadcast %432 : vector<1x256xf32> to vector<16x256xf32>
    %434 = arith.mulf %433, %430 : vector<16x256xf32>
    %435 = arith.addf %421, %434 : vector<16x256xf32>
    %436 = vector.extract_strided_slice %341 {offsets = [5, 0], sizes = [1, 256], strides = [1, 1]} : vector<9x256xf32> to vector<1x256xf32>
    %437 = vector.broadcast %436 : vector<1x256xf32> to vector<16x256xf32>
    %438 = arith.mulf %437, %430 : vector<16x256xf32>
    %439 = arith.addf %429, %438 : vector<16x256xf32>
    %440 = vector.extract_strided_slice %357 {offsets = [5, 0], sizes = [1, 256], strides = [1, 1]} : vector<9x256xf32> to vector<1x256xf32>
    %441 = vector.broadcast %440 : vector<1x256xf32> to vector<16x256xf32>
    %442 = arith.mulf %441, %431 : vector<16x256xf32>
    %443 = arith.addf %439, %442 : vector<16x256xf32>
    %c96_246 = arith.constant 96 : index
    %c0_247 = arith.constant 0 : index
    %444 = vector.load %arg18[%c96_246, %c0_247] : memref<144x256xf32, #tpu.memory_space<vmem>>, vector<16x256xf32>
    %c96_248 = arith.constant 96 : index
    %c0_249 = arith.constant 0 : index
    %445 = vector.load %arg19[%c96_248, %c0_249] : memref<144x256xf32, #tpu.memory_space<vmem>>, vector<16x256xf32>
    %446 = vector.extract_strided_slice %350 {offsets = [6, 0], sizes = [1, 256], strides = [1, 1]} : vector<9x256xf32> to vector<1x256xf32>
    %447 = vector.broadcast %446 : vector<1x256xf32> to vector<16x256xf32>
    %448 = arith.mulf %447, %444 : vector<16x256xf32>
    %449 = arith.addf %435, %448 : vector<16x256xf32>
    %450 = vector.extract_strided_slice %341 {offsets = [6, 0], sizes = [1, 256], strides = [1, 1]} : vector<9x256xf32> to vector<1x256xf32>
    %451 = vector.broadcast %450 : vector<1x256xf32> to vector<16x256xf32>
    %452 = arith.mulf %451, %444 : vector<16x256xf32>
    %453 = arith.addf %443, %452 : vector<16x256xf32>
    %454 = vector.extract_strided_slice %357 {offsets = [6, 0], sizes = [1, 256], strides = [1, 1]} : vector<9x256xf32> to vector<1x256xf32>
    %455 = vector.broadcast %454 : vector<1x256xf32> to vector<16x256xf32>
    %456 = arith.mulf %455, %445 : vector<16x256xf32>
    %457 = arith.addf %453, %456 : vector<16x256xf32>
    %c112_250 = arith.constant 112 : index
    %c0_251 = arith.constant 0 : index
    %458 = vector.load %arg18[%c112_250, %c0_251] : memref<144x256xf32, #tpu.memory_space<vmem>>, vector<16x256xf32>
    %c112_252 = arith.constant 112 : index
    %c0_253 = arith.constant 0 : index
    %459 = vector.load %arg19[%c112_252, %c0_253] : memref<144x256xf32, #tpu.memory_space<vmem>>, vector<16x256xf32>
    %460 = vector.extract_strided_slice %350 {offsets = [7, 0], sizes = [1, 256], strides = [1, 1]} : vector<9x256xf32> to vector<1x256xf32>
    %461 = vector.broadcast %460 : vector<1x256xf32> to vector<16x256xf32>
    %462 = arith.mulf %461, %458 : vector<16x256xf32>
    %463 = arith.addf %449, %462 : vector<16x256xf32>
    %464 = vector.extract_strided_slice %341 {offsets = [7, 0], sizes = [1, 256], strides = [1, 1]} : vector<9x256xf32> to vector<1x256xf32>
    %465 = vector.broadcast %464 : vector<1x256xf32> to vector<16x256xf32>
    %466 = arith.mulf %465, %458 : vector<16x256xf32>
    %467 = arith.addf %457, %466 : vector<16x256xf32>
    %468 = vector.extract_strided_slice %357 {offsets = [7, 0], sizes = [1, 256], strides = [1, 1]} : vector<9x256xf32> to vector<1x256xf32>
    %469 = vector.broadcast %468 : vector<1x256xf32> to vector<16x256xf32>
    %470 = arith.mulf %469, %459 : vector<16x256xf32>
    %471 = arith.addf %467, %470 : vector<16x256xf32>
    %c128_254 = arith.constant 128 : index
    %c0_255 = arith.constant 0 : index
    %472 = vector.load %arg18[%c128_254, %c0_255] : memref<144x256xf32, #tpu.memory_space<vmem>>, vector<16x256xf32>
    %c128_256 = arith.constant 128 : index
    %c0_257 = arith.constant 0 : index
    %473 = vector.load %arg19[%c128_256, %c0_257] : memref<144x256xf32, #tpu.memory_space<vmem>>, vector<16x256xf32>
    %474 = vector.extract_strided_slice %350 {offsets = [8, 0], sizes = [1, 256], strides = [1, 1]} : vector<9x256xf32> to vector<1x256xf32>
    %475 = vector.broadcast %474 : vector<1x256xf32> to vector<16x256xf32>
    %476 = arith.mulf %475, %472 : vector<16x256xf32>
    %477 = arith.addf %463, %476 : vector<16x256xf32>
    %478 = vector.extract_strided_slice %341 {offsets = [8, 0], sizes = [1, 256], strides = [1, 1]} : vector<9x256xf32> to vector<1x256xf32>
    %479 = vector.broadcast %478 : vector<1x256xf32> to vector<16x256xf32>
    %480 = arith.mulf %479, %472 : vector<16x256xf32>
    %481 = arith.addf %471, %480 : vector<16x256xf32>
    %482 = vector.extract_strided_slice %357 {offsets = [8, 0], sizes = [1, 256], strides = [1, 1]} : vector<9x256xf32> to vector<1x256xf32>
    %483 = vector.broadcast %482 : vector<1x256xf32> to vector<16x256xf32>
    %484 = arith.mulf %483, %473 : vector<16x256xf32>
    %485 = arith.addf %481, %484 : vector<16x256xf32>
    %486 = arith.mulf %3, %477 : vector<16x256xf32>
    %487 = arith.addf %486, %485 : vector<16x256xf32>
    %c0_258 = arith.constant 0 : index
    %c0_259 = arith.constant 0 : index
    %c1_260 = arith.constant 1 : index
    %c0_261 = arith.constant 0 : index
    %c0_262 = arith.constant 0 : index
    %488 = vector.load %arg5[%c0_258, %c0_259, %c1_260, %c0_261, %c0_262] : memref<1x1x3x3x16xf32, #tpu.memory_space<vmem>>, vector<1x1x1x3x16xf32>
    %489 = vector.shape_cast %488 : vector<1x1x1x3x16xf32> to vector<3x16xf32>
    %c0_263 = arith.constant 0 : index
    %c0_264 = arith.constant 0 : index
    %c1_265 = arith.constant 1 : index
    %c0_266 = arith.constant 0 : index
    %c0_267 = arith.constant 0 : index
    %490 = vector.load %arg6[%c0_263, %c0_264, %c1_265, %c0_266, %c0_267] : memref<1x1x3x16x3xf32, #tpu.memory_space<vmem>>, vector<1x1x1x16x3xf32>
    %491 = vector.shape_cast %490 : vector<1x1x1x16x3xf32> to vector<16x3xf32>
    %cst_268 = arith.constant dense<0.000000e+00> : vector<3x256xf32>
    %492 = tpu.matmul %489, %487, %cst_268 {dimension_numbers = #tpu.dot_dimension_numbers<[1], [0], [0], [1], [0, 0, 1, 1], [], []>} : vector<3x16xf32>, vector<16x256xf32>, vector<3x256xf32> -> vector<3x256xf32>
    %cst_269 = arith.constant 0.000000e+00 : f32
    %493 = vector.broadcast %cst_269 : f32 to vector<3x256xf32>
    %494 = arith.subf %493, %492 : vector<3x256xf32>
    %495 = math.exp %494 : vector<3x256xf32>
    %cst_270 = arith.constant 1.000000e+00 : f32
    %496 = vector.broadcast %cst_270 : f32 to vector<3x256xf32>
    %497 = arith.addf %496, %495 : vector<3x256xf32>
    %498 = tpu.reciprocal %497 {approx = true} : vector<3x256xf32> -> vector<3x256xf32>
    %cst_271 = arith.constant dense<0.000000e+00> : vector<16x256xf32>
    %499 = tpu.matmul %491, %498, %cst_271 {dimension_numbers = #tpu.dot_dimension_numbers<[1], [0], [0], [1], [0, 0, 1, 1], [], []>} : vector<16x3xf32>, vector<3x256xf32>, vector<16x256xf32> -> vector<16x256xf32>
    %500 = arith.mulf %487, %499 : vector<16x256xf32>
    %501 = arith.mulf %500, %477 : vector<16x256xf32>
    %c16_272 = arith.constant 16 : index
    %c0_273 = arith.constant 0 : index
    %502 = vector.load %arg20[%c16_272, %c0_273] : memref<48x256xf32, #tpu.memory_space<vmem>>, vector<16x256xf32>
    tpu.vector_store %arg20[%c16_272, %c0_273], %501 {strides = array<i32>} : memref<48x256xf32, #tpu.memory_space<vmem>>, vector<16x256xf32>,
    %c2 = arith.constant 2 : index
    %c0_274 = arith.constant 0 : index
    %c0_275 = arith.constant 0 : index
    %503 = vector.load %arg4[%c2, %c0_274, %c0_275] : memref<3x9x256xf32, #tpu.memory_space<vmem>>, vector<1x9x256xf32>
    %504 = vector.shape_cast %503 : vector<1x9x256xf32> to vector<9x256xf32>
    %505 = vector.extract_strided_slice %504 {offsets = [0, 0], sizes = [1, 256], strides = [1, 1]} : vector<9x256xf32> to vector<1x256xf32>
    %c136_i32 = arith.constant 136 : i32
    %506 = tpu.dynamic_rotate %1 by %c136_i32 dim 1 : vector<16x256xf32>, i32 -> vector<16x256xf32>
    %507 = vector.broadcast %505 : vector<1x256xf32> to vector<16x256xf32>
    %508 = arith.mulf %506, %507 : vector<16x256xf32>
    %c0_276 = arith.constant 0 : index
    %c0_277 = arith.constant 0 : index
    %509 = vector.load %arg18[%c0_276, %c0_277] : memref<144x256xf32, #tpu.memory_space<vmem>>, vector<16x256xf32>
    tpu.vector_store %arg18[%c0_276, %c0_277], %508 {strides = array<i32>} : memref<144x256xf32, #tpu.memory_space<vmem>>, vector<16x256xf32>,
    %c136_i32_278 = arith.constant 136 : i32
    %510 = tpu.dynamic_rotate %3 by %c136_i32_278 dim 1 : vector<16x256xf32>, i32 -> vector<16x256xf32>
    %511 = vector.broadcast %505 : vector<1x256xf32> to vector<16x256xf32>
    %512 = arith.mulf %510, %511 : vector<16x256xf32>
    %c0_279 = arith.constant 0 : index
    %c0_280 = arith.constant 0 : index
    %513 = vector.load %arg19[%c0_279, %c0_280] : memref<144x256xf32, #tpu.memory_space<vmem>>, vector<16x256xf32>
    tpu.vector_store %arg19[%c0_279, %c0_280], %512 {strides = array<i32>} : memref<144x256xf32, #tpu.memory_space<vmem>>, vector<16x256xf32>,
    %514 = vector.extract_strided_slice %504 {offsets = [1, 0], sizes = [1, 256], strides = [1, 1]} : vector<9x256xf32> to vector<1x256xf32>
    %c128_i32 = arith.constant 128 : i32
    %515 = tpu.dynamic_rotate %1 by %c128_i32 dim 1 : vector<16x256xf32>, i32 -> vector<16x256xf32>
    %516 = vector.broadcast %514 : vector<1x256xf32> to vector<16x256xf32>
    %517 = arith.mulf %515, %516 : vector<16x256xf32>
    %c16_281 = arith.constant 16 : index
    %c0_282 = arith.constant 0 : index
    %518 = vector.load %arg18[%c16_281, %c0_282] : memref<144x256xf32, #tpu.memory_space<vmem>>, vector<16x256xf32>
    tpu.vector_store %arg18[%c16_281, %c0_282], %517 {strides = array<i32>} : memref<144x256xf32, #tpu.memory_space<vmem>>, vector<16x256xf32>,
    %c128_i32_283 = arith.constant 128 : i32
    %519 = tpu.dynamic_rotate %3 by %c128_i32_283 dim 1 : vector<16x256xf32>, i32 -> vector<16x256xf32>
    %520 = vector.broadcast %514 : vector<1x256xf32> to vector<16x256xf32>
    %521 = arith.mulf %519, %520 : vector<16x256xf32>
    %c16_284 = arith.constant 16 : index
    %c0_285 = arith.constant 0 : index
    %522 = vector.load %arg19[%c16_284, %c0_285] : memref<144x256xf32, #tpu.memory_space<vmem>>, vector<16x256xf32>
    tpu.vector_store %arg19[%c16_284, %c0_285], %521 {strides = array<i32>} : memref<144x256xf32, #tpu.memory_space<vmem>>, vector<16x256xf32>,
    %523 = vector.extract_strided_slice %504 {offsets = [2, 0], sizes = [1, 256], strides = [1, 1]} : vector<9x256xf32> to vector<1x256xf32>
    %c120_i32 = arith.constant 120 : i32
    %524 = tpu.dynamic_rotate %1 by %c120_i32 dim 1 : vector<16x256xf32>, i32 -> vector<16x256xf32>
    %525 = vector.broadcast %523 : vector<1x256xf32> to vector<16x256xf32>
    %526 = arith.mulf %524, %525 : vector<16x256xf32>
    %c32_286 = arith.constant 32 : index
    %c0_287 = arith.constant 0 : index
    %527 = vector.load %arg18[%c32_286, %c0_287] : memref<144x256xf32, #tpu.memory_space<vmem>>, vector<16x256xf32>
    tpu.vector_store %arg18[%c32_286, %c0_287], %526 {strides = array<i32>} : memref<144x256xf32, #tpu.memory_space<vmem>>, vector<16x256xf32>,
    %c120_i32_288 = arith.constant 120 : i32
    %528 = tpu.dynamic_rotate %3 by %c120_i32_288 dim 1 : vector<16x256xf32>, i32 -> vector<16x256xf32>
    %529 = vector.broadcast %523 : vector<1x256xf32> to vector<16x256xf32>
    %530 = arith.mulf %528, %529 : vector<16x256xf32>
    %c32_289 = arith.constant 32 : index
    %c0_290 = arith.constant 0 : index
    %531 = vector.load %arg19[%c32_289, %c0_290] : memref<144x256xf32, #tpu.memory_space<vmem>>, vector<16x256xf32>
    tpu.vector_store %arg19[%c32_289, %c0_290], %530 {strides = array<i32>} : memref<144x256xf32, #tpu.memory_space<vmem>>, vector<16x256xf32>,
    %532 = vector.extract_strided_slice %504 {offsets = [3, 0], sizes = [1, 256], strides = [1, 1]} : vector<9x256xf32> to vector<1x256xf32>
    %c8_i32 = arith.constant 8 : i32
    %533 = tpu.dynamic_rotate %1 by %c8_i32 dim 1 : vector<16x256xf32>, i32 -> vector<16x256xf32>
    %534 = vector.broadcast %532 : vector<1x256xf32> to vector<16x256xf32>
    %535 = arith.mulf %533, %534 : vector<16x256xf32>
    %c48_291 = arith.constant 48 : index
    %c0_292 = arith.constant 0 : index
    %536 = vector.load %arg18[%c48_291, %c0_292] : memref<144x256xf32, #tpu.memory_space<vmem>>, vector<16x256xf32>
    tpu.vector_store %arg18[%c48_291, %c0_292], %535 {strides = array<i32>} : memref<144x256xf32, #tpu.memory_space<vmem>>, vector<16x256xf32>,
    %c8_i32_293 = arith.constant 8 : i32
    %537 = tpu.dynamic_rotate %3 by %c8_i32_293 dim 1 : vector<16x256xf32>, i32 -> vector<16x256xf32>
    %538 = vector.broadcast %532 : vector<1x256xf32> to vector<16x256xf32>
    %539 = arith.mulf %537, %538 : vector<16x256xf32>
    %c48_294 = arith.constant 48 : index
    %c0_295 = arith.constant 0 : index
    %540 = vector.load %arg19[%c48_294, %c0_295] : memref<144x256xf32, #tpu.memory_space<vmem>>, vector<16x256xf32>
    tpu.vector_store %arg19[%c48_294, %c0_295], %539 {strides = array<i32>} : memref<144x256xf32, #tpu.memory_space<vmem>>, vector<16x256xf32>,
    %c64_296 = arith.constant 64 : index
    %c0_297 = arith.constant 0 : index
    %541 = vector.load %arg18[%c64_296, %c0_297] : memref<144x256xf32, #tpu.memory_space<vmem>>, vector<16x256xf32>
    tpu.vector_store %arg18[%c64_296, %c0_297], %1 {strides = array<i32>} : memref<144x256xf32, #tpu.memory_space<vmem>>, vector<16x256xf32>,
    %c64_298 = arith.constant 64 : index
    %c0_299 = arith.constant 0 : index
    %542 = vector.load %arg19[%c64_298, %c0_299] : memref<144x256xf32, #tpu.memory_space<vmem>>, vector<16x256xf32>
    tpu.vector_store %arg19[%c64_298, %c0_299], %3 {strides = array<i32>} : memref<144x256xf32, #tpu.memory_space<vmem>>, vector<16x256xf32>,
    %543 = vector.extract_strided_slice %504 {offsets = [5, 0], sizes = [1, 256], strides = [1, 1]} : vector<9x256xf32> to vector<1x256xf32>
    %c248_i32 = arith.constant 248 : i32
    %544 = tpu.dynamic_rotate %1 by %c248_i32 dim 1 : vector<16x256xf32>, i32 -> vector<16x256xf32>
    %545 = vector.broadcast %543 : vector<1x256xf32> to vector<16x256xf32>
    %546 = arith.mulf %544, %545 : vector<16x256xf32>
    %c80_300 = arith.constant 80 : index
    %c0_301 = arith.constant 0 : index
    %547 = vector.load %arg18[%c80_300, %c0_301] : memref<144x256xf32, #tpu.memory_space<vmem>>, vector<16x256xf32>
    tpu.vector_store %arg18[%c80_300, %c0_301], %546 {strides = array<i32>} : memref<144x256xf32, #tpu.memory_space<vmem>>, vector<16x256xf32>,
    %c248_i32_302 = arith.constant 248 : i32
    %548 = tpu.dynamic_rotate %3 by %c248_i32_302 dim 1 : vector<16x256xf32>, i32 -> vector<16x256xf32>
    %549 = vector.broadcast %543 : vector<1x256xf32> to vector<16x256xf32>
    %550 = arith.mulf %548, %549 : vector<16x256xf32>
    %c80_303 = arith.constant 80 : index
    %c0_304 = arith.constant 0 : index
    %551 = vector.load %arg19[%c80_303, %c0_304] : memref<144x256xf32, #tpu.memory_space<vmem>>, vector<16x256xf32>
    tpu.vector_store %arg19[%c80_303, %c0_304], %550 {strides = array<i32>} : memref<144x256xf32, #tpu.memory_space<vmem>>, vector<16x256xf32>,
    %552 = vector.extract_strided_slice %504 {offsets = [6, 0], sizes = [1, 256], strides = [1, 1]} : vector<9x256xf32> to vector<1x256xf32>
    %c136_i32_305 = arith.constant 136 : i32
    %553 = tpu.dynamic_rotate %1 by %c136_i32_305 dim 1 : vector<16x256xf32>, i32 -> vector<16x256xf32>
    %554 = vector.broadcast %552 : vector<1x256xf32> to vector<16x256xf32>
    %555 = arith.mulf %553, %554 : vector<16x256xf32>
    %c96_306 = arith.constant 96 : index
    %c0_307 = arith.constant 0 : index
    %556 = vector.load %arg18[%c96_306, %c0_307] : memref<144x256xf32, #tpu.memory_space<vmem>>, vector<16x256xf32>
    tpu.vector_store %arg18[%c96_306, %c0_307], %555 {strides = array<i32>} : memref<144x256xf32, #tpu.memory_space<vmem>>, vector<16x256xf32>,
    %c136_i32_308 = arith.constant 136 : i32
    %557 = tpu.dynamic_rotate %3 by %c136_i32_308 dim 1 : vector<16x256xf32>, i32 -> vector<16x256xf32>
    %558 = vector.broadcast %552 : vector<1x256xf32> to vector<16x256xf32>
    %559 = arith.mulf %557, %558 : vector<16x256xf32>
    %c96_309 = arith.constant 96 : index
    %c0_310 = arith.constant 0 : index
    %560 = vector.load %arg19[%c96_309, %c0_310] : memref<144x256xf32, #tpu.memory_space<vmem>>, vector<16x256xf32>
    tpu.vector_store %arg19[%c96_309, %c0_310], %559 {strides = array<i32>} : memref<144x256xf32, #tpu.memory_space<vmem>>, vector<16x256xf32>,
    %561 = vector.extract_strided_slice %504 {offsets = [7, 0], sizes = [1, 256], strides = [1, 1]} : vector<9x256xf32> to vector<1x256xf32>
    %c128_i32_311 = arith.constant 128 : i32
    %562 = tpu.dynamic_rotate %1 by %c128_i32_311 dim 1 : vector<16x256xf32>, i32 -> vector<16x256xf32>
    %563 = vector.broadcast %561 : vector<1x256xf32> to vector<16x256xf32>
    %564 = arith.mulf %562, %563 : vector<16x256xf32>
    %c112_312 = arith.constant 112 : index
    %c0_313 = arith.constant 0 : index
    %565 = vector.load %arg18[%c112_312, %c0_313] : memref<144x256xf32, #tpu.memory_space<vmem>>, vector<16x256xf32>
    tpu.vector_store %arg18[%c112_312, %c0_313], %564 {strides = array<i32>} : memref<144x256xf32, #tpu.memory_space<vmem>>, vector<16x256xf32>,
    %c128_i32_314 = arith.constant 128 : i32
    %566 = tpu.dynamic_rotate %3 by %c128_i32_314 dim 1 : vector<16x256xf32>, i32 -> vector<16x256xf32>
    %567 = vector.broadcast %561 : vector<1x256xf32> to vector<16x256xf32>
    %568 = arith.mulf %566, %567 : vector<16x256xf32>
    %c112_315 = arith.constant 112 : index
    %c0_316 = arith.constant 0 : index
    %569 = vector.load %arg19[%c112_315, %c0_316] : memref<144x256xf32, #tpu.memory_space<vmem>>, vector<16x256xf32>
    tpu.vector_store %arg19[%c112_315, %c0_316], %568 {strides = array<i32>} : memref<144x256xf32, #tpu.memory_space<vmem>>, vector<16x256xf32>,
    %570 = vector.extract_strided_slice %504 {offsets = [8, 0], sizes = [1, 256], strides = [1, 1]} : vector<9x256xf32> to vector<1x256xf32>
    %c120_i32_317 = arith.constant 120 : i32
    %571 = tpu.dynamic_rotate %1 by %c120_i32_317 dim 1 : vector<16x256xf32>, i32 -> vector<16x256xf32>
    %572 = vector.broadcast %570 : vector<1x256xf32> to vector<16x256xf32>
    %573 = arith.mulf %571, %572 : vector<16x256xf32>
    %c128_318 = arith.constant 128 : index
    %c0_319 = arith.constant 0 : index
    %574 = vector.load %arg18[%c128_318, %c0_319] : memref<144x256xf32, #tpu.memory_space<vmem>>, vector<16x256xf32>
    tpu.vector_store %arg18[%c128_318, %c0_319], %573 {strides = array<i32>} : memref<144x256xf32, #tpu.memory_space<vmem>>, vector<16x256xf32>,
    %c120_i32_320 = arith.constant 120 : i32
    %575 = tpu.dynamic_rotate %3 by %c120_i32_320 dim 1 : vector<16x256xf32>, i32 -> vector<16x256xf32>
    %576 = vector.broadcast %570 : vector<1x256xf32> to vector<16x256xf32>
    %577 = arith.mulf %575, %576 : vector<16x256xf32>
    %c128_321 = arith.constant 128 : index
    %c0_322 = arith.constant 0 : index
    %578 = vector.load %arg19[%c128_321, %c0_322] : memref<144x256xf32, #tpu.memory_space<vmem>>, vector<16x256xf32>
    tpu.vector_store %arg19[%c128_321, %c0_322], %577 {strides = array<i32>} : memref<144x256xf32, #tpu.memory_space<vmem>>, vector<16x256xf32>,
    %c0_323 = arith.constant 0 : index
    %c0_324 = arith.constant 0 : index
    %579 = vector.load %arg18[%c0_323, %c0_324] : memref<144x256xf32, #tpu.memory_space<vmem>>, vector<144x256xf32>
    %c0_325 = arith.constant 0 : index
    %c2_326 = arith.constant 2 : index
    %c0_327 = arith.constant 0 : index
    %c0_328 = arith.constant 0 : index
    %580 = vector.load %arg7[%c0_325, %c2_326, %c0_327, %c0_328] : memref<1x3x9x144xf32, #tpu.memory_space<vmem>>, vector<1x1x9x144xf32>
    %581 = vector.shape_cast %580 : vector<1x1x9x144xf32> to vector<9x144xf32>
    %cst_329 = arith.constant dense<0.000000e+00> : vector<9x256xf32>
    %582 = tpu.matmul %581, %579, %cst_329 {dimension_numbers = #tpu.dot_dimension_numbers<[1], [0], [0], [1], [0, 0, 1, 1], [], []>} : vector<9x144xf32>, vector<144x256xf32>, vector<9x256xf32> -> vector<9x256xf32>
    %c0_330 = arith.constant 0 : index
    %c2_331 = arith.constant 2 : index
    %c0_332 = arith.constant 0 : index
    %c0_333 = arith.constant 0 : index
    %583 = vector.load %arg10[%c0_330, %c2_331, %c0_332, %c0_333] : memref<1x3x9x144xf32, #tpu.memory_space<vmem>>, vector<1x1x9x144xf32>
    %584 = vector.shape_cast %583 : vector<1x1x9x144xf32> to vector<9x144xf32>
    %cst_334 = arith.constant dense<0.000000e+00> : vector<9x256xf32>
    %585 = tpu.matmul %584, %579, %cst_334 {dimension_numbers = #tpu.dot_dimension_numbers<[1], [0], [0], [1], [0, 0, 1, 1], [], []>} : vector<9x144xf32>, vector<144x256xf32>, vector<9x256xf32> -> vector<9x256xf32>
    %c0_335 = arith.constant 0 : index
    %c2_336 = arith.constant 2 : index
    %c0_337 = arith.constant 0 : index
    %c0_338 = arith.constant 0 : index
    %586 = vector.load %arg11[%c0_335, %c2_336, %c0_337, %c0_338] : memref<1x3x9x1xf32, #tpu.memory_space<vmem>>, vector<1x1x9x1xf32>
    %587 = vector.shape_cast %586 : vector<1x1x9x1xf32> to vector<9x1xf32>
    %588 = vector.broadcast %587 : vector<9x1xf32> to vector<9x256xf32>
    %589 = arith.addf %585, %588 : vector<9x256xf32>
    %c0_339 = arith.constant 0 : index
    %c0_340 = arith.constant 0 : index
    %590 = vector.load %arg19[%c0_339, %c0_340] : memref<144x256xf32, #tpu.memory_space<vmem>>, vector<144x256xf32>
    %c0_341 = arith.constant 0 : index
    %c2_342 = arith.constant 2 : index
    %c0_343 = arith.constant 0 : index
    %c0_344 = arith.constant 0 : index
    %591 = vector.load %arg8[%c0_341, %c2_342, %c0_343, %c0_344] : memref<1x3x9x144xf32, #tpu.memory_space<vmem>>, vector<1x1x9x144xf32>
    %592 = vector.shape_cast %591 : vector<1x1x9x144xf32> to vector<9x144xf32>
    %cst_345 = arith.constant dense<0.000000e+00> : vector<9x256xf32>
    %593 = tpu.matmul %592, %590, %cst_345 {dimension_numbers = #tpu.dot_dimension_numbers<[1], [0], [0], [1], [0, 0, 1, 1], [], []>} : vector<9x144xf32>, vector<144x256xf32>, vector<9x256xf32> -> vector<9x256xf32>
    %594 = arith.addf %582, %593 : vector<9x256xf32>
    %c0_346 = arith.constant 0 : index
    %c2_347 = arith.constant 2 : index
    %c0_348 = arith.constant 0 : index
    %c0_349 = arith.constant 0 : index
    %595 = vector.load %arg9[%c0_346, %c2_347, %c0_348, %c0_349] : memref<1x3x9x1xf32, #tpu.memory_space<vmem>>, vector<1x1x9x1xf32>
    %596 = vector.shape_cast %595 : vector<1x1x9x1xf32> to vector<9x1xf32>
    %597 = vector.broadcast %596 : vector<9x1xf32> to vector<9x256xf32>
    %598 = arith.addf %594, %597 : vector<9x256xf32>
    %c0_350 = arith.constant 0 : index
    %c2_351 = arith.constant 2 : index
    %c0_352 = arith.constant 0 : index
    %c0_353 = arith.constant 0 : index
    %599 = vector.load %arg12[%c0_350, %c2_351, %c0_352, %c0_353] : memref<1x3x9x144xf32, #tpu.memory_space<vmem>>, vector<1x1x9x144xf32>
    %600 = vector.shape_cast %599 : vector<1x1x9x144xf32> to vector<9x144xf32>
    %cst_354 = arith.constant dense<0.000000e+00> : vector<9x256xf32>
    %601 = tpu.matmul %600, %590, %cst_354 {dimension_numbers = #tpu.dot_dimension_numbers<[1], [0], [0], [1], [0, 0, 1, 1], [], []>} : vector<9x144xf32>, vector<144x256xf32>, vector<9x256xf32> -> vector<9x256xf32>
    %c0_355 = arith.constant 0 : index
    %c2_356 = arith.constant 2 : index
    %c0_357 = arith.constant 0 : index
    %c0_358 = arith.constant 0 : index
    %602 = vector.load %arg13[%c0_355, %c2_356, %c0_357, %c0_358] : memref<1x3x9x1xf32, #tpu.memory_space<vmem>>, vector<1x1x9x1xf32>
    %603 = vector.shape_cast %602 : vector<1x1x9x1xf32> to vector<9x1xf32>
    %604 = vector.broadcast %603 : vector<9x1xf32> to vector<9x256xf32>
    %605 = arith.addf %601, %604 : vector<9x256xf32>
    %cst_359 = arith.constant 0.000000e+00 : f32
    %606 = vector.broadcast %cst_359 : f32 to vector<16x256xf32>
    %cst_360 = arith.constant 0.000000e+00 : f32
    %607 = vector.broadcast %cst_360 : f32 to vector<16x256xf32>
    %c0_361 = arith.constant 0 : index
    %c0_362 = arith.constant 0 : index
    %608 = vector.load %arg18[%c0_361, %c0_362] : memref<144x256xf32, #tpu.memory_space<vmem>>, vector<16x256xf32>
    %c0_363 = arith.constant 0 : index
    %c0_364 = arith.constant 0 : index
    %609 = vector.load %arg19[%c0_363, %c0_364] : memref<144x256xf32, #tpu.memory_space<vmem>>, vector<16x256xf32>
    %610 = vector.extract_strided_slice %598 {offsets = [0, 0], sizes = [1, 256], strides = [1, 1]} : vector<9x256xf32> to vector<1x256xf32>
    %611 = vector.broadcast %610 : vector<1x256xf32> to vector<16x256xf32>
    %612 = arith.mulf %611, %608 : vector<16x256xf32>
    %613 = arith.addf %606, %612 : vector<16x256xf32>
    %614 = vector.extract_strided_slice %589 {offsets = [0, 0], sizes = [1, 256], strides = [1, 1]} : vector<9x256xf32> to vector<1x256xf32>
    %615 = vector.broadcast %614 : vector<1x256xf32> to vector<16x256xf32>
    %616 = arith.mulf %615, %608 : vector<16x256xf32>
    %617 = arith.addf %607, %616 : vector<16x256xf32>
    %618 = vector.extract_strided_slice %605 {offsets = [0, 0], sizes = [1, 256], strides = [1, 1]} : vector<9x256xf32> to vector<1x256xf32>
    %619 = vector.broadcast %618 : vector<1x256xf32> to vector<16x256xf32>
    %620 = arith.mulf %619, %609 : vector<16x256xf32>
    %621 = arith.addf %617, %620 : vector<16x256xf32>
    %c16_365 = arith.constant 16 : index
    %c0_366 = arith.constant 0 : index
    %622 = vector.load %arg18[%c16_365, %c0_366] : memref<144x256xf32, #tpu.memory_space<vmem>>, vector<16x256xf32>
    %c16_367 = arith.constant 16 : index
    %c0_368 = arith.constant 0 : index
    %623 = vector.load %arg19[%c16_367, %c0_368] : memref<144x256xf32, #tpu.memory_space<vmem>>, vector<16x256xf32>
    %624 = vector.extract_strided_slice %598 {offsets = [1, 0], sizes = [1, 256], strides = [1, 1]} : vector<9x256xf32> to vector<1x256xf32>
    %625 = vector.broadcast %624 : vector<1x256xf32> to vector<16x256xf32>
    %626 = arith.mulf %625, %622 : vector<16x256xf32>
    %627 = arith.addf %613, %626 : vector<16x256xf32>
    %628 = vector.extract_strided_slice %589 {offsets = [1, 0], sizes = [1, 256], strides = [1, 1]} : vector<9x256xf32> to vector<1x256xf32>
    %629 = vector.broadcast %628 : vector<1x256xf32> to vector<16x256xf32>
    %630 = arith.mulf %629, %622 : vector<16x256xf32>
    %631 = arith.addf %621, %630 : vector<16x256xf32>
    %632 = vector.extract_strided_slice %605 {offsets = [1, 0], sizes = [1, 256], strides = [1, 1]} : vector<9x256xf32> to vector<1x256xf32>
    %633 = vector.broadcast %632 : vector<1x256xf32> to vector<16x256xf32>
    %634 = arith.mulf %633, %623 : vector<16x256xf32>
    %635 = arith.addf %631, %634 : vector<16x256xf32>
    %c32_369 = arith.constant 32 : index
    %c0_370 = arith.constant 0 : index
    %636 = vector.load %arg18[%c32_369, %c0_370] : memref<144x256xf32, #tpu.memory_space<vmem>>, vector<16x256xf32>
    %c32_371 = arith.constant 32 : index
    %c0_372 = arith.constant 0 : index
    %637 = vector.load %arg19[%c32_371, %c0_372] : memref<144x256xf32, #tpu.memory_space<vmem>>, vector<16x256xf32>
    %638 = vector.extract_strided_slice %598 {offsets = [2, 0], sizes = [1, 256], strides = [1, 1]} : vector<9x256xf32> to vector<1x256xf32>
    %639 = vector.broadcast %638 : vector<1x256xf32> to vector<16x256xf32>
    %640 = arith.mulf %639, %636 : vector<16x256xf32>
    %641 = arith.addf %627, %640 : vector<16x256xf32>
    %642 = vector.extract_strided_slice %589 {offsets = [2, 0], sizes = [1, 256], strides = [1, 1]} : vector<9x256xf32> to vector<1x256xf32>
    %643 = vector.broadcast %642 : vector<1x256xf32> to vector<16x256xf32>
    %644 = arith.mulf %643, %636 : vector<16x256xf32>
    %645 = arith.addf %635, %644 : vector<16x256xf32>
    %646 = vector.extract_strided_slice %605 {offsets = [2, 0], sizes = [1, 256], strides = [1, 1]} : vector<9x256xf32> to vector<1x256xf32>
    %647 = vector.broadcast %646 : vector<1x256xf32> to vector<16x256xf32>
    %648 = arith.mulf %647, %637 : vector<16x256xf32>
    %649 = arith.addf %645, %648 : vector<16x256xf32>
    %c48_373 = arith.constant 48 : index
    %c0_374 = arith.constant 0 : index
    %650 = vector.load %arg18[%c48_373, %c0_374] : memref<144x256xf32, #tpu.memory_space<vmem>>, vector<16x256xf32>
    %c48_375 = arith.constant 48 : index
    %c0_376 = arith.constant 0 : index
    %651 = vector.load %arg19[%c48_375, %c0_376] : memref<144x256xf32, #tpu.memory_space<vmem>>, vector<16x256xf32>
    %652 = vector.extract_strided_slice %598 {offsets = [3, 0], sizes = [1, 256], strides = [1, 1]} : vector<9x256xf32> to vector<1x256xf32>
    %653 = vector.broadcast %652 : vector<1x256xf32> to vector<16x256xf32>
    %654 = arith.mulf %653, %650 : vector<16x256xf32>
    %655 = arith.addf %641, %654 : vector<16x256xf32>
    %656 = vector.extract_strided_slice %589 {offsets = [3, 0], sizes = [1, 256], strides = [1, 1]} : vector<9x256xf32> to vector<1x256xf32>
    %657 = vector.broadcast %656 : vector<1x256xf32> to vector<16x256xf32>
    %658 = arith.mulf %657, %650 : vector<16x256xf32>
    %659 = arith.addf %649, %658 : vector<16x256xf32>
    %660 = vector.extract_strided_slice %605 {offsets = [3, 0], sizes = [1, 256], strides = [1, 1]} : vector<9x256xf32> to vector<1x256xf32>
    %661 = vector.broadcast %660 : vector<1x256xf32> to vector<16x256xf32>
    %662 = arith.mulf %661, %651 : vector<16x256xf32>
    %663 = arith.addf %659, %662 : vector<16x256xf32>
    %c64_377 = arith.constant 64 : index
    %c0_378 = arith.constant 0 : index
    %664 = vector.load %arg18[%c64_377, %c0_378] : memref<144x256xf32, #tpu.memory_space<vmem>>, vector<16x256xf32>
    %c64_379 = arith.constant 64 : index
    %c0_380 = arith.constant 0 : index
    %665 = vector.load %arg19[%c64_379, %c0_380] : memref<144x256xf32, #tpu.memory_space<vmem>>, vector<16x256xf32>
    %666 = vector.extract_strided_slice %598 {offsets = [4, 0], sizes = [1, 256], strides = [1, 1]} : vector<9x256xf32> to vector<1x256xf32>
    %667 = vector.broadcast %666 : vector<1x256xf32> to vector<16x256xf32>
    %668 = arith.mulf %667, %664 : vector<16x256xf32>
    %669 = arith.addf %655, %668 : vector<16x256xf32>
    %670 = vector.extract_strided_slice %589 {offsets = [4, 0], sizes = [1, 256], strides = [1, 1]} : vector<9x256xf32> to vector<1x256xf32>
    %671 = vector.broadcast %670 : vector<1x256xf32> to vector<16x256xf32>
    %672 = arith.mulf %671, %664 : vector<16x256xf32>
    %673 = arith.addf %663, %672 : vector<16x256xf32>
    %674 = vector.extract_strided_slice %605 {offsets = [4, 0], sizes = [1, 256], strides = [1, 1]} : vector<9x256xf32> to vector<1x256xf32>
    %675 = vector.broadcast %674 : vector<1x256xf32> to vector<16x256xf32>
    %676 = arith.mulf %675, %665 : vector<16x256xf32>
    %677 = arith.addf %673, %676 : vector<16x256xf32>
    %c80_381 = arith.constant 80 : index
    %c0_382 = arith.constant 0 : index
    %678 = vector.load %arg18[%c80_381, %c0_382] : memref<144x256xf32, #tpu.memory_space<vmem>>, vector<16x256xf32>
    %c80_383 = arith.constant 80 : index
    %c0_384 = arith.constant 0 : index
    %679 = vector.load %arg19[%c80_383, %c0_384] : memref<144x256xf32, #tpu.memory_space<vmem>>, vector<16x256xf32>
    %680 = vector.extract_strided_slice %598 {offsets = [5, 0], sizes = [1, 256], strides = [1, 1]} : vector<9x256xf32> to vector<1x256xf32>
    %681 = vector.broadcast %680 : vector<1x256xf32> to vector<16x256xf32>
    %682 = arith.mulf %681, %678 : vector<16x256xf32>
    %683 = arith.addf %669, %682 : vector<16x256xf32>
    %684 = vector.extract_strided_slice %589 {offsets = [5, 0], sizes = [1, 256], strides = [1, 1]} : vector<9x256xf32> to vector<1x256xf32>
    %685 = vector.broadcast %684 : vector<1x256xf32> to vector<16x256xf32>
    %686 = arith.mulf %685, %678 : vector<16x256xf32>
    %687 = arith.addf %677, %686 : vector<16x256xf32>
    %688 = vector.extract_strided_slice %605 {offsets = [5, 0], sizes = [1, 256], strides = [1, 1]} : vector<9x256xf32> to vector<1x256xf32>
    %689 = vector.broadcast %688 : vector<1x256xf32> to vector<16x256xf32>
    %690 = arith.mulf %689, %679 : vector<16x256xf32>
    %691 = arith.addf %687, %690 : vector<16x256xf32>
    %c96_385 = arith.constant 96 : index
    %c0_386 = arith.constant 0 : index
    %692 = vector.load %arg18[%c96_385, %c0_386] : memref<144x256xf32, #tpu.memory_space<vmem>>, vector<16x256xf32>
    %c96_387 = arith.constant 96 : index
    %c0_388 = arith.constant 0 : index
    %693 = vector.load %arg19[%c96_387, %c0_388] : memref<144x256xf32, #tpu.memory_space<vmem>>, vector<16x256xf32>
    %694 = vector.extract_strided_slice %598 {offsets = [6, 0], sizes = [1, 256], strides = [1, 1]} : vector<9x256xf32> to vector<1x256xf32>
    %695 = vector.broadcast %694 : vector<1x256xf32> to vector<16x256xf32>
    %696 = arith.mulf %695, %692 : vector<16x256xf32>
    %697 = arith.addf %683, %696 : vector<16x256xf32>
    %698 = vector.extract_strided_slice %589 {offsets = [6, 0], sizes = [1, 256], strides = [1, 1]} : vector<9x256xf32> to vector<1x256xf32>
    %699 = vector.broadcast %698 : vector<1x256xf32> to vector<16x256xf32>
    %700 = arith.mulf %699, %692 : vector<16x256xf32>
    %701 = arith.addf %691, %700 : vector<16x256xf32>
    %702 = vector.extract_strided_slice %605 {offsets = [6, 0], sizes = [1, 256], strides = [1, 1]} : vector<9x256xf32> to vector<1x256xf32>
    %703 = vector.broadcast %702 : vector<1x256xf32> to vector<16x256xf32>
    %704 = arith.mulf %703, %693 : vector<16x256xf32>
    %705 = arith.addf %701, %704 : vector<16x256xf32>
    %c112_389 = arith.constant 112 : index
    %c0_390 = arith.constant 0 : index
    %706 = vector.load %arg18[%c112_389, %c0_390] : memref<144x256xf32, #tpu.memory_space<vmem>>, vector<16x256xf32>
    %c112_391 = arith.constant 112 : index
    %c0_392 = arith.constant 0 : index
    %707 = vector.load %arg19[%c112_391, %c0_392] : memref<144x256xf32, #tpu.memory_space<vmem>>, vector<16x256xf32>
    %708 = vector.extract_strided_slice %598 {offsets = [7, 0], sizes = [1, 256], strides = [1, 1]} : vector<9x256xf32> to vector<1x256xf32>
    %709 = vector.broadcast %708 : vector<1x256xf32> to vector<16x256xf32>
    %710 = arith.mulf %709, %706 : vector<16x256xf32>
    %711 = arith.addf %697, %710 : vector<16x256xf32>
    %712 = vector.extract_strided_slice %589 {offsets = [7, 0], sizes = [1, 256], strides = [1, 1]} : vector<9x256xf32> to vector<1x256xf32>
    %713 = vector.broadcast %712 : vector<1x256xf32> to vector<16x256xf32>
    %714 = arith.mulf %713, %706 : vector<16x256xf32>
    %715 = arith.addf %705, %714 : vector<16x256xf32>
    %716 = vector.extract_strided_slice %605 {offsets = [7, 0], sizes = [1, 256], strides = [1, 1]} : vector<9x256xf32> to vector<1x256xf32>
    %717 = vector.broadcast %716 : vector<1x256xf32> to vector<16x256xf32>
    %718 = arith.mulf %717, %707 : vector<16x256xf32>
    %719 = arith.addf %715, %718 : vector<16x256xf32>
    %c128_393 = arith.constant 128 : index
    %c0_394 = arith.constant 0 : index
    %720 = vector.load %arg18[%c128_393, %c0_394] : memref<144x256xf32, #tpu.memory_space<vmem>>, vector<16x256xf32>
    %c128_395 = arith.constant 128 : index
    %c0_396 = arith.constant 0 : index
    %721 = vector.load %arg19[%c128_395, %c0_396] : memref<144x256xf32, #tpu.memory_space<vmem>>, vector<16x256xf32>
    %722 = vector.extract_strided_slice %598 {offsets = [8, 0], sizes = [1, 256], strides = [1, 1]} : vector<9x256xf32> to vector<1x256xf32>
    %723 = vector.broadcast %722 : vector<1x256xf32> to vector<16x256xf32>
    %724 = arith.mulf %723, %720 : vector<16x256xf32>
    %725 = arith.addf %711, %724 : vector<16x256xf32>
    %726 = vector.extract_strided_slice %589 {offsets = [8, 0], sizes = [1, 256], strides = [1, 1]} : vector<9x256xf32> to vector<1x256xf32>
    %727 = vector.broadcast %726 : vector<1x256xf32> to vector<16x256xf32>
    %728 = arith.mulf %727, %720 : vector<16x256xf32>
    %729 = arith.addf %719, %728 : vector<16x256xf32>
    %730 = vector.extract_strided_slice %605 {offsets = [8, 0], sizes = [1, 256], strides = [1, 1]} : vector<9x256xf32> to vector<1x256xf32>
    %731 = vector.broadcast %730 : vector<1x256xf32> to vector<16x256xf32>
    %732 = arith.mulf %731, %721 : vector<16x256xf32>
    %733 = arith.addf %729, %732 : vector<16x256xf32>
    %734 = arith.mulf %3, %725 : vector<16x256xf32>
    %735 = arith.addf %734, %733 : vector<16x256xf32>
    %c0_397 = arith.constant 0 : index
    %c0_398 = arith.constant 0 : index
    %c2_399 = arith.constant 2 : index
    %c0_400 = arith.constant 0 : index
    %c0_401 = arith.constant 0 : index
    %736 = vector.load %arg5[%c0_397, %c0_398, %c2_399, %c0_400, %c0_401] : memref<1x1x3x3x16xf32, #tpu.memory_space<vmem>>, vector<1x1x1x3x16xf32>
    %737 = vector.shape_cast %736 : vector<1x1x1x3x16xf32> to vector<3x16xf32>
    %c0_402 = arith.constant 0 : index
    %c0_403 = arith.constant 0 : index
    %c2_404 = arith.constant 2 : index
    %c0_405 = arith.constant 0 : index
    %c0_406 = arith.constant 0 : index
    %738 = vector.load %arg6[%c0_402, %c0_403, %c2_404, %c0_405, %c0_406] : memref<1x1x3x16x3xf32, #tpu.memory_space<vmem>>, vector<1x1x1x16x3xf32>
    %739 = vector.shape_cast %738 : vector<1x1x1x16x3xf32> to vector<16x3xf32>
    %cst_407 = arith.constant dense<0.000000e+00> : vector<3x256xf32>
    %740 = tpu.matmul %737, %735, %cst_407 {dimension_numbers = #tpu.dot_dimension_numbers<[1], [0], [0], [1], [0, 0, 1, 1], [], []>} : vector<3x16xf32>, vector<16x256xf32>, vector<3x256xf32> -> vector<3x256xf32>
    %cst_408 = arith.constant 0.000000e+00 : f32
    %741 = vector.broadcast %cst_408 : f32 to vector<3x256xf32>
    %742 = arith.subf %741, %740 : vector<3x256xf32>
    %743 = math.exp %742 : vector<3x256xf32>
    %cst_409 = arith.constant 1.000000e+00 : f32
    %744 = vector.broadcast %cst_409 : f32 to vector<3x256xf32>
    %745 = arith.addf %744, %743 : vector<3x256xf32>
    %746 = tpu.reciprocal %745 {approx = true} : vector<3x256xf32> -> vector<3x256xf32>
    %cst_410 = arith.constant dense<0.000000e+00> : vector<16x256xf32>
    %747 = tpu.matmul %739, %746, %cst_410 {dimension_numbers = #tpu.dot_dimension_numbers<[1], [0], [0], [1], [0, 0, 1, 1], [], []>} : vector<16x3xf32>, vector<3x256xf32>, vector<16x256xf32> -> vector<16x256xf32>
    %748 = arith.mulf %735, %747 : vector<16x256xf32>
    %749 = arith.mulf %748, %725 : vector<16x256xf32>
    %c32_411 = arith.constant 32 : index
    %c0_412 = arith.constant 0 : index
    %750 = vector.load %arg20[%c32_411, %c0_412] : memref<48x256xf32, #tpu.memory_space<vmem>>, vector<16x256xf32>
    tpu.vector_store %arg20[%c32_411, %c0_412], %749 {strides = array<i32>} : memref<48x256xf32, #tpu.memory_space<vmem>>, vector<16x256xf32>,
    %c0_413 = arith.constant 0 : index
    %c0_414 = arith.constant 0 : index
    %c0_415 = arith.constant 0 : index
    %751 = vector.load %arg14[%c0_413, %c0_414, %c0_415] : memref<1x16x48xf32, #tpu.memory_space<vmem>>, vector<1x16x48xf32>
    %752 = vector.shape_cast %751 : vector<1x16x48xf32> to vector<16x48xf32>
    %c0_416 = arith.constant 0 : index
    %c0_417 = arith.constant 0 : index
    %753 = vector.load %arg20[%c0_416, %c0_417] : memref<48x256xf32, #tpu.memory_space<vmem>>, vector<48x256xf32>
    %cst_418 = arith.constant dense<0.000000e+00> : vector<16x256xf32>
    %754 = tpu.matmul %752, %753, %cst_418 {dimension_numbers = #tpu.dot_dimension_numbers<[1], [0], [0], [1], [0, 0, 1, 1], [], []>} : vector<16x48xf32>, vector<48x256xf32>, vector<16x256xf32> -> vector<16x256xf32>
    %c0_419 = arith.constant 0 : index
    %c0_420 = arith.constant 0 : index
    %c0_421 = arith.constant 0 : index
    %755 = vector.load %arg15[%c0_419, %c0_420, %c0_421] : memref<1x16x1xf32, #tpu.memory_space<vmem>>, vector<1x16x1xf32>
    %756 = vector.shape_cast %755 : vector<1x16x1xf32> to vector<16x1xf32>
    %757 = vector.broadcast %756 : vector<16x1xf32> to vector<16x256xf32>
    %758 = arith.addf %754, %757 : vector<16x256xf32>
    %cst_422 = arith.constant 0.000000e+00 : f32
    %759 = vector.broadcast %cst_422 : f32 to vector<16x256xf32>
    %760 = arith.maximumf %758, %759 : vector<16x256xf32>
    %c0_423 = arith.constant 0 : index
    %c0_424 = arith.constant 0 : index
    %c0_425 = arith.constant 0 : index
    %c0_426 = arith.constant 0 : index
    %761 = vector.load %arg16[%c0_423, %c0_424, %c0_425, %c0_426] : memref<1x1x16x256xf32, #tpu.memory_space<vmem>>, vector<1x1x16x256xf32>
    %762 = vector.shape_cast %761 : vector<1x1x16x256xf32> to vector<16x256xf32>
    %763 = vector.shape_cast %760 : vector<16x256xf32> to vector<1x1x16x256xf32>
    tpu.vector_store %arg16[%c0_423, %c0_424, %c0_425, %c0_426], %763 {strides = array<i32>} : memref<1x1x16x256xf32, #tpu.memory_space<vmem>>, vector<1x1x16x256xf32>,
    return
  }
  func.func @transform_0(%arg0: i32, %arg1: i32) -> (i32, i32, i32, i32) {
    %c0_i32 = arith.constant 0 : i32
    %c0_i32_0 = arith.constant 0 : i32
    %c0_i32_1 = arith.constant 0 : i32
    return %arg0, %arg1, %c0_i32, %c0_i32_0 : i32, i32, i32, i32
  }
  func.func @transform_1(%arg0: i32, %arg1: i32) -> (i32, i32, i32) {
    %c0_i32 = arith.constant 0 : i32
    %c0_i32_0 = arith.constant 0 : i32
    %c0_i32_1 = arith.constant 0 : i32
    return %arg1, %c0_i32, %c0_i32_0 : i32, i32, i32
  }
  func.func @transform_2(%arg0: i32, %arg1: i32) -> (i32, i32, i32) {
    %c0_i32 = arith.constant 0 : i32
    %c0_i32_0 = arith.constant 0 : i32
    %c0_i32_1 = arith.constant 0 : i32
    %c0_i32_2 = arith.constant 0 : i32
    return %c0_i32, %c0_i32_0, %c0_i32_1 : i32, i32, i32
  }
  func.func @transform_3(%arg0: i32, %arg1: i32) -> (i32, i32, i32, i32, i32) {
    %c0_i32 = arith.constant 0 : i32
    %c0_i32_0 = arith.constant 0 : i32
    %c0_i32_1 = arith.constant 0 : i32
    %c0_i32_2 = arith.constant 0 : i32
    return %arg0, %arg1, %c0_i32, %c0_i32_0, %c0_i32_1 : i32, i32, i32, i32, i32
  }
  func.func @transform_4(%arg0: i32, %arg1: i32) -> (i32, i32, i32, i32, i32) {
    %c0_i32 = arith.constant 0 : i32
    %c0_i32_0 = arith.constant 0 : i32
    %c0_i32_1 = arith.constant 0 : i32
    %c0_i32_2 = arith.constant 0 : i32
    return %arg0, %arg1, %c0_i32, %c0_i32_0, %c0_i32_1 : i32, i32, i32, i32, i32
  }
  func.func @transform_5(%arg0: i32, %arg1: i32) -> (i32, i32, i32, i32) {
    %c0_i32 = arith.constant 0 : i32
    %c0_i32_0 = arith.constant 0 : i32
    %c0_i32_1 = arith.constant 0 : i32
    %c0_i32_2 = arith.constant 0 : i32
    return %arg0, %c0_i32, %c0_i32_0, %c0_i32_1 : i32, i32, i32, i32
  }
  func.func @transform_6(%arg0: i32, %arg1: i32) -> (i32, i32, i32, i32) {
    %c0_i32 = arith.constant 0 : i32
    %c0_i32_0 = arith.constant 0 : i32
    %c0_i32_1 = arith.constant 0 : i32
    %c0_i32_2 = arith.constant 0 : i32
    return %arg0, %c0_i32, %c0_i32_0, %c0_i32_1 : i32, i32, i32, i32
  }
  func.func @transform_7(%arg0: i32, %arg1: i32) -> (i32, i32, i32, i32) {
    %c0_i32 = arith.constant 0 : i32
    %c0_i32_0 = arith.constant 0 : i32
    %c0_i32_1 = arith.constant 0 : i32
    %c0_i32_2 = arith.constant 0 : i32
    return %arg0, %c0_i32, %c0_i32_0, %c0_i32_1 : i32, i32, i32, i32
  }
  func.func @transform_8(%arg0: i32, %arg1: i32) -> (i32, i32, i32, i32) {
    %c0_i32 = arith.constant 0 : i32
    %c0_i32_0 = arith.constant 0 : i32
    %c0_i32_1 = arith.constant 0 : i32
    %c0_i32_2 = arith.constant 0 : i32
    return %arg0, %c0_i32, %c0_i32_0, %c0_i32_1 : i32, i32, i32, i32
  }
  func.func @transform_9(%arg0: i32, %arg1: i32) -> (i32, i32, i32, i32) {
    %c0_i32 = arith.constant 0 : i32
    %c0_i32_0 = arith.constant 0 : i32
    %c0_i32_1 = arith.constant 0 : i32
    %c0_i32_2 = arith.constant 0 : i32
    return %arg0, %c0_i32, %c0_i32_0, %c0_i32_1 : i32, i32, i32, i32
  }
  func.func @transform_10(%arg0: i32, %arg1: i32) -> (i32, i32, i32, i32) {
    %c0_i32 = arith.constant 0 : i32
    %c0_i32_0 = arith.constant 0 : i32
    %c0_i32_1 = arith.constant 0 : i32
    %c0_i32_2 = arith.constant 0 : i32
    return %arg0, %c0_i32, %c0_i32_0, %c0_i32_1 : i32, i32, i32, i32
  }
  func.func @transform_11(%arg0: i32, %arg1: i32) -> (i32, i32, i32, i32) {
    %c0_i32 = arith.constant 0 : i32
    %c0_i32_0 = arith.constant 0 : i32
    %c0_i32_1 = arith.constant 0 : i32
    %c0_i32_2 = arith.constant 0 : i32
    return %arg0, %c0_i32, %c0_i32_0, %c0_i32_1 : i32, i32, i32, i32
  }
  func.func @transform_12(%arg0: i32, %arg1: i32) -> (i32, i32, i32) {
    %c0_i32 = arith.constant 0 : i32
    %c0_i32_0 = arith.constant 0 : i32
    %c0_i32_1 = arith.constant 0 : i32
    return %arg0, %c0_i32, %c0_i32_0 : i32, i32, i32
  }
  func.func @transform_13(%arg0: i32, %arg1: i32) -> (i32, i32, i32) {
    %c0_i32 = arith.constant 0 : i32
    %c0_i32_0 = arith.constant 0 : i32
    %c0_i32_1 = arith.constant 0 : i32
    return %arg0, %c0_i32, %c0_i32_0 : i32, i32, i32
  }
  func.func @transform_14(%arg0: i32, %arg1: i32) -> (i32, i32, i32, i32) {
    %c0_i32 = arith.constant 0 : i32
    %c0_i32_0 = arith.constant 0 : i32
    %c0_i32_1 = arith.constant 0 : i32
    return %arg0, %arg1, %c0_i32, %c0_i32_0 : i32, i32, i32, i32
  }
  func.func @transform_15(%arg0: i32, %arg1: i32) -> (i32, i32, i32, i32) {
    %c0_i32 = arith.constant 0 : i32
    %c0_i32_0 = arith.constant 0 : i32
    %c0_i32_1 = arith.constant 0 : i32
    return %arg0, %arg1, %c0_i32, %c0_i32_0 : i32, i32, i32, i32
  }
}

module attributes {stable_mosaic.version = 11 : i64} {
  func.func @_matmul_kernel(%arg0: i32, %arg1: memref<64x576xbf16, #tpu.memory_space<vmem>>, %arg2: memref<576x128xbf16, #tpu.memory_space<vmem>>, %arg3: memref<64x1xf32, #tpu.memory_space<vmem>>, %arg4: memref<64x128xf32, #tpu.memory_space<vmem>>) attributes {dimension_semantics = [#tpu.dimension_semantics<parallel>], iteration_bounds = array<i64: 1>, scalar_prefetch = 0 : i64, scratch_operands = 0 : i64, tpu.core_type = #tpu.core_type<tc>, window_params = [{pipeline_mode = #tpu.pipeline_mode<synchronous>, transform_indices = @transform_0, window_bounds = array<i64: 64, 576>}, {transform_indices = @transform_1, window_bounds = array<i64: 576, 128>}, {pipeline_mode = #tpu.pipeline_mode<synchronous>, transform_indices = @transform_2, window_bounds = array<i64: 64, 1>}, {transform_indices = @transform_3, window_bounds = array<i64: 64, 128>}]} {
    %c0 = arith.constant 0 : index
    %c0_0 = arith.constant 0 : index
    %0 = vector.load %arg1[%c0, %c0_0] : memref<64x576xbf16, #tpu.memory_space<vmem>>, vector<64x576xbf16>
    %c0_1 = arith.constant 0 : index
    %c0_2 = arith.constant 0 : index
    %1 = vector.load %arg2[%c0_1, %c0_2] : memref<576x128xbf16, #tpu.memory_space<vmem>>, vector<576x128xbf16>
    %cst = arith.constant dense<0.000000e+00> : vector<64x128xf32>
    %2 = tpu.matmul %0, %1, %cst {dimension_numbers = #tpu.dot_dimension_numbers<[1], [0], [0], [1], [0, 0, 1, 1], [], []>} : vector<64x576xbf16>, vector<576x128xbf16>, vector<64x128xf32> -> vector<64x128xf32>
    %c0_3 = arith.constant 0 : index
    %c0_4 = arith.constant 0 : index
    %3 = vector.load %arg3[%c0_3, %c0_4] : memref<64x1xf32, #tpu.memory_space<vmem>>, vector<64x1xf32>
    %4 = vector.broadcast %3 : vector<64x1xf32> to vector<64x128xf32>
    %5 = arith.addf %2, %4 : vector<64x128xf32>
    %cst_5 = arith.constant 0.000000e+00 : f32
    %6 = vector.broadcast %cst_5 : f32 to vector<64x128xf32>
    %7 = arith.maximumf %5, %6 : vector<64x128xf32>
    %c0_6 = arith.constant 0 : index
    %c0_7 = arith.constant 0 : index
    %8 = vector.load %arg4[%c0_6, %c0_7] : memref<64x128xf32, #tpu.memory_space<vmem>>, vector<64x128xf32>
    tpu.vector_store %arg4[%c0_6, %c0_7], %7 {strides = array<i32>} : memref<64x128xf32, #tpu.memory_space<vmem>>, vector<64x128xf32>,
    return
  }
  func.func @transform_0(%arg0: i32) -> (i32, i32) {
    %c0_i32 = arith.constant 0 : i32
    %c0_i32_0 = arith.constant 0 : i32
    %c0_i32_1 = arith.constant 0 : i32
    return %c0_i32, %c0_i32_0 : i32, i32
  }
  func.func @transform_1(%arg0: i32) -> (i32, i32) {
    %c0_i32 = arith.constant 0 : i32
    %c0_i32_0 = arith.constant 0 : i32
    return %c0_i32, %arg0 : i32, i32
  }
  func.func @transform_2(%arg0: i32) -> (i32, i32) {
    %c0_i32 = arith.constant 0 : i32
    %c0_i32_0 = arith.constant 0 : i32
    %c0_i32_1 = arith.constant 0 : i32
    return %c0_i32, %c0_i32_0 : i32, i32
  }
  func.func @transform_3(%arg0: i32) -> (i32, i32) {
    %c0_i32 = arith.constant 0 : i32
    %c0_i32_0 = arith.constant 0 : i32
    return %c0_i32, %arg0 : i32, i32
  }
}

module attributes {stable_mosaic.version = 11 : i64} {
  func.func @_matmul_kernel(%arg0: i32, %arg1: memref<64x576xbf16, #tpu.memory_space<vmem>>, %arg2: memref<576x32xbf16, #tpu.memory_space<vmem>>, %arg3: memref<64x1xf32, #tpu.memory_space<vmem>>, %arg4: memref<64x32xf32, #tpu.memory_space<vmem>>) attributes {dimension_semantics = [#tpu.dimension_semantics<parallel>], iteration_bounds = array<i64: 1>, scalar_prefetch = 0 : i64, scratch_operands = 0 : i64, tpu.core_type = #tpu.core_type<tc>, window_params = [{pipeline_mode = #tpu.pipeline_mode<synchronous>, transform_indices = @transform_0, window_bounds = array<i64: 64, 576>}, {transform_indices = @transform_1, window_bounds = array<i64: 576, 32>}, {pipeline_mode = #tpu.pipeline_mode<synchronous>, transform_indices = @transform_2, window_bounds = array<i64: 64, 1>}, {transform_indices = @transform_3, window_bounds = array<i64: 64, 32>}]} {
    %c0 = arith.constant 0 : index
    %c0_0 = arith.constant 0 : index
    %0 = vector.load %arg1[%c0, %c0_0] : memref<64x576xbf16, #tpu.memory_space<vmem>>, vector<64x576xbf16>
    %c0_1 = arith.constant 0 : index
    %c0_2 = arith.constant 0 : index
    %1 = vector.load %arg2[%c0_1, %c0_2] : memref<576x32xbf16, #tpu.memory_space<vmem>>, vector<576x32xbf16>
    %cst = arith.constant dense<0.000000e+00> : vector<64x32xf32>
    %2 = tpu.matmul %0, %1, %cst {dimension_numbers = #tpu.dot_dimension_numbers<[1], [0], [0], [1], [0, 0, 1, 1], [], []>} : vector<64x576xbf16>, vector<576x32xbf16>, vector<64x32xf32> -> vector<64x32xf32>
    %c0_3 = arith.constant 0 : index
    %c0_4 = arith.constant 0 : index
    %3 = vector.load %arg3[%c0_3, %c0_4] : memref<64x1xf32, #tpu.memory_space<vmem>>, vector<64x1xf32>
    %4 = vector.broadcast %3 : vector<64x1xf32> to vector<64x32xf32>
    %5 = arith.addf %2, %4 : vector<64x32xf32>
    %cst_5 = arith.constant 0.000000e+00 : f32
    %6 = vector.broadcast %cst_5 : f32 to vector<64x32xf32>
    %7 = arith.maximumf %5, %6 : vector<64x32xf32>
    %c0_6 = arith.constant 0 : index
    %c0_7 = arith.constant 0 : index
    %8 = vector.load %arg4[%c0_6, %c0_7] : memref<64x32xf32, #tpu.memory_space<vmem>>, vector<64x32xf32>
    tpu.vector_store %arg4[%c0_6, %c0_7], %7 {strides = array<i32>} : memref<64x32xf32, #tpu.memory_space<vmem>>, vector<64x32xf32>,
    return
  }
  func.func @transform_0(%arg0: i32) -> (i32, i32) {
    %c0_i32 = arith.constant 0 : i32
    %c0_i32_0 = arith.constant 0 : i32
    %c0_i32_1 = arith.constant 0 : i32
    return %c0_i32, %c0_i32_0 : i32, i32
  }
  func.func @transform_1(%arg0: i32) -> (i32, i32) {
    %c0_i32 = arith.constant 0 : i32
    %c0_i32_0 = arith.constant 0 : i32
    return %c0_i32, %arg0 : i32, i32
  }
  func.func @transform_2(%arg0: i32) -> (i32, i32) {
    %c0_i32 = arith.constant 0 : i32
    %c0_i32_0 = arith.constant 0 : i32
    %c0_i32_1 = arith.constant 0 : i32
    return %c0_i32, %c0_i32_0 : i32, i32
  }
  func.func @transform_3(%arg0: i32) -> (i32, i32) {
    %c0_i32 = arith.constant 0 : i32
    %c0_i32_0 = arith.constant 0 : i32
    return %c0_i32, %arg0 : i32, i32
  }
}

</mosaic_0001>

<bundles_post_ra>
// kernel: _lambda_.8
= control target key start
LH: loop header
LB: loop body
LE: loop exit
PB: predicated region body
PF: predicated region fallthrough
CT: control target
= control target key end

     0   :  { %v129_v1 = vmov 0   ;;  %vm74_vm0 = vcmask 1043456   ;;  %vm70_vm1 = vcmask 588800   ;;  %vm94_vm2 = vcmask 261120   ;;  %s180_s1 = inlined_call_operand.vmem [shape: bf16[72,32], index: 1, kind: input, shape index: {}]   ;;  %s181_s2 = inlined_call_operand.vmem [shape: f32[16,1], index: 2, kind: input, shape index: {}]   ;;  %s182_s0 = inlined_call_operand.vmem [shape: bf16[16,72], index: 0, kind: input, shape index: {}]   ;;  %s183_s3 = inlined_call_operand.vmem [shape: f32[16,32], index: 3, kind: output, shape index: {}]  }
   0x1   :  { %v25_v0 = vld [vmem:[%s180_s1 + $0x20] sm:$0xf]  ;;  %128 = vset.pattern.permute.xlu0 %v129_v1  ;;  %v126_v6 = vld [vmem:[%s180_s1 + $0x18] sm:$0xff]  ;;  %v27_v7 = vld [vmem:[%s181_s2 + $0x8] sm:$0xff] }
   0x2   :  { %v60_v2 = vunpack.c.l.b16 %v25_v0  ;;  %v26_v3 = vld [vmem:[%s181_s2] sm:$0xff]  ;;  %v125_v8 = vld [vmem:[%s180_s1 + $0x10] sm:$0xff]  ;;  %v124_v9 = vld [vmem:[%s180_s1 + $0x8] sm:$0xff] }
   0x3   :  { %30 = vperm.xlu0 %128, %v26_v3   ;;  %v123_v10 = vld [vmem:[%s180_s1] sm:$0xff] }
   0x4   :  { %v65_v4 = vpack.c.b16 %v60_v2, %v60_v2  ;;  %v122_v11 = vld [vmem:[%s182_s0] sm:$0xff] }
   0x6   :  { %v76_v5 = vsel %vm74_vm0, %v65_v4, 0 }
   0x7   :  { %81 = vmatpush.bf16.msra.mxu0 %v76_v5 }
   0xb   :  { %82 = vmatpush.bf16.msra.mxu0 %v126_v6  ;;  %35 = vperm.xlu0 %128, %v27_v7  }
   0xf   :  { %83 = vmatpush.bf16.msra.mxu0 %v125_v8 }
  0x13   :  { %84 = vmatpush.bf16.msra.mxu0 %v124_v9 }
  0x17   :  { %85 = vmatpush.bf16.msra.mxu0 %v123_v10 }
  0x1a   :  { %121 = vmatmul.msk.bf16.vlgmr.msra.gmra.mxu0 %vm70_vm1, %v122_v11 }
  0x75   :  { %v31_v12 = vpop.permute.xlu0 %30 }
  0x7d   :  { %v36_v16 = vpop.permute.xlu0 %35 }
  0x97   :  { %v87_v13 = vpop.f32.mrf.mxu0 }
  0x98   :  { %v88_v14 = vadd.f32 %v87_v13, %v31_v12 }
  0x9a   :  { %v92_v15 = vmax.f32 %v88_v14, 0.0 }
  0x9c   :  { %95 = vst.msk [vmem:[%s183_s3] sm:$0xff] %vm94_vm2, %v92_v15 }
  0x9f   :  { %v89_v17 = vpop.f32.mrf.mxu0 }
  0xa0   :  { %v90_v18 = vadd.f32 %v89_v17, %v36_v16 }
  0xa2   :  { %v93_v19 = vmax.f32 %v90_v18, 0.0 }
  0xa4   :  { %96 = vst.msk [vmem:[%s183_s3 + $0x8] sm:$0xff] %vm94_vm2, %v93_v19 }

// kernel: _lambda_.6
= control target key start
LH: loop header
LB: loop body
LE: loop exit
PB: predicated region body
PF: predicated region fallthrough
CT: control target
= control target key end

     0   :  { %s550_s12 = smov 0   ;;  %s552_s13 = smov 0   ;;  %s623_s0 = inlined_call_operand.vmem [shape: bf16[16,54], index: 0, kind: input, shape index: {}]   ;;  %s624_s1 = inlined_call_operand.vmem [shape: bf16[54,512], index: 1, kind: input, shape index: {}]   ;;  %s625_s2 = inlined_call_operand.vmem [shape: f32[16,1], index: 2, kind: input, shape index: {}]   ;;  %s626_s3 = inlined_call_operand.vmem [shape: f32[16,512], index: 3, kind: output, shape index: {}]  }
   0x1   :  { %s554_s14 = smov 0  }
   0x2 LB: > { %s425_s15 = sadd.s32 4294967295, %s527_s14   ;;  %s567_s16 = sadd.s32 1, %s527_s14   ;;  %s527_s14 = sphi %s554_s14, %s630_s14   ;;  %s523_s13 = sphi %s552_s13, %s629_s13   ;;  %s519_s12 = sphi %s550_s12, %s628_s12  }
   0x3   : > { %s38_s17 = ssub.s32 %s527_s14, %s567_s16  ;;  %s41_s18 = sadd.s32 1, %s523_s13 }
   0x4   : > { %p39_p0 = scmp.eq.s32.totalorder %s38_s17, 0  ;;  %p48_p1 = scmp.ne.s32.totalorder %s523_s13, %s519_s12 }
   0x5   : > { %p49_p2 = scmp.eq.s32.totalorder %s527_s14, 0  ;;  %p99_p3 = scmp.eq.s32.totalorder %s425_s15, 1 }
   0x6   : > { %s578_s19 = scalar_select %p39_p0, %s523_s13, %s41_s18  }
   0x7   : > { %p50_p4 = por %p49_p2, %p48_p1  ;;  %p580_p5 = por %p99_p3, %p48_p1 }
   0x8   : > { %p428_p6 = scmp.ge.s32.totalorder %s527_s14, 2 }
   0xa   : > { %127 = sbr.rel (%p428_p6) target bundleno = 26 (0x1a), region = 24 }
   0xf   : > { %130 = sbr.rel (!%p50_p4) target bundleno = 26 (0x1a), region = 28  ;;  %s132_s21 = sand.u32 (%p50_p4), 1, %s523_s13  }
  0x10   : > { %s468_s22 = sshll.u32 (%p50_p4), %s527_s14, 3  ;;  %s477_s23 = smul.u32 (%p50_p4), 56, %s132_s21 }
  0x11   : > { %s137_s26 = scalar_lea.vmem (%p50_p4), %s624_s1, %s468_s22 }
  0x12   : > { %v178_v0 = vld [vmem:[%s137_s26] sm:$0xff] (%p50_p4)  ;;  %v180_v1 = vld [vmem:[%s137_s26 + $0x10] sm:$0xff] (%p50_p4)  ;;  %s134_s27 = scalar_lea.vmem (%p50_p4), [#allocation2], %s477_s23 }
  0x13   : > { %v182_v2 = vld [vmem:[%s137_s26 + $0x20] sm:$0xff] (%p50_p4)  ;;  %179 = vst [vmem:[%s134_s27] sm:$0xff] (%p50_p4), %v178_v0  ;;  %v184_v3 = vld [vmem:[%s137_s26 + $0x30] sm:$0xff] (%p50_p4) }
  0x14   : > { %181 = vst [vmem:[%s134_s27 + $0x8] sm:$0xff] %v180_v1  ;;  %v186_v4 = vld [vmem:[%s137_s26 + $0x40] sm:$0xff]  ;;  %v188_v5 = vld [vmem:[%s137_s26 + $0x50] sm:$0xff] }
  0x15   : > { %183 = vst [vmem:[%s134_s27 + $0x10] sm:$0xff] %v182_v2  ;;  %v190_v6 = vld [vmem:[%s137_s26 + $0x60] sm:$0xff] }
  0x16   : > { %185 = vst [vmem:[%s134_s27 + $0x18] sm:$0xff] %v184_v3 }
  0x17   : > { %187 = vst [vmem:[%s134_s27 + $0x20] sm:$0xff] %v186_v4 }
  0x18   : > { %189 = vst [vmem:[%s134_s27 + $0x28] sm:$0xff] %v188_v5 }
  0x19   : > { %191 = vst [vmem:[%s134_s27 + $0x30] sm:$0xff] %v190_v6 }
  0x1a PF: > { %p431_p7 = scmp.ge.s32.totalorder %s527_s14, 1  ;;  %p196_p8 = scmp.lt.s32.totalorder %s527_s14, 3 }
  0x1c   : > { %p197_p9 = pnand %p431_p7, %p196_p8 }
  0x1d   : > { %s203_s28 = sand.u32 (!%p197_p9), 1, %s519_s12  }
  0x1e   : > { %200 = sbr.rel (%p197_p9) target bundleno = 204 (0xcc), region = 66  ;;  %s432_s10 = sshll.u32 (!%p197_p9), %s203_s28, 5 }
  0x1f   : > { %s478_s4 = smul.u32 (!%p197_p9), 56, %s203_s28  ;;  %s224_s11 = scalar_lea.vmem (!%p197_p9), [#allocation3], %s432_s10 }
  0x21   : > { %s205_s5 = scalar_lea.vmem (!%p197_p9), [#allocation2], %s478_s4 }
  0x23   : > { %v237_v7 = vld [vmem:[%s625_s2] sm:$0xff]  ;;  %v529_v8 = vmov 0   ;;  %v236_v9 = vld [vmem:[%s205_s5 + $0x30] sm:$0x77]  ;;  %vm293_vm0 = vcmask 1042432   ;;  %vm289_vm1 = vcmask 441344  }
  0x24   : > { %504 = vset.pattern.permute.xlu0 %v529_v8  ;;  %v273_v10 = vunpack.c.l.b16 %v236_v9  ;;  %v274_v11 = vunpack.c.h.b16 %v236_v9  ;;  %v455_v12 = vld [vmem:[%s205_s5 + $0x20] sm:$0xf]  ;;  %v475_v15 = vld [vmem:[%s205_s5 + $0x24] sm:$0xf0]  ;;  %v474_v16 = vld [vmem:[%s205_s5 + $0x24] sm:$0xf] }
  0x25   : > { %241 = vperm.xlu0 %504, %v237_v7   ;;  %v457_v17 = vld [vmem:[%s205_s5 + $0x28] sm:$0xf0]  ;;  %v456_v21 = vor.u32 %v475_v15, %v455_v12  ;;  %v447_v23 = vld [vmem:[%s205_s5 + $0x10] sm:$0xf]  ;;  %v473_v24 = vld [vmem:[%s205_s5 + $0x14] sm:$0xf0] }
  0x26   : > { %v281_v13 = vpack.c.b16 %v273_v10, %v273_v10  ;;  %v282_v14 = vpack.c.b16 %v274_v11, %v274_v11  ;;  %v238_v18 = vld [vmem:[%s625_s2 + $0x8] sm:$0xff]  ;;  %v460_v22 = vor.u32 %v474_v16, %v457_v17  ;;  %v449_v26 = vld [vmem:[%s205_s5 + $0x18] sm:$0xf0]  ;;  %v448_v27 = vor.u32 %v473_v24, %v447_v23  ;;  %v439_v29 = vld [vmem:[%s205_s5] sm:$0xf]  ;;  %s476_s12 = sshll.u32 (%p580_p5), %s425_s15, 4 }
  0x27   : > { %v472_v25 = vld [vmem:[%s205_s5 + $0x14] sm:$0xf]  ;;  %v471_v30 = vld [vmem:[%s205_s5 + $0x4] sm:$0xf0]  ;;  %v470_v31 = vld [vmem:[%s205_s5 + $0x4] sm:$0xf]  ;;  %s345_s21 = scalar_lea.vmem (%p580_p5), %s626_s3, %s476_s12 }
  0x28   : > { %v295_v19 = vsel %vm293_vm0, %v281_v13, 0  ;;  %v298_v20 = vsel %vm293_vm0, %v282_v14, 0  ;;  %v452_v28 = vor.u32 %v472_v25, %v449_v26  ;;  %v441_v32 = vld [vmem:[%s205_s5 + $0x8] sm:$0xf0]  ;;  %v440_v33 = vor.u32 %v471_v30, %v439_v29 }
  0x29   : > { %304 = vmatpush.bf16.msra.mxu0 %v295_v19  ;;  %318 = vmatpush.bf16.msra.mxu1 %v298_v20  ;;  %v444_v34 = vor.u32 %v470_v31, %v441_v32  ;;  %v469_v35 = vld [vmem:[%s623_s0] sm:$0xff] }
  0x2d   : > { %246 = vperm.xlu0 %504, %v238_v18   ;;  %305 = vmatpush.bf16.msra.mxu0 %v456_v21 }
  0x2e   : > { %319 = vmatpush.bf16.msra.mxu1 %v460_v22 }
  0x31   : > { %306 = vmatpush.bf16.msra.mxu0 %v448_v27 }
  0x32   : > { %320 = vmatpush.bf16.msra.mxu1 %v452_v28 }
  0x35   : > { %307 = vmatpush.bf16.msra.mxu0 %v440_v33 }
  0x36   : > { %321 = vmatpush.bf16.msra.mxu1 %v444_v34 }
  0x38   : > { %461 = vmatmul.msk.bf16.vlgmr.msra.gmra.mxu0 %vm289_vm1, %v469_v35 }
  0x39   : > { %462 = vmatmul.msk.bf16.vlgmr.msra.gmra.mxu1 %vm289_vm1, %v469_v35 }
  0x97   : > { %v242_v36 = vpop.permute.xlu0 %241 }
  0x9f   : > { %v247_v43 = vpop.permute.xlu0 %246 }
  0xb5   : > { %v309_v37 = vpop.f32.mrf.mxu0 }
  0xb6   : > { %v323_v38 = vpop.f32.mrf.mxu1  ;;  %v310_v39 = vadd.f32 %v309_v37, %v242_v36 }
  0xb7   : > { %v324_v40 = vadd.f32 %v323_v38, %v242_v36 }
  0xb8   : > { %v328_v41 = vmax.f32 %v310_v39, 0.0 }
  0xb9   : > { %v329_v42 = vmax.f32 %v324_v40, 0.0 }
  0xba   : > { %332 = vst [vmem:[%s224_s11] sm:$0xff] %v328_v41 }
  0xbb   : > { %333 = vst [vmem:[%s224_s11 + $0x8] sm:$0xff] %v329_v42 }
  0xbd   : > { %v311_v44 = vpop.f32.mrf.mxu0 }
  0xbe   : > { %v325_v45 = vpop.f32.mrf.mxu1  ;;  %v312_v46 = vadd.f32 %v311_v44, %v247_v43 }
  0xbf   : > { %v326_v47 = vadd.f32 %v325_v45, %v247_v43  ;;  %342 = sbr.rel (!%p580_p5) target bundleno = 204 (0xcc), region = 74 }
  0xc0   : > { %v330_v48 = vmax.f32 %v312_v46, 0.0 }
  0xc1   : > { %v331_v49 = vmax.f32 %v326_v47, 0.0  ;;  %v358_v50 = vld [vmem:[%s224_s11] sm:$0xff] (%p580_p5) }
  0xc2   : > { %334 = vst [vmem:[%s224_s11 + $0x10] sm:$0xff] %v330_v48  ;;  %v360_v51 = vld [vmem:[%s224_s11 + $0x8] sm:$0xff] (%p580_p5) }
  0xc3   : > { %335 = vst [vmem:[%s224_s11 + $0x18] sm:$0xff] %v331_v49 }
  0xc4   : > { %359 = vst [vmem:[%s345_s21] sm:$0xff] %v358_v50 }
  0xc5   : > { %361 = vst [vmem:[%s345_s21 + $0x8] sm:$0xff] %v360_v51 }
  0xc9   : > { %v362_v52 = vld [vmem:[%s224_s11 + $0x10] sm:$0xff] }
  0xca   : > { %v364_v53 = vld [vmem:[%s224_s11 + $0x18] sm:$0xff]  ;;  %363 = vst [vmem:[%s345_s21 + $0x20] sm:$0xff] %v362_v52 }
  0xcb   : > { %365 = vst [vmem:[%s345_s21 + $0x28] sm:$0xff] %v364_v53 }
  0xcc PF: > { %p10_p10 = scmp.ge.s32.totalorder %s567_s16, 4   ;;  %s628_s12 = smov %s523_s13 }
  0xcd   : > { %s629_s13 = smov %s578_s19  ;;  %s630_s14 = smov %s567_s16 }
  0xce   :  { %12 = sbr.rel (!%p10_p10) target bundleno = 2 (0x2), region = 128 }

// kernel: _lambda_.7
= control target key start
LH: loop header
LB: loop body
LE: loop exit
PB: predicated region body
PF: predicated region fallthrough
CT: control target
= control target key end

     0   :  { %v128_v1 = vmov 0   ;;  %vm74_vm0 = vcmask 1043456   ;;  %vm70_vm1 = vcmask 588800   ;;  %s179_s1 = inlined_call_operand.vmem [shape: bf16[72,128], index: 1, kind: input, shape index: {}]   ;;  %s180_s2 = inlined_call_operand.vmem [shape: f32[16,1], index: 2, kind: input, shape index: {}]   ;;  %s181_s0 = inlined_call_operand.vmem [shape: bf16[16,72], index: 0, kind: input, shape index: {}]   ;;  %s182_s3 = inlined_call_operand.vmem [shape: f32[16,128], index: 3, kind: output, shape index: {}]  }
   0x1   :  { %v25_v0 = vld [vmem:[%s179_s1 + $0x20] sm:$0xf]  ;;  %127 = vset.pattern.permute.xlu0 %v128_v1  ;;  %v125_v6 = vld [vmem:[%s179_s1 + $0x18] sm:$0xff]  ;;  %v27_v7 = vld [vmem:[%s180_s2 + $0x8] sm:$0xff] }
   0x2   :  { %v60_v2 = vunpack.c.l.b16 %v25_v0  ;;  %v26_v3 = vld [vmem:[%s180_s2] sm:$0xff]  ;;  %v124_v8 = vld [vmem:[%s179_s1 + $0x10] sm:$0xff]  ;;  %v123_v9 = vld [vmem:[%s179_s1 + $0x8] sm:$0xff] }
   0x3   :  { %30 = vperm.xlu0 %127, %v26_v3   ;;  %v122_v10 = vld [vmem:[%s179_s1] sm:$0xff] }
   0x4   :  { %v65_v4 = vpack.c.b16 %v60_v2, %v60_v2  ;;  %v121_v11 = vld [vmem:[%s181_s0] sm:$0xff] }
   0x6   :  { %v76_v5 = vsel %vm74_vm0, %v65_v4, 0 }
   0x7   :  { %81 = vmatpush.bf16.msra.mxu0 %v76_v5 }
   0xb   :  { %82 = vmatpush.bf16.msra.mxu0 %v125_v6  ;;  %35 = vperm.xlu0 %127, %v27_v7  }
   0xf   :  { %83 = vmatpush.bf16.msra.mxu0 %v124_v8 }
  0x13   :  { %84 = vmatpush.bf16.msra.mxu0 %v123_v9 }
  0x17   :  { %85 = vmatpush.bf16.msra.mxu0 %v122_v10 }
  0x1a   :  { %120 = vmatmul.msk.bf16.vlgmr.msra.gmra.mxu0 %vm70_vm1, %v121_v11 }
  0x75   :  { %v31_v12 = vpop.permute.xlu0 %30 }
  0x7d   :  { %v36_v16 = vpop.permute.xlu0 %35 }
  0x97   :  { %v87_v13 = vpop.f32.mrf.mxu0 }
  0x98   :  { %v88_v14 = vadd.f32 %v87_v13, %v31_v12 }
  0x9a   :  { %v92_v15 = vmax.f32 %v88_v14, 0.0 }
  0x9c   :  { %94 = vst [vmem:[%s182_s3] sm:$0xff] %v92_v15 }
  0x9f   :  { %v89_v17 = vpop.f32.mrf.mxu0 }
  0xa0   :  { %v90_v18 = vadd.f32 %v89_v17, %v36_v16 }
  0xa2   :  { %v93_v19 = vmax.f32 %v90_v18, 0.0 }
  0xa4   :  { %95 = vst [vmem:[%s182_s3 + $0x8] sm:$0xff] %v93_v19 }

// kernel: _lambda_.9
= control target key start
LH: loop header
LB: loop body
LE: loop exit
PB: predicated region body
PF: predicated region fallthrough
CT: control target
= control target key end

     0   :  { %s9314_s0 = inlined_call_operand.vmem [shape: f32[3,2,16,256], index: 0, kind: input, shape index: {}]   ;;  %s9315_s1 = inlined_call_operand.vmem [shape: f32[2,16,256], index: 1, kind: input, shape index: {}]   ;;  %s9316_s2 = inlined_call_operand.vmem [shape: f32[3,9,256], index: 2, kind: input, shape index: {}]   ;;  %s9317_s3 = inlined_call_operand.vmem [shape: f32[3,2,3,3,16], index: 3, kind: input, shape index: {}]   ;;  %s9318_s4 = inlined_call_operand.vmem [shape: f32[3,2,3,16,3], index: 4, kind: input, shape index: {}]   ;;  %s9319_s5 = inlined_call_operand.vmem [shape: f32[3,3,9,144], index: 5, kind: input, shape index: {}]   ;;  %s9320_s6 = inlined_call_operand.vmem [shape: f32[3,3,9,144], index: 6, kind: input, shape index: {}]   ;;  %s9321_s7 = inlined_call_operand.vmem [shape: f32[3,3,9,1], index: 7, kind: input, shape index: {}]   ;;  %s9322_s8 = inlined_call_operand.vmem [shape: f32[3,3,9,144], index: 8, kind: input, shape index: {}]   ;;  %s9323_s9 = inlined_call_operand.vmem [shape: f32[3,3,9,1], index: 9, kind: input, shape index: {}]   ;;  %s9324_s10 = inlined_call_operand.vmem [shape: f32[3,3,9,144], index: 10, kind: input, shape index: {}]   ;;  %s9325_s11 = inlined_call_operand.vmem [shape: f32[3,3,9,1], index: 11, kind: input, shape index: {}]   ;;  %s9326_s12 = inlined_call_operand.vmem [shape: f32[3,16,48], index: 12, kind: input, shape index: {}]   ;;  %s9327_s13 = inlined_call_operand.vmem [shape: f32[3,16,1], index: 13, kind: input, shape index: {}]   ;;  %s9328_s14 = inlined_call_operand.vmem [shape: f32[3,2,16,256], index: 14, kind: output, shape index: {0}]   ;;  %s9329_s15 = inlined_call_operand.hbm [shape: f32[3,2,16,256], index: 15, kind: output, shape index: {1}]  }
   0x1   :  { %9752 = sst [smem:[#allocation188_spill]] %s9314_s0 }
   0x2   :  { %9753 = sst [smem:[#allocation189_spill]] %s9315_s1 }
   0x3   :  { %9754 = sst [smem:[#allocation190_spill]] %s9317_s3 }
   0x4   :  { %9755 = sst [smem:[#allocation191_spill]] %s9320_s6 }
   0x5   :  { %9756 = sst [smem:[#allocation192_spill]] %s9321_s7 }
   0x6   :  { %9757 = sst [smem:[#allocation193_spill]] %s9322_s8 }
   0x7   :  { %9758 = sst [smem:[#allocation194_spill]] %s9328_s14 }
   0x8   :  { %9759 = sst [smem:[#allocation195_spill]] %s9329_s15 }
   0x9   :  { %21 = vsyncpa [#allocation6], 0 }
   0xa   :  { %23 = vsyncpa [#allocation6 + $0x1], 0  ;;  %s5600_s18 = smov 0   ;;  %s5602_s19 = smov 0  }
   0xb   :  { %s5604_s20 = smov 0   ;;  %s5606_s21 = smov 0  }
   0xc   :  { %s5608_s22 = smov 0   ;;  %s5610_s23 = smov 0  }
   0xd   :  { %s5612_s24 = smov 0   ;;  %s5614_s25 = smov 0  }
   0xe LB: > { %9760 = sst [smem:[#allocation8_spill]] %s5481_s20  ;;  %s5061_s26 = sadd.s32 4294967295, %s5501_s25   ;;  %s5501_s25 = sphi %s5614_s25, %s29_s25   ;;  %s5497_s24 = sphi %s5612_s24, %s10499_s24   ;;  %s5493_s23 = sphi %s5610_s23, %s10498_s23   ;;  %s5489_s22 = sphi %s5608_s22, %s10497_s22   ;;  %s5485_s21 = sphi %s5606_s21, %s10496_s21   ;;  %s5481_s20 = sphi %s5604_s20, %s10502_s20   ;;  %s5477_s19 = sphi %s5602_s19, %s10501_s19   ;;  %s5473_s18 = sphi %s5600_s18, %s10500_s18  }
   0xf   : > { %9761 = sst [smem:[#allocation9_spill]] %s5493_s23  ;;  %s5062_s27 = sadd.s32 4294967294, %s5501_s25  }
  0x10   : > { %9762 = sst [smem:[#allocation10_spill]] %s5497_s24  ;;  %s38_s28 = sadd.s32 1, %s5493_s23 }
  0x11   : > { %p39_p0 = scmp.ge.s32.totalorder %s38_s28, 2  ;;  %s41_s29 = sadd.s32 1, %s5497_s24 }
  0x12   : > { %p453_p1 = scmp.ne.s32.totalorder %s5481_s20, %s5477_s19  ;;  %p454_p2 = scmp.eq.s32.totalorder %s5061_s26, 5 }
  0x13   : > { %s10504_s28 = smov (%p39_p0, %s38_s28), 0  ;;  %s10506_s29 = smov (!%p39_p0, %s41_s29), %s5497_s24 }
  0x14   : > { %9763 = sst [smem:[#allocation11_spill]] %s10504_s28  ;;  %s439_s30 = ssub.s32 %s5493_s23, %s10504_s28 }
  0x15   : > { %p5651_p3 = por %p454_p2, %p453_p1  ;;  %p43_p4 = scmp.ge.s32.totalorder %s10506_s29, 3 }
  0x16   : > { %p459_p5 = scmp.ne.s32.totalorder %s5477_s19, %s5473_s18  ;;  %p460_p6 = scmp.eq.s32.totalorder %s5062_s27, 5 }
  0x17   : > { %p5065_p7 = scmp.ge.s32.totalorder %s5501_s25, 1  ;;  %s10508_s29 = smov (%p43_p4, %s10506_s29), 0 }
  0x18   : > { %9765 = sst [smem:[#allocation12_spill]] %s10508_s29  ;;  %p5660_p8 = por %p460_p6, %p459_p5 }
  0x19   : > { %p597_p9 = scmp.lt.s32.totalorder %s5501_s25, 7  ;;  %s438_s26 = ssub.s32 %s5497_s24, %s10508_s29 }
  0x1a   : > { %s9766_s17 = scalar_select %p5660_p8, 1, 0 }
  0x1b   : > { %s443_s14 = sadd.s32 1, %s5481_s20  ;;  %s440_s15 = sor.u32 %s439_s30, %s438_s26 }
  0x1c   : > { %9767 = sst [smem:[#allocation13_spill]] %s9766_s17  ;;  %p598_p10 = pnand %p5065_p7, %p597_p9 }
  0x1d   : > { %p441_p11 = scmp.eq.s32.totalorder %s440_s15, 0 }
  0x1e   : > { %601 = sbr.rel (%p598_p10) target bundleno = 1880 (0x758), region = 76 }
  0x1f   : > { %s5669_s28 = scalar_select %p441_p11, %s5481_s20, %s443_s14  }
  0x21   : > { %9768 = sst [smem:[#allocation14_spill]] %s5669_s28 }
  0x23   : > { %p728_p12 = scmp.lt.s32.totalorder %s5485_s21, 1  ;;  %p726_p13 = scmp.lt.s32.totalorder %s5489_s22, 2  ;;  %v832_v9 = vlaneseq  ;;  %v5766_v11 = vld [vmem:[%s9316_s2] sm:$0xff]  ;;  %v5771_v12 = vld [vmem:[%s9316_s2 + $0x8] sm:$0xff]  ;;  %v5511_v42 = vmov 0   ;;  %vm1234_vm6 = vcmask 130048  }
  0x24   : > { %s9769_s1 = sld [smem:[#allocation189_spill]]  ;;  %s5503_s20 = smov 112   ;;  %v5777_v13 = vperm.slane %v5766_v11, 7  ;;  %v1106_v14 = vperm.slane %v5771_v12, 7  ;;  %v1063_v36 = vperm.slane %v5771_v12, 6  ;;  %5331 = vset.pattern.permute.xlu1 %v5511_v42  ;;  %5333 = vset.pattern.permute.xlu0 %v5511_v42  ;;  %v5860_v47 = vperm.slane %v5766_v11, 6 }
  0x25   : > { %s5674_s27 = scalar_select %p728_p12, %s5485_s21, 1  ;;  %v5761_v10 = vand.u32 127, %v832_v9  ;;  %5332 = vset.pattern.permute.xlu2 %v5511_v42  ;;  %v1020_v58 = vperm.slane %v5771_v12, 5 }
  0x26   : > { %s5677_s23 = scalar_select %p726_p13, %s5489_s22, 2 }
  0x27   : > { %s5228_s29 = sshll.u32 %s5674_s27, 5  ;;  %s5067_s30 = sshll.u32 %s5674_s27, 2  ;;  %vm1100_vm0 = vcmp.lt.s32.totalorder %v5761_v10, 112  ;;  %vm1057_vm1 = vcmp.lt.s32.totalorder %v5761_v10, 113  ;;  %vm1014_vm2 = vcmp.lt.s32.totalorder %v5761_v10, 127  ;;  %vm1143_vm3 = vcmp.lt.s32.totalorder %v5761_v10, 111 }
  0x28   : > { %s5068_s24 = sshll.u32 %s5677_s23, 3  ;;  %s9770_s0 = sld [smem:[#allocation188_spill]]  ;;  %vm963_vm4 = vcmp.lt.s32.totalorder %v5761_v10, 1  ;;  %vm920_vm5 = vcmp.lt.s32.totalorder %v5761_v10, 15  ;;  %vm877_vm7 = vcmp.lt.s32.totalorder %v5761_v10, 16  ;;  %vm834_vm8 = vcmp.lt.s32.totalorder %v5761_v10, 17 }
  0x29   : > { %s5690_s28 = sadd.s32 %s5068_s24, %s5067_s30  ;;  %s5504_s24 = smov 113   ;;  %vm2229_vm9 = vcmp.lt.s32.totalorder %v5761_v10, 64  ;;  %vm2186_vm10 = vcmp.lt.s32.totalorder %v5761_v10, 68  ;;  %vm2366_vm11 = vcmp.lt.s32.totalorder %v5761_v10, 124  ;;  %vm2315_vm12 = vcmp.lt.s32.totalorder %v5761_v10, 4 }
  0x2a   : > { %s5684_s14 = scalar_lea.vmem %s9769_s1, %s5228_s29  ;;  %s9337_s17 = sshll.u32 %s5690_s28, 3  ;;  %vm2272_vm13 = vcmp.lt.s32.totalorder %v5761_v10, 60  ;;  %vm3465_vm14 = vcmp.lt.s32.totalorder %v5761_v10, 8  ;;  %vm3526_vm15 = vcmp.lt.s32.totalorder %v5761_v10, 120 }
  0x2b   : > { %v5688_v0 = vld [vmem:[%s5684_s14 + $0x10] sm:$0xff]  ;;  %v5693_v1 = vld [vmem:[%s5684_s14] sm:$0xff]  ;;  %v5710_v3 = vld [vmem:[%s5684_s14 + $0x18] sm:$0xff]  ;;  %s5505_s30 = smov 127   ;;  %s5507_s29 = smov 1  }
  0x2c   : > { %1117 = vrot.lane.b32.xlu0 %v5688_v0, %s5503_s20  ;;  %1115 = vrot.lane.b32.xlu2 %v5693_v1, %s5503_s20  ;;  %v5713_v4 = vld [vmem:[%s5684_s14 + $0x8] sm:$0xff]  ;;  %s5508_s26 = smov 15   ;;  %s9789_s7 = sld [smem:[#allocation192_spill]] }
  0x2d   : > { %s9812_s8 = sld [smem:[#allocation193_spill]] }
  0x2e   : > { %s5703_s15 = scalar_lea.vmem %s9770_s0, %s9337_s17  ;;  %s9340_s17 = smov 16  }
  0x2f   : > { %v5706_v2 = vld [vmem:[%s5703_s15 + $0x10] sm:$0xff]  ;;  %v5717_v5 = vld [vmem:[%s5703_s15 + $0x18] sm:$0xff]  ;;  %v5722_v6 = vld [vmem:[%s5703_s15] sm:$0xff]  ;;  %s6178_s0 = smul.u32 96, %s5677_s23  ;;  %s9833_s6 = sld [smem:[#allocation191_spill]] }
  0x30   : > { %1094 = vrot.lane.b32.xlu1 %v5706_v2, %s5503_s20  ;;  %v5728_v7 = vld [vmem:[%s5703_s15 + $0x8] sm:$0xff]  ;;  %s10128_s3 = sld [smem:[#allocation190_spill]] }
  0x34   : > { %1121 = vrot.lane.b32.xlu0 %v5710_v3, %s5503_s20  ;;  %1119 = vrot.lane.b32.xlu2 %v5713_v4, %s5503_s20 }
  0x38   : > { %1098 = vrot.lane.b32.xlu1 %v5717_v5, %s5503_s20 }
  0x3c   : > { %1074 = vrot.lane.b32.xlu0 %v5688_v0, %s5504_s24  ;;  %1092 = vrot.lane.b32.xlu2 %v5722_v6, %s5503_s20 }
  0x40   : > { %1078 = vrot.lane.b32.xlu1 %v5710_v3, %s5504_s24 }
  0x44   : > { %1096 = vrot.lane.b32.xlu0 %v5728_v7, %s5503_s20  ;;  %1055 = vrot.lane.b32.xlu2 %v5717_v5, %s5504_s24  ;;  %s9338_s20 = smov 111  }
  0x48   : > { %1051 = vrot.lane.b32.xlu1 %v5706_v2, %s5504_s24 }
  0x4c   : > { %1072 = vrot.lane.b32.xlu0 %v5693_v1, %s5504_s24  ;;  %1031 = vrot.lane.b32.xlu2 %v5688_v0, %s5505_s30 }
  0x50   : > { %1076 = vrot.lane.b32.xlu1 %v5713_v4, %s5504_s24 }
  0x54   : > { %1035 = vrot.lane.b32.xlu0 %v5710_v3, %s5505_s30  ;;  %1053 = vrot.lane.b32.xlu2 %v5728_v7, %s5504_s24 }
  0x58   : > { %1049 = vrot.lane.b32.xlu1 %v5722_v6, %s5504_s24 }
  0x5c   : > { %1008 = vrot.lane.b32.xlu0 %v5706_v2, %s5505_s30  ;;  %1029 = vrot.lane.b32.xlu2 %v5693_v1, %s5505_s30 }
  0x60   : > { %1012 = vrot.lane.b32.xlu1 %v5717_v5, %s5505_s30 }
  0x64   : > { %1033 = vrot.lane.b32.xlu0 %v5713_v4, %s5505_s30  ;;  %1010 = vrot.lane.b32.xlu2 %v5728_v7, %s5505_s30 }
  0x68   : > { %1006 = vrot.lane.b32.xlu1 %v5722_v6, %s5505_s30  ;;  %s9346_s30 = smov 124  }
  0x6c   : > { %1137 = vrot.lane.b32.xlu0 %v5706_v2, %s9338_s20  ;;  %1135 = vrot.lane.b32.xlu2 %v5722_v6, %s9338_s20 }
  0x70   : > { %1141 = vrot.lane.b32.xlu1 %v5717_v5, %s9338_s20 }
  0x74   : > { %1139 = vrot.lane.b32.xlu0 %v5728_v7, %s9338_s20  ;;  %984 = vrot.lane.b32.xlu2 %v5710_v3, %s5507_s29  ;;  %s9341_s20 = smov 17  }
  0x78   : > { %980 = vrot.lane.b32.xlu1 %v5688_v0, %s5507_s29 }
  0x7c   : > { %957 = vrot.lane.b32.xlu0 %v5706_v2, %s5507_s29  ;;  %978 = vrot.lane.b32.xlu2 %v5693_v1, %s5507_s29 }
  0x80   : > { %961 = vrot.lane.b32.xlu1 %v5717_v5, %s5507_s29 }
  0x84   : > { %982 = vrot.lane.b32.xlu0 %v5713_v4, %s5507_s29  ;;  %941 = vrot.lane.b32.xlu2 %v5710_v3, %s5508_s26 }
  0x86   : > { %v1116_v8 = vpop.permute.xlu2 %1115 }
  0x88   : > { %937 = vrot.lane.b32.xlu1 %v5688_v0, %s5508_s26 }
  0x8c   : > { %955 = vrot.lane.b32.xlu0 %v5722_v6, %s5507_s29  ;;  %914 = vrot.lane.b32.xlu2 %v5706_v2, %s5508_s26 }
  0x8e   : > { %v1120_v15 = vpop.permute.xlu2 %1119 }
  0x8f   : > { %v1123_v16 = vsel %vm1100_vm0, %v1116_v8, %v1120_v15  ;;  %v1125_v17 = vsel %vm1100_vm0, %v1120_v15, %v1116_v8 }
  0x90   : > { %959 = vrot.lane.b32.xlu1 %v5728_v7, %s5507_s29  ;;  %v5786_v18 = vmul.f32 %v1123_v16, %v5777_v13  ;;  %v5788_v19 = vmul.f32 %v1125_v17, %v1106_v14  ;;  %s9781_s29 = smov 111  }
  0x92   : > { %9771 = vst [vmem:[#allocation15_spill] sm:$0xff] %v5786_v18 }
  0x93   : > { %9772 = vst [vmem:[#allocation16_spill] sm:$0xff] %v5788_v19 }
  0x94   : > { %918 = vrot.lane.b32.xlu0 %v5717_v5, %s5508_s26  ;;  %939 = vrot.lane.b32.xlu2 %v5713_v4, %s5508_s26 }
  0x96   : > { %v1093_v20 = vpop.permute.xlu2 %1092 }
  0x98   : > { %935 = vrot.lane.b32.xlu1 %v5693_v1, %s5508_s26 }
  0x9c   : > { %894 = vrot.lane.b32.xlu0 %v5688_v0, %s9340_s17  ;;  %912 = vrot.lane.b32.xlu2 %v5722_v6, %s5508_s26 }
  0x9e   : > { %v1118_v21 = vpop.permute.xlu0 %1117  ;;  %v1056_v22 = vpop.permute.xlu2 %1055 }
  0xa0   : > { %898 = vrot.lane.b32.xlu1 %v5710_v3, %s9340_s17 }
  0xa2   : > { %v1095_v23 = vpop.permute.xlu1 %1094 }
  0xa4   : > { %916 = vrot.lane.b32.xlu0 %v5728_v7, %s5508_s26  ;;  %875 = vrot.lane.b32.xlu2 %v5717_v5, %s9340_s17  ;;  %s5242_s26 = smul.u32 48, %s5677_s23 }
  0xa6   : > { %v1122_v24 = vpop.permute.xlu0 %1121  ;;  %v5801_v25 = vpop.permute.xlu2 %1031  ;;  %s5940_s1 = scalar_lea.vmem %s9323_s9, %s5242_s26  ;;  %s5962_s24 = scalar_lea.vmem %s9789_s7, %s5242_s26 }
  0xa7   : > { %v5805_v26 = vsel %vm1100_vm0, %v1118_v21, %v1122_v24  ;;  %v1126_v27 = vsel %vm1100_vm0, %v1122_v24, %v1118_v21  ;;  %v1569_v42 = vld [vmem:[%s5962_s24] sm:$0xff]  ;;  %s9815_s7 = smov 4  }
  0xa8   : > { %871 = vrot.lane.b32.xlu1 %v5706_v2, %s9340_s17  ;;  %v5811_v28 = vmul.f32 %v1126_v27, %v1106_v14 }
  0xaa   : > { %9773 = vst [vmem:[#allocation17_spill] sm:$0xff] %v5811_v28  ;;  %v1099_v29 = vpop.permute.xlu1 %1098 }
  0xab   : > { %v1102_v30 = vsel %vm1100_vm0, %v1095_v23, %v1099_v29  ;;  %v1104_v31 = vsel %vm1100_vm0, %v1099_v29, %v1095_v23 }
  0xac   : > { %v5818_v32 = vmul.f32 %v5777_v13, %v1102_v30  ;;  %v5820_v33 = vmul.f32 %v1106_v14, %v1104_v31  ;;  %892 = vrot.lane.b32.xlu0 %v5693_v1, %s9340_s17  ;;  %851 = vrot.lane.b32.xlu2 %v5688_v0, %s9341_s20  ;;  %v1222_v30 = vld [vmem:[%s5940_s1] sm:$0xff] }
  0xae   : > { %9774 = vst [vmem:[#allocation18_spill] sm:$0xff] %v5818_v32  ;;  %1241 = vmatpush.msra.mxu0 %v5818_v32  ;;  %1287 = vmatpush.msra.mxu2 %v5820_v33  ;;  %v5828_v34 = vpop.permute.xlu0 %1074  ;;  %v1054_v35 = vpop.permute.xlu2 %1053 }
  0xaf   : > { %9775 = vst [vmem:[#allocation19_spill] sm:$0xff] %v5820_v33 }
  0xb0   : > { %896 = vrot.lane.b32.xlu1 %v5713_v4, %s9340_s17 }
  0xb2   : > { %v5834_v37 = vpop.permute.xlu1 %1078 }
  0xb3   : > { %v1083_v38 = vsel %vm1057_vm1, %v5834_v37, %v5828_v34 }
  0xb4   : > { %v5840_v39 = vmul.f32 %v1083_v38, %v1063_v36  ;;  %855 = vrot.lane.b32.xlu0 %v5710_v3, %s9341_s20  ;;  %873 = vrot.lane.b32.xlu2 %v5728_v7, %s9340_s17 }
  0xb6   : > { %9776 = vst [vmem:[#allocation20_spill] sm:$0xff] %v5840_v39  ;;  %v1097_v40 = vpop.permute.xlu0 %1096  ;;  %v5846_v41 = vpop.permute.xlu2 %1029 }
  0xb7   : > { %v1101_v43 = vsel %vm1100_vm0, %v1093_v20, %v1097_v40  ;;  %v1103_v44 = vsel %vm1100_vm0, %v1097_v40, %v1093_v20  ;;  %v5935_v20 = vperm.slane %v5766_v11, 5  ;;  %vm2104_vm0 = vcmask 1042432  }
  0xb8   : > { %869 = vrot.lane.b32.xlu1 %v5722_v6, %s9340_s17  ;;  %v5855_v45 = vmul.f32 %v5777_v13, %v1101_v43  ;;  %v5857_v46 = vmul.f32 %v1106_v14, %v1103_v44  ;;  %s5930_s17 = scalar_lea.vmem %s9325_s11, %s5242_s26  ;;  %v1570_v43 = vld [vmem:[%s5962_s24 + $0x8] sm:$0x1]  ;;  %s9348_s26 = smov 68  }
  0xba   : > { %9777 = vst [vmem:[#allocation21_spill] sm:$0xff] %v5855_v45  ;;  %v1052_v48 = vpop.permute.xlu1 %1051  ;;  %1242 = vmatpush.msra.mxu0 %v5855_v45  ;;  %1288 = vmatpush.msra.mxu2 %v5857_v46 }
  0xbb   : > { %9778 = vst [vmem:[#allocation22_spill] sm:$0xff] %v5857_v46  ;;  %v1059_v49 = vsel %vm1057_vm1, %v1052_v48, %v1056_v22  ;;  %v1061_v50 = vsel %vm1057_vm1, %v1056_v22, %v1052_v48  ;;  %v1589_v22 = vld [vmem:[%s5930_s17] sm:$0xff] }
  0xbc   : > { %v5869_v51 = vmul.f32 %v5860_v47, %v1059_v49  ;;  %v5871_v52 = vmul.f32 %v1063_v36, %v1061_v50  ;;  %1160 = vrot.lane.b32.xlu0 %v5688_v0, %s9781_s29  ;;  %826 = vrot.lane.b32.xlu2 %v5706_v2, %s9341_s20 }
  0xbe   : > { %9779 = vst [vmem:[#allocation23_spill] sm:$0xff] %v5869_v51  ;;  %1243 = vmatpush.msra.mxu0 %v5869_v51  ;;  %1289 = vmatpush.msra.mxu2 %v5871_v52  ;;  %v5879_v53 = vpop.permute.xlu0 %1072  ;;  %v1011_v54 = vpop.permute.xlu2 %1010 }
  0xbf   : > { %9780 = vst [vmem:[#allocation24_spill] sm:$0xff] %v5871_v52 }
  0xc0   : > { %1164 = vrot.lane.b32.xlu1 %v5710_v3, %s9781_s29 }
  0xc2   : > { %v5883_v55 = vpop.permute.xlu1 %1076 }
  0xc3   : > { %v1082_v56 = vsel %vm1057_vm1, %v5883_v55, %v5879_v53 }
  0xc4   : > { %v5889_v57 = vmul.f32 %v1082_v56, %v1063_v36  ;;  %830 = vrot.lane.b32.xlu0 %v5717_v5, %s9341_s20  ;;  %853 = vrot.lane.b32.xlu2 %v5713_v4, %s9341_s20  ;;  %v1223_v56 = vld [vmem:[%s5940_s1 + $0x8] sm:$0x1] }
  0xc6   : > { %9782 = vst [vmem:[#allocation25_spill] sm:$0xff] %v5889_v57  ;;  %v5897_v59 = vpop.permute.xlu0 %1035  ;;  %v5899_v60 = vpop.permute.xlu2 %1135 }
  0xc7   : > { %v1040_v61 = vsel %vm1014_vm2, %v5897_v59, %v5801_v25 }
  0xc8   : > { %849 = vrot.lane.b32.xlu1 %v5693_v1, %s9341_s20  ;;  %v5907_v62 = vmul.f32 %v1040_v61, %v1020_v58 }
  0xca   : > { %9783 = vst [vmem:[#allocation26_spill] sm:$0xff] %v5907_v62  ;;  %v1050_v63 = vpop.permute.xlu1 %1049 }
  0xcb   : > { %v1058_v8 = vsel %vm1057_vm1, %v1050_v63, %v1054_v35  ;;  %v1060_v9 = vsel %vm1057_vm1, %v1054_v35, %v1050_v63 }
  0xcc   : > { %v5914_v14 = vmul.f32 %v5860_v47, %v1058_v8  ;;  %v5916_v15 = vmul.f32 %v1063_v36, %v1060_v9  ;;  %1158 = vrot.lane.b32.xlu0 %v5693_v1, %s9781_s29  ;;  %824 = vrot.lane.b32.xlu2 %v5722_v6, %s9341_s20  ;;  %s5512_s20 = smov 64  }
  0xce   : > { %9784 = vst [vmem:[#allocation27_spill] sm:$0xff] %v5914_v14  ;;  %1244 = vmatpush.msra.mxu0 %v5914_v14  ;;  %1290 = vmatpush.msra.mxu2 %v5916_v15  ;;  %v1009_v16 = vpop.permute.xlu0 %1008  ;;  %v5925_v17 = vpop.permute.xlu2 %984 }
  0xcf   : > { %9785 = vst [vmem:[#allocation28_spill] sm:$0xff] %v5916_v15 }
  0xd0   : > { %1162 = vrot.lane.b32.xlu1 %v5713_v4, %s9781_s29  ;;  %s9788_s29 = smov 17  }
  0xd2   : > { %v1013_v21 = vpop.permute.xlu1 %1012 }
  0xd3   : > { %v1016_v23 = vsel %vm1014_vm2, %v1009_v16, %v1013_v21  ;;  %v1018_v24 = vsel %vm1014_vm2, %v1013_v21, %v1009_v16 }
  0xd4   : > { %v5948_v27 = vmul.f32 %v5935_v20, %v1016_v23  ;;  %v5950_v29 = vmul.f32 %v1020_v58, %v1018_v24  ;;  %828 = vrot.lane.b32.xlu0 %v5728_v7, %s9788_s29  ;;  %1593 = vperm.xlu2 %5332, %v1589_v22   ;;  %v1590_v23 = vld [vmem:[%s5930_s17 + $0x8] sm:$0x1]  ;;  %s9350_s29 = smov 4  }
  0xd6   : > { %9786 = vst [vmem:[#allocation29_spill] sm:$0xff] %v5948_v27  ;;  %1245 = vmatpush.msra.mxu0 %v5948_v27  ;;  %1291 = vmatpush.msra.mxu2 %v5950_v29  ;;  %v5957_v31 = vpop.permute.xlu0 %1033  ;;  %v5964_v35 = vpop.permute.xlu2 %978 }
  0xd7   : > { %9787 = vst [vmem:[#allocation30_spill] sm:$0xff] %v5950_v29  ;;  %v1039_v36 = vsel %vm1014_vm2, %v5957_v31, %v5846_v41 }
  0xd8   : > { %1226 = vperm.xlu1 %5331, %v1222_v30   ;;  %v5970_v38 = vmul.f32 %v1039_v36, %v1020_v58 }
  0xda   : > { %9790 = vst [vmem:[#allocation31_spill] sm:$0xff] %v5970_v38  ;;  %v1007_v40 = vpop.permute.xlu1 %1006 }
  0xdb   : > { %v1015_v44 = vsel %vm1014_vm2, %v1007_v40, %v1011_v54  ;;  %v1017_v48 = vsel %vm1014_vm2, %v1011_v54, %v1007_v40  ;;  %v5992_v54 = vld [vmem:[%s9316_s2 + $0x10] ss:$0 sm:$0xff] }
  0xdc   : > { %v5979_v49 = vmul.f32 %v5935_v20, %v1015_v44  ;;  %v5981_v50 = vmul.f32 %v1020_v58, %v1017_v48  ;;  %1573 = vperm.xlu0 %5333, %v1569_v42   ;;  %1578 = vperm.xlu2 %5332, %v1570_v43   ;;  %v5997_v58 = vld [vmem:[%s9316_s2 + $0x18] ss:$0 sm:$0xff]  ;;  %v6030_v42 = vperm.slane %v5771_v12, 3  ;;  %v6040_v48 = vmul.f32 %v5805_v26, %v5777_v13 }
  0xdd   : > { %v1080_v13 = vsel %vm1057_vm1, %v5879_v53, %v5883_v55 }
  0xde   : > { %9791 = vst [vmem:[#allocation32_spill] sm:$0xff] %v5979_v49  ;;  %1246 = vmatpush.msra.mxu0 %v5979_v49  ;;  %1292 = vmatpush.msra.mxu2 %v5981_v50  ;;  %v1138_v61 = vpop.permute.xlu0 %1137  ;;  %v5986_v63 = vpop.permute.xlu2 %941  ;;  %v6074_v53 = vmul.f32 %v1080_v13, %v5860_v47  ;;  %v6123_v13 = vperm.slane %v5771_v12, 2 }
  0xdf   : > { %9792 = vst [vmem:[#allocation33_spill] sm:$0xff] %v5981_v50 }
  0xe0   : > { %1231 = vperm.xlu1 %5331, %v1223_v56   ;;  %1247 = vmatpush.msra.mxu0 %v5706_v2  ;;  %9797 = vst [vmem:[#allocation38_spill] sm:$0xff] %v6040_v48 }
  0xe1   : > { %1293 = vmatpush.msra.mxu2 %v5717_v5  ;;  %9800 = vst [vmem:[#allocation41_spill] sm:$0xff] %v6074_v53 }
  0xe2   : > { %v1142_v8 = vpop.permute.xlu1 %1141  ;;  %1248 = vmatpush.msra.mxu0 %v5722_v6 }
  0xe3   : > { %v1145_v9 = vsel %vm1143_vm3, %v1138_v61, %v1142_v8  ;;  %v1147_v16 = vsel %vm1143_vm3, %v1142_v8, %v1138_v61  ;;  %1294 = vmatpush.msra.mxu2 %v5728_v7 }
  0xe4   : > { %v6008_v21 = vmul.f32 %v5992_v54, %v1145_v9  ;;  %v6011_v22 = vmul.f32 %v5997_v58, %v1147_v16  ;;  %2227 = vrot.lane.b32.xlu0 %v5717_v5, %s5512_s20  ;;  %2223 = vrot.lane.b32.xlu2 %v5706_v2, %s5512_s20  ;;  %v1037_v16 = vsel %vm1014_vm2, %v5846_v41, %v5957_v31 }
  0xe5   : > { %v6099_v41 = vmul.f32 %v1037_v16, %v5935_v20  ;;  %v6134_v16 = vperm.slane %v5766_v11, 2 }
  0xe6   : > { %9793 = vst [vmem:[#allocation34_spill] sm:$0xff] %v6008_v21  ;;  %1278 = vmatpush.msra.mxu1 %v6008_v21  ;;  %1324 = vmatpush.msra.mxu3 %v6011_v22  ;;  %v1140_v24 = vpop.permute.xlu0 %1139  ;;  %v6020_v30 = vpop.permute.xlu2 %914 }
  0xe7   : > { %9794 = vst [vmem:[#allocation35_spill] sm:$0xff] %v6011_v22  ;;  %v1144_v36 = vsel %vm1143_vm3, %v5899_v60, %v1140_v24  ;;  %v1146_v40 = vsel %vm1143_vm3, %v1140_v24, %v5899_v60  ;;  %v1081_v60 = vsel %vm1057_vm1, %v5828_v34, %v5834_v37  ;;  %v1038_v34 = vsel %vm1014_vm2, %v5801_v25, %v5897_v59 }
  0xe8   : > { %1598 = vperm.xlu1 %5331, %v1590_v23   ;;  %v6033_v43 = vmul.f32 %v5992_v54, %v1144_v36  ;;  %v6036_v44 = vmul.f32 %v5997_v58, %v1146_v40  ;;  %v6064_v26 = vmul.f32 %v1081_v60, %v5860_v47  ;;  %v6080_v55 = vmul.f32 %v1038_v34, %v5935_v20 }
  0xe9   : > { %v968_v25 = vperm.slane %v5766_v11, 3  ;;  %9803 = vst [vmem:[#allocation44_spill] sm:$0xff] %v6099_v41  ;;  %vm2097_vm1 = vcmask 23552   ;;  %vm4682_vm2 = vcmask 392192  }
  0xea   : > { %9795 = vst [vmem:[#allocation36_spill] sm:$0xff] %v6033_v43  ;;  %v981_v56 = vpop.permute.xlu1 %980  ;;  %1279 = vmatpush.msra.mxu1 %v6033_v43  ;;  %1325 = vmatpush.msra.mxu3 %v6036_v44 }
  0xeb   : > { %9796 = vst [vmem:[#allocation37_spill] sm:$0xff] %v6036_v44  ;;  %v987_v61 = vsel %vm963_vm4, %v981_v56, %v5925_v17  ;;  %v989_v20 = vsel %vm963_vm4, %v5925_v17, %v981_v56 }
  0xec   : > { %v6052_v8 = vmul.f32 %v987_v61, %v6030_v42  ;;  %1379 = vmatpush.msrb.mxu1 %v6040_v48  ;;  %2180 = vrot.lane.b32.xlu0 %v5706_v2, %s9348_s26  ;;  %9799 = vst [vmem:[#allocation40_spill] sm:$0xff] %v6064_v26  ;;  %v6129_v56 = vmul.f32 %v989_v20, %v968_v25 }
  0xed   : > { %2225 = vrot.lane.b32.xlu2 %v5728_v7, %s5512_s20  ;;  %9801 = vst [vmem:[#allocation42_spill] sm:$0xff] %v6080_v55 }
  0xee   : > { %9798 = vst [vmem:[#allocation39_spill] sm:$0xff] %v6052_v8  ;;  %1380 = vmatpush.msrb.mxu1 %v5786_v18  ;;  %v958_v37 = vpop.permute.xlu0 %957  ;;  %v6071_v9 = vpop.permute.xlu2 %939 }
  0xef   : > { %9805 = vst [vmem:[#allocation46_spill] sm:$0xff] %v6129_v56 }
  0xf0   : > { %2221 = vrot.lane.b32.xlu1 %v5722_v6, %s5512_s20  ;;  %1381 = vmatpush.msrb.mxu1 %v6064_v26 }
  0xf2   : > { %v962_v59 = vpop.permute.xlu1 %961  ;;  %1382 = vmatpush.msrb.mxu1 %v6074_v53 }
  0xf3   : > { %v965_v47 = vsel %vm963_vm4, %v958_v37, %v962_v59  ;;  %v967_v23 = vsel %vm963_vm4, %v962_v59, %v958_v37 }
  0xf4   : > { %v6092_v24 = vmul.f32 %v968_v25, %v967_v23  ;;  %v6095_v36 = vmul.f32 %v6030_v42, %v965_v47  ;;  %1383 = vmatpush.msrb.mxu1 %v6080_v55  ;;  %2182 = vrot.lane.b32.xlu0 %v5728_v7, %s9348_s26 }
  0xf5   : > { %2178 = vrot.lane.b32.xlu2 %v5722_v6, %s9348_s26 }
  0xf6   : > { %9802 = vst [vmem:[#allocation43_spill] sm:$0xff] %v6095_v36  ;;  %1249 = vmatpush.msra.mxu0 %v6092_v24  ;;  %1295 = vmatpush.msra.mxu2 %v6095_v36  ;;  %v983_v31 = vpop.permute.xlu0 %982  ;;  %v6109_v40 = vpop.permute.xlu2 %912 }
  0xf7   : > { %1384 = vmatpush.msrb.mxu1 %v6099_v41  ;;  %v986_v60 = vsel %vm963_vm4, %v5964_v35, %v983_v31  ;;  %v988_v61 = vsel %vm963_vm4, %v983_v31, %v5964_v35 }
  0xf8   : > { %2184 = vrot.lane.b32.xlu1 %v5717_v5, %s9348_s26  ;;  %v6126_v34 = vmul.f32 %v986_v60, %v6030_v42  ;;  %v6131_v37 = vmul.f32 %v988_v61, %v968_v25  ;;  %s9381_s26 = smov 60  }
  0xf9   : > { %1385 = vmatpush.msrb.mxu1 %v5688_v0 }
  0xfa   : > { %9804 = vst [vmem:[#allocation45_spill] sm:$0xff] %v6126_v34  ;;  %v938_v17 = vpop.permute.xlu1 %937 }
  0xfb   : > { %9806 = vst [vmem:[#allocation47_spill] sm:$0xff] %v6131_v37  ;;  %v944_v35 = vsel %vm920_vm5, %v938_v17, %v5986_v63  ;;  %1386 = vmatpush.msrb.mxu1 %v5693_v1  ;;  %v946_v59 = vsel %vm920_vm5, %v5986_v63, %v938_v17 }
  0xfc   : > { %v6144_v47 = vmul.f32 %v944_v35, %v6123_v13  ;;  %2358 = vrot.lane.b32.xlu0 %v5722_v6, %s9346_s30  ;;  %v6152_v23 = vmul.f32 %v946_v59, %v6134_v16 }
  0xfd   : > { %1387 = vmatpush.msrb.mxu1 %v6129_v56  ;;  %2364 = vrot.lane.b32.xlu2 %v5717_v5, %s9346_s30 }
  0xfe   : > { %9807 = vst [vmem:[#allocation48_spill] sm:$0xff] %v6144_v47  ;;  %v956_v31 = vpop.permute.xlu0 %955  ;;  %v6155_v63 = vpop.permute.xlu2 %875 }
  0xff   : > { %9808 = vst [vmem:[#allocation49_spill] sm:$0xff] %v6152_v23  ;;  %1388 = vmatpush.msrb.mxu1 %v6131_v37 }
 0x100   : > { %2360 = vrot.lane.b32.xlu1 %v5706_v2, %s9346_s30 }
 0x101   : > { %1389 = vmatpush.msrb.mxu1 %v6152_v23 }
 0x102   : > { %v960_v20 = vpop.permute.xlu1 %959 }
 0x103   : > { %v964_v60 = vsel %vm963_vm4, %v956_v31, %v960_v20  ;;  %v966_v61 = vsel %vm963_vm4, %v960_v20, %v956_v31 }
 0x104   : > { %v6164_v17 = vmul.f32 %v968_v25, %v966_v61  ;;  %v6167_v35 = vmul.f32 %v6030_v42, %v964_v60  ;;  %2313 = vrot.lane.b32.xlu0 %v5717_v5, %s9350_s29 }
 0x105   : > { %2309 = vrot.lane.b32.xlu2 %v5706_v2, %s9350_s29  ;;  %s6206_s29 = scalar_lea.vmem %s9812_s8, %s6178_s0  ;;  %s6357_s8 = scalar_lea.vmem %s9833_s6, %s6178_s0 }
 0x106   : > { %9809 = vst [vmem:[#allocation50_spill] sm:$0xff] %v6164_v17  ;;  %1250 = vmatpush.msra.mxu0 %v6164_v17  ;;  %1296 = vmatpush.msra.mxu2 %v6167_v35  ;;  %v919_v59 = vpop.permute.xlu0 %918  ;;  %v6175_v23 = vpop.permute.xlu2 %851  ;;  %v1221_v53 = vld [vmem:[%s6206_s29 + $0x18] sm:$0x1]  ;;  %s6425_s6 = scalar_lea.vmem %s9319_s5, %s6178_s0 }
 0x107   : > { %9810 = vst [vmem:[#allocation51_spill] sm:$0xff] %v6167_v35  ;;  %v922_v42 = vsel %vm920_vm5, %v6020_v30, %v919_v59  ;;  %v924_v25 = vsel %vm920_vm5, %v919_v59, %v6020_v30 }
 0x108   : > { %2362 = vrot.lane.b32.xlu1 %v5728_v7, %s9346_s30  ;;  %v6189_v31 = vmul.f32 %v6134_v16, %v924_v25  ;;  %v6192_v20 = vmul.f32 %v6123_v13, %v922_v42  ;;  %s9824_s30 = smov 68  }
 0x10a   : > { %9811 = vst [vmem:[#allocation52_spill] sm:$0xff] %v6192_v20  ;;  %v936_v60 = vpop.permute.xlu1 %935  ;;  %1251 = vmatpush.msra.mxu0 %v6189_v31  ;;  %1297 = vmatpush.msra.mxu2 %v6192_v20 }
 0x10b   : > { %v943_v61 = vsel %vm920_vm5, %v936_v60, %v6071_v9  ;;  %v945_v37 = vsel %vm920_vm5, %v6071_v9, %v936_v60  ;;  %v1219_v9 = vld [vmem:[%s6206_s29 + $0x8] sm:$0xff]  ;;  %v883_v60 = vperm.slane %v5771_v12, 1 }
 0x10c   : > { %v6209_v30 = vmul.f32 %v945_v37, %v6134_v16  ;;  %v6212_v59 = vmul.f32 %v943_v61, %v6123_v13  ;;  %2246 = vrot.lane.b32.xlu0 %v5688_v0, %s5512_s20  ;;  %5088 = vmatmul.msk.f32.vlgmr.msra.gmra.mxu1 %vm1234_vm6, %v1219_v9  ;;  %v882_v37 = vperm.slane %v5766_v11, 1 }
 0x10d   : > { %2311 = vrot.lane.b32.xlu2 %v5728_v7, %s9815_s7  ;;  %5090 = vmatmul.msk.f32.vlgmr.msra.gmra.mxu3 %vm1234_vm6, %v1219_v9 }
 0x10e   : > { %9813 = vst [vmem:[#allocation53_spill] sm:$0xff] %v6209_v30  ;;  %1390 = vmatpush.msrb.mxu1 %v6209_v30  ;;  %v895_v42 = vpop.permute.xlu0 %894  ;;  %v874_v25 = vpop.permute.xlu2 %873 }
 0x10f   : > { %9814 = vst [vmem:[#allocation54_spill] sm:$0xff] %v6212_v59 }
 0x110   : > { %2307 = vrot.lane.b32.xlu1 %v5722_v6, %s9815_s7 }
 0x112   : > { %v899_v61 = vpop.permute.xlu1 %898 }
 0x113   : > { %v901_v30 = vsel %vm877_vm7, %v895_v42, %v899_v61  ;;  %v903_v56 = vsel %vm877_vm7, %v899_v61, %v895_v42 }
 0x114   : > { %v6231_v41 = vmul.f32 %v903_v56, %v882_v37  ;;  %v6233_v55 = vmul.f32 %v901_v30, %v883_v60  ;;  %2270 = vrot.lane.b32.xlu0 %v5717_v5, %s9381_s26  ;;  %5089 = vmatmul.msk.f32.gmra.mxu1 %vm1234_vm6, %v1221_v53 }
 0x115   : > { %2266 = vrot.lane.b32.xlu2 %v5706_v2, %s9381_s26  ;;  %5091 = vmatmul.msk.f32.gmra.mxu3 %vm1234_vm6, %v1221_v53 }
 0x116   : > { %9816 = vst [vmem:[#allocation55_spill] sm:$0xff] %v6231_v41  ;;  %1391 = vmatpush.msrb.mxu1 %v6231_v41  ;;  %v917_v26 = vpop.permute.xlu0 %916  ;;  %v827_v9 = vpop.permute.xlu2 %826 }
 0x117   : > { %9817 = vst [vmem:[#allocation56_spill] sm:$0xff] %v6233_v55  ;;  %v921_v56 = vsel %vm920_vm5, %v6109_v40, %v917_v26  ;;  %v923_v30 = vsel %vm920_vm5, %v917_v26, %v6109_v40 }
 0x118   : > { %2250 = vrot.lane.b32.xlu1 %v5710_v3, %s5512_s20  ;;  %v6252_v42 = vmul.f32 %v6134_v16, %v923_v30  ;;  %v6255_v61 = vmul.f32 %v6123_v13, %v921_v56 }
 0x11a   : > { %9818 = vst [vmem:[#allocation57_spill] sm:$0xff] %v6252_v42  ;;  %v872_v41 = vpop.permute.xlu1 %871  ;;  %1252 = vmatpush.msra.mxu0 %v6252_v42  ;;  %1298 = vmatpush.msra.mxu2 %v6255_v61 }
 0x11b   : > { %9819 = vst [vmem:[#allocation58_spill] sm:$0xff] %v6255_v61  ;;  %v879_v18 = vsel %vm877_vm7, %v872_v41, %v6155_v63  ;;  %v881_v26 = vsel %vm877_vm7, %v6155_v63, %v872_v41 }
 0x11c   : > { %v6265_v53 = vmul.f32 %v882_v37, %v881_v26  ;;  %v6267_v40 = vmul.f32 %v883_v60, %v879_v18  ;;  %2264 = vrot.lane.b32.xlu0 %v5722_v6, %s9381_s26  ;;  %v6289_v26 = vperm.slane %v5766_v11, 0 }
 0x11d   : > { %2248 = vrot.lane.b32.xlu2 %v5713_v4, %s5512_s20 }
 0x11e   : > { %9820 = vst [vmem:[#allocation59_spill] sm:$0xff] %v6265_v53  ;;  %1253 = vmatpush.msra.mxu0 %v6265_v53  ;;  %1299 = vmatpush.msra.mxu2 %v6267_v40  ;;  %v893_v13 = vpop.permute.xlu0 %892  ;;  %v6275_v41 = vpop.permute.xlu2 %853 }
 0x11f   : > { %9821 = vst [vmem:[#allocation60_spill] sm:$0xff] %v6267_v40 }
 0x120   : > { %2244 = vrot.lane.b32.xlu1 %v5693_v1, %s5512_s20  ;;  %s9828_s20 = smov 124  }
 0x122   : > { %v897_v16 = vpop.permute.xlu1 %896 }
 0x123   : > { %v900_v18 = vsel %vm877_vm7, %v893_v13, %v897_v16  ;;  %v902_v63 = vsel %vm877_vm7, %v897_v16, %v893_v13 }
 0x124   : > { %v6283_v56 = vmul.f32 %v902_v63, %v882_v37  ;;  %v6285_v30 = vmul.f32 %v900_v18, %v883_v60  ;;  %2207 = vrot.lane.b32.xlu0 %v5710_v3, %s9824_s30 }
 0x125   : > { %2203 = vrot.lane.b32.xlu2 %v5688_v0, %s9824_s30 }
 0x126   : > { %9822 = vst [vmem:[#allocation61_spill] sm:$0xff] %v6283_v56  ;;  %1392 = vmatpush.msrb.mxu1 %v6283_v56  ;;  %v6294_v40 = vpop.permute.xlu0 %855  ;;  %v825_v13 = vpop.permute.xlu2 %824 }
 0x127   : > { %9823 = vst [vmem:[#allocation62_spill] sm:$0xff] %v6285_v30  ;;  %v860_v16 = vsel %vm834_vm8, %v6294_v40, %v6175_v23 }
 0x128   : > { %2268 = vrot.lane.b32.xlu1 %v5728_v7, %s9381_s26  ;;  %v6305_v11 = vmul.f32 %v860_v16, %v6289_v26  ;;  %s9837_s26 = smov 60  }
 0x12a   : > { %9825 = vst [vmem:[#allocation63_spill] sm:$0xff] %v6305_v11  ;;  %v870_v18 = vpop.permute.xlu1 %869  ;;  %1393 = vmatpush.msrb.mxu1 %v6305_v11 }
 0x12b   : > { %v878_v63 = vsel %vm877_vm7, %v870_v18, %v874_v25  ;;  %v880_v56 = vsel %vm877_vm7, %v874_v25, %v870_v18 }
 0x12c   : > { %v6312_v48 = vmul.f32 %v882_v37, %v880_v56  ;;  %v6314_v61 = vmul.f32 %v883_v60, %v878_v63  ;;  %2383 = vrot.lane.b32.xlu0 %v5688_v0, %s9828_s20  ;;  %v6335_v56 = vperm.slane %v5771_v12, 0 }
 0x12d   : > { %2205 = vrot.lane.b32.xlu2 %v5713_v4, %s9824_s30 }
 0x12e   : > { %9826 = vst [vmem:[#allocation64_spill] sm:$0xff] %v6312_v48  ;;  %1254 = vmatpush.msra.mxu0 %v6312_v48  ;;  %1300 = vmatpush.msra.mxu2 %v6314_v61  ;;  %v1161_v16 = vpop.permute.xlu0 %1160  ;;  %v6322_v53 = vpop.permute.xlu2 %1593 }
 0x12f   : > { %9827 = vst [vmem:[#allocation65_spill] sm:$0xff] %v6314_v61  ;;  %v6392_v61 = vld [vmem:[%s6357_s8 + $0x10] sm:$0x1] }
 0x130   : > { %9829 = vst [vmem:[#allocation66_spill] sm:$0xff] %v6322_v53  ;;  %2201 = vrot.lane.b32.xlu1 %v5693_v1, %s9824_s30 }
 0x131   : > { %9836 = vst [vmem:[#allocation72_spill] sm:$0xff] %v6392_v61 }
 0x132   : > { %v1165_v25 = vpop.permute.xlu1 %1164 }
 0x133   : > { %v1167_v37 = vsel %vm1143_vm3, %v1161_v16, %v1165_v25 }
 0x134   : > { %v6329_v60 = vmul.f32 %v5992_v54, %v1167_v37  ;;  %2385 = vrot.lane.b32.xlu0 %v5713_v4, %s9828_s20 }
 0x135   : > { %2381 = vrot.lane.b32.xlu2 %v5693_v1, %s9828_s20 }
 0x136   : > { %9830 = vst [vmem:[#allocation67_spill] sm:$0xff] %v6329_v60  ;;  %1416 = vmatpush.msrb.mxu3 %v6329_v60  ;;  %v831_v18 = vpop.permute.xlu0 %830  ;;  %v6339_v63 = vpop.permute.xlu2 %1578 }
 0x137   : > { %9831 = vst [vmem:[#allocation68_spill] sm:$0xff] %v6339_v63  ;;  %v836_v53 = vsel %vm834_vm8, %v827_v9, %v831_v18  ;;  %v838_v37 = vsel %vm834_vm8, %v831_v18, %v827_v9  ;;  %v6371_v18 = vld [vmem:[%s6357_s8] sm:$0xff] }
 0x138   : > { %2387 = vrot.lane.b32.xlu1 %v5710_v3, %s9828_s20  ;;  %v6348_v11 = vmul.f32 %v6289_v26, %v838_v37  ;;  %v6351_v12 = vmul.f32 %v6335_v56, %v836_v53 }
 0x13a   : > { %9832 = vst [vmem:[#allocation69_spill] sm:$0xff] %v6351_v12  ;;  %v6359_v63 = vpop.permute.xlu1 %849  ;;  %1255 = vmatpush.msra.mxu0 %v6348_v11  ;;  %1301 = vmatpush.msra.mxu2 %v6351_v12 }
 0x13b   : > { %v859_v9 = vsel %vm834_vm8, %v6275_v41, %v6359_v63 }
 0x13c   : > { %v6368_v53 = vmul.f32 %v859_v9, %v6289_v26  ;;  %2330 = vrot.lane.b32.xlu0 %v5693_v1, %s9815_s7 }
 0x13d   : > { %2336 = vrot.lane.b32.xlu2 %v5710_v3, %s9815_s7 }
 0x13e   : > { %9834 = vst [vmem:[#allocation70_spill] sm:$0xff] %v6368_v53  ;;  %1394 = vmatpush.msrb.mxu1 %v6368_v53  ;;  %v1159_v37 = vpop.permute.xlu0 %1158  ;;  %v6379_v60 = vpop.permute.xlu2 %2223 }
 0x13f   : > { %1395 = vmatmul.f32.vlgmr.msrb.gmra.mxu1 %v6371_v18 }
 0x140   : > { %1514 = vmatpush.msra.mxu1 %v6008_v21  ;;  %2332 = vrot.lane.b32.xlu1 %v5688_v0, %s9815_s7  ;;  %v6401_v21 = vld [vmem:[%s6357_s8 + $0x8] sm:$0xff] }
 0x142   : > { %1515 = vmatpush.msra.mxu1 %v6033_v43  ;;  %v1163_v9 = vpop.permute.xlu1 %1162 }
 0x143   : > { %v1166_v53 = vsel %vm1143_vm3, %v1159_v37, %v1163_v9 }
 0x144   : > { %1560 = vmatpush.msrb.mxu1 %v6011_v22  ;;  %v6389_v12 = vmul.f32 %v5992_v54, %v1166_v53  ;;  %2293 = vrot.lane.b32.xlu0 %v5710_v3, %s9837_s26  ;;  %v1169_v22 = vsel %vm1143_vm3, %v1165_v25, %v1161_v16  ;;  %v6442_v16 = vld [vmem:[%s6425_s6 + $0x8] sm:$0xff] }
 0x145   : > { %2289 = vrot.lane.b32.xlu2 %v5688_v0, %s9837_s26 }
 0x146   : > { %9835 = vst [vmem:[#allocation71_spill] sm:$0xff] %v6389_v12  ;;  %1561 = vmatpush.msrb.mxu1 %v6036_v44  ;;  %1417 = vmatpush.msrb.mxu3 %v6389_v12  ;;  %v829_v43 = vpop.permute.xlu0 %828  ;;  %v1218_v12 = vld [vmem:[%s6206_s29] sm:$0xff] }
 0x147   : > { %1398 = vmatmul.f32.gmra.mxu1 %v6392_v61  ;;  %v835_v54 = vsel %vm834_vm8, %v825_v13, %v829_v43  ;;  %v837_v53 = vsel %vm834_vm8, %v829_v43, %v825_v13  ;;  %v6427_v43 = vpop.permute.xlu2 %2225  ;;  %5092 = vmatmul.msk.f32.vlgmr.msrb.gmra.mxu3 %vm1234_vm6, %v6401_v21  ;;  %v6438_v13 = vmul.f32 %v5997_v58, %v1169_v22 }
 0x148   : > { %1425 = vmatpush.msra.mxu3 %v5811_v28  ;;  %2334 = vrot.lane.b32.xlu1 %v5713_v4, %s9815_s7  ;;  %v6414_v44 = vmul.f32 %v6289_v26, %v837_v53  ;;  %v6417_v61 = vmul.f32 %v6335_v56, %v835_v54  ;;  %v1168_v26 = vsel %vm1143_vm3, %v1163_v9, %v1159_v37  ;;  %v5148_v53 = vld [vmem:[%s5930_s17 + $0x10] sm:$0xff]  ;;  %s6763_s7 = scalar_lea.vmem %s9324_s10, %s6178_s0  ;;  %s5518_s0 = smov 120  }
 0x149   : > { %9840 = vst [vmem:[#allocation75_spill] sm:$0xff] %v6438_v13  ;;  %v6446_v25 = vmul.f32 %v5997_v58, %v1168_v26 }
 0x14a   : > { %9838 = vst [vmem:[#allocation73_spill] sm:$0xff] %v6414_v44  ;;  %1426 = vmatpush.msra.mxu3 %v5788_v19  ;;  %v6429_v0 = vpop.permute.xlu1 %1226  ;;  %1256 = vmatpush.msra.mxu0 %v6414_v44 }
 0x14b   : > { %9839 = vst [vmem:[#allocation74_spill] sm:$0xff] %v6417_v61  ;;  %1302 = vmatpush.msra.mxu2 %v6417_v61  ;;  %1257 = vmatmul.f32.vlgmr.msra.gmra.mxu0 %v1218_v12 }
 0x14c   : > { %1427 = vmatpush.msra.mxu3 %v5840_v39  ;;  %1303 = vmatmul.f32.vlgmr.msra.gmra.mxu2 %v1218_v12  ;;  %9841 = vst [vmem:[#allocation76_spill] sm:$0xff] %v6446_v25  ;;  %v1220_v12 = vld [vmem:[%s6206_s29 + $0x10] sm:$0x1] }
 0x14d   : > { %1462 = vmatpush.msrb.mxu0 %v6438_v13  ;;  %1477 = vmatpush.msrb.mxu2 %v5818_v32 }
 0x14e   : > { %1428 = vmatpush.msra.mxu3 %v5889_v57  ;;  %v6453_v22 = vpop.permute.xlu0 %1573  ;;  %2291 = vrot.lane.b32.xlu2 %v5713_v4, %s9837_s26 }
 0x14f   : > { %5096 = vmatmul.msk.f32.vlgmr.msra.gmra.mxu1 %vm1234_vm6, %v6442_v16  ;;  %9842 = vst [vmem:[#allocation77_spill] sm:$0xff] %v6453_v22  ;;  %1463 = vmatpush.msrb.mxu0 %v6446_v25  ;;  %v6467_v37 = vpop.permute.xlu2 %2178 }
 0x150   : > { %1429 = vmatpush.msra.mxu3 %v5907_v62  ;;  %1478 = vmatpush.msrb.mxu2 %v5855_v45 }
 0x151   : > { %1653 = vmatpush.msra.mxu1 %v5811_v28  ;;  %2287 = vrot.lane.b32.xlu1 %v5693_v1, %s9837_s26  ;;  %v6476_v1 = vld [vmem:[%s9316_s2 + $0x28] sm:$0xff]  ;;  %s5517_s26 = smov 8  }
 0x152   : > { %1523 = vmatpush.msra.mxu0 %v5820_v33  ;;  %1430 = vmatpush.msra.mxu3 %v5970_v38  ;;  %v6462_v58 = vpop.permute.xlu1 %1231  ;;  %v6482_v9 = vperm.slane %v6476_v1, 1  ;;  %v6488_v26 = vperm.slane %v6476_v1, 7 }
 0x153   : > { %9843 = vst [vmem:[#allocation78_spill] sm:$0xff] %v6462_v58  ;;  %1479 = vmatpush.msrb.mxu2 %v5869_v51  ;;  %1654 = vmatpush.msra.mxu1 %v5788_v19  ;;  %v5122_v58 = vld [vmem:[%s6206_s29 + $0x30] sm:$0x1] }
 0x154   : > { %1524 = vmatpush.msra.mxu0 %v5857_v46  ;;  %1431 = vmatpush.msra.mxu3 %v5710_v3  ;;  %v9885_v46 = vld [vmem:[#allocation55_spill] sm:$0xff] }
 0x155   : > { %1480 = vmatpush.msrb.mxu2 %v5914_v14  ;;  %1655 = vmatpush.msra.mxu1 %v5840_v39  ;;  %v5125_v39 = vld [vmem:[%s5940_s1 + $0x18] sm:$0x1] }
 0x156   : > { %1525 = vmatpush.msra.mxu0 %v5871_v52  ;;  %1306 = vmatmul.f32.gmra.mxu2 %v1220_v12  ;;  %v2228_v54 = vpop.permute.xlu0 %2227 }
 0x157   : > { %1260 = vmatmul.f32.gmra.mxu0 %v1220_v12  ;;  %1432 = vmatpush.msra.mxu3 %v5713_v4  ;;  %v6493_v45 = vsel %vm2229_vm9, %v6379_v60, %v2228_v54  ;;  %v6498_v12 = vsel %vm2229_vm9, %v2228_v54, %v6379_v60  ;;  %v6519_v60 = vpop.permute.xlu2 %2364  ;;  %v1372_v54 = vld [vmem:[%s6357_s8 + $0x18] sm:$0x1] }
 0x158   : > { %1481 = vmatpush.msrb.mxu2 %v5948_v27  ;;  %1656 = vmatpush.msra.mxu1 %v5889_v57  ;;  %v6504_v14 = vmul.f32 %v6482_v9, %v6493_v45  ;;  %v6512_v19 = vmul.f32 %v6488_v26, %v6498_v12 }
 0x159   : > { %1526 = vmatpush.msra.mxu0 %v5916_v15  ;;  %1433 = vmatpush.msra.mxu3 %v6052_v8 }
 0x15a   : > { %9844 = vst [vmem:[#allocation79_spill] sm:$0xff] %v6504_v14  ;;  %1482 = vmatpush.msrb.mxu2 %v5979_v49  ;;  %1657 = vmatpush.msra.mxu1 %v5907_v62  ;;  %v6508_v28 = vpop.permute.xlu1 %1598  ;;  %v9853_v49 = vld [vmem:[#allocation59_spill] sm:$0xff]  ;;  %v9860_v62 = vld [vmem:[#allocation65_spill] sm:$0xff] }
 0x15b   : > { %9845 = vst [vmem:[#allocation80_spill] sm:$0xff] %v6508_v28  ;;  %2876 = vperm.xlu1 %5331, %v5148_v53   ;;  %1527 = vmatpush.msra.mxu0 %v5950_v29  ;;  %v9863_v28 = vld [vmem:[#allocation69_spill] sm:$0xff] }
 0x15c   : > { %9846 = vst [vmem:[#allocation81_spill] sm:$0xff] %v6512_v19  ;;  %1434 = vmatpush.msra.mxu3 %v6126_v34  ;;  %1483 = vmatpush.msrb.mxu2 %v5706_v2  ;;  %v5124_v2 = vld [vmem:[%s5940_s1 + $0x10] sm:$0xff] }
 0x15d   : > { %1658 = vmatpush.msra.mxu1 %v5970_v38  ;;  %1528 = vmatpush.msra.mxu0 %v5981_v50  ;;  %v9890_v50 = vld [vmem:[#allocation70_spill] sm:$0xff] }
 0x15e   : > { %1435 = vmatpush.msra.mxu3 %v6144_v47  ;;  %1484 = vmatpush.msrb.mxu2 %v5722_v6  ;;  %v2181_v53 = vpop.permute.xlu0 %2180  ;;  %v5143_v6 = vld [vmem:[%s5962_s24 + $0x18] sm:$0x1] }
 0x15f   : > { %1659 = vmatpush.msra.mxu1 %v5710_v3  ;;  %1529 = vmatpush.msra.mxu0 %v5717_v5  ;;  %v858_v5 = vsel %vm834_vm8, %v6175_v23, %v6294_v40 }
 0x160   : > { %1436 = vmatpush.msra.mxu3 %v6212_v59  ;;  %1485 = vmatpush.msrb.mxu2 %v6092_v24  ;;  %v6567_v14 = vmul.f32 %v858_v5, %v6335_v56 }
 0x161   : > { %1660 = vmatpush.msra.mxu1 %v5713_v4  ;;  %1530 = vmatpush.msra.mxu0 %v5728_v7 }
 0x162   : > { %5093 = vmatmul.msk.f32.gmra.mxu3 %vm1234_vm6, %v1372_v54  ;;  %v2222_v3 = vpop.permute.xlu1 %2221  ;;  %5094 = vmatmul.msk.f32.vlgmr.msrb.gmra.mxu0 %vm1234_vm6, %v6401_v21  ;;  %v857_v21 = vsel %vm834_vm8, %v6359_v63, %v6275_v41  ;;  %9849 = vst [vmem:[#allocation84_spill] sm:$0xff] %v6567_v14  ;;  %v6575_v41 = vperm.slane %v6476_v1, 0 }
 0x163   : > { %1437 = vmatpush.msra.mxu3 %v6233_v55  ;;  %v6545_v4 = vsel %vm2229_vm9, %v2222_v3, %v6427_v43  ;;  %1486 = vmatpush.msrb.mxu2 %v6164_v17  ;;  %v6552_v7 = vsel %vm2229_vm9, %v6427_v43, %v2222_v3  ;;  %v6577_v43 = vpop.permute.xlu2 %2309  ;;  %v6588_v3 = vperm.slane %v6476_v1, 6  ;;  %v9856_v17 = vld [vmem:[#allocation38_spill] sm:$0xff] }
 0x164   : > { %1661 = vmatpush.msra.mxu1 %v6052_v8  ;;  %v6556_v23 = vmul.f32 %v6482_v9, %v6545_v4  ;;  %2506 = vperm.xlu0 %5333, %v5124_v2   ;;  %v6564_v40 = vmul.f32 %v6488_v26, %v6552_v7  ;;  %v6580_v2 = vmul.f32 %v857_v21, %v6335_v56  ;;  %v5142_v56 = vld [vmem:[%s5962_s24 + $0x10] sm:$0xff]  ;;  %v5149_v8 = vld [vmem:[%s5930_s17 + $0x18] sm:$0x1] }
 0x165   : > { %2859 = vperm.xlu1 %5331, %v5143_v6   ;;  %1531 = vmatpush.msra.mxu0 %v6095_v36  ;;  %v6585_v6 = vld [vmem:[%s6425_s6 + $0x18] sm:$0x1] }
 0x166   : > { %9847 = vst [vmem:[#allocation82_spill] sm:$0xff] %v6556_v23  ;;  %1438 = vmatpush.msra.mxu3 %v6285_v30  ;;  %1487 = vmatpush.msrb.mxu2 %v6189_v31  ;;  %v2183_v63 = vpop.permute.xlu0 %2182 }
 0x167   : > { %9848 = vst [vmem:[#allocation83_spill] sm:$0xff] %v6564_v40  ;;  %1662 = vmatpush.msra.mxu1 %v6126_v34  ;;  %1532 = vmatpush.msra.mxu0 %v6167_v35  ;;  %v6593_v5 = vsel %vm2186_vm10, %v6467_v37, %v2183_v63  ;;  %v6601_v21 = vsel %vm2186_vm10, %v2183_v63, %v6467_v37 }
 0x168   : > { %9850 = vst [vmem:[#allocation85_spill] sm:$0xff] %v6580_v2  ;;  %1439 = vmatpush.msra.mxu3 %v6567_v14  ;;  %1488 = vmatpush.msrb.mxu2 %v6252_v42  ;;  %v6605_v23 = vmul.f32 %v6575_v41, %v6593_v5  ;;  %v6611_v19 = vmul.f32 %v6588_v3, %v6601_v21  ;;  %v1586_v42 = vld [vmem:[%s6763_s7 + $0x8] sm:$0xff] }
 0x169   : > { %1663 = vmatpush.msra.mxu1 %v6144_v47  ;;  %1533 = vmatpush.msra.mxu0 %v6192_v20 }
 0x16a   : > { %9851 = vst [vmem:[#allocation86_spill] sm:$0xff] %v6605_v23  ;;  %1440 = vmatpush.msra.mxu3 %v6580_v2  ;;  %v2185_v40 = vpop.permute.xlu1 %2184  ;;  %1489 = vmatpush.msrb.mxu2 %v9853_v49 }
 0x16b   : > { %9852 = vst [vmem:[#allocation87_spill] sm:$0xff] %v6611_v19  ;;  %5097 = vmatmul.msk.f32.gmra.mxu1 %vm1234_vm6, %v6585_v6  ;;  %v6618_v37 = vsel %vm2186_vm10, %v2181_v53, %v2185_v40  ;;  %2854 = vperm.xlu2 %5332, %v5142_v56   ;;  %v6623_v63 = vsel %vm2186_vm10, %v2185_v40, %v2181_v53  ;;  %v9855_v19 = vld [vmem:[#allocation58_spill] sm:$0xff]  ;;  %v9858_v56 = vld [vmem:[#allocation60_spill] sm:$0xff] }
 0x16c   : > { %1664 = vmatpush.msra.mxu1 %v6212_v59  ;;  %v6627_v23 = vmul.f32 %v6575_v41, %v6618_v37  ;;  %1534 = vmatpush.msra.mxu0 %v9855_v19  ;;  %v6634_v57 = vmul.f32 %v6588_v3, %v6623_v63  ;;  %v6643_v40 = vld [vmem:[%s5703_s15 + $0x18] sm:$0xff]  ;;  %v9865_v59 = vld [vmem:[#allocation67_spill] sm:$0xff]  ;;  %v5121_v19 = vld [vmem:[%s6206_s29 + $0x28] sm:$0xff] }
 0x16d   : > { %1607 = vmatpush.msrb.mxu3 %v9856_v17  ;;  %5095 = vmatmul.msk.f32.gmra.mxu0 %vm1234_vm6, %v1372_v54  ;;  %v1214_v54 = vld [vmem:[%s6425_s6] sm:$0xff] }
 0x16e   : > { %9854 = vst [vmem:[#allocation59_spill] sm:$0xff] %v6627_v23  ;;  %1441 = vmatmul.f32.vlgmr.msra.gmra.mxu3 %v6371_v18  ;;  %1490 = vmatpush.msrb.mxu2 %v6312_v48  ;;  %v6640_v53 = vpop.permute.xlu0 %2358  ;;  %v9859_v23 = vld [vmem:[#allocation15_spill] sm:$0xff]  ;;  %v6649_v18 = vpop.permute.xlu2 %2311 }
 0x16f   : > { %9857 = vst [vmem:[#allocation88_spill] sm:$0xff] %v6634_v57  ;;  %1665 = vmatpush.msra.mxu1 %v6233_v55  ;;  %2511 = vperm.xlu0 %5333, %v5125_v39   ;;  %v6656_v39 = vperm.slane %v6476_v1, 5  ;;  %v6661_v17 = vld [vmem:[%s9316_s2 + $0x20] sm:$0xff]  ;;  %v1216_v55 = vld [vmem:[%s6425_s6 + $0x10] sm:$0x1] }
 0x170   : > { %3463 = vrot.lane.b32.xlu1 %v6643_v40, %s5517_s26  ;;  %1535 = vmatpush.msra.mxu0 %v9858_v56  ;;  %v6676_v47 = vperm.slane %v6661_v17, 7 }
 0x171   : > { %1608 = vmatpush.msrb.mxu3 %v9859_v23  ;;  %1491 = vmatpush.msrb.mxu2 %v6348_v11  ;;  %v9861_v23 = vld [vmem:[#allocation40_spill] sm:$0xff] }
 0x172   : > { %1666 = vmatpush.msra.mxu1 %v6285_v30  ;;  %v2361_v57 = vpop.permute.xlu1 %2360  ;;  %1536 = vmatpush.msra.mxu0 %v9860_v62  ;;  %v5120_v62 = vld [vmem:[%s6206_s29 + $0x20] sm:$0xff] }
 0x173   : > { %1609 = vmatpush.msrb.mxu3 %v9861_v23  ;;  %v2370_v38 = vsel %vm2366_vm11, %v6519_v60, %v2361_v57  ;;  %1492 = vmatpush.msrb.mxu2 %v6414_v44  ;;  %v9864_v23 = vld [vmem:[#allocation41_spill] sm:$0xff] }
 0x174   : > { %1667 = vmatpush.msra.mxu1 %v6567_v14  ;;  %v6672_v34 = vmul.f32 %v6656_v39, %v2370_v38  ;;  %1493 = vmatmul.f32.vlgmr.msrb.gmra.mxu2 %v1214_v54  ;;  %v6702_v14 = vperm.slane %v6661_v17, 6 }
 0x175   : > { %1537 = vmatpush.msra.mxu0 %v9863_v28  ;;  %1610 = vmatpush.msrb.mxu3 %v9864_v23  ;;  %v9867_v23 = vld [vmem:[#allocation42_spill] sm:$0xff] }
 0x176   : > { %9862 = vst [vmem:[#allocation89_spill] sm:$0xff] %v6672_v34  ;;  %1644 = vmatpush.msra.mxu2 %v9865_v59  ;;  %5098 = vmatmul.msk.f32.vlgmr.msrb.gmra.mxu1 %vm1234_vm6, %v6442_v16  ;;  %v6683_v38 = vpop.permute.xlu0 %2313  ;;  %v9868_v16 = vld [vmem:[#allocation71_spill] sm:$0xff]  ;;  %v9870_v59 = vld [vmem:[#allocation72_spill] sm:$0xff]  ;;  %v5123_v28 = vld [vmem:[%s6206_s29 + $0x38] sm:$0x1] }
 0x177   : > { %2881 = vperm.xlu2 %5332, %v5149_v8   ;;  %1668 = vmatpush.msra.mxu1 %v6580_v2  ;;  %v6691_v34 = vsel %vm2315_vm12, %v6577_v43, %v6683_v38  ;;  %v6697_v8 = vmul.f32 %v6676_v47, %v6493_v45 }
 0x178   : > { %1538 = vmatpush.msra.mxu0 %v6417_v61  ;;  %9866 = vst [vmem:[#allocation90_spill] sm:$0xff] %v6691_v34  ;;  %1611 = vmatpush.msrb.mxu3 %v9867_v23  ;;  %v6706_v34 = vld [vmem:[%s5703_s15 + $0x10] sm:$0xff]  ;;  %v9872_v23 = vld [vmem:[#allocation44_spill] sm:$0xff] }
 0x179   : > { %1645 = vmatpush.msra.mxu2 %v9868_v16  ;;  %9869 = vst [vmem:[#allocation91_spill] sm:$0xff] %v6697_v8  ;;  %1444 = vmatmul.f32.gmra.mxu3 %v9870_v59  ;;  %v6713_v16 = vpop.permute.xlu2 %2266  ;;  %v6717_v59 = vmul.f32 %v6676_v47, %v6545_v4  ;;  %v6733_v4 = vmul.f32 %v6702_v14, %v6618_v37 }
 0x17a   : > { %1539 = vmatmul.f32.vlgmr.msra.gmra.mxu0 %v1214_v54  ;;  %v2363_v30 = vpop.permute.xlu1 %2362  ;;  %3459 = vrot.lane.b32.xlu0 %v6706_v34, %s5517_s26  ;;  %v6720_v54 = vld [vmem:[%s5684_s14 + $0x10] sm:$0xff]  ;;  %v6754_v37 = vmul.f32 %v6702_v14, %v6593_v5 }
 0x17b   : > { %1690 = vmatpush.msrb.mxu0 %v6438_v13  ;;  %v2369_v45 = vsel %vm2366_vm11, %v2363_v30, %v6640_v53  ;;  %9871 = vst [vmem:[#allocation72_spill] sm:$0xff] %v6717_v59  ;;  %3482 = vrot.lane.b32.xlu1 %v6720_v54, %s5517_s26  ;;  %v2367_v5 = vsel %vm2366_vm11, %v6640_v53, %v2363_v30  ;;  %v6802_v30 = vld [vmem:[%s5684_s14 + $0x18] sm:$0xff]  ;;  %v6808_v53 = vperm.slane %v6476_v1, 2 }
 0x17c   : > { %1612 = vmatpush.msrb.mxu3 %v9872_v23  ;;  %v6726_v13 = vmul.f32 %v6656_v39, %v2369_v45  ;;  %1496 = vmatmul.f32.gmra.mxu2 %v1216_v55  ;;  %9874 = vst [vmem:[#allocation93_spill] sm:$0xff] %v6733_v4  ;;  %v6738_v23 = vld [vmem:[%s5703_s15] sm:$0xff] }
 0x17d   : > { %1691 = vmatpush.msrb.mxu0 %v6446_v25  ;;  %9875 = vst [vmem:[#allocation94_spill] sm:$0xff] %v6738_v23  ;;  %v6748_v25 = vld [vmem:[%s5684_s14] sm:$0xff] }
 0x17e   : > { %9873 = vst [vmem:[#allocation92_spill] sm:$0xff] %v6726_v13  ;;  %1613 = vmatpush.msrb.mxu3 %v6720_v54  ;;  %5099 = vmatmul.msk.f32.gmra.mxu1 %vm1234_vm6, %v6585_v6  ;;  %v6742_v45 = vpop.permute.xlu0 %2246  ;;  %v6745_v13 = vperm.slane %v6661_v17, 5  ;;  %v2368_v6 = vsel %vm2366_vm11, %v2361_v57, %v6519_v60 }
 0x17f   : > { %2520 = vmatpush.msra.mxu0 %v6697_v8  ;;  %3457 = vrot.lane.b32.xlu2 %v6738_v23, %s5517_s26  ;;  %9876 = vst [vmem:[#allocation95_spill] sm:$0xff] %v6754_v37  ;;  %v9877_v8 = vld [vmem:[#allocation46_spill] sm:$0xff] }
 0x180   : > { %1614 = vmatpush.msrb.mxu3 %v6748_v25  ;;  %v6778_v60 = vmul.f32 %v6745_v13, %v2368_v6  ;;  %v9881_v6 = vld [vmem:[#allocation49_spill] sm:$0xff] }
 0x181   : > { %2521 = vmatpush.msra.mxu0 %v6717_v59  ;;  %v6767_v59 = vld [vmem:[%s5703_s15 + $0x8] sm:$0xff] }
 0x182   : > { %1615 = vmatpush.msrb.mxu3 %v9877_v8  ;;  %1542 = vmatmul.f32.gmra.mxu0 %v1216_v55  ;;  %v2308_v2 = vpop.permute.xlu1 %2307  ;;  %9879 = vst [vmem:[#allocation97_spill] sm:$0xff] %v6778_v60  ;;  %v9880_v55 = vld [vmem:[#allocation47_spill] sm:$0xff] }
 0x183   : > { %3461 = vrot.lane.b32.xlu0 %v6767_v59, %s5517_s26  ;;  %v6774_v57 = vsel %vm2315_vm12, %v2308_v2, %v6649_v18  ;;  %2522 = vmatpush.msra.mxu0 %v6733_v4  ;;  %v1585_v8 = vld [vmem:[%s6763_s7] sm:$0xff]  ;;  %v6796_v4 = vld [vmem:[%s9316_s2 + $0x30] ss:$0 sm:$0xff] }
 0x184   : > { %9878 = vst [vmem:[#allocation96_spill] sm:$0xff] %v6774_v57  ;;  %3524 = vrot.lane.b32.xlu1 %v6643_v40, %s5518_s0  ;;  %1616 = vmatpush.msrb.mxu3 %v9880_v55  ;;  %v6789_v57 = vpop.permute.xlu2 %2248  ;;  %v6799_v55 = vmul.f32 %v6745_v13, %v2367_v5 }
 0x185   : > { %5100 = vmatmul.msk.f32.vlgmr.msra.gmra.mxu2 %vm1234_vm6, %v1586_v42  ;;  %2523 = vmatpush.msra.mxu0 %v6754_v37 }
 0x186   : > { %1617 = vmatpush.msrb.mxu3 %v9881_v6  ;;  %9882 = vst [vmem:[#allocation98_spill] sm:$0xff] %v6799_v55  ;;  %1669 = vmatmul.f32.vlgmr.msra.gmra.mxu1 %v1585_v8  ;;  %v2271_v37 = vpop.permute.xlu0 %2270  ;;  %v9883_v6 = vld [vmem:[#allocation53_spill] sm:$0xff] }
 0x187   : > { %3486 = vrot.lane.b32.xlu2 %v6802_v30, %s5517_s26  ;;  %v2274_v5 = vsel %vm2272_vm13, %v6713_v16, %v2271_v37  ;;  %2524 = vmatpush.msra.mxu0 %v6778_v60  ;;  %v1588_v60 = vld [vmem:[%s6763_s7 + $0x18] sm:$0x1] }
 0x188   : > { %1618 = vmatpush.msrb.mxu3 %v9883_v6  ;;  %v6816_v33 = vmul.f32 %v6808_v53, %v2274_v5  ;;  %v6823_v15 = vmul.f32 %v6796_v4, %v2274_v5  ;;  %v6828_v6 = vperm.slane %v6661_v17, 3  ;;  %v1587_v5 = vld [vmem:[%s6763_s7 + $0x10] sm:$0x1] }
 0x189   : > { %2525 = vmatpush.msra.mxu0 %v6799_v55  ;;  %v2318_v55 = vsel %vm2315_vm12, %v6649_v18, %v2308_v2  ;;  %v6861_v2 = vsel %vm2272_vm13, %v2271_v37, %v6713_v16  ;;  %v6882_v16 = vperm.slane %v6661_v17, 1 }
 0x18a   : > { %9884 = vst [vmem:[#allocation99_spill] sm:$0xff] %v6816_v33  ;;  %1619 = vmatpush.msrb.mxu3 %v9885_v46  ;;  %5102 = vmatmul.msk.f32.vlgmr.msrb.gmra.mxu0 %vm1234_vm6, %v1586_v42  ;;  %v6820_v52 = vpop.permute.xlu1 %2250  ;;  %v2319_v33 = vsel %vm2315_vm12, %v6683_v38, %v6577_v43  ;;  %v9887_v42 = vld [vmem:[#allocation61_spill] sm:$0xff]  ;;  %v9888_v46 = vld [vmem:[#allocation63_spill] sm:$0xff]  ;;  %v6853_v38 = vperm.slane %v6661_v17, 2 }
 0x18b   : > { %9886 = vst [vmem:[#allocation100_spill] sm:$0xff] %v6823_v15  ;;  %3520 = vrot.lane.b32.xlu0 %v6706_v34, %s5518_s0  ;;  %2526 = vmatpush.msra.mxu0 %v6706_v34  ;;  %v6848_v43 = vmul.f32 %v6828_v6, %v2319_v33  ;;  %v6865_v33 = vmul.f32 %v6828_v6, %v2318_v55 }
 0x18c   : > { %3518 = vrot.lane.b32.xlu1 %v6738_v23, %s5518_s0  ;;  %1620 = vmatpush.msrb.mxu3 %v9887_v42  ;;  %v6855_v42 = vpop.permute.xlu2 %2203  ;;  %v6891_v37 = vsel %vm2229_vm9, %v6742_v45, %v6820_v52 }
 0x18d   : > { %5101 = vmatmul.msk.f32.gmra.mxu2 %vm1234_vm6, %v1588_v60  ;;  %2557 = vmatpush.msrb.mxu1 %v6823_v15  ;;  %9889 = vst [vmem:[#allocation101_spill] sm:$0xff] %v6848_v43  ;;  %v6913_v36 = vmul.f32 %v6676_v47, %v6891_v37 }
 0x18e   : > { %1621 = vmatpush.msrb.mxu3 %v9888_v46  ;;  %1672 = vmatmul.f32.gmra.mxu1 %v1587_v5  ;;  %v2265_v29 = vpop.permute.xlu0 %2264  ;;  %9891 = vst [vmem:[#allocation102_spill] sm:$0xff] %v6865_v33  ;;  %v6869_v46 = vld [vmem:[%s5684_s14 + $0x8] sm:$0xff] }
 0x18f   : > { %3480 = vrot.lane.b32.xlu2 %v6748_v25, %s5517_s26  ;;  %2527 = vmatpush.msra.mxu0 %v6738_v23  ;;  %9894 = vst [vmem:[#allocation105_spill] sm:$0xff] %v6913_v36 }
 0x190   : > { %1622 = vmatpush.msrb.mxu3 %v9890_v50  ;;  %v6875_v50 = vmul.f32 %v6853_v38, %v6861_v2 }
 0x191   : > { %1623 = vmatmul.f32.vlgmr.msrb.gmra.mxu3 %v1585_v8  ;;  %2528 = vmatpush.msra.mxu0 %v6848_v43  ;;  %v6896_v43 = vmul.f32 %v6882_v16, %v6498_v12 }
 0x192   : > { %5103 = vmatmul.msk.f32.gmra.mxu0 %vm1234_vm6, %v1588_v60  ;;  %v2245_v18 = vpop.permute.xlu1 %2244  ;;  %9892 = vst [vmem:[#allocation103_spill] sm:$0xff] %v6875_v50  ;;  %v5177_v60 = vld [vmem:[%s5940_s1 + $0x20] sm:$0xff] }
 0x193   : > { %3484 = vrot.lane.b32.xlu0 %v6869_v46, %s5517_s26  ;;  %2529 = vmatpush.msra.mxu0 %v6865_v33  ;;  %9893 = vst [vmem:[#allocation104_spill] sm:$0xff] %v6896_v43 }
 0x194   : > { %3547 = vrot.lane.b32.xlu1 %v6802_v30, %s5518_s0  ;;  %v2206_v55 = vpop.permute.xlu2 %2205 }
 0x195   : > { %2530 = vmatpush.msra.mxu0 %v6875_v50  ;;  %v6903_v50 = vsel %vm2229_vm9, %v2245_v18, %v6789_v57 }
 0x196   : > { %v2208_v8 = vpop.permute.xlu0 %2207 }
 0x197   : > { %3522 = vrot.lane.b32.xlu2 %v6767_v59, %s5518_s0 }
 0x199   : > { %1626 = vmatmul.f32.gmra.mxu3 %v1587_v5 }
 0x19a   : > { %v2269_v33 = vpop.permute.xlu1 %2268 }
 0x19b   : > { %3543 = vrot.lane.b32.xlu0 %v6720_v54, %s5518_s0  ;;  %v2273_v23 = vsel %vm2272_vm13, %v2265_v29, %v2269_v33  ;;  %v6909_v5 = vsel %vm2272_vm13, %v2269_v33, %v2265_v29  ;;  %v6927_v29 = vperm.slane %v6661_v17, 0  ;;  %v6931_v33 = vmul.f32 %v6882_v16, %v6552_v7  ;;  %v5178_v7 = vld [vmem:[%s5940_s1 + $0x28] sm:$0x1]  ;;  %s9635_s1 = sshll.u32 %s5677_s23, 4 }
 0x19c   : > { %3710 = vperm.xlu1 %5331, %v5177_v60   ;;  %v6917_v12 = vmul.f32 %v6853_v38, %v6909_v5  ;;  %v6920_v35 = vmul.f32 %v6808_v53, %v2273_v23  ;;  %v6923_v20 = vmul.f32 %v6796_v4, %v2273_v23  ;;  %v6935_v60 = vmul.f32 %v6676_v47, %v6903_v50  ;;  %s7005_s20 = scalar_lea.vmem %s9327_s13, %s9635_s1 }
 0x19d   : > { %9898 = vst [vmem:[#allocation109_spill] sm:$0xff] %v6931_v33  ;;  %v6951_v47 = vmul.f32 %v6927_v29, %v6623_v63  ;;  %v6968_v63 = vmul.f32 %v6927_v29, %v6601_v21 }
 0x19e   : > { %9895 = vst [vmem:[#allocation106_spill] sm:$0xff] %v6917_v12  ;;  %2531 = vmatpush.msra.mxu0 %v6917_v12  ;;  %2558 = vmatpush.msrb.mxu1 %v6923_v20  ;;  %v2384_v17 = vpop.permute.xlu0 %2383  ;;  %v2382_v12 = vpop.permute.xlu2 %2381 }
 0x19f   : > { %9896 = vst [vmem:[#allocation107_spill] sm:$0xff] %v6920_v35  ;;  %v6941_v35 = vsel %vm2186_vm10, %v6855_v42, %v2208_v8  ;;  %3541 = vrot.lane.b32.xlu2 %v6748_v25, %s5518_s0  ;;  %5126 = vmatmul.msk.f32.vlgmr.msrb.gmra.mxu1 %vm1234_vm6, %v5121_v19  ;;  %v6962_v19 = vsel %vm2229_vm9, %v6820_v52, %v6742_v45 }
 0x1a0   : > { %9897 = vst [vmem:[#allocation108_spill] sm:$0xff] %v6923_v20  ;;  %2532 = vmatpush.msra.mxu0 %v6896_v43  ;;  %2659 = vmatpush.msra.mxu1 %v6913_v36  ;;  %v6956_v23 = vmul.f32 %v6702_v14, %v6941_v35  ;;  %v6980_v45 = vsel %vm2229_vm9, %v6789_v57, %v2245_v18 }
 0x1a1   : > { %9899 = vst [vmem:[#allocation110_spill] sm:$0xff] %v6935_v60  ;;  %v6985_v21 = vmul.f32 %v6488_v26, %v6962_v19  ;;  %v6998_v57 = vsel %vm2186_vm10, %v2208_v8, %v6855_v42 }
 0x1a2   : > { %9900 = vst [vmem:[#allocation111_spill] sm:$0xff] %v6951_v47  ;;  %v2202_v43 = vpop.permute.xlu1 %2201  ;;  %2533 = vmatpush.msra.mxu0 %v6931_v33  ;;  %2660 = vmatpush.msra.mxu1 %v6935_v60  ;;  %v5201_v33 = vld [vmem:[%s5930_s17 + $0x20] sm:$0xff]  ;;  %v7020_v8 = vmul.f32 %v6588_v3, %v6998_v57 }
 0x1a3   : > { %9901 = vst [vmem:[#allocation112_spill] sm:$0xff] %v6956_v23  ;;  %3545 = vrot.lane.b32.xlu0 %v6869_v46, %s5518_s0  ;;  %v6975_v52 = vsel %vm2186_vm10, %v2202_v43, %v2206_v55  ;;  %v7015_v42 = vsel %vm2186_vm10, %v2206_v55, %v2202_v43  ;;  %v5196_v55 = vld [vmem:[%s5962_s24 + $0x28] sm:$0x1] }
 0x1a4   : > { %9902 = vst [vmem:[#allocation113_spill] sm:$0xff] %v6968_v63  ;;  %3715 = vperm.xlu1 %5331, %v5178_v7   ;;  %v6989_v56 = vmul.f32 %v6702_v14, %v6975_v52  ;;  %2534 = vmatpush.msra.mxu0 %v6951_v47  ;;  %v7009_v14 = vmul.f32 %v6488_v26, %v6980_v45  ;;  %v5195_v7 = vld [vmem:[%s5962_s24 + $0x20] sm:$0xff]  ;;  %s5238_s24 = smul.u32 6, %s5677_s23 }
 0x1a5   : > { %9903 = vst [vmem:[#allocation114_spill] sm:$0xff] %v6985_v21  ;;  %2661 = vmatpush.msra.mxu1 %v6956_v23  ;;  %v4670_v47 = vld [vmem:[%s7005_s20] sm:$0xff] }
 0x1a6   : > { %9904 = vst [vmem:[#allocation115_spill] sm:$0xff] %v6989_v56  ;;  %2535 = vmatpush.msra.mxu0 %v6968_v63  ;;  %v2386_v18 = vpop.permute.xlu0 %2385  ;;  %v2337_v61 = vpop.permute.xlu2 %2336 }
 0x1a7   : > { %9905 = vst [vmem:[#allocation116_spill] sm:$0xff] %v7009_v14  ;;  %4080 = vperm.xlu2 %5332, %v5201_v33   ;;  %2536 = vmatmul.f32.vlgmr.msra.gmra.mxu0 %v5120_v62  ;;  %v2389_v26 = vsel %vm2366_vm11, %v2382_v12, %v2386_v18  ;;  %v7029_v62 = vmul.f32 %v6588_v3, %v7015_v42 }
 0x1a8   : > { %5127 = vmatmul.msk.f32.gmra.mxu1 %vm1234_vm6, %v5123_v28  ;;  %9906 = vst [vmem:[#allocation117_spill] sm:$0xff] %v7020_v8  ;;  %2705 = vmatpush.msrb.mxu0 %v6985_v21  ;;  %v7043_v3 = vmul.f32 %v2389_v26, %v6745_v13 }
 0x1a9   : > { %2662 = vmatpush.msra.mxu1 %v6989_v56  ;;  %9907 = vst [vmem:[#allocation118_spill] sm:$0xff] %v7029_v62 }
 0x1aa   : > { %v2388_v33 = vpop.permute.xlu1 %2387  ;;  %2706 = vmatpush.msrb.mxu0 %v7009_v14  ;;  %9909 = vst [vmem:[#allocation120_spill] sm:$0xff] %v7043_v3 }
 0x1ab   : > { %4058 = vperm.xlu0 %5333, %v5195_v7   ;;  %v2390_v28 = vsel %vm2366_vm11, %v2384_v17, %v2388_v33  ;;  %v2392_v43 = vsel %vm2366_vm11, %v2388_v33, %v2384_v17  ;;  %v2391_v7 = vsel %vm2366_vm11, %v2386_v18, %v2382_v12 }
 0x1ac   : > { %4674 = vperm.xlu1 %5331, %v4670_v47   ;;  %v7038_v63 = vmul.f32 %v2390_v28, %v6745_v13  ;;  %v7046_v22 = vmul.f32 %v2392_v43, %v6656_v39  ;;  %2707 = vmatpush.msrb.mxu0 %v7020_v8  ;;  %v7052_v17 = vmul.f32 %v2391_v7, %v6656_v39  ;;  %v5202_v47 = vld [vmem:[%s5930_s17 + $0x28] sm:$0x1]  ;;  %v7058_v13 = vperm.slane %v6476_v1, 3  ;;  %v5337_v28 = vld [vmem:[%s9316_s2 + $0x38] ss:$0 sm:$0xff]  ;;  %s5237_s17 = smul.u32 3, %s5674_s27 }
 0x1ae   : > { %9908 = vst [vmem:[#allocation119_spill] sm:$0xff] %v7038_v63  ;;  %2663 = vmatpush.msra.mxu1 %v7038_v63  ;;  %2708 = vmatpush.msrb.mxu0 %v7029_v62  ;;  %v2331_v12 = vpop.permute.xlu0 %2330  ;;  %s7918_s30 = sadd.s32 %s5238_s24, %s5237_s17  ;;  %s5239_s24 = smul.u32 6, %s5674_s27 }
 0x1af   : > { %9910 = vst [vmem:[#allocation121_spill] sm:$0xff] %v7046_v22  ;;  %4063 = vperm.xlu2 %5332, %v5196_v55   ;;  %2539 = vmatmul.f32.gmra.mxu0 %v5122_v58  ;;  %v4671_v58 = vld [vmem:[%s7005_s20 + $0x8] sm:$0xff]  ;;  %s5072_s26 = sshll.u32 %s7918_s30, 2  ;;  %s5240_s30 = smul.u32 12, %s5677_s23 }
 0x1b0   : > { %9911 = vst [vmem:[#allocation122_spill] sm:$0xff] %v7052_v17  ;;  %2664 = vmatpush.msra.mxu1 %v7043_v3  ;;  %2709 = vmatpush.msrb.mxu0 %v7046_v22  ;;  %s7973_s17 = scalar_lea.vmem %s10128_s3, %s5072_s26  ;;  %s723_s27 = sand.u32 1, %s5477_s19  }
 0x1b1   : > { %9912 = vst [vmem:[#allocation123_spill] sm:$0xff] %v7058_v13  ;;  %s755_s26 = sadd.s32 %s5240_s30, %s5239_s24  ;;  %s5066_s1 = sshll.u32 %s723_s27, 5 }
 0x1b2   : > { %v2333_v18 = vpop.permute.xlu1 %2332  ;;  %2665 = vmatpush.msra.mxu1 %v6720_v54  ;;  %2710 = vmatpush.msrb.mxu0 %v7052_v17  ;;  %s5073_s0 = sshll.u32 %s755_s26, 3  ;;  %s8256_s24 = scalar_lea.vmem [#allocation5], %s5066_s1 }
 0x1b3   : > { %4085 = vperm.xlu0 %5333, %v5202_v47   ;;  %v2339_v39 = vsel %vm2315_vm12, %v2333_v18, %v2337_v61  ;;  %v2341_v26 = vsel %vm2315_vm12, %v2337_v61, %v2333_v18  ;;  %v2290_v61 = vpop.permute.xlu2 %2289  ;;  %s8153_s3 = scalar_lea.vmem %s9318_s4, %s5073_s0  ;;  %s10489_s26 = sld [smem:[#allocation195_spill]] }
 0x1b4   : > { %v7069_v33 = vmul.f32 %v2341_v26, %v6828_v6  ;;  %2666 = vmatpush.msra.mxu1 %v6748_v25  ;;  %v7073_v1 = vmul.f32 %v2339_v39, %v7058_v13  ;;  %2711 = vmatpush.msrb.mxu0 %v6802_v30  ;;  %v7091_v26 = vpop.f32.mrf.mxu1 }
 0x1b6   : > { %9913 = vst [vmem:[#allocation124_spill] sm:$0xff] %v7069_v33  ;;  %2667 = vmatpush.msra.mxu1 %v7069_v33  ;;  %2712 = vmatpush.msrb.mxu0 %v6869_v46  ;;  %v2294_v43 = vpop.permute.xlu0 %2293 }
 0x1b7   : > { %9914 = vst [vmem:[#allocation125_spill] sm:$0xff] %v7073_v1  ;;  %4679 = vperm.xlu2 %5332, %v4671_v58   ;;  %v2296_v55 = vsel %vm2272_vm13, %v2290_v61, %v2294_v43  ;;  %v2298_v7 = vsel %vm2272_vm13, %v2294_v43, %v2290_v61 }
 0x1b8   : > { %v7086_v47 = vmul.f32 %v6796_v4, %v2296_v55  ;;  %v7088_v18 = vmul.f32 %v5337_v28, %v2298_v7  ;;  %2713 = vmatpush.msrb.mxu0 %v7073_v1  ;;  %v7104_v43 = vmul.f32 %v2298_v7, %v6853_v38  ;;  %v7119_v7 = vmul.f32 %v6891_v37, %v6482_v9 }
 0x1b9   : > { %v7140_v37 = vmul.f32 %v6980_v45, %v6882_v16 }
 0x1ba   : > { %9915 = vst [vmem:[#allocation126_spill] sm:$0xff] %v7086_v47  ;;  %v2335_v39 = vpop.permute.xlu1 %2334 }
 0x1bb   : > { %9916 = vst [vmem:[#allocation127_spill] sm:$0xff] %v7088_v18  ;;  %v2338_v58 = vsel %vm2315_vm12, %v2331_v12, %v2335_v39  ;;  %v2340_v32 = vsel %vm2315_vm12, %v2335_v39, %v2331_v12  ;;  %v7107_v18 = vmul.f32 %v2296_v55, %v6808_v53  ;;  %v2292_v12 = vpop.permute.xlu2 %2291 }
 0x1bc   : > { %v7098_v51 = vmul.f32 %v2340_v32, %v6828_v6  ;;  %v7101_v61 = vmul.f32 %v2338_v58, %v7058_v13  ;;  %9919 = vst [vmem:[#allocation130_spill] sm:$0xff] %v7104_v43  ;;  %v7115_v6 = vmul.f32 %v6962_v19, %v6882_v16  ;;  %v7125_v58 = vpop.f32.mrf.mxu1 }
 0x1bd   : > { %9920 = vst [vmem:[#allocation131_spill] sm:$0xff] %v7107_v18 }
 0x1be   : > { %9917 = vst [vmem:[#allocation128_spill] sm:$0xff] %v7098_v51  ;;  %2668 = vmatpush.msra.mxu1 %v7098_v51  ;;  %2714 = vmatpush.msrb.mxu0 %v7101_v61 }
 0x1bf   : > { %9918 = vst [vmem:[#allocation129_spill] sm:$0xff] %v7101_v61 }
 0x1c0   : > { %2669 = vmatpush.msra.mxu1 %v7104_v43  ;;  %2715 = vmatpush.msrb.mxu0 %v7107_v18  ;;  %9921 = vst [vmem:[#allocation132_spill] sm:$0xff] %v7115_v6 }
 0x1c1   : > { %9922 = vst [vmem:[#allocation133_spill] sm:$0xff] %v7119_v7 }
 0x1c2   : > { %9927 = vst [vmem:[#allocation138_spill] sm:$0xff] %v7140_v37 }
 0x1c3   : > { %v2288_v32 = vpop.permute.xlu1 %2287 }
 0x1c4   : > { %v2295_v55 = vsel %vm2272_vm13, %v2288_v32, %v2292_v12  ;;  %v2297_v39 = vsel %vm2272_vm13, %v2292_v12, %v2288_v32  ;;  %v7144_v12 = vmul.f32 %v6903_v50, %v6482_v9  ;;  %v7162_v50 = vmul.f32 %v7015_v42, %v6927_v29  ;;  %v7177_v45 = vpop.f32.mrf.mxu1  ;;  %v5132_v42 = vld [vmem:[%s6357_s8 + $0x30] sm:$0x1] }
 0x1c5   : > { %v7128_v13 = vmul.f32 %v2297_v39, %v6853_v38  ;;  %v7131_v47 = vmul.f32 %v2295_v55, %v6808_v53  ;;  %v7134_v19 = vmul.f32 %v6796_v4, %v2295_v55  ;;  %v7136_v27 = vmul.f32 %v5337_v28, %v2297_v39  ;;  %v7158_v38 = vpop.f32.mrf.mxu3  ;;  %v7173_v16 = vpop.permute.xlu2 %2854 }
 0x1c6   : > { %9928 = vst [vmem:[#allocation139_spill] sm:$0xff] %v7144_v12  ;;  %v7150_v53 = vmul.f32 %v6998_v57, %v6927_v29  ;;  %v7154_v4 = vmul.f32 %v6941_v35, %v6575_v41  ;;  %v7166_v9 = vmul.f32 %v6975_v52, %v6575_v41  ;;  %v7171_v35 = vmul.f32 %v5337_v28, %v6861_v2  ;;  %v5130_v29 = vld [vmem:[%s6357_s8 + $0x20] sm:$0xff] }
 0x1c7   : > { %9923 = vst [vmem:[#allocation134_spill] sm:$0xff] %v7128_v13  ;;  %2670 = vmatpush.msra.mxu1 %v7128_v13  ;;  %2716 = vmatpush.msrb.mxu0 %v7131_v47  ;;  %v7181_v57 = vmul.f32 %v5337_v28, %v6909_v5 }
 0x1c8   : > { %9924 = vst [vmem:[#allocation135_spill] sm:$0xff] %v7131_v47  ;;  %v1258_v2 = vpop.f32.mrf.mxu0 }
 0x1c9   : > { %9925 = vst [vmem:[#allocation136_spill] sm:$0xff] %v7134_v19  ;;  %2671 = vmatpush.msra.mxu1 %v7115_v6  ;;  %2717 = vmatpush.msrb.mxu0 %v7119_v7 }
 0x1ca   : > { %9926 = vst [vmem:[#allocation137_spill] sm:$0xff] %v7136_v27 }
 0x1cb   : > { %9929 = vst [vmem:[#allocation140_spill] sm:$0xff] %v7150_v53  ;;  %2672 = vmatpush.msra.mxu1 %v7140_v37  ;;  %2718 = vmatpush.msrb.mxu0 %v7144_v12 }
 0x1cc   : > { %9930 = vst [vmem:[#allocation141_spill] sm:$0xff] %v7154_v4  ;;  %v7201_v28 = vpop.f32.mrf.mxu1 }
 0x1cd   : > { %9931 = vst [vmem:[#allocation142_spill] sm:$0xff] %v7162_v50  ;;  %2673 = vmatpush.msra.mxu1 %v7150_v53  ;;  %2719 = vmatpush.msrb.mxu0 %v7154_v4  ;;  %v7185_v41 = vpop.permute.xlu1 %2876  ;;  %v7191_v5 = vpop.f32.mrf.mxu3 }
 0x1ce   : > { %9932 = vst [vmem:[#allocation143_spill] sm:$0xff] %v7166_v9 }
 0x1cf   : > { %9933 = vst [vmem:[#allocation144_spill] sm:$0xff] %v7171_v35  ;;  %2674 = vmatpush.msra.mxu1 %v7162_v50  ;;  %2720 = vmatpush.msrb.mxu0 %v7166_v9 }
 0x1d0   : > { %9934 = vst [vmem:[#allocation145_spill] sm:$0xff] %v7173_v16  ;;  %2675 = vmatmul.f32.vlgmr.msra.gmra.mxu1 %v5130_v29  ;;  %2721 = vmatmul.f32.vlgmr.msrb.gmra.mxu0 %v5130_v29 }
 0x1d1   : > { %9935 = vst [vmem:[#allocation146_spill] sm:$0xff] %v7181_v57  ;;  %2794 = vmatpush.msrb.mxu1 %v6823_v15  ;;  %2840 = vmatpush.msra.mxu0 %v7171_v35  ;;  %v7197_v52 = vpop.permute.xlu2 %2881 }
 0x1d2   : > { %9936 = vst [vmem:[#allocation147_spill] sm:$0xff] %v7185_v41 }
 0x1d3   : > { %2795 = vmatpush.msrb.mxu1 %v6923_v20  ;;  %2841 = vmatpush.msra.mxu0 %v7181_v57  ;;  %9937 = vst [vmem:[#allocation148_spill] sm:$0xff] %v7197_v52  ;;  %v9973_v57 = vld [vmem:[#allocation18_spill] sm:$0xff] }
 0x1d4   : > { %v7210_v39 = vpop.f32.mrf.mxu0 }
 0x1d5   : > { %2890 = vmatpush.msra.mxu1 %v6913_v36  ;;  %2936 = vmatpush.msrb.mxu0 %v6985_v21  ;;  %v7214_v29 = vpop.f32.mrf.mxu3  ;;  %v5117_v21 = vld [vmem:[%s6425_s6 + $0x28] sm:$0xff] }
 0x1d6   : > { %v7204_v32 = vpop.permute.xlu0 %2506 }
 0x1d7   : > { %2891 = vmatpush.msra.mxu1 %v6935_v60  ;;  %2937 = vmatpush.msrb.mxu0 %v7009_v14  ;;  %9938 = vst [vmem:[#allocation149_spill] sm:$0xff] %v7204_v32  ;;  %v7207_v55 = vpop.permute.xlu1 %2859 }
 0x1d8   : > { %9939 = vst [vmem:[#allocation150_spill] sm:$0xff] %v7207_v55  ;;  %2678 = vmatmul.f32.gmra.mxu1 %v5132_v42  ;;  %2724 = vmatmul.f32.gmra.mxu0 %v5132_v42  ;;  %v7224_v42 = vpop.f32.mrf.mxu1 }
 0x1d9   : > { %2892 = vmatpush.msra.mxu1 %v6956_v23  ;;  %2938 = vmatpush.msrb.mxu0 %v7020_v8  ;;  %v7221_v14 = vpop.permute.xlu2 %3457 }
 0x1db   : > { %2893 = vmatpush.msra.mxu1 %v6989_v56  ;;  %2939 = vmatpush.msrb.mxu0 %v7029_v62 }
 0x1dd   : > { %2894 = vmatpush.msra.mxu1 %v7038_v63  ;;  %2940 = vmatpush.msrb.mxu0 %v7046_v22  ;;  %v5119_v22 = vld [vmem:[%s6425_s6 + $0x38] sm:$0x1] }
 0x1df   : > { %2895 = vmatpush.msra.mxu1 %v7043_v3  ;;  %2941 = vmatpush.msrb.mxu0 %v7052_v17  ;;  %v1465_v62 = vpop.f32.mrf.mxu0  ;;  %v1259_v17 = vadd.f32 %v1258_v2, %v6429_v0 }
 0x1e0   : > { %5138 = vmatmul.msk.f32.vlgmr.msrb.gmra.mxu1 %vm1234_vm6, %v5117_v21  ;;  %5140 = vmatmul.msk.f32.vlgmr.msra.gmra.mxu0 %vm1234_vm6, %v5117_v21  ;;  %v7243_v21 = vld [vmem:[%s9316_s2 + $0x40] sm:$0xff] }
 0x1e1   : > { %2896 = vmatpush.msra.mxu1 %v6720_v54  ;;  %2942 = vmatpush.msrb.mxu0 %v6802_v30  ;;  %v7228_v8 = vpop.permute.xlu0 %2511  ;;  %v1304_v30 = vpop.f32.mrf.mxu2  ;;  %v7263_v2 = vperm.slane %v7243_v21, 7  ;;  %v7272_v60 = vadd.f32 %v7091_v26, %v1259_v17  ;;  %v5144_v17 = vld [vmem:[%s6763_s7 + $0x20] sm:$0xff]  ;;  %v7297_v52 = vperm.slane %v7243_v21, 6  ;;  %v7324_v55 = vperm.slane %v7243_v21, 0 }
 0x1e2   : > { %9940 = vst [vmem:[#allocation151_spill] sm:$0xff] %v7228_v8  ;;  %v3464_v54 = vpop.permute.xlu1 %3463 }
 0x1e3   : > { %2897 = vmatpush.msra.mxu1 %v6748_v25  ;;  %2943 = vmatpush.msrb.mxu0 %v6869_v46  ;;  %9941 = vst [vmem:[#allocation152_spill] sm:$0xff] %v7263_v2  ;;  %v1755_v3 = vperm.slane %v7272_v60, 1  ;;  %v9963_v41 = vperm.slane %v7272_v60, 4  ;;  %v9970_v27 = vperm.slane %v7272_v60, 6 }
 0x1e4   : > { %9946 = vst [vmem:[#allocation157_spill] sm:$0xff] %v7297_v52 }
 0x1e5   : > { %2898 = vmatpush.msra.mxu1 %v7069_v33  ;;  %2944 = vmatpush.msrb.mxu0 %v7073_v1  ;;  %v7235_v25 = vpop.f32.mrf.mxu3  ;;  %v7249_v1 = vpop.permute.xlu2 %3486  ;;  %v7373_v8 = vmul.f32 %v1755_v3, %v9853_v49  ;;  %v7397_v16 = vmul.f32 %v6706_v34, %v9963_v41 }
 0x1e7   : > { %2899 = vmatpush.msra.mxu1 %v7098_v51  ;;  %2945 = vmatpush.msrb.mxu0 %v7101_v61  ;;  %v7257_v61 = vld [vmem:[%s9316_s2 + $0x48] sm:$0xff]  ;;  %9964 = vst [vmem:[#allocation172_spill] sm:$0xff] %v7397_v16 }
 0x1e8   : > { %5139 = vmatmul.msk.f32.gmra.mxu1 %vm1234_vm6, %v5119_v22  ;;  %5141 = vmatmul.msk.f32.gmra.mxu0 %vm1234_vm6, %v5119_v22  ;;  %v7275_v36 = vperm.slane %v7257_v61, 6  ;;  %v7327_v33 = vperm.slane %v7257_v61, 0 }
 0x1e9   : > { %2900 = vmatpush.msra.mxu1 %v7104_v43  ;;  %2946 = vmatpush.msrb.mxu0 %v7107_v18  ;;  %v7259_v18 = vpop.f32.mrf.mxu1  ;;  %v7294_v26 = vpop.f32.mrf.mxu2  ;;  %v1420_v43 = vadd.f32 %v7214_v29, %v7177_v45 }
 0x1ea   : > { %v7268_v22 = vpop.f32.mrf.mxu0  ;;  %9943 = vst [vmem:[#allocation154_spill] sm:$0xff] %v7275_v36 }
 0x1eb   : > { %2901 = vmatpush.msra.mxu1 %v7128_v13  ;;  %2947 = vmatpush.msrb.mxu0 %v7131_v47  ;;  %v7266_v47 = vperm.slane %v7257_v61, 3  ;;  %9951 = vst [vmem:[#allocation162_spill] sm:$0xff] %v7327_v33 }
 0x1ec   : > { %v3460_v20 = vpop.permute.xlu0 %3459 }
 0x1ed   : > { %2902 = vmatpush.msra.mxu1 %v7115_v6  ;;  %2948 = vmatpush.msrb.mxu0 %v7119_v7  ;;  %9942 = vst [vmem:[#allocation153_spill] sm:$0xff] %v7266_v47  ;;  %v7279_v7 = vsel %vm3465_vm14, %v3460_v20, %v3464_v54  ;;  %v7281_v15 = vpop.permute.xlu1 %3482  ;;  %v7286_v23 = vsel %vm3465_vm14, %v3464_v54, %v3460_v20 }
 0x1ee   : > { %9944 = vst [vmem:[#allocation155_spill] sm:$0xff] %v7286_v23  ;;  %v7290_v56 = vmul.f32 %v7266_v47, %v7279_v7  ;;  %v7301_v63 = vmul.f32 %v7275_v36, %v7286_v23  ;;  %v7307_v20 = vsel %vm3465_vm14, %v7281_v15, %v7249_v1  ;;  %v7312_v54 = vmul.f32 %v6643_v40, %v7263_v2 }
 0x1ef   : > { %2903 = vmatpush.msra.mxu1 %v7140_v37  ;;  %2949 = vmatpush.msrb.mxu0 %v7144_v12  ;;  %9948 = vst [vmem:[#allocation159_spill] sm:$0xff] %v7307_v20  ;;  %v1717_v12 = vperm.slane %v7272_v60, 0 }
 0x1f0   : > { %9945 = vst [vmem:[#allocation156_spill] sm:$0xff] %v7290_v56 }
 0x1f1   : > { %2904 = vmatpush.msra.mxu1 %v7150_v53  ;;  %9947 = vst [vmem:[#allocation158_spill] sm:$0xff] %v7301_v63  ;;  %2950 = vmatpush.msrb.mxu0 %v7154_v4  ;;  %v1442_v56 = vpop.f32.mrf.mxu3  ;;  %v7320_v63 = vmul.f32 %v6767_v59, %v7263_v2  ;;  %v1305_v4 = vadd.f32 %v1304_v30, %v6429_v0  ;;  %v7337_v0 = vpop.permute.xlu2 %3480  ;;  %v5146_v53 = vld [vmem:[%s6763_s7 + $0x30] sm:$0x1]  ;;  %v7431_v2 = vperm.slane %v7257_v61, 2 }
 0x1f2   : > { %9949 = vst [vmem:[#allocation160_spill] sm:$0xff] %v7312_v54  ;;  %v1466_v13 = vadd.f32 %v1465_v62, %v1442_v56  ;;  %v7344_v45 = vmul.f32 %v1717_v12, %v6414_v44  ;;  %v7347_v29 = vmul.f32 %v1717_v12, %v6348_v11  ;;  %v7350_v56 = vmul.f32 %v1755_v3, %v6312_v48 }
 0x1f3   : > { %2905 = vmatpush.msra.mxu1 %v7162_v50  ;;  %2951 = vmatpush.msrb.mxu0 %v7166_v9  ;;  %9950 = vst [vmem:[#allocation161_spill] sm:$0xff] %v7320_v63  ;;  %v7334_v9 = vmul.f32 %v7297_v52, %v7279_v7  ;;  %v7359_v51 = vadd.f32 %v7158_v38, %v1305_v4  ;;  %v9961_v3 = vperm.slane %v7272_v60, 3 }
 0x1f4   : > { %2906 = vmatmul.f32.vlgmr.msra.gmra.mxu1 %v5144_v17  ;;  %2952 = vmatmul.f32.vlgmr.msrb.gmra.mxu0 %v5144_v17  ;;  %9953 = vst [vmem:[#allocation164_spill] sm:$0xff] %v7344_v45  ;;  %v1563_v17 = vpop.f32.mrf.mxu1 }
 0x1f5   : > { %9952 = vst [vmem:[#allocation163_spill] sm:$0xff] %v7334_v9  ;;  %3724 = vmatpush.msra.mxu0 %v7312_v54  ;;  %v3462_v30 = vpop.permute.xlu0 %3461  ;;  %v7392_v50 = vmul.f32 %v9961_v3, %v6092_v24  ;;  %v9969_v3 = vld [vmem:[#allocation23_spill] sm:$0xff]  ;;  %v1718_v41 = vperm.slane %v7359_v51, 0  ;;  %v1908_v48 = vperm.slane %v7359_v51, 5 }
 0x1f6   : > { %9954 = vst [vmem:[#allocation165_spill] sm:$0xff] %v7350_v56  ;;  %v7355_v62 = vsel %vm3465_vm14, %v7221_v14, %v3462_v30  ;;  %v3525_v6 = vpop.permute.xlu1 %3524  ;;  %v7364_v37 = vsel %vm3465_vm14, %v3462_v30, %v7221_v14  ;;  %v7411_v19 = vmul.f32 %v9970_v27, %v9969_v3  ;;  %v9977_v27 = vld [vmem:[#allocation77_spill] sm:$0xff] }
 0x1f7   : > { %3725 = vmatpush.msra.mxu0 %v7320_v63  ;;  %9955 = vst [vmem:[#allocation166_spill] sm:$0xff] %v7364_v37  ;;  %v7368_v12 = vmul.f32 %v7266_v47, %v7355_v62  ;;  %v1540_v54 = vpop.f32.mrf.mxu0  ;;  %v7377_v4 = vmul.f32 %v7297_v52, %v7355_v62  ;;  %v7381_v14 = vmul.f32 %v7275_v36, %v7364_v37  ;;  %v1494_v30 = vpop.f32.mrf.mxu2  ;;  %v9959_v63 = vperm.slane %v7272_v60, 2 }
 0x1f8   : > { %v1541_v38 = vadd.f32 %v1540_v54, %v1466_v13  ;;  %9962 = vst [vmem:[#allocation171_spill] sm:$0xff] %v7392_v50  ;;  %v9966_v13 = vperm.slane %v7272_v60, 5  ;;  %v1495_v32 = vadd.f32 %v1494_v30, %v1420_v43  ;;  %v9976_v30 = vld [vmem:[#allocation78_spill] sm:$0xff]  ;;  %v1794_v52 = vperm.slane %v7359_v51, 2 }
 0x1f9   : > { %9956 = vst [vmem:[#allocation167_spill] sm:$0xff] %v7368_v12  ;;  %3726 = vmatpush.msra.mxu0 %v7334_v9  ;;  %v7387_v12 = vmul.f32 %v9959_v63, %v6189_v31  ;;  %v7405_v9 = vperm.slane %v7243_v21, 3  ;;  %v3523_v44 = vpop.permute.xlu2 %3522 }
 0x1fa   : > { %9957 = vst [vmem:[#allocation168_spill] sm:$0xff] %v7377_v4  ;;  %v1564_v63 = vadd.f32 %v1563_v17, %v1541_v38  ;;  %v9974_v17 = vperm.slane %v7272_v60, 7  ;;  %v1756_v38 = vperm.slane %v7359_v51, 1  ;;  %v1518_v56 = vadd.f32 %v7224_v42, %v1495_v32 }
 0x1fb   : > { %9958 = vst [vmem:[#allocation169_spill] sm:$0xff] %v7381_v14  ;;  %v9965_v14 = vld [vmem:[#allocation29_spill] sm:$0xff]  ;;  %3727 = vmatpush.msra.mxu0 %v7377_v4  ;;  %v1262_v4 = vadd.f32 %v7210_v39, %v9976_v30  ;;  %v7540_v36 = vmul.f32 %v7405_v9, %v7364_v37 }
 0x1fc   : > { %9960 = vst [vmem:[#allocation170_spill] sm:$0xff] %v7387_v12  ;;  %v7402_v54 = vmul.f32 %v9966_v13, %v9965_v14  ;;  %2909 = vmatmul.f32.gmra.mxu1 %v5146_v53  ;;  %v7416_v13 = vperm.slane %v7243_v21, 5  ;;  %2955 = vmatmul.f32.gmra.mxu0 %v5146_v53  ;;  %v7421_v43 = vmul.f32 %v9974_v17, %v9973_v57  ;;  %v7434_v53 = vperm.slane %v7257_v61, 5 }
 0x1fd   : > { %9968 = vst [vmem:[#allocation173_spill] sm:$0xff] %v7405_v9  ;;  %v7427_v35 = vadd.f32 %v9977_v27, %v1564_v63  ;;  %v3521_v33 = vpop.permute.xlu0 %3520  ;;  %v1832_v17 = vperm.slane %v7359_v51, 3  ;;  %v7491_v12 = vadd.f32 %v7125_v58, %v1262_v4  ;;  %v9995_v58 = vld [vmem:[#allocation60_spill] sm:$0xff] }
 0x1fe   : > { %9967 = vst [vmem:[#allocation29_spill] sm:$0xff] %v7402_v54  ;;  %v7441_v39 = vsel %vm3526_vm15, %v3521_v33, %v3525_v6  ;;  %v7445_v63 = vsel %vm3526_vm15, %v3525_v6, %v3521_v33  ;;  %v3519_v42 = vpop.permute.xlu1 %3518  ;;  %v9985_v6 = vld [vmem:[#allocation74_spill] sm:$0xff]  ;;  %v7507_v4 = vmul.f32 %v1756_v38, %v9995_v58 }
 0x1ff   : > { %9971 = vst [vmem:[#allocation23_spill] sm:$0xff] %v7411_v19  ;;  %v1445_v19 = vpop.f32.mrf.mxu3  ;;  %v7450_v54 = vmul.f32 %v7431_v2, %v7441_v39  ;;  %v7454_v47 = vmul.f32 %v7416_v13, %v7441_v39  ;;  %v7458_v32 = vmul.f32 %v7434_v53, %v7445_v63  ;;  %v7462_v20 = vmul.f32 %v1718_v41, %v9985_v6  ;;  %v1566_v6 = vpop.f32.mrf.mxu1 }
 0x200   : > { %9972 = vst [vmem:[#allocation174_spill] sm:$0xff] %v7416_v13  ;;  %v7466_v45 = vsel %vm3526_vm15, %v3519_v42, %v3523_v44  ;;  %v1469_v50 = vadd.f32 %v7268_v22, %v1445_v19  ;;  %v9994_v19 = vperm.slane %v7427_v35, 0 }
 0x201   : > { %9975 = vst [vmem:[#allocation18_spill] sm:$0xff] %v7421_v43  ;;  %v1870_v43 = vperm.slane %v7359_v51, 4  ;;  %v7475_v16 = vmul.f32 %v7431_v2, %v7466_v45  ;;  %v7479_v33 = vmul.f32 %v7416_v13, %v7466_v45  ;;  %3728 = vmatpush.msra.mxu0 %v7454_v47  ;;  %v9993_v13 = vld [vmem:[#allocation65_spill] sm:$0xff] }
 0x202   : > { %9978 = vst [vmem:[#allocation78_spill] sm:$0xff] %v7431_v2  ;;  %v7496_v2 = vmul.f32 %v1756_v38, %v9993_v13  ;;  %v9997_v13 = vld [vmem:[#allocation52_spill] sm:$0xff] }
 0x203   : > { %9979 = vst [vmem:[#allocation77_spill] sm:$0xff] %v7434_v53  ;;  %3729 = vmatpush.msra.mxu0 %v7479_v33 }
 0x204   : > { %9980 = vst [vmem:[#allocation175_spill] sm:$0xff] %v7441_v39  ;;  %v1946_v39 = vperm.slane %v7359_v51, 6 }
 0x205   : > { %9981 = vst [vmem:[#allocation176_spill] sm:$0xff] %v7445_v63  ;;  %3730 = vmatpush.msra.mxu0 %v6706_v34 }
 0x206   : > { %9982 = vst [vmem:[#allocation177_spill] sm:$0xff] %v7450_v54  ;;  %v7470_v54 = vsel %vm3526_vm15, %v3523_v44, %v3519_v42  ;;  %v9991_v44 = vld [vmem:[#allocation69_spill] sm:$0xff] }
 0x207   : > { %9983 = vst [vmem:[#allocation178_spill] sm:$0xff] %v7454_v47  ;;  %v7488_v42 = vmul.f32 %v1718_v41, %v9991_v44  ;;  %v1712_v22 = vmul.f32 %v9994_v19, %v9991_v44  ;;  %v9588_v41 = vperm.slane %v7427_v35, 1  ;;  %v7521_v44 = vmul.f32 %v7405_v9, %v7286_v23 }
 0x208   : > { %9984 = vst [vmem:[#allocation179_spill] sm:$0xff] %v7458_v32  ;;  %v7483_v32 = vmul.f32 %v7434_v53, %v7470_v54  ;;  %v7514_v53 = vmul.f32 %v1794_v52, %v9997_v13  ;;  %v7524_v19 = vperm.slane %v7243_v21, 2  ;;  %v7536_v23 = vmul.f32 %v6767_v59, %v1870_v43 }
 0x209   : > { %9986 = vst [vmem:[#allocation180_spill] sm:$0xff] %v7466_v45  ;;  %v1543_v45 = vpop.f32.mrf.mxu0  ;;  %v7550_v59 = vmul.f32 %v6643_v40, %v1870_v43 }
 0x20a   : > { %9987 = vst [vmem:[#allocation181_spill] sm:$0xff] %v7470_v54  ;;  %v1544_v38 = vadd.f32 %v1543_v45, %v1469_v50 }
 0x20b   : > { %9988 = vst [vmem:[#allocation182_spill] sm:$0xff] %v7475_v16  ;;  %v1308_v16 = vadd.f32 %v7294_v26, %v9976_v30  ;;  %v9996_v30 = vld [vmem:[#allocation58_spill] sm:$0xff]  ;;  %v1750_v26 = vmul.f32 %v9588_v41, %v9995_v58 }
 0x20c   : > { %9989 = vst [vmem:[#allocation183_spill] sm:$0xff] %v7479_v33  ;;  %v7511_v47 = vmul.f32 %v1794_v52, %v9996_v30  ;;  %v10003_v41 = vld [vmem:[#allocation94_spill] sm:$0xff]  ;;  %v1984_v52 = vperm.slane %v7359_v51, 7  ;;  %v10006_v51 = vld [vmem:[#allocation33_spill] sm:$0xff] }
 0x20d   : > { %9990 = vst [vmem:[#allocation184_spill] sm:$0xff] %v7483_v32  ;;  %v7499_v32 = vadd.f32 %v9977_v27, %v1518_v56  ;;  %v9998_v56 = vld [vmem:[#allocation51_spill] sm:$0xff]  ;;  %v1331_v33 = vadd.f32 %v7191_v5, %v1308_v16  ;;  %v1754_v50 = vadd.f32 %v1750_v26, %v1712_v22  ;;  %3731 = vmatpush.msra.mxu0 %v10003_v41  ;;  %v10004_v16 = vperm.slane %v7427_v35, 2 }
 0x20e   : > { %9992 = vst [vmem:[#allocation69_spill] sm:$0xff] %v7491_v12  ;;  %v7517_v27 = vmul.f32 %v1832_v17, %v9998_v56  ;;  %v10001_v56 = vld [vmem:[#allocation43_spill] sm:$0xff]  ;;  %v7555_v22 = vmul.f32 %v7524_v19, %v7445_v63  ;;  %v1567_v26 = vadd.f32 %v1566_v6, %v1544_v38  ;;  %v7566_v37 = vmul.f32 %v1908_v48, %v10006_v51  ;;  %v10007_v63 = vld [vmem:[#allocation30_spill] sm:$0xff] }
 0x20f   : > { %9999 = vst [vmem:[#allocation60_spill] sm:$0xff] %v7521_v44  ;;  %v7533_v30 = vmul.f32 %v1832_v17, %v10001_v56  ;;  %v9594_v45 = vperm.slane %v7499_v32, 0  ;;  %v9593_v58 = vperm.slane %v7499_v32, 1  ;;  %v1788_v5 = vmul.f32 %v10004_v16, %v9997_v13  ;;  %3732 = vmatpush.msra.mxu0 %v7521_v44  ;;  %v1497_v17 = vpop.f32.mrf.mxu2  ;;  %v10017_v12 = vld [vmem:[#allocation22_spill] sm:$0xff] }
 0x210   : > { %10000 = vst [vmem:[#allocation52_spill] sm:$0xff] %v7524_v19  ;;  %v7569_v9 = vmul.f32 %v1908_v48, %v10007_v63  ;;  %v2014_v6 = vperm.slane %v1331_v33, 0  ;;  %v7575_v38 = vmul.f32 %v7524_v19, %v7470_v54  ;;  %v10014_v33 = vld [vmem:[#allocation24_spill] sm:$0xff]  ;;  %v7595_v51 = vmul.f32 %v1984_v52, %v10017_v12 }
 0x211   : > { %10002 = vst [vmem:[#allocation43_spill] sm:$0xff] %v7540_v36  ;;  %v1711_v41 = vmul.f32 %v9594_v45, %v6348_v11  ;;  %v1749_v13 = vmul.f32 %v9593_v58, %v9853_v49  ;;  %v1792_v16 = vadd.f32 %v1788_v5, %v1754_v50  ;;  %v1423_v11 = vadd.f32 %v7235_v25, %v7201_v28  ;;  %v3485_v50 = vpop.permute.xlu0 %3484  ;;  %v1670_v5 = vpop.f32.mrf.mxu1  ;;  %v10012_v28 = vld [vmem:[#allocation28_spill] sm:$0xff] }
 0x212   : > { %10005 = vst [vmem:[#allocation94_spill] sm:$0xff] %v7555_v22  ;;  %3733 = vmatpush.msra.mxu0 %v7540_v36  ;;  %v10010_v58 = vperm.slane %v7427_v35, 3  ;;  %v7585_v48 = vsel %vm3465_vm14, %v7337_v0, %v3485_v50  ;;  %v7588_v25 = vmul.f32 %v1946_v39, %v10012_v28  ;;  %v7591_v43 = vmul.f32 %v1946_v39, %v10014_v33  ;;  %v10016_v49 = vld [vmem:[#allocation68_spill] sm:$0xff]  ;;  %v1693_v36 = vpop.f32.mrf.mxu0  ;;  %v10019_v28 = vld [vmem:[#allocation66_spill] sm:$0xff] }
 0x213   : > { %10008 = vst [vmem:[#allocation30_spill] sm:$0xff] %v7569_v9  ;;  %v1584_v44 = vadd.f32 %v10016_v49, %v1567_v26  ;;  %v1498_v54 = vadd.f32 %v1497_v17, %v1423_v11  ;;  %v1753_v19 = vadd.f32 %v1749_v13, %v1711_v41  ;;  %v10020_v9 = vld [vmem:[#allocation19_spill] sm:$0xff]  ;;  %v10022_v41 = vperm.slane %v7499_v32, 2 }
 0x214   : > { %10009 = vst [vmem:[#allocation185_spill] sm:$0xff] %v7575_v38  ;;  %v1826_v45 = vmul.f32 %v10010_v58, %v10001_v56  ;;  %3734 = vmatpush.msra.mxu0 %v7555_v22  ;;  %v10018_v58 = vperm.slane %v7427_v35, 4  ;;  %v7603_v39 = vmul.f32 %v1984_v52, %v10020_v9  ;;  %v7619_v52 = vmul.f32 %v7324_v55, %v7279_v7 }
 0x215   : > { %10011 = vst [vmem:[#allocation186_spill] sm:$0xff] %v7585_v48  ;;  %v1787_v13 = vmul.f32 %v10022_v41, %v6189_v31  ;;  %v2004_v17 = vperm.slane %v1584_v44, 0  ;;  %v1521_v31 = vadd.f32 %v7259_v18, %v1498_v54  ;;  %v10026_v11 = vperm.slane %v7272_v60, 2 }
 0x216   : > { %10013 = vst [vmem:[#allocation187_spill] sm:$0xff] %v7588_v25  ;;  %v1830_v56 = vadd.f32 %v1826_v45, %v1792_v16  ;;  %v1864_v48 = vmul.f32 %v6643_v40, %v10018_v58  ;;  %v1671_v25 = vadd.f32 %v1670_v5, %v10019_v28  ;;  %3735 = vmatpush.msra.mxu0 %v7575_v38  ;;  %v10023_v16 = vld [vmem:[#allocation35_spill] sm:$0xff]  ;;  %v10025_v38 = vld [vmem:[#allocation57_spill] sm:$0xff]  ;;  %v10028_v18 = vperm.slane %v7427_v35, 5 }
 0x217   : > { %10015 = vst [vmem:[#allocation24_spill] sm:$0xff] %v7591_v43  ;;  %v10021_v43 = vld [vmem:[#allocation37_spill] sm:$0xff]  ;;  %v7615_v40 = vmul.f32 %v2014_v6, %v10023_v16  ;;  %v1791_v41 = vadd.f32 %v1787_v13, %v1753_v19  ;;  %v7640_v44 = vmul.f32 %v7324_v55, %v7355_v62  ;;  %v10033_v22 = vperm.slane %v7427_v35, 7 }
 0x218   : > { %v7606_v26 = vmul.f32 %v2014_v6, %v10021_v43  ;;  %10024 = vst [vmem:[#allocation68_spill] sm:$0xff] %v7619_v52  ;;  %v7622_v5 = vadd.f32 %v1693_v36, %v1671_v25  ;;  %v7630_v6 = vsel %vm3465_vm14, %v7249_v1, %v7281_v15  ;;  %v1868_v45 = vadd.f32 %v1864_v48, %v1830_v56  ;;  %v10031_v56 = vld [vmem:[#allocation85_spill] sm:$0xff] }
 0x219   : > { %v7636_v36 = vmul.f32 %v10026_v11, %v10025_v38  ;;  %10027 = vst [vmem:[#allocation22_spill] sm:$0xff] %v7640_v44  ;;  %v1902_v54 = vmul.f32 %v10028_v18, %v10007_v63  ;;  %v10029_v15 = vperm.slane %v7499_v32, 3  ;;  %v10030_v48 = vperm.slane %v7427_v35, 6  ;;  %v10032_v11 = vld [vmem:[#allocation84_spill] sm:$0xff] }
 0x21a   : > { %v1728_v7 = vperm.slane %v7622_v5, 0  ;;  %v1766_v62 = vperm.slane %v7622_v5, 1  ;;  %v1978_v63 = vmul.f32 %v10033_v22, %v10020_v9  ;;  %v7659_v18 = vmul.f32 %v2004_v17, %v10021_v43 }
 0x21b   : > { %v1825_v1 = vmul.f32 %v10029_v15, %v6092_v24  ;;  %v1940_v25 = vmul.f32 %v10030_v48, %v10014_v33  ;;  %v7662_v24 = vadd.f32 %v10016_v49, %v1521_v31  ;;  %v1906_v19 = vadd.f32 %v1902_v54, %v1868_v45  ;;  %v10035_v49 = vld [vmem:[#allocation62_spill] sm:$0xff] }
 0x21c   : > { %v1730_v13 = vmul.f32 %v1728_v7, %v10031_v56  ;;  %v1732_v58 = vmul.f32 %v1728_v7, %v10032_v11  ;;  %v9612_v33 = vperm.slane %v7499_v32, 5  ;;  %v10034_v56 = vperm.slane %v7499_v32, 4 }
 0x21d   : > { %v1829_v15 = vadd.f32 %v1825_v1, %v1791_v41  ;;  %v9611_v9 = vperm.slane %v7499_v32, 6  ;;  %v9610_v22 = vperm.slane %v7499_v32, 7  ;;  %v1804_v43 = vperm.slane %v7622_v5, 2  ;;  %v10036_v41 = vld [vmem:[#allocation56_spill] sm:$0xff] }
 0x21e   : > { %v1734_v48 = vadd.f32 %v1730_v13, %v7462_v20  ;;  %v1736_v7 = vadd.f32 %v1732_v58, %v7488_v42  ;;  %v1863_v11 = vmul.f32 %v6706_v34, %v10034_v56  ;;  %v1768_v31 = vmul.f32 %v1766_v62, %v10035_v49  ;;  %v1624_v13 = vpop.f32.mrf.mxu3  ;;  %v1673_v49 = vpop.f32.mrf.mxu1 }
 0x21f   : > { %v1770_v45 = vmul.f32 %v1766_v62, %v10036_v41  ;;  %v2008_v42 = vmul.f32 %v2004_v17, %v10023_v16  ;;  %v9609_v1 = vperm.slane %v7662_v24, 0  ;;  %v7682_v34 = vsel %vm3465_vm14, %v3485_v50, %v7337_v0  ;;  %v10037_v16 = vld [vmem:[#allocation54_spill] sm:$0xff]  ;;  %v10040_v41 = vld [vmem:[#allocation80_spill] sm:$0xff] }
 0x220   : > { %v1762_v54 = vadd.f32 %v7496_v2, %v1734_v48  ;;  %v1764_v20 = vadd.f32 %v7507_v4, %v1736_v7  ;;  %v1867_v58 = vadd.f32 %v1863_v11, %v1829_v15  ;;  %v1944_v56 = vadd.f32 %v1940_v25, %v1906_v19  ;;  %v1647_v19 = vpop.f32.mrf.mxu2  ;;  %v10038_v15 = vld [vmem:[#allocation48_spill] sm:$0xff] }
 0x221   : > { %v1901_v62 = vmul.f32 %v9612_v33, %v9965_v14  ;;  %v1939_v4 = vmul.f32 %v9611_v9, %v9969_v3  ;;  %v1977_v17 = vmul.f32 %v9610_v22, %v9973_v57  ;;  %v1806_v0 = vmul.f32 %v1804_v43, %v10037_v16  ;;  %v10057_v22 = vld [vmem:[#allocation20_spill] sm:$0xff]  ;;  %v10058_v33 = vld [vmem:[#allocation154_spill] sm:$0xff] }
 0x222   : > { %v1772_v2 = vadd.f32 %v1768_v31, %v1762_v54  ;;  %v1774_v48 = vadd.f32 %v1770_v45, %v1764_v20  ;;  %v1842_v50 = vperm.slane %v7622_v5, 3  ;;  %v1808_v7 = vmul.f32 %v1804_v43, %v10038_v15  ;;  %v10039_v31 = vld [vmem:[#allocation34_spill] sm:$0xff]  ;;  %v10041_v43 = vld [vmem:[#allocation45_spill] sm:$0xff] }
 0x223   : > { %v1625_v11 = vadd.f32 %v1624_v13, %v10019_v28  ;;  %v1905_v3 = vadd.f32 %v1901_v62, %v1867_v58  ;;  %v7702_v57 = vmul.f32 %v9609_v1, %v10039_v31  ;;  %v1674_v45 = vadd.f32 %v1673_v49, %v10040_v41  ;;  %v7713_v58 = vld [vmem:[%s5703_s15 + $0x18] sm:$0xff]  ;;  %v7720_v62 = vld [vmem:[%s5703_s15 + $0x8] sm:$0xff]  ;;  %v7782_v1 = vld [vmem:[%s5684_s14] sm:$0xff] }
 0x224   : > { %v1800_v25 = vadd.f32 %v7511_v47, %v1772_v2  ;;  %v1802_v14 = vadd.f32 %v7514_v53, %v1774_v48  ;;  %v7706_v54 = vperm.slane %v7243_v21, 1  ;;  %v1982_v20 = vadd.f32 %v1978_v63, %v1944_v56  ;;  %v3548_v48 = vpop.permute.xlu1 %3547  ;;  %v3544_v63 = vpop.permute.xlu0 %3543 }
 0x225   : > { %v7708_v53 = vadd.f32 %v1647_v19, %v1625_v11  ;;  %v1844_v16 = vmul.f32 %v1842_v50, %v10041_v43  ;;  %v1880_v28 = vperm.slane %v7622_v5, 4  ;;  %v1696_v56 = vpop.f32.mrf.mxu0  ;;  %v10044_v19 = vld [vmem:[#allocation39_spill] sm:$0xff]  ;;  %v1943_v15 = vadd.f32 %v1939_v4, %v1905_v3 }
 0x226   : > { %v1810_v47 = vadd.f32 %v1806_v0, %v1800_v25  ;;  %v1812_v2 = vadd.f32 %v1808_v7, %v1802_v14  ;;  %v7717_v13 = vmul.f32 %v7713_v58, %v7706_v54  ;;  %v7724_v21 = vmul.f32 %v7720_v62, %v7706_v54 }
 0x227   : > { %v1846_v25 = vmul.f32 %v1842_v50, %v10044_v19  ;;  %v9614_v14 = vperm.slane %v7708_v53, 0  ;;  %v7732_v7 = vsel %vm3526_vm15, %v3544_v63, %v3548_v48  ;;  %v7736_v11 = vsel %vm3526_vm15, %v3548_v48, %v3544_v63  ;;  %v10048_v50 = vld [vmem:[#allocation63_spill] sm:$0xff] }
 0x228   : > { %10042 = vst [vmem:[#allocation66_spill] sm:$0xff] %v7717_v13  ;;  %v1838_v49 = vadd.f32 %v7517_v27, %v1810_v47  ;;  %v1840_v0 = vadd.f32 %v7533_v30, %v1812_v2  ;;  %3736 = vmatpush.msra.mxu0 %v7717_v13  ;;  %v7740_v27 = vperm.slane %v7257_v61, 7  ;;  %v9613_v3 = vperm.slane %v7708_v53, 1 }
 0x229   : > { %10043 = vst [vmem:[#allocation19_spill] sm:$0xff] %v7724_v21  ;;  %v1731_v4 = vmul.f32 %v9614_v14, %v10048_v50  ;;  %v7746_v2 = vadd.f32 %v2008_v42, %v1982_v20  ;;  %v7748_v43 = vadd.f32 %v1696_v56, %v1674_v45  ;;  %v1882_v48 = vmul.f32 %v6869_v46, %v1880_v28  ;;  %v5173_v20 = vld [vmem:[%s6206_s29 + $0x40] sm:$0xff]  ;;  %v7767_v56 = vld [vmem:[%s5684_s14 + $0x10] sm:$0xff] }
 0x22a   : > { %10045 = vst [vmem:[#allocation37_spill] sm:$0xff] %v7732_v7  ;;  %v1848_v30 = vadd.f32 %v1844_v16, %v1838_v49  ;;  %v1850_v47 = vadd.f32 %v1846_v25, %v1840_v0  ;;  %v1918_v63 = vperm.slane %v7622_v5, 5  ;;  %3737 = vmatpush.msra.mxu0 %v7724_v21  ;;  %v7756_v0 = vld [vmem:[%s5684_s14 + $0x18] sm:$0xff]  ;;  %v7760_v42 = vadd.f32 %v1977_v17, %v1943_v15  ;;  %v10052_v15 = vld [vmem:[#allocation31_spill] sm:$0xff] }
 0x22b   : > { %10046 = vst [vmem:[#allocation35_spill] sm:$0xff] %v7736_v11  ;;  %v1884_v19 = vmul.f32 %v7756_v0, %v1880_v28  ;;  %v1735_v25 = vadd.f32 %v1731_v4, %v7347_v29  ;;  %v1956_v45 = vperm.slane %v7622_v5, 6  ;;  %v9615_v46 = vperm.slane %v7708_v53, 2 }
 0x22c   : > { %10047 = vst [vmem:[#allocation57_spill] sm:$0xff] %v7740_v27  ;;  %v1876_v16 = vadd.f32 %v7536_v23, %v1848_v30  ;;  %v1878_v49 = vadd.f32 %v7550_v59, %v1850_v47  ;;  %3738 = vmatpush.msra.mxu0 %v7619_v52  ;;  %v7771_v23 = vmul.f32 %v7767_v56, %v7740_v27  ;;  %v10051_v30 = vld [vmem:[#allocation55_spill] sm:$0xff]  ;;  %v1994_v50 = vperm.slane %v7622_v5, 7  ;;  %v3546_v9 = vpop.permute.xlu0 %3545 }
 0x22d   : > { %10049 = vst [vmem:[#allocation85_spill] sm:$0xff] %v7746_v2  ;;  %v1769_v29 = vmul.f32 %v9613_v3, %v10051_v30  ;;  %v1763_v17 = vadd.f32 %v7373_v8, %v1735_v25  ;;  %v1920_v47 = vmul.f32 %v1918_v63, %v10052_v15  ;;  %v2024_v4 = vperm.slane %v7748_v43, 0  ;;  %v10055_v30 = vld [vmem:[#allocation26_spill] sm:$0xff]  ;;  %v10056_v15 = vld [vmem:[#allocation25_spill] sm:$0xff] }
 0x22e   : > { %10050 = vst [vmem:[#allocation84_spill] sm:$0xff] %v7771_v23  ;;  %v1886_v59 = vadd.f32 %v1882_v48, %v1876_v16  ;;  %v1888_v28 = vadd.f32 %v1884_v19, %v1878_v49  ;;  %3739 = vmatpush.msra.mxu0 %v7640_v44  ;;  %v7786_v48 = vmul.f32 %v7782_v1, %v7740_v27  ;;  %v10054_v49 = vld [vmem:[#allocation30_spill] sm:$0xff]  ;;  %v10077_v13 = vperm.slane %v7708_v53, 3 }
 0x22f   : > { %v1922_v8 = vmul.f32 %v1918_v63, %v10055_v30  ;;  %3740 = vmatmul.f32.vlgmr.msra.gmra.mxu0 %v5173_v20  ;;  %v1773_v25 = vadd.f32 %v1769_v29, %v1763_v17  ;;  %v1958_v5 = vmul.f32 %v1956_v45, %v10056_v15  ;;  %v1960_v43 = vmul.f32 %v1956_v45, %v10057_v22  ;;  %v3542_v20 = vpop.permute.xlu2 %3541  ;;  %v10062_v29 = vld [vmem:[#allocation16_spill] sm:$0xff]  ;;  %v10063_v45 = vld [vmem:[#allocation17_spill] sm:$0xff] }
 0x230   : > { %10053 = vst [vmem:[#allocation62_spill] sm:$0xff] %v7786_v48  ;;  %v1914_v16 = vadd.f32 %v7566_v37, %v1886_v59  ;;  %v1916_v19 = vadd.f32 %v10054_v49, %v1888_v28  ;;  %3909 = vmatpush.msrb.mxu0 %v7771_v23  ;;  %v7797_v3 = vmul.f32 %v10058_v33, %v7630_v6  ;;  %v10060_v59 = vld [vmem:[#allocation170_spill] sm:$0xff]  ;;  %v10061_v49 = vld [vmem:[#allocation49_spill] sm:$0xff]  ;;  %v10064_v30 = vld [vmem:[#allocation76_spill] sm:$0xff] }
 0x231   : > { %v1801_v28 = vadd.f32 %v10060_v59, %v1773_v25  ;;  %v1807_v63 = vmul.f32 %v9615_v46, %v10061_v49  ;;  %v1996_v22 = vmul.f32 %v1994_v50, %v10062_v29  ;;  %v1998_v17 = vmul.f32 %v1994_v50, %v10063_v45  ;;  %v1627_v49 = vpop.f32.mrf.mxu3  ;;  %v5175_v45 = vld [vmem:[%s6206_s29 + $0x50] sm:$0x1]  ;;  %v10076_v29 = vld [vmem:[#allocation46_spill] sm:$0xff] }
 0x232   : > { %10059 = vst [vmem:[#allocation56_spill] sm:$0xff] %v7797_v3  ;;  %v1924_v14 = vadd.f32 %v1920_v47, %v1914_v16  ;;  %v1926_v37 = vadd.f32 %v1922_v8, %v1916_v19  ;;  %v7806_v15 = vmul.f32 %v2024_v4, %v10064_v30  ;;  %3910 = vmatpush.msrb.mxu0 %v7786_v48  ;;  %v10066_v16 = vld [vmem:[#allocation187_spill] sm:$0xff]  ;;  %v10067_v8 = vld [vmem:[#allocation24_spill] sm:$0xff]  ;;  %v10069_v30 = vld [vmem:[#allocation77_spill] sm:$0xff] }
 0x233   : > { %v7811_v47 = vmul.f32 %v10058_v33, %v7682_v34  ;;  %v7817_v59 = vsel %vm3526_vm15, %v3546_v9, %v3542_v20  ;;  %v1811_v50 = vadd.f32 %v1807_v63, %v1801_v28  ;;  %v7824_v46 = vmul.f32 %v10069_v30, %v7736_v11  ;;  %v10071_v33 = vld [vmem:[#allocation74_spill] sm:$0xff]  ;;  %v10075_v28 = vld [vmem:[#allocation171_spill] sm:$0xff] }
 0x234   : > { %v1952_v19 = vadd.f32 %v10066_v16, %v1924_v14  ;;  %v1954_v25 = vadd.f32 %v10067_v8, %v1926_v37  ;;  %10068 = vst [vmem:[#allocation48_spill] sm:$0xff] %v7817_v59  ;;  %3911 = vmatpush.msrb.mxu0 %v7797_v3  ;;  %v10072_v14 = vperm.slane %v7427_v35, 0  ;;  %v10073_v37 = vld [vmem:[#allocation65_spill] sm:$0xff]  ;;  %v10074_v8 = vperm.slane %v7427_v35, 1  ;;  %v10078_v3 = vld [vmem:[#allocation75_spill] sm:$0xff] }
 0x235   : > { %10065 = vst [vmem:[#allocation54_spill] sm:$0xff] %v7811_v47  ;;  %v1839_v63 = vadd.f32 %v10075_v28, %v1811_v50  ;;  %v1845_v27 = vmul.f32 %v10077_v13, %v10076_v29  ;;  %v2028_v48 = vmul.f32 %v2024_v4, %v10078_v3  ;;  %v1628_v23 = vadd.f32 %v1627_v49, %v10040_v41  ;;  %v10080_v13 = vld [vmem:[#allocation58_spill] sm:$0xff] }
 0x236   : > { %10070 = vst [vmem:[#allocation34_spill] sm:$0xff] %v7824_v46  ;;  %v1710_v16 = vmul.f32 %v10072_v14, %v10071_v33  ;;  %v1748_v44 = vmul.f32 %v10074_v8, %v10073_v37  ;;  %v1962_v52 = vadd.f32 %v1958_v5, %v1952_v19  ;;  %v1964_v21 = vadd.f32 %v1960_v43, %v1954_v25  ;;  %v1650_v19 = vpop.f32.mrf.mxu2  ;;  %v10082_v49 = vld [vmem:[#allocation70_spill] sm:$0xff]  ;;  %v10086_v37 = vld [vmem:[#allocation51_spill] sm:$0xff] }
 0x237   : > { %3912 = vmatpush.msrb.mxu0 %v7811_v47  ;;  %v7841_v33 = vmul.f32 %v10069_v30, %v7817_v59  ;;  %v2036_v43 = vmul.f32 %v7756_v0, %v7746_v2  ;;  %v1849_v25 = vadd.f32 %v1845_v27, %v1839_v63  ;;  %v10081_v3 = vperm.slane %v7427_v35, 2  ;;  %v10196_v2 = vld [vmem:[#allocation103_spill] sm:$0xff]  ;;  %v5145_v47 = vld [vmem:[%s6763_s7 + $0x28] sm:$0xff] }
 0x238   : > { %v1752_v14 = vadd.f32 %v1748_v44, %v1710_v16  ;;  %v1992_v5 = vadd.f32 %v7603_v39, %v1964_v21  ;;  %3743 = vmatmul.f32.gmra.mxu0 %v5175_v45  ;;  %v1990_v41 = vadd.f32 %v7595_v51, %v1962_v52  ;;  %v10083_v50 = vperm.slane %v7708_v53, 0  ;;  %v10085_v45 = vld [vmem:[#allocation172_spill] sm:$0xff] }
 0x239   : > { %10079 = vst [vmem:[#allocation80_spill] sm:$0xff] %v7841_v33  ;;  %v1786_v4 = vmul.f32 %v10081_v3, %v10080_v13  ;;  %v10084_v44 = vperm.slane %v7708_v53, 4  ;;  %v1917_v21 = vperm.slane %v7708_v53, 5  ;;  %3913 = vmatpush.msrb.mxu0 %v7824_v46  ;;  %v1877_v30 = vadd.f32 %v10085_v45, %v1849_v25  ;;  %v10090_v25 = vld [vmem:[#allocation61_spill] sm:$0xff] }
 0x23a   : > { %v1729_v29 = vmul.f32 %v10083_v50, %v10082_v49  ;;  %v2002_v27 = vadd.f32 %v1998_v17, %v1992_v5  ;;  %v10087_v51 = vperm.slane %v7427_v35, 3  ;;  %v7864_v8 = vsel %vm3526_vm15, %v3542_v20, %v3546_v9  ;;  %v10092_v20 = vld [vmem:[#allocation164_spill] sm:$0xff]  ;;  %v10094_v50 = vld [vmem:[#allocation159_spill] sm:$0xff]  ;;  %v10097_v45 = vld [vmem:[#allocation29_spill] sm:$0xff] }
 0x23b   : > { %v1883_v39 = vmul.f32 %v7767_v56, %v10084_v44  ;;  %v1790_v16 = vadd.f32 %v1786_v4, %v1752_v14  ;;  %10088 = vst [vmem:[#allocation45_spill] sm:$0xff] %v7864_v8  ;;  %v7866_v28 = vadd.f32 %v1650_v19, %v1628_v23  ;;  %v1955_v63 = vperm.slane %v7708_v53, 6  ;;  %3914 = vmatpush.msrb.mxu0 %v7841_v33  ;;  %v10093_v4 = vld [vmem:[#allocation42_spill] sm:$0xff]  ;;  %v10095_v44 = vld [vmem:[#allocation153_spill] sm:$0xff]  ;;  %v10213_v33 = vld [vmem:[#allocation127_spill] sm:$0xff] }
 0x23c   : > { %v1824_v52 = vmul.f32 %v10087_v51, %v10086_v37  ;;  %v10089_v17 = vperm.slane %v7427_v35, 4  ;;  %v2022_v14 = vadd.f32 %v7615_v40, %v2002_v27  ;;  %v10091_v13 = vperm.slane %v7708_v53, 1  ;;  %v10214_v46 = vld [vmem:[#allocation137_spill] sm:$0xff] }
 0x23d   : > { %v1887_v10 = vadd.f32 %v1883_v39, %v1877_v30  ;;  %v2000_v23 = vadd.f32 %v1996_v22, %v1990_v41  ;;  %v1733_v19 = vadd.f32 %v1729_v29, %v10092_v20  ;;  %v1921_v49 = vmul.f32 %v1917_v21, %v10093_v4  ;;  %3915 = vmatpush.msrb.mxu0 %v7756_v0  ;;  %v10098_v30 = vld [vmem:[#allocation33_spill] sm:$0xff]  ;;  %v10100_v29 = vld [vmem:[#allocation40_spill] sm:$0xff] }
 0x23e   : > { %v1862_v5 = vmul.f32 %v7720_v62, %v10089_v17  ;;  %v1767_v3 = vmul.f32 %v10091_v13, %v10090_v25  ;;  %v1828_v9 = vadd.f32 %v1824_v52, %v1790_v16  ;;  %v7885_v40 = vmul.f32 %v10095_v44, %v10094_v50  ;;  %v7897_v52 = vld [vmem:[%s5684_s14 + $0x8] sm:$0xff]  ;;  %v10101_v17 = vld [vmem:[#allocation186_spill] sm:$0xff] }
 0x23f   : > { %v2032_v27 = vadd.f32 %v2028_v48, %v2022_v14  ;;  %v1915_v37 = vadd.f32 %v10097_v45, %v1887_v10  ;;  %v10099_v22 = vperm.slane %v7427_v35, 5  ;;  %v1959_v16 = vmul.f32 %v1955_v63, %v10100_v29  ;;  %3916 = vmatpush.msrb.mxu0 %v7897_v52  ;;  %v10103_v14 = vld [vmem:[#allocation78_spill] sm:$0xff]  ;;  %v10114_v29 = vld [vmem:[#allocation165_spill] sm:$0xff] }
 0x240   : > { %10096 = vst [vmem:[#allocation39_spill] sm:$0xff] %v7885_v40  ;;  %v1866_v39 = vadd.f32 %v1862_v5, %v1828_v9  ;;  %v9633_v51 = vperm.slane %v7708_v53, 7  ;;  %v7902_v48 = vmul.f32 %v10095_v44, %v10101_v17  ;;  %v7906_v5 = vmul.f32 %v7732_v7, %v10103_v14  ;;  %v10105_v9 = vld [vmem:[#allocation28_spill] sm:$0xff]  ;;  %v10108_v44 = vld [vmem:[#allocation73_spill] sm:$0xff] }
 0x241   : > { %v1900_v41 = vmul.f32 %v10099_v22, %v10098_v30  ;;  %v7908_v25 = vadd.f32 %v2036_v43, %v2032_v27  ;;  %v1925_v13 = vadd.f32 %v1921_v49, %v1915_v37  ;;  %v10106_v20 = vperm.slane %v7427_v35, 6  ;;  %3917 = vmatpush.msrb.mxu0 %v7885_v40  ;;  %v10110_v49 = vld [vmem:[#allocation64_spill] sm:$0xff]  ;;  %v5382_v40 = vld [vmem:[%s6206_s29 + $0x20] sm:$0xff] }
 0x242   : > { %10102 = vst [vmem:[#allocation63_spill] sm:$0xff] %v7902_v48  ;;  %v2020_v45 = vadd.f32 %v7606_v26, %v2000_v23  ;;  %v7916_v30 = vperm.slane %v7257_v61, 1  ;;  %v10109_v22 = vperm.slane %v7499_v32, 0  ;;  %v10111_v27 = vperm.slane %v7499_v32, 1 }
 0x243   : > { %10104 = vst [vmem:[#allocation55_spill] sm:$0xff] %v7906_v5  ;;  %v1904_v10 = vadd.f32 %v1900_v41, %v1866_v39  ;;  %v1938_v4 = vmul.f32 %v10106_v20, %v10105_v9  ;;  %v10112_v39 = vld [vmem:[#allocation23_spill] sm:$0xff]  ;;  %2081 = vmatpush.msra.mxu3 %v7908_v25  ;;  %v10113_v61 = vperm.slane %v7427_v35, 7  ;;  %v1761_v9 = vadd.f32 %v10114_v29, %v1733_v19 }
 0x244   : > { %10107 = vst [vmem:[#allocation31_spill] sm:$0xff] %v7916_v30  ;;  %v1709_v43 = vmul.f32 %v10109_v22, %v10108_v44  ;;  %v1747_v37 = vmul.f32 %v10111_v27, %v10110_v49  ;;  %v1953_v41 = vadd.f32 %v10112_v39, %v1925_v13  ;;  %v9632_v20 = vperm.slane %v7866_v28, 0  ;;  %3918 = vmatpush.msrb.mxu0 %v7902_v48  ;;  %v10121_v39 = vld [vmem:[#allocation18_spill] sm:$0xff] }
 0x245   : > { %v1942_v26 = vadd.f32 %v1938_v4, %v1904_v10  ;;  %v1976_v23 = vmul.f32 %v10113_v61, %v10017_v12  ;;  %v7936_v44 = vmul.f32 %v7864_v8, %v10103_v14  ;;  %v10116_v13 = vperm.slane %v7499_v32, 2  ;;  %v10117_v4 = vld [vmem:[#allocation38_spill] sm:$0xff] }
 0x246   : > { %v1751_v22 = vadd.f32 %v1747_v37, %v1709_v43  ;;  %v1963_v10 = vadd.f32 %v1959_v16, %v1953_v41  ;;  %v1997_v35 = vmul.f32 %v9633_v51, %v10117_v4  ;;  %v1771_v19 = vadd.f32 %v1767_v3, %v1761_v9  ;;  %3919 = vmatpush.msrb.mxu0 %v7906_v5  ;;  %v10119_v37 = vld [vmem:[#allocation53_spill] sm:$0xff]  ;;  %v10212_v48 = vld [vmem:[#allocation86_spill] sm:$0xff] }
 0x247   : > { %10115 = vst [vmem:[#allocation30_spill] sm:$0xff] %v7936_v44  ;;  %v1785_v49 = vmul.f32 %v10116_v13, %v10025_v38  ;;  %v1980_v12 = vadd.f32 %v1976_v23, %v1942_v26  ;;  %v2030_v27 = vadd.f32 %v7806_v15, %v2020_v45  ;;  %v7949_v14 = vmul.f32 %v7767_v56, %v7916_v30  ;;  %v10123_v26 = vld [vmem:[#allocation50_spill] sm:$0xff]  ;;  %v10125_v23 = vld [vmem:[#allocation69_spill] sm:$0xff] }
 0x248   : > { %v10120_v38 = vperm.slane %v7708_v53, 2  ;;  %v1991_v41 = vadd.f32 %v10121_v39, %v1963_v10  ;;  %v1799_v3 = vadd.f32 %v7636_v36, %v1771_v19  ;;  %v10124_v15 = vperm.slane %v7499_v32, 3  ;;  %3920 = vmatpush.msrb.mxu0 %v7936_v44  ;;  %v10131_v10 = vld [vmem:[#allocation67_spill] sm:$0xff]  ;;  %v5118_v5 = vld [vmem:[%s6425_s6 + $0x30] sm:$0x1] }
 0x249   : > { %10118 = vst [vmem:[#allocation26_spill] sm:$0xff] %v7949_v14  ;;  %v1789_v43 = vadd.f32 %v1785_v49, %v1751_v22  ;;  %v7956_v61 = vadd.f32 %v7659_v18, %v1980_v12  ;;  %v10126_v29 = vperm.slane %v10125_v23, 0  ;;  %v7967_v22 = vadd.f32 %v7702_v57, %v7760_v42  ;;  %v10132_v12 = vld [vmem:[#allocation162_spill] sm:$0xff]  ;;  %v10211_v44 = vld [vmem:[#allocation59_spill] sm:$0xff] }
 0x24a   : > { %v1805_v16 = vmul.f32 %v10120_v38, %v10119_v37  ;;  %v1823_v45 = vmul.f32 %v10124_v15, %v10123_v26  ;;  %v7977_v36 = vmul.f32 %v7782_v1, %v7916_v30  ;;  %v10130_v18 = vperm.slane %v7272_v60, 3  ;;  %3921 = vmatpush.msrb.mxu0 %v7949_v14  ;;  %v10134_v37 = vld [vmem:[#allocation47_spill] sm:$0xff]  ;;  %v10208_v14 = vld [vmem:[#allocation113_spill] sm:$0xff] }
 0x24b   : > { %10122 = vst [vmem:[#allocation25_spill] sm:$0xff] %v7956_v61  ;;  %v2017_v9 = vmul.f32 %v10126_v29, %v10039_v31  ;;  %v2001_v13 = vadd.f32 %v1997_v35, %v1991_v41  ;;  %v2034_v57 = vmul.f32 %v7897_v52, %v7956_v61  ;;  %v2027_v4 = vmul.f32 %v9632_v20, %v10131_v10  ;;  %v10138_v29 = vld [vmem:[#allocation152_spill] sm:$0xff]  ;;  %v10205_v30 = vld [vmem:[#allocation99_spill] sm:$0xff] }
 0x24c   : > { %10127 = vst [vmem:[#allocation20_spill] sm:$0xff] %v7967_v22  ;;  %v1833_v31 = vmul.f32 %v10130_v18, %v10123_v26  ;;  %v1809_v42 = vadd.f32 %v1805_v16, %v1799_v3  ;;  %v1827_v49 = vadd.f32 %v1823_v45, %v1789_v43  ;;  %v7990_v19 = vmul.f32 %v7630_v6, %v10132_v12  ;;  %v7998_v26 = vld [vmem:[%s7973_s17] sm:$0x7] }
 0x24d   : > { %10129 = vst [vmem:[#allocation154_spill] sm:$0xff] %v7977_v36  ;;  %v10135_v38 = vperm.slane %v7708_v53, 3  ;;  %v2021_v35 = vadd.f32 %v2017_v9, %v2001_v13  ;;  %v7995_v41 = vadd.f32 %v2034_v57, %v2030_v27  ;;  %v8001_v16 = vld [vmem:[%s5703_s15] sm:$0xff]  ;;  %v10136_v3 = vperm.slane %v7499_v32, 4  ;;  %3922 = vmatpush.msrb.mxu0 %v7977_v36 }
 0x24e   : > { %10133 = vst [vmem:[#allocation170_spill] sm:$0xff] %v7990_v19  ;;  %v1837_v43 = vadd.f32 %v1833_v31, %v1809_v42  ;;  %v8009_v45 = vmul.f32 %v7682_v34, %v10132_v12  ;;  %v8013_v27 = vmul.f32 %v7756_v0, %v10138_v29  ;;  %v10140_v9 = vperm.slane %v7272_v60, 4  ;;  %v10203_v12 = vld [vmem:[#allocation104_spill] sm:$0xff]  ;;  %v10207_v36 = vld [vmem:[#allocation107_spill] sm:$0xff] }
 0x24f   : > { %v1843_v39 = vmul.f32 %v10135_v38, %v10134_v37  ;;  %v1861_v15 = vmul.f32 %v8001_v16, %v10136_v3  ;;  %v2031_v31 = vadd.f32 %v2027_v4, %v2021_v35  ;;  %2082 = vmatpush.msra.mxu3 %v7995_v41  ;;  %v2035_v13 = vmul.f32 %v7767_v56, %v7967_v22  ;;  %v10143_v3 = vld [vmem:[#allocation32_spill] sm:$0xff]  ;;  %v10197_v22 = vld [vmem:[#allocation90_spill] sm:$0xff] }
 0x250   : > { %10137 = vst [vmem:[#allocation49_spill] sm:$0xff] %v8009_v45  ;;  %v1871_v18 = vmul.f32 %v8001_v16, %v10140_v9  ;;  %5105 = vmatmul.msk.f32.vlgmr.msra.gmra.mxu3 %vm1234_vm6, %v7998_v26  ;;  %3923 = vmatpush.msrb.mxu0 %v7990_v19  ;;  %v8026_v10 = vmul.f32 %v7897_v52, %v10138_v29  ;;  %v10142_v4 = vperm.slane %v7708_v53, 4  ;;  %v10146_v29 = vld [vmem:[#allocation157_spill] sm:$0xff]  ;;  %v10151_v20 = vperm.slane %v7499_v32, 6  ;;  %v5116_v19 = vld [vmem:[%s6425_s6 + $0x20] sm:$0xff] }
 0x251   : > { %10139 = vst [vmem:[#allocation16_spill] sm:$0xff] %v8013_v27  ;;  %v1847_v57 = vadd.f32 %v1843_v39, %v1837_v43  ;;  %v1865_v42 = vadd.f32 %v1861_v15, %v1827_v49  ;;  %v8028_v37 = vadd.f32 %v2035_v13, %v2031_v31  ;;  %v10144_v39 = vperm.slane %v7499_v32, 5  ;;  %v5183_v43 = vld [vmem:[%s6357_s8 + $0x40] sm:$0xff] }
 0x252   : > { %10141 = vst [vmem:[#allocation17_spill] sm:$0xff] %v8026_v10  ;;  %v1881_v35 = vmul.f32 %v7782_v1, %v10142_v4  ;;  %3924 = vmatpush.msrb.mxu0 %v8009_v45  ;;  %v10145_v15 = vperm.slane %v7272_v60, 5  ;;  %v10206_v45 = vld [vmem:[#allocation111_spill] sm:$0xff] }
 0x253   : > { %v1875_v38 = vadd.f32 %v1871_v18, %v1847_v57  ;;  %v1899_v49 = vmul.f32 %v10144_v39, %v10143_v3  ;;  %v8044_v18 = vmul.f32 %v10146_v29, %v10094_v50  ;;  %2061 = vmatpush.msrb.mxu2 %v8028_v37  ;;  %3925 = vmatmul.f32.vlgmr.msrb.gmra.mxu0 %v5183_v43  ;;  %v10153_v43 = vld [vmem:[#allocation174_spill] sm:$0xff] }
 0x254   : > { %v1909_v9 = vmul.f32 %v10145_v15, %v10143_v3  ;;  %4094 = vmatpush.msra.mxu0 %v8013_v27  ;;  %v8050_v57 = vmul.f32 %v10146_v29, %v10101_v17  ;;  %v10149_v3 = vld [vmem:[#allocation44_spill] sm:$0xff]  ;;  %v10150_v15 = vld [vmem:[#allocation27_spill] sm:$0xff]  ;;  %v8064_v29 = vmul.f32 %v10153_v43, %v7732_v7 }
 0x255   : > { %10147 = vst [vmem:[#allocation76_spill] sm:$0xff] %v8044_v18  ;;  %v1885_v31 = vadd.f32 %v1881_v35, %v1875_v38  ;;  %v1903_v13 = vadd.f32 %v1899_v49, %v1865_v42  ;;  %v1919_v39 = vmul.f32 %v1917_v21, %v10149_v3  ;;  %v1937_v51 = vmul.f32 %v10151_v20, %v10150_v15  ;;  %v10155_v21 = vld [vmem:[#allocation41_spill] sm:$0xff]  ;;  %v10201_v7 = vld [vmem:[#allocation96_spill] sm:$0xff] }
 0x256   : > { %4095 = vmatpush.msra.mxu0 %v8026_v10  ;;  %10148 = vst [vmem:[#allocation187_spill] sm:$0xff] %v8050_v57  ;;  %v10152_v35 = vperm.slane %v7272_v60, 6  ;;  %v10156_v20 = vld [vmem:[#allocation21_spill] sm:$0xff]  ;;  %v10157_v3 = vperm.slane %v7499_v32, 7 }
 0x257   : > { %v1913_v4 = vadd.f32 %v1909_v9, %v1885_v31  ;;  %v1941_v38 = vadd.f32 %v1937_v51, %v1903_v13  ;;  %10154 = vst [vmem:[#allocation24_spill] sm:$0xff] %v8064_v29  ;;  %v1957_v31 = vmul.f32 %v1955_v63, %v10155_v21  ;;  %v8075_v51 = vmul.f32 %v10153_v43, %v7864_v8  ;;  %v5185_v13 = vld [vmem:[%s6357_s8 + $0x50] sm:$0x1]  ;;  %v10162_v21 = vld [vmem:[#allocation15_spill] sm:$0xff] }
 0x258   : > { %4096 = vmatpush.msra.mxu0 %v8044_v18  ;;  %v1947_v49 = vmul.f32 %v10152_v35, %v10150_v15  ;;  %v10159_v35 = vperm.slane %v7272_v60, 7  ;;  %v10161_v63 = vperm.slane %v7662_v24, 0  ;;  %v10198_v8 = vld [vmem:[#allocation123_spill] sm:$0xff]  ;;  %v10216_v10 = vld [vmem:[#allocation145_spill] sm:$0xff] }
 0x259   : > { %v1923_v42 = vadd.f32 %v1919_v39, %v1913_v4  ;;  %v1975_v4 = vmul.f32 %v10157_v3, %v10156_v20  ;;  %10158 = vst [vmem:[#allocation77_spill] sm:$0xff] %v8075_v51  ;;  %v10163_v3 = vperm.slane %v7708_v53, 7 }
 0x25a   : > { %4097 = vmatpush.msra.mxu0 %v8050_v57  ;;  %v1985_v61 = vmul.f32 %v10159_v35, %v10156_v20  ;;  %v10166_v20 = vld [vmem:[#allocation173_spill] sm:$0xff]  ;;  %v10171_v35 = vld [vmem:[#allocation52_spill] sm:$0xff] }
 0x25b   : > { %v1951_v9 = vadd.f32 %v1947_v49, %v1923_v42  ;;  %v1979_v15 = vadd.f32 %v1975_v4, %v1941_v38  ;;  %3928 = vmatmul.f32.gmra.mxu0 %v5185_v13  ;;  %v10160_v42 = vld [vmem:[#allocation36_spill] sm:$0xff]  ;;  %v1995_v43 = vmul.f32 %v10163_v3, %v10162_v21  ;;  %v10164_v38 = vperm.slane %v10125_v23, 0 }
 0x25c   : > { %4098 = vmatpush.msra.mxu0 %v8064_v29  ;;  %v2005_v49 = vmul.f32 %v10161_v63, %v10160_v42  ;;  %v8097_v24 = vmul.f32 %v10166_v20, %v7630_v6  ;;  %v10169_v4 = vperm.slane %v7866_v28, 0  ;;  %v8105_v23 = vmul.f32 %v10166_v20, %v7682_v34  ;;  %v10180_v20 = vld [vmem:[#allocation126_spill] sm:$0xff] }
 0x25d   : > { %v1961_v39 = vadd.f32 %v1957_v31, %v1951_v9  ;;  %v2015_v9 = vmul.f32 %v10164_v38, %v10160_v42  ;;  %v8112_v6 = vmul.f32 %v7736_v11, %v10171_v35  ;;  %v8119_v34 = vmul.f32 %v7817_v59, %v10171_v35  ;;  %v10182_v35 = vld [vmem:[#allocation91_spill] sm:$0xff] }
 0x25e   : > { %4099 = vmatpush.msra.mxu0 %v8075_v51  ;;  %v8092_v31 = vadd.f32 %v2005_v49, %v1979_v15  ;;  %10167 = vst [vmem:[#allocation65_spill] sm:$0xff] %v8097_v24  ;;  %v8125_v42 = vmul.f32 %v7756_v0, %v7706_v54  ;;  %v8132_v63 = vmul.f32 %v7897_v52, %v7706_v54  ;;  %v5199_v54 = vld [vmem:[%s6763_s7 + $0x50] sm:$0x1] }
 0x25f   : > { %v1989_v32 = vadd.f32 %v1985_v61, %v1961_v39  ;;  %v10168_v61 = vld [vmem:[#allocation71_spill] sm:$0xff]  ;;  %10170 = vst [vmem:[#allocation171_spill] sm:$0xff] %v8105_v23  ;;  %v8137_v49 = vmul.f32 %v10094_v50, %v7324_v55  ;;  %v8142_v0 = vmul.f32 %v10101_v17, %v7324_v55  ;;  %v8197_v59 = vmul.f32 %v10198_v8, %v10197_v22  ;;  %v10204_v22 = vld [vmem:[#allocation109_spill] sm:$0xff] }
 0x260   : > { %10165 = vst [vmem:[#allocation74_spill] sm:$0xff] %v8092_v31  ;;  %4100 = vmatpush.msra.mxu0 %v7767_v56  ;;  %v2025_v53 = vmul.f32 %v10169_v4, %v10168_v61  ;;  %v2033_v15 = vmul.f32 %v7782_v1, %v8092_v31  ;;  %v2042_v55 = vld [vmem:[%s8153_s3] sm:$0xff]  ;;  %v2043_v4 = vld [vmem:[%s8153_s3 + $0x8] sm:$0xff]  ;;  %v5133_v31 = vld [vmem:[%s6357_s8 + $0x38] sm:$0x1]  ;;  %v8204_v11 = vmul.f32 %v10198_v8, %v10201_v7 }
 0x261   : > { %v1999_v60 = vadd.f32 %v1995_v43, %v1989_v32  ;;  %10172 = vst [vmem:[#allocation46_spill] sm:$0xff] %v8112_v6  ;;  %v10178_v43 = vld [vmem:[#allocation144_spill] sm:$0xff]  ;;  %v10209_v7 = vld [vmem:[#allocation79_spill] sm:$0xff]  ;;  %v10210_v8 = vld [vmem:[#allocation82_spill] sm:$0xff] }
 0x262   : > { %4101 = vmatpush.msra.mxu0 %v7782_v1  ;;  %10173 = vst [vmem:[#allocation75_spill] sm:$0xff] %v8119_v34 }
 0x263   : > { %v2019_v13 = vadd.f32 %v2015_v9, %v1999_v60  ;;  %10174 = vst [vmem:[#allocation58_spill] sm:$0xff] %v8125_v42  ;;  %v10179_v60 = vld [vmem:[#allocation146_spill] sm:$0xff] }
 0x264   : > { %4102 = vmatpush.msra.mxu0 %v8097_v24  ;;  %10175 = vst [vmem:[#allocation70_spill] sm:$0xff] %v8132_v63 }
 0x265   : > { %v2029_v39 = vadd.f32 %v2025_v53, %v2019_v13  ;;  %10176 = vst [vmem:[#allocation172_spill] sm:$0xff] %v8137_v49  ;;  %v10181_v53 = vld [vmem:[#allocation136_spill] sm:$0xff] }
 0x266   : > { %4103 = vmatpush.msra.mxu0 %v8105_v23  ;;  %10177 = vst [vmem:[#allocation51_spill] sm:$0xff] %v8142_v0 }
 0x267   : > { %v8114_v28 = vadd.f32 %v2033_v15, %v2029_v39  ;;  %v5379_v15 = vld [vmem:[%s6206_s29 + $0x28] sm:$0xff]  ;;  %10199 = vst [vmem:[#allocation61_spill] sm:$0xff] %v8197_v59 }
 0x268   : > { %4104 = vmatpush.msra.mxu0 %v8112_v6  ;;  %10202 = vst [vmem:[#allocation164_spill] sm:$0xff] %v8204_v11 }
 0x269   : > { %2062 = vmatpush.msrb.mxu2 %v8114_v28 }
 0x26a   : > { %5104 = vmatmul.msk.f32.vlgmr.msrb.gmra.mxu2 %vm1234_vm6, %v7998_v26  ;;  %4105 = vmatpush.msra.mxu0 %v8119_v34  ;;  %v5197_v26 = vld [vmem:[%s6763_s7 + $0x40] sm:$0xff] }
 0x26c   : > { %4106 = vmatpush.msra.mxu0 %v8125_v42 }
 0x26e   : > { %4107 = vmatpush.msra.mxu0 %v8132_v63 }
 0x270   : > { %4108 = vmatpush.msra.mxu0 %v8137_v49 }
 0x272   : > { %4109 = vmatpush.msra.mxu0 %v8142_v0  ;;  %v5383_v0 = vld [vmem:[%s6206_s29 + $0x30] sm:$0x1] }
 0x273   : > { %4110 = vmatmul.f32.vlgmr.msra.gmra.mxu0 %v5197_v26  ;;  %v10183_v26 = vld [vmem:[#allocation72_spill] sm:$0xff] }
 0x27b   : > { %4113 = vmatmul.f32.gmra.mxu0 %v5199_v54  ;;  %v10184_v54 = vld [vmem:[#allocation93_spill] sm:$0xff] }
 0x2d3   : > { %v2084_v52 = vpop.f32.mrf.mxu3 }
 0x2d4   : > { %v2088_v32 = vsub.f32 0.0, %v2084_v52 }
 0x2d6   : > { %v2091_v21 = vmul.f32 1.442695, %v2088_v32  ;;  %v10185_v32 = vld [vmem:[#allocation95_spill] sm:$0xff] }
 0x2d8   : > { %5340 = vpow2.f32 %v2091_v21  ;;  %v5380_v21 = vld [vmem:[%s6206_s29 + $0x38] sm:$0x1] }
 0x2de   : > { %v5341_v50 = vpop.eup %5340 }
 0x2df   : > { %v2094_v3 = vadd.f32 1.0, %v5341_v50  ;;  %v10186_v50 = vld [vmem:[#allocation81_spill] sm:$0xff] }
 0x2e1   : > { %5342 = vrcp.f32 %v2094_v3  ;;  %v10187_v3 = vld [vmem:[#allocation97_spill] sm:$0xff] }
 0x2e7   : > { %v5343_v17 = vpop.eup %5342 }
 0x2e8   : > { %5109 = vmatpush.msk.msrb.mxu3 %vm2104_vm0, %v5343_v17  ;;  %v10188_v17 = vld [vmem:[#allocation83_spill] sm:$0xff] }
 0x2e9   : > { %5110 = vmatmul.msk.f32.vlgmr.msrb.gmra.mxu3 %vm2097_vm1, %v2042_v55 }
 0x2ea   : > { %2603 = vmatpush.msra.mxu3 %v10178_v43 }
 0x2ec   : > { %2604 = vmatpush.msra.mxu3 %v10179_v60 }
 0x2ed   : > { %v2064_v38 = vpop.f32.mrf.mxu2 }
 0x2ee   : > { %v2087_v9 = vsub.f32 0.0, %v2064_v38  ;;  %2696 = vmatpush.msrb.mxu3 %v10180_v20  ;;  %v10189_v38 = vld [vmem:[#allocation98_spill] sm:$0xff] }
 0x2f0   : > { %v2089_v61 = vmul.f32 1.442695, %v2087_v9  ;;  %2697 = vmatpush.msrb.mxu3 %v10181_v53  ;;  %v10190_v9 = vld [vmem:[#allocation88_spill] sm:$0xff] }
 0x2f1   : > { %5111 = vmatmul.msk.f32.gmra.mxu3 %vm2097_vm1, %v2043_v4 }
 0x2f2   : > { %5344 = vpow2.f32 %v2089_v61  ;;  %v8180_v61 = vld [vmem:[%s5703_s15 + $0x10] sm:$0xff] }
 0x2f8   : > { %v5345_v13 = vpop.eup %5344 }
 0x2f9   : > { %v2093_v39 = vadd.f32 1.0, %v5345_v13  ;;  %5128 = vmatmul.msk.f32.vlgmr.msra.gmra.mxu3 %vm1234_vm6, %v5379_v15  ;;  %v5131_v13 = vld [vmem:[%s6357_s8 + $0x28] sm:$0xff]  ;;  %v10193_v15 = vld [vmem:[#allocation101_spill] sm:$0xff] }
 0x2fa   : > { %2757 = vmatpush.msra.mxu3 %v10182_v35 }
 0x2fb   : > { %5346 = vrcp.f32 %v2093_v39  ;;  %v10192_v39 = vld [vmem:[#allocation89_spill] sm:$0xff] }
 0x2fc   : > { %2758 = vmatpush.msra.mxu3 %v10183_v26 }
 0x2fe   : > { %2759 = vmatpush.msra.mxu3 %v10184_v54 }
 0x300   : > { %2760 = vmatpush.msra.mxu3 %v10185_v32 }
 0x301   : > { %v5347_v52 = vpop.eup %5346  ;;  %5129 = vmatmul.msk.f32.gmra.mxu3 %vm1234_vm6, %v5380_v21  ;;  %v10195_v21 = vld [vmem:[#allocation102_spill] sm:$0xff] }
 0x302   : > { %5106 = vmatpush.msk.msra.mxu2 %vm2104_vm0, %v5347_v52  ;;  %2761 = vmatpush.msra.mxu3 %v10187_v3  ;;  %v10194_v52 = vld [vmem:[#allocation92_spill] sm:$0xff] }
 0x303   : > { %5107 = vmatmul.msk.f32.vlgmr.msra.gmra.mxu2 %vm2097_vm1, %v2042_v55  ;;  %v10191_v55 = vld [vmem:[#allocation87_spill] sm:$0xff] }
 0x304   : > { %2566 = vmatpush.msrb.mxu2 %v10186_v50  ;;  %2762 = vmatpush.msra.mxu3 %v10189_v38 }
 0x306   : > { %2567 = vmatpush.msrb.mxu2 %v10188_v17  ;;  %2763 = vmatpush.msra.mxu3 %v8180_v61 }
 0x308   : > { %2568 = vmatpush.msrb.mxu2 %v10190_v9  ;;  %2764 = vmatpush.msra.mxu3 %v8001_v16 }
 0x309   : > { %5134 = vmatmul.msk.f32.vlgmr.msrb.gmra.mxu3 %vm1234_vm6, %v5131_v13 }
 0x30a   : > { %2569 = vmatpush.msrb.mxu2 %v10191_v55  ;;  %2765 = vmatpush.msra.mxu3 %v10193_v15 }
 0x30b   : > { %5108 = vmatmul.msk.f32.gmra.mxu2 %vm2097_vm1, %v2043_v4  ;;  %v10200_v4 = vld [vmem:[#allocation106_spill] sm:$0xff] }
 0x30c   : > { %2570 = vmatpush.msrb.mxu2 %v10192_v39  ;;  %2766 = vmatpush.msra.mxu3 %v10195_v21 }
 0x30e   : > { %2571 = vmatpush.msrb.mxu2 %v10194_v52  ;;  %2767 = vmatpush.msra.mxu3 %v10196_v2 }
 0x310   : > { %2572 = vmatpush.msrb.mxu2 %v7713_v58  ;;  %2768 = vmatpush.msra.mxu3 %v10200_v4 }
 0x311   : > { %5135 = vmatmul.msk.f32.gmra.mxu3 %vm1234_vm6, %v5133_v31 }
 0x312   : > { %2573 = vmatpush.msrb.mxu2 %v7720_v62  ;;  %2769 = vmatpush.msra.mxu3 %v10203_v12 }
 0x314   : > { %2574 = vmatpush.msrb.mxu2 %v8197_v59  ;;  %2770 = vmatpush.msra.mxu3 %v10204_v22 }
 0x316   : > { %2575 = vmatpush.msrb.mxu2 %v8204_v11  ;;  %2771 = vmatpush.msra.mxu3 %v10206_v45 }
 0x318   : > { %2576 = vmatpush.msrb.mxu2 %v10205_v30  ;;  %2772 = vmatpush.msra.mxu3 %v10208_v14 }
 0x319   : > { %2773 = vmatmul.f32.vlgmr.msra.gmra.mxu3 %v5116_v19 }
 0x31a   : > { %2577 = vmatpush.msrb.mxu2 %v10207_v36  ;;  %2927 = vmatpush.msrb.mxu3 %v10180_v20 }
 0x31c   : > { %2578 = vmatpush.msrb.mxu2 %v10209_v7  ;;  %2928 = vmatpush.msrb.mxu3 %v10181_v53 }
 0x31e   : > { %2579 = vmatpush.msrb.mxu2 %v10210_v8 }
 0x320   : > { %2580 = vmatpush.msrb.mxu2 %v10211_v44 }
 0x321   : > { %2776 = vmatmul.f32.gmra.mxu3 %v5118_v5 }
 0x322   : > { %2581 = vmatpush.msrb.mxu2 %v10212_v48 }
 0x323   : > { %2582 = vmatmul.f32.vlgmr.msrb.gmra.mxu2 %v5382_v40  ;;  %v5147_v40 = vld [vmem:[%s6763_s7 + $0x38] sm:$0x1] }
 0x324   : > { %2742 = vmatpush.msra.mxu2 %v10213_v33 }
 0x326   : > { %2743 = vmatpush.msra.mxu2 %v10214_v46 }
 0x328   : > { %2803 = vmatpush.msrb.mxu2 %v10186_v50 }
 0x329   : > { %5150 = vmatmul.msk.f32.vlgmr.msrb.gmra.mxu3 %vm1234_vm6, %v5145_v47 }
 0x32a   : > { %2804 = vmatpush.msrb.mxu2 %v10188_v17 }
 0x32b   : > { %2585 = vmatmul.f32.gmra.mxu2 %v5383_v0 }
 0x32c   : > { %2805 = vmatpush.msrb.mxu2 %v10190_v9  ;;  %v10222_v9 = vld [vmem:[#allocation140_spill] sm:$0xff] }
 0x32e   : > { %2806 = vmatpush.msrb.mxu2 %v10191_v55 }
 0x330   : > { %2807 = vmatpush.msrb.mxu2 %v10192_v39 }
 0x331   : > { %5151 = vmatmul.msk.f32.gmra.mxu3 %vm1234_vm6, %v5147_v40 }
 0x332   : > { %2808 = vmatpush.msrb.mxu2 %v10194_v52 }
 0x333   : > { %5136 = vmatmul.msk.f32.vlgmr.msra.gmra.mxu2 %vm1234_vm6, %v5131_v13 }
 0x334   : > { %2809 = vmatpush.msrb.mxu2 %v7713_v58 }
 0x336   : > { %2810 = vmatpush.msrb.mxu2 %v7720_v62 }
 0x338   : > { %2811 = vmatpush.msrb.mxu2 %v8197_v59 }
 0x33a   : > { %2812 = vmatpush.msrb.mxu2 %v8204_v11 }
 0x33b   : > { %5137 = vmatmul.msk.f32.gmra.mxu2 %vm1234_vm6, %v5133_v31  ;;  %v2560_v31 = vpop.f32.mrf.mxu1 }
 0x33c   : > { %2813 = vmatpush.msrb.mxu2 %v10205_v30 }
 0x33e   : > { %2814 = vmatpush.msrb.mxu2 %v10207_v36 }
 0x340   : > { %2815 = vmatpush.msrb.mxu2 %v10209_v7 }
 0x342   : > { %2816 = vmatpush.msrb.mxu2 %v10210_v8 }
 0x344   : > { %2817 = vmatpush.msrb.mxu2 %v10211_v44 }
 0x346   : > { %2818 = vmatpush.msrb.mxu2 %v10212_v48 }
 0x347   : > { %2819 = vmatmul.f32.vlgmr.msrb.gmra.mxu2 %v5116_v19 }
 0x348   : > { %2973 = vmatpush.msra.mxu2 %v10213_v33 }
 0x34a   : > { %2974 = vmatpush.msra.mxu2 %v10214_v46 }
 0x34f   : > { %2822 = vmatmul.f32.gmra.mxu2 %v5118_v5 }
 0x357   : > { %5152 = vmatmul.msk.f32.vlgmr.msra.gmra.mxu2 %vm1234_vm6, %v5145_v47  ;;  %v2563_v47 = vpop.f32.mrf.mxu1 }
 0x35f   : > { %5153 = vmatmul.msk.f32.gmra.mxu2 %vm1234_vm6, %v5147_v40  ;;  %v2676_v13 = vpop.f32.mrf.mxu1 }
 0x36c   : > { %v2151_v58 = vpop.f32.mrf.mxu3 }
 0x36d   : > { %v2158_v62 = vmul.f32 %v2151_v58, %v7995_v41  ;;  %v2679_v58 = vpop.f32.mrf.mxu1 }
 0x36f   : > { %2170 = vst [vmem:[%s8256_s24 + $0x8] sm:$0xff] %v2158_v62  ;;  %v2537_v62 = vpop.f32.mrf.mxu0 }
 0x374   : > { %v2154_v19 = vpop.f32.mrf.mxu3 }
 0x375   : > { %v2160_v5 = vmul.f32 %v2154_v19, %v7908_v25  ;;  %v2797_v23 = vpop.f32.mrf.mxu1 }
 0x377   : > { %2172 = vst [vmem:[%s8256_s24 + $0x18] sm:$0xff] %v2160_v5  ;;  %v2540_v25 = vpop.f32.mrf.mxu0 }
 0x37c   : > { %v8261_v0 = vpop.f32.mrf.mxu3 }
 0x37d   : > { %v8267_v24 = vpop.f32.mrf.mxu1 }
 0x37f   : > { %v8269_v29 = vpop.f32.mrf.mxu0 }
 0x384   : > { %v2609_v49 = vpop.f32.mrf.mxu3 }
 0x386   : > { %v2128_v40 = vpop.f32.mrf.mxu2 }
 0x387   : > { %v2157_v41 = vmul.f32 %v2128_v40, %v8114_v28  ;;  %v8279_v27 = vpop.f32.mrf.mxu0 }
 0x388   : > { %10217 = vst [vmem:[#allocation42_spill] sm:$0xff] %v8279_v27 }
 0x389   : > { %2169 = vst [vmem:[%s8256_s24] sm:$0xff] %v2157_v41  ;;  %v10215_v41 = vld [vmem:[#allocation149_spill] sm:$0xff] }
 0x38a   : > { %v2538_v18 = vadd.f32 %v2537_v62, %v10215_v41 }
 0x38c   : > { %v2699_v42 = vpop.f32.mrf.mxu3 }
 0x38d   : > { %v2700_v19 = vadd.f32 %v2699_v42, %v2676_v13 }
 0x38e   : > { %v2131_v63 = vpop.f32.mrf.mxu2 }
 0x38f   : > { %v2159_v34 = vmul.f32 %v2131_v63, %v8028_v37  ;;  %v2907_v63 = vpop.f32.mrf.mxu1 }
 0x391   : > { %2171 = vst [vmem:[%s8256_s24 + $0x10] sm:$0xff] %v2159_v34  ;;  %v8277_v34 = vadd.f32 %v2560_v31, %v2538_v18 }
 0x393   : > { %v3038_v18 = vperm.slane %v8277_v34, 1  ;;  %v3190_v27 = vperm.slane %v8277_v34, 5 }
 0x394   : > { %v2702_v6 = vpop.f32.mrf.mxu3 }
 0x39c   : > { %v2774_v5 = vpop.f32.mrf.mxu3 }
 0x39d   : > { %v2775_v51 = vadd.f32 %v2774_v5, %v2700_v19  ;;  %v10218_v19 = vld [vmem:[#allocation147_spill] sm:$0xff] }
 0x39e   : > { %v2908_v5 = vadd.f32 %v2907_v63, %v10218_v19 }
 0x39f   : > { %v2798_v28 = vadd.f32 %v2797_v23, %v2775_v51  ;;  %v3000_v51 = vperm.slane %v8277_v34, 0  ;;  %v10219_v23 = vld [vmem:[#allocation151_spill] sm:$0xff] }
 0x3a0   : > { %v2541_v17 = vadd.f32 %v2540_v25, %v10219_v23  ;;  %v3076_v25 = vperm.slane %v8277_v34, 2 }
 0x3a1   : > { %v8275_v37 = vadd.f32 %v10216_v10, %v2798_v28  ;;  %v3002_v55 = vmul.f32 %v3000_v51, %v10208_v14 }
 0x3a2   : > { %v8304_v39 = vadd.f32 %v2563_v47, %v2541_v17  ;;  %v10225_v47 = vld [vmem:[#allocation132_spill] sm:$0xff]  ;;  %v3078_v30 = vmul.f32 %v3076_v25, %v10200_v4  ;;  %v3080_v8 = vmul.f32 %v3076_v25, %v10196_v2 }
 0x3a3   : > { %v2990_v42 = vperm.slane %v8275_v37, 0  ;;  %v3028_v13 = vperm.slane %v8275_v37, 1  ;;  %v10226_v7 = vperm.slane %v8275_v37, 3 }
 0x3a4   : > { %v2777_v40 = vpop.f32.mrf.mxu3 }
 0x3a5   : > { %v2994_v28 = vmul.f32 %v2990_v42, %v10206_v45  ;;  %v3032_v43 = vmul.f32 %v3028_v13, %v10203_v12 }
 0x3a6   : > { %v8271_v57 = vpop.f32.mrf.mxu2 }
 0x3ac   : > { %v2930_v46 = vpop.f32.mrf.mxu3 }
 0x3ad   : > { %v8286_v60 = vadd.f32 %v2930_v46, %v2908_v5  ;;  %v10221_v46 = vld [vmem:[#allocation142_spill] sm:$0xff] }
 0x3ae   : > { %v2586_v33 = vpop.f32.mrf.mxu2 }
 0x3af   : > { %v2587_v62 = vadd.f32 %v2586_v33, %v10219_v23  ;;  %v3010_v63 = vperm.slane %v8286_v60, 0  ;;  %v3004_v33 = vmul.f32 %v3000_v51, %v10206_v45  ;;  %v3036_v23 = vadd.f32 %v3032_v43, %v2994_v28  ;;  %v10224_v43 = vld [vmem:[#allocation138_spill] sm:$0xff] }
 0x3b0   : > { %v3114_v45 = vperm.slane %v8277_v34, 3 }
 0x3b1   : > { %v8289_v31 = vadd.f32 %v2609_v49, %v2587_v62  ;;  %v3012_v5 = vmul.f32 %v3010_v63, %v10221_v46  ;;  %v3014_v52 = vmul.f32 %v3010_v63, %v10222_v9  ;;  %v3048_v49 = vperm.slane %v8286_v60, 1 }
 0x3b2   : > { %v3040_v62 = vmul.f32 %v3038_v18, %v10204_v22  ;;  %v10223_v9 = vperm.slane %v8275_v37, 2  ;;  %v3086_v46 = vperm.slane %v8286_v60, 2  ;;  %v3118_v25 = vmul.f32 %v3114_v45, %v10193_v15 }
 0x3b3   : > { %10220 = vst [vmem:[#allocation159_spill] sm:$0xff] %v8289_v31  ;;  %v3042_v31 = vmul.f32 %v3038_v18, %v10203_v12  ;;  %v3016_v50 = vadd.f32 %v3012_v5, %v3002_v55  ;;  %v3018_v59 = vadd.f32 %v3014_v52, %v3004_v33  ;;  %v3152_v12 = vperm.slane %v8277_v34, 4  ;;  %v8315_v18 = vpop.f32.mrf.mxu0 }
 0x3b4   : > { %v3070_v51 = vmul.f32 %v10223_v9, %v10196_v2  ;;  %v3050_v17 = vmul.f32 %v3048_v49, %v10224_v43  ;;  %v3052_v28 = vmul.f32 %v3048_v49, %v10225_v47  ;;  %v2703_v33 = vadd.f32 %v2702_v6, %v2679_v58 }
 0x3b5   : > { %v3044_v55 = vadd.f32 %v3040_v62, %v3016_v50  ;;  %v3046_v52 = vadd.f32 %v3042_v31, %v3018_v59  ;;  %v3228_v9 = vperm.slane %v8277_v34, 6  ;;  %v3108_v43 = vmul.f32 %v10226_v7, %v10193_v15  ;;  %v10227_v31 = vld [vmem:[#allocation134_spill] sm:$0xff] }
 0x3b6   : > { %v8306_v11 = vpop.f32.mrf.mxu2  ;;  %v3074_v5 = vadd.f32 %v3070_v51, %v3036_v23  ;;  %v3142_v49 = vperm.slane %v8275_v37, 4  ;;  %v3124_v59 = vperm.slane %v8286_v60, 3  ;;  %v3266_v6 = vperm.slane %v8277_v34, 7  ;;  %v10228_v23 = vld [vmem:[#allocation130_spill] sm:$0xff] }
 0x3b7   : > { %v3054_v36 = vadd.f32 %v3050_v17, %v3044_v55  ;;  %v3056_v63 = vadd.f32 %v3052_v28, %v3046_v52  ;;  %v3088_v62 = vmul.f32 %v3086_v46, %v10227_v31  ;;  %v3090_v51 = vmul.f32 %v3086_v46, %v10228_v23 }
 0x3b8   : > { %v2778_v17 = vadd.f32 %v2777_v40, %v2703_v33  ;;  %v3112_v47 = vadd.f32 %v3108_v43, %v3074_v5  ;;  %v3116_v2 = vmul.f32 %v3114_v45, %v10195_v21  ;;  %v2992_v55 = vmul.f32 %v2990_v42, %v10208_v14  ;;  %v10230_v45 = vld [vmem:[#allocation124_spill] sm:$0xff] }
 0x3b9   : > { %v3082_v50 = vadd.f32 %v3078_v30, %v3054_v36  ;;  %v3084_v58 = vadd.f32 %v3080_v8, %v3056_v63  ;;  %v3030_v52 = vmul.f32 %v3028_v13, %v10204_v22  ;;  %v3146_v30 = vmul.f32 %v8180_v61, %v3142_v49  ;;  %v10229_v8 = vld [vmem:[#allocation128_spill] sm:$0xff] }
 0x3ba   : > { %v3180_v36 = vperm.slane %v8275_v37, 5  ;;  %v3126_v63 = vmul.f32 %v3124_v59, %v10229_v8  ;;  %v3162_v40 = vperm.slane %v8286_v60, 4  ;;  %v3128_v5 = vmul.f32 %v3124_v59, %v10230_v45  ;;  %v2910_v8 = vpop.f32.mrf.mxu1 }
 0x3bb   : > { %v3092_v28 = vadd.f32 %v3088_v62, %v3082_v50  ;;  %v3094_v7 = vadd.f32 %v3090_v51, %v3084_v58  ;;  %v3034_v43 = vadd.f32 %v3030_v52, %v2992_v55  ;;  %v2801_v14 = vadd.f32 %v8267_v24, %v2778_v17  ;;  %v8348_v50 = vpop.f32.mrf.mxu0 }
 0x3bc   : > { %v3154_v22 = vmul.f32 %v8001_v16, %v3152_v12  ;;  %v3156_v42 = vmul.f32 %v8180_v61, %v3152_v12  ;;  %v3192_v13 = vmul.f32 %v3190_v27, %v10189_v38  ;;  %v3150_v58 = vadd.f32 %v3146_v30, %v3112_v47 }
 0x3bd   : > { %v3120_v33 = vadd.f32 %v3116_v2, %v3092_v28  ;;  %v3122_v15 = vadd.f32 %v3118_v25, %v3094_v7  ;;  %v10231_v23 = vperm.slane %v8275_v37, 2  ;;  %v3184_v59 = vmul.f32 %v3180_v36, %v10187_v3  ;;  %v10232_v7 = vld [vmem:[#allocation150_spill] sm:$0xff] }
 0x3be   : > { %v8341_v46 = vpop.f32.mrf.mxu2  ;;  %v3218_v24 = vperm.slane %v8275_v37, 6  ;;  %v3164_v17 = vmul.f32 %v7782_v1, %v3162_v40  ;;  %v3200_v12 = vperm.slane %v8286_v60, 5  ;;  %v3166_v47 = vmul.f32 %v7767_v56, %v3162_v40  ;;  %v10234_v40 = vld [vmem:[#allocation120_spill] sm:$0xff] }
 0x3bf   : > { %v3130_v31 = vadd.f32 %v3126_v63, %v3120_v33  ;;  %v3132_v62 = vadd.f32 %v3128_v5, %v3122_v15  ;;  %v3068_v51 = vmul.f32 %v10231_v23, %v10200_v4  ;;  %v8361_v55 = vadd.f32 %v10232_v7, %v2801_v14  ;;  %v10236_v23 = vld [vmem:[#allocation148_spill] sm:$0xff] }
 0x3c0   : > { %v3256_v4 = vperm.slane %v8275_v37, 7  ;;  %v3194_v52 = vmul.f32 %v3190_v27, %v10187_v3  ;;  %v3230_v30 = vmul.f32 %v3228_v9, %v10185_v32  ;;  %v3188_v63 = vadd.f32 %v3184_v59, %v3150_v58  ;;  %v2933_v3 = vpop.f32.mrf.mxu3 }
 0x3c1   : > { %v3158_v2 = vadd.f32 %v3154_v22, %v3130_v31  ;;  %v3160_v25 = vadd.f32 %v3156_v42, %v3132_v62  ;;  %v3072_v28 = vadd.f32 %v3068_v51, %v3034_v43  ;;  %v10233_v15 = vperm.slane %v8275_v37, 3  ;;  %v10235_v42 = vld [vmem:[#allocation119_spill] sm:$0xff] }
 0x3c2   : > { %v3222_v56 = vmul.f32 %v3218_v24, %v10184_v54  ;;  %v3202_v5 = vmul.f32 %v3200_v12, %v10234_v40  ;;  %v3232_v43 = vmul.f32 %v3228_v9, %v10184_v54  ;;  %v3238_v27 = vperm.slane %v8286_v60, 6 }
 0x3c3   : > { %v3168_v33 = vadd.f32 %v3164_v17, %v3158_v2  ;;  %v3170_v1 = vadd.f32 %v3166_v47, %v3160_v25  ;;  %v3106_v45 = vmul.f32 %v10233_v15, %v10195_v21  ;;  %v3204_v58 = vmul.f32 %v3200_v12, %v10235_v42  ;;  %v10237_v25 = vld [vmem:[#allocation115_spill] sm:$0xff]  ;;  %v10242_v42 = vld [vmem:[#allocation110_spill] sm:$0xff] }
 0x3c4   : > { %v2911_v51 = vadd.f32 %v2910_v8, %v10236_v23  ;;  %v3260_v21 = vmul.f32 %v3256_v4, %v10182_v35  ;;  %v3286_v59 = vperm.slane %v8361_v55, 0  ;;  %v2746_v54 = vadd.f32 %v8306_v11, %v8269_v29  ;;  %v2953_v8 = vpop.f32.mrf.mxu0  ;;  %v10238_v55 = vld [vmem:[#allocation112_spill] sm:$0xff] }
 0x3c5   : > { %v3196_v14 = vadd.f32 %v3192_v13, %v3168_v33  ;;  %v3198_v22 = vadd.f32 %v3194_v52, %v3170_v1  ;;  %v3110_v62 = vadd.f32 %v3106_v45, %v3072_v28  ;;  %v3226_v9 = vadd.f32 %v3222_v56, %v3188_v63 }
 0x3c6   : > { %v3144_v13 = vmul.f32 %v8001_v16, %v3142_v49  ;;  %v2934_v12 = vadd.f32 %v2933_v3, %v2911_v51  ;;  %v3240_v47 = vmul.f32 %v3238_v27, %v10237_v25  ;;  %v3276_v28 = vperm.slane %v8286_v60, 7 }
 0x3c7   : > { %v3206_v17 = vadd.f32 %v3202_v5, %v3196_v14  ;;  %v3208_v2 = vadd.f32 %v3204_v58, %v3198_v22  ;;  %v3242_v15 = vmul.f32 %v3238_v27, %v10238_v55  ;;  %v3296_v11 = vperm.slane %v8304_v39, 0 }
 0x3c8   : > { %v3148_v45 = vadd.f32 %v3144_v13, %v3110_v62  ;;  %v2584_v29 = vadd.f32 %v8271_v57, %v10215_v41  ;;  %v3270_v16 = vmul.f32 %v3266_v6, %v10182_v35  ;;  %v3264_v49 = vadd.f32 %v3260_v21, %v3226_v9  ;;  %v10240_v41 = vld [vmem:[#allocation105_spill] sm:$0xff]  ;;  %v10243_v13 = vld [vmem:[#allocation108_spill] sm:$0xff] }
 0x3c9   : > { %v3234_v33 = vadd.f32 %v3230_v30, %v3206_v17  ;;  %v3236_v1 = vadd.f32 %v3232_v43, %v3208_v2  ;;  %v3182_v60 = vmul.f32 %v3180_v36, %v10189_v38  ;;  %v10239_v30 = vld [vmem:[#allocation100_spill] sm:$0xff]  ;;  %v3268_v39 = vmul.f32 %v3266_v6, %v10183_v26  ;;  %v8422_v17 = vld [vmem:[%s5684_s14 + $0x10] sm:$0xff] }
 0x3ca   : > { %v2820_v31 = vpop.f32.mrf.mxu2  ;;  %v3290_v40 = vmul.f32 %v3286_v59, %v10239_v30  ;;  %v3280_v43 = vmul.f32 %v3276_v28, %v10240_v41  ;;  %v3306_v27 = vperm.slane %v2934_v12, 0  ;;  %v3300_v14 = vmul.f32 %v3296_v11, %v10239_v30 }
 0x3cb   : > { %v2821_v52 = vadd.f32 %v2820_v31, %v2746_v54  ;;  %v3244_v63 = vadd.f32 %v3240_v47, %v3234_v33  ;;  %v3246_v56 = vadd.f32 %v3242_v15, %v3236_v1  ;;  %v3186_v3 = vadd.f32 %v3182_v60, %v3148_v45  ;;  %v10245_v15 = vld [vmem:[#allocation79_spill] sm:$0xff] }
 0x3cc   : > { %v8408_v38 = vadd.f32 %v8261_v0, %v2584_v29  ;;  %v8410_v36 = vadd.f32 %v3290_v40, %v3264_v49  ;;  %v3278_v58 = vmul.f32 %v3276_v28, %v10242_v42  ;;  %v3310_v62 = vmul.f32 %v3306_v27, %v10180_v20  ;;  %v2956_v21 = vpop.f32.mrf.mxu0  ;;  %v10247_v49 = vld [vmem:[#allocation82_spill] sm:$0xff] }
 0x3cd   : > { %v2844_v5 = vadd.f32 %v8315_v18, %v2821_v52  ;;  %v3274_v57 = vadd.f32 %v3270_v16, %v3246_v56  ;;  %v3272_v22 = vadd.f32 %v3268_v39, %v3244_v63  ;;  %v3220_v18 = vmul.f32 %v3218_v24, %v10185_v32  ;;  %v10248_v56 = vld [vmem:[#allocation143_spill] sm:$0xff] }
 0x3ce   : > { %10241 = vst [vmem:[#allocation153_spill] sm:$0xff] %v8410_v36  ;;  %v3001_v0 = vperm.slane %v8408_v38, 0  ;;  %v3318_v2 = vmul.f32 %v8422_v17, %v8410_v36  ;;  %v2954_v32 = vadd.f32 %v2953_v8, %v10218_v19  ;;  %v3298_v12 = vmul.f32 %v3296_v11, %v10243_v13  ;;  %v10334_v36 = vld [vmem:[#allocation35_spill] sm:$0xff] }
 0x3cf   : > { %v3284_v34 = vadd.f32 %v3280_v43, %v3274_v57  ;;  %v8416_v6 = vadd.f32 %v10216_v10, %v2844_v5  ;;  %v3224_v51 = vadd.f32 %v3220_v18, %v3186_v3  ;;  %v3282_v54 = vadd.f32 %v3278_v58, %v3272_v22  ;;  %v10251_v58 = vld [vmem:[#allocation139_spill] sm:$0xff] }
 0x3d0   : > { %v3258_v10 = vmul.f32 %v3256_v4, %v10183_v26  ;;  %v8436_v52 = vadd.f32 %v2956_v21, %v10236_v23  ;;  %v3039_v33 = vperm.slane %v8408_v38, 1  ;;  %v3003_v26 = vmul.f32 %v3001_v0, %v10212_v48 }
 0x3d1   : > { %v3304_v31 = vadd.f32 %v3300_v14, %v3284_v34  ;;  %v2991_v24 = vperm.slane %v8416_v6, 0  ;;  %v3029_v20 = vperm.slane %v8416_v6, 1  ;;  %v3077_v37 = vperm.slane %v8408_v38, 2  ;;  %v8465_v34 = vld [vmem:[%s5684_s14] sm:$0xff] }
 0x3d2   : > { %v8404_v35 = vpop.f32.mrf.mxu2  ;;  %v3262_v28 = vadd.f32 %v3258_v10, %v3224_v51  ;;  %v3288_v19 = vmul.f32 %v3286_v59, %v10243_v13  ;;  %v3302_v4 = vadd.f32 %v3298_v12, %v3282_v54  ;;  %v3308_v8 = vmul.f32 %v3306_v27, %v10181_v53  ;;  %v10249_v53 = vld [vmem:[#allocation141_spill] sm:$0xff]  ;;  %v10253_v54 = vld [vmem:[#allocation107_spill] sm:$0xff] }
 0x3d3   : > { %v3314_v9 = vadd.f32 %v3310_v62, %v3304_v31  ;;  %v2995_v55 = vmul.f32 %v2991_v24, %v10211_v44  ;;  %v3033_v23 = vmul.f32 %v3029_v20, %v10245_v15  ;;  %v3067_v11 = vperm.slane %v8416_v6, 2  ;;  %v10252_v62 = vld [vmem:[#allocation133_spill] sm:$0xff] }
 0x3d4   : > { %v8450_v29 = vadd.f32 %v3288_v19, %v3262_v28  ;;  %v2993_v16 = vmul.f32 %v2991_v24, %v10212_v48  ;;  %v3031_v59 = vmul.f32 %v3029_v20, %v10247_v49  ;;  %v3005_v63 = vmul.f32 %v3001_v0, %v10211_v44  ;;  %v10250_v44 = vld [vmem:[#allocation99_spill] sm:$0xff]  ;;  %v10255_v20 = vld [vmem:[#allocation42_spill] sm:$0xff] }
 0x3d5   : > { %v8433_v25 = vadd.f32 %v3318_v2, %v3314_v9  ;;  %v3041_v39 = vmul.f32 %v3039_v33, %v10247_v49  ;;  %v3043_v5 = vmul.f32 %v3039_v33, %v10245_v15  ;;  %v3312_v57 = vadd.f32 %v3308_v8, %v3302_v4  ;;  %v10256_v33 = vld [vmem:[#allocation61_spill] sm:$0xff]  ;;  %v10257_v15 = vld [vmem:[#allocation135_spill] sm:$0xff] }
 0x3d6   : > { %10246 = vst [vmem:[#allocation33_spill] sm:$0xff] %v8450_v29  ;;  %v3115_v41 = vperm.slane %v8408_v38, 3  ;;  %v3037_v43 = vadd.f32 %v3033_v23, %v2995_v55  ;;  %v3105_v48 = vperm.slane %v8416_v6, 3  ;;  %v3071_v14 = vmul.f32 %v3067_v11, %v10250_v44 }
 0x3d7   : > { %10244 = vst [vmem:[#allocation29_spill] sm:$0xff] %v8433_v25  ;;  %3346 = vmatpush.msra.mxu3 %v8433_v25  ;;  %v3316_v18 = vmul.f32 %v8465_v34, %v8450_v29  ;;  %v3035_v42 = vadd.f32 %v3031_v59, %v2993_v16  ;;  %v3079_v9 = vmul.f32 %v3077_v37, %v10253_v54  ;;  %v3143_v19 = vperm.slane %v8416_v6, 4  ;;  %v10259_v16 = vld [vmem:[#allocation164_spill] sm:$0xff] }
 0x3d8   : > { %v3081_v2 = vmul.f32 %v3077_v37, %v10250_v44  ;;  %v3069_v24 = vmul.f32 %v3067_v11, %v10253_v54  ;;  %v2749_v13 = vadd.f32 %v8341_v46, %v10255_v20  ;;  %v3075_v12 = vadd.f32 %v3071_v14, %v3037_v43 }
 0x3d9   : > { %v8473_v10 = vadd.f32 %v3316_v18, %v3312_v57  ;;  %v3117_v49 = vmul.f32 %v3115_v41, %v10259_v16  ;;  %v3119_v59 = vmul.f32 %v3115_v41, %v10256_v33  ;;  %v10260_v57 = vld [vmem:[#allocation129_spill] sm:$0xff] }
 0x3da   : > { %v2976_v47 = vpop.f32.mrf.mxu2  ;;  %v3073_v37 = vadd.f32 %v3069_v24, %v3035_v42  ;;  %v2824_v46 = vadd.f32 %v8404_v35, %v2749_v13 }
 0x3db   : > { %v8439_v1 = vadd.f32 %v2976_v47, %v2954_v32  ;;  %10254 = vst [vmem:[#allocation40_spill] sm:$0xff] %v8473_v10  ;;  %v8476_v32 = vld [vmem:[%s7973_s17 + $0x4] sm:$0x7]  ;;  %3347 = vmatpush.msra.mxu3 %v8473_v10 }
 0x3dc   : > { %5157 = vmatmul.msk.f32.vlgmr.msra.gmra.mxu3 %vm1234_vm6, %v8476_v32 }
 0x3dd   : > { %v3011_v45 = vperm.slane %v8439_v1, 0  ;;  %v3049_v40 = vperm.slane %v8439_v1, 1  ;;  %v3087_v22 = vperm.slane %v8439_v1, 2  ;;  %v3125_v4 = vperm.slane %v8439_v1, 3 }
 0x3de   : > { %v3163_v43 = vperm.slane %v8439_v1, 4  ;;  %v3201_v24 = vperm.slane %v8439_v1, 5 }
 0x3df   : > { %v3013_v60 = vmul.f32 %v3011_v45, %v10248_v56  ;;  %v3015_v30 = vmul.f32 %v3011_v45, %v10249_v53  ;;  %v3051_v31 = vmul.f32 %v3049_v40, %v10251_v58  ;;  %v3053_v51 = vmul.f32 %v3049_v40, %v10252_v62  ;;  %v10258_v45 = vld [vmem:[#allocation131_spill] sm:$0xff]  ;;  %v8495_v40 = vld [vmem:[%s5703_s15 + $0x18] sm:$0xff] }
 0x3e0   : > { %v3089_v23 = vmul.f32 %v3087_v22, %v10257_v15  ;;  %v3091_v11 = vmul.f32 %v3087_v22, %v10258_v45  ;;  %v3127_v35 = vmul.f32 %v3125_v4, %v10260_v57  ;;  %v2847_v22 = vadd.f32 %v8348_v50, %v2824_v46 }
 0x3e1   : > { %v3017_v27 = vadd.f32 %v3013_v60, %v3003_v26  ;;  %v3019_v3 = vadd.f32 %v3015_v30, %v3005_v63  ;;  %v3109_v26 = vmul.f32 %v3105_v48, %v10256_v33  ;;  %v3153_v63 = vperm.slane %v8408_v38, 4 }
 0x3e2   : > { %v3107_v30 = vmul.f32 %v3105_v48, %v10259_v16  ;;  %v8504_v48 = vld [vmem:[%s5703_s15 + $0x8] sm:$0xff]  ;;  %v3191_v58 = vperm.slane %v8408_v38, 5  ;;  %v3257_v33 = vperm.slane %v8416_v6, 7  ;;  %v2865_v45 = vadd.f32 %v10232_v7, %v2847_v22  ;;  %v10267_v16 = vld [vmem:[#allocation122_spill] sm:$0xff] }
 0x3e3   : > { %v3045_v0 = vadd.f32 %v3041_v39, %v3017_v27  ;;  %v3047_v21 = vadd.f32 %v3043_v5, %v3019_v3  ;;  %v3113_v56 = vadd.f32 %v3109_v26, %v3075_v12  ;;  %v3147_v39 = vmul.f32 %v8495_v40, %v3143_v19  ;;  %v10261_v3 = vld [vmem:[#allocation125_spill] sm:$0xff]  ;;  %v8518_v12 = vld [vmem:[%s5684_s14 + $0x18] sm:$0xff]  ;;  %v10265_v26 = vld [vmem:[#allocation92_spill] sm:$0xff] }
 0x3e4   : > { %v3181_v5 = vperm.slane %v8416_v6, 5  ;;  %v3129_v44 = vmul.f32 %v3125_v4, %v10261_v3  ;;  %v3111_v14 = vadd.f32 %v3107_v30, %v3073_v37  ;;  %v3155_v18 = vmul.f32 %v8504_v48, %v3153_v63  ;;  %10264 = vst [vmem:[#allocation78_spill] sm:$0xff] %v8518_v12 }
 0x3e5   : > { %v3055_v47 = vadd.f32 %v3051_v31, %v3045_v0  ;;  %v3057_v28 = vadd.f32 %v3053_v51, %v3047_v21  ;;  %v3157_v42 = vmul.f32 %v8495_v40, %v3153_v63  ;;  %v3151_v31 = vadd.f32 %v3147_v39, %v3113_v56  ;;  %v10262_v21 = vld [vmem:[#allocation89_spill] sm:$0xff] }
 0x3e6   : > { %v3145_v0 = vmul.f32 %v8504_v48, %v3143_v19  ;;  %v3185_v54 = vmul.f32 %v3181_v5, %v10262_v21  ;;  %v3193_v19 = vmul.f32 %v3191_v58, %v10265_v26  ;;  %v3195_v4 = vmul.f32 %v3191_v58, %v10262_v21  ;;  %v10269_v39 = vld [vmem:[#allocation81_spill] sm:$0xff] }
 0x3e7   : > { %v3083_v8 = vadd.f32 %v3079_v9, %v3055_v47  ;;  %v3085_v55 = vadd.f32 %v3081_v2, %v3057_v28  ;;  %v3219_v9 = vperm.slane %v8416_v6, 6  ;;  %v8513_v2 = vld [vmem:[%s5684_s14 + $0x8] sm:$0xff]  ;;  %v3167_v47 = vmul.f32 %v8518_v12, %v3163_v43  ;;  %v2979_v6 = vpop.f32.mrf.mxu2 }
 0x3e8   : > { %10263 = vst [vmem:[#allocation186_spill] sm:$0xff] %v8513_v2  ;;  %v3165_v50 = vmul.f32 %v8513_v2, %v3163_v43  ;;  %v3149_v28 = vadd.f32 %v3145_v0, %v3111_v14  ;;  %v3229_v37 = vperm.slane %v8408_v38, 6  ;;  %v3261_v57 = vmul.f32 %v3257_v33, %v10269_v39 }
 0x3e9   : > { %v3093_v60 = vadd.f32 %v3089_v23, %v3083_v8  ;;  %v3095_v53 = vadd.f32 %v3091_v11, %v3085_v55  ;;  %v3189_v8 = vadd.f32 %v3185_v54, %v3151_v31  ;;  %v3183_v23 = vmul.f32 %v3181_v5, %v10265_v26  ;;  %v10266_v11 = vld [vmem:[#allocation88_spill] sm:$0xff]  ;;  %v10273_v54 = vld [vmem:[#allocation159_spill] sm:$0xff] }
 0x3ea   : > { %v3223_v46 = vmul.f32 %v3219_v9, %v10266_v11  ;;  %v3233_v5 = vmul.f32 %v3229_v37, %v10266_v11  ;;  %v3267_v7 = vperm.slane %v8408_v38, 7  ;;  %v3287_v14 = vperm.slane %v2865_v45, 0  ;;  %v10274_v38 = vld [vmem:[#allocation83_spill] sm:$0xff]  ;;  %v10278_v45 = vld [vmem:[#allocation146_spill] sm:$0xff] }
 0x3eb   : > { %v3121_v41 = vadd.f32 %v3117_v49, %v3093_v60  ;;  %v3123_v27 = vadd.f32 %v3119_v59, %v3095_v53  ;;  %v3203_v49 = vmul.f32 %v3201_v24, %v10267_v16  ;;  %v3239_v59 = vperm.slane %v8439_v1, 6  ;;  %v10268_v60 = vld [vmem:[#allocation121_spill] sm:$0xff] }
 0x3ec   : > { %v3205_v53 = vmul.f32 %v3201_v24, %v10268_v60  ;;  %v3187_v30 = vadd.f32 %v3183_v23, %v3149_v28  ;;  %v2980_v22 = vadd.f32 %v2979_v6, %v8436_v52  ;;  %v3277_v58 = vperm.slane %v8439_v1, 7  ;;  %v10275_v28 = vld [vmem:[#allocation144_spill] sm:$0xff]  ;;  %v10280_v6 = vld [vmem:[#allocation137_spill] sm:$0xff] }
 0x3ed   : > { %v3131_v62 = vadd.f32 %v3127_v35, %v3121_v41  ;;  %v3133_v51 = vadd.f32 %v3129_v44, %v3123_v27  ;;  %v10270_v35 = vld [vmem:[#allocation87_spill] sm:$0xff]  ;;  %v3227_v41 = vadd.f32 %v3223_v46, %v3189_v8  ;;  %v3269_v24 = vmul.f32 %v3267_v7, %v10274_v38 }
 0x3ee   : > { %v3231_v43 = vmul.f32 %v3229_v37, %v10270_v35  ;;  %v3221_v44 = vmul.f32 %v3219_v9, %v10270_v35  ;;  %v3259_v52 = vmul.f32 %v3257_v33, %v10274_v38  ;;  %v3291_v26 = vmul.f32 %v3287_v14, %v10275_v28  ;;  %v10296_v38 = vld [vmem:[#allocation75_spill] sm:$0xff] }
 0x3ef   : > { %v3159_v20 = vadd.f32 %v3155_v18, %v3131_v62  ;;  %v3161_v13 = vadd.f32 %v3157_v42, %v3133_v51  ;;  %v10271_v18 = vld [vmem:[#allocation118_spill] sm:$0xff]  ;;  %v10272_v51 = vld [vmem:[#allocation117_spill] sm:$0xff]  ;;  %v3289_v16 = vmul.f32 %v3287_v14, %v10278_v45 }
 0x3f0   : > { %v3241_v42 = vmul.f32 %v3239_v59, %v10271_v18  ;;  %v3243_v0 = vmul.f32 %v3239_v59, %v10272_v51  ;;  %v3225_v21 = vadd.f32 %v3221_v44, %v3187_v30  ;;  %v10286_v14 = vld [vmem:[#allocation181_spill] sm:$0xff]  ;;  %v10287_v18 = vld [vmem:[#allocation16_spill] sm:$0xff] }
 0x3f1   : > { %v3169_v55 = vadd.f32 %v3165_v50, %v3159_v20  ;;  %v3171_v15 = vadd.f32 %v3167_v47, %v3161_v13  ;;  %v3297_v50 = vperm.slane %v10273_v54, 0  ;;  %v3271_v20 = vmul.f32 %v3267_v7, %v10269_v39  ;;  %v10291_v51 = vld [vmem:[#allocation24_spill] sm:$0xff]  ;;  %v10294_v54 = vld [vmem:[#allocation171_spill] sm:$0xff] }
 0x3f2   : > { %v3265_v13 = vadd.f32 %v3261_v57, %v3227_v41  ;;  %v3263_v23 = vadd.f32 %v3259_v52, %v3225_v21  ;;  %v8559_v57 = vld [vmem:[%s9316_s2 + $0x50] ss:$0 sm:$0xff]  ;;  %v5390_v52 = vld [vmem:[%s6357_s8 + $0x40] sm:$0xff] }
 0x3f3   : > { %v3197_v63 = vadd.f32 %v3193_v19, %v3169_v55  ;;  %v3199_v56 = vadd.f32 %v3195_v4, %v3171_v15  ;;  %v10276_v19 = vld [vmem:[#allocation116_spill] sm:$0xff]  ;;  %v3307_v4 = vperm.slane %v2980_v22, 0  ;;  %v10277_v55 = vld [vmem:[#allocation114_spill] sm:$0xff]  ;;  %v3299_v11 = vmul.f32 %v3297_v50, %v10278_v45  ;;  %v10293_v21 = vld [vmem:[#allocation65_spill] sm:$0xff] }
 0x3f4   : > { %v3279_v1 = vmul.f32 %v3277_v58, %v10276_v19  ;;  %v3281_v15 = vmul.f32 %v3277_v58, %v10277_v55  ;;  %v3301_v46 = vmul.f32 %v3297_v50, %v10275_v28  ;;  %v8554_v39 = vadd.f32 %v3289_v16, %v3263_v23  ;;  %v8586_v58 = vld [vmem:[%s6206_s29 + $0x48] sm:$0xff]  ;;  %v10295_v50 = vld [vmem:[#allocation46_spill] sm:$0xff]  ;;  %v5391_v19 = vld [vmem:[%s6357_s8 + $0x50] sm:$0x1] }
 0x3f5   : > { %v3207_v27 = vadd.f32 %v3203_v49, %v3197_v63  ;;  %v3209_v3 = vadd.f32 %v3205_v53, %v3199_v56  ;;  %v8550_v49 = vadd.f32 %v3291_v26, %v3265_v13  ;;  %v3309_v63 = vmul.f32 %v3307_v4, %v10280_v6  ;;  %v10281_v53 = vld [vmem:[#allocation127_spill] sm:$0xff]  ;;  %v10303_v28 = vld [vmem:[#allocation180_spill] sm:$0xff]  ;;  %v5172_v55 = vld [vmem:[%s6425_s6 + $0x58] sm:$0x1] }
 0x3f6   : > { %v3311_v30 = vmul.f32 %v3307_v4, %v10281_v53  ;;  %10282 = vst [vmem:[#allocation73_spill] sm:$0xff] %v8554_v39  ;;  %v3317_v41 = vmul.f32 %v8513_v2, %v8554_v39  ;;  %v8576_v22 = vmul.f32 %v8559_v57, %v10286_v14  ;;  %v10300_v13 = vld [vmem:[#allocation51_spill] sm:$0xff]  ;;  %v10305_v4 = vld [vmem:[#allocation84_spill] sm:$0xff]  ;;  %v10309_v23 = vld [vmem:[#allocation34_spill] sm:$0xff]  ;;  %v8699_v10 = vmul.f32 %v8559_v57, %v10334_v36 }
 0x3f7   : > { %v3235_v31 = vadd.f32 %v3231_v43, %v3207_v27  ;;  %v3237_v62 = vadd.f32 %v3233_v5, %v3209_v3  ;;  %10279 = vst [vmem:[#allocation28_spill] sm:$0xff] %v8550_v49  ;;  %v3319_v5 = vmul.f32 %v8518_v12, %v8550_v49  ;;  %v10284_v27 = vld [vmem:[#allocation176_spill] sm:$0xff]  ;;  %v10313_v16 = vld [vmem:[#allocation55_spill] sm:$0xff]  ;;  %v10316_v6 = vld [vmem:[#allocation154_spill] sm:$0xff] }
 0x3f8   : > { %v8569_v3 = vmul.f32 %v8559_v57, %v10284_v27  ;;  %v10310_v45 = vld [vmem:[#allocation80_spill] sm:$0xff]  ;;  %v5393_v53 = vld [vmem:[%s6763_s7 + $0x50] sm:$0x1]  ;;  %v10330_v39 = vld [vmem:[#allocation31_spill] sm:$0xff]  ;;  %10335 = vst [vmem:[#allocation69_spill] sm:$0xff] %v8699_v10 }
 0x3f9   : > { %v3245_v9 = vadd.f32 %v3241_v42, %v3235_v31  ;;  %v3247_v47 = vadd.f32 %v3243_v0, %v3237_v62  ;;  %v10288_v42 = vld [vmem:[#allocation17_spill] sm:$0xff]  ;;  %v10289_v31 = vld [vmem:[#allocation76_spill] sm:$0xff]  ;;  %v10290_v62 = vld [vmem:[#allocation187_spill] sm:$0xff] }
 0x3fa   : > { %v8595_v0 = vld [vmem:[%s6206_s29 + $0x58] sm:$0x1]  ;;  %v5155_v27 = vld [vmem:[%s8153_s3 + $0x10] sm:$0xff] }
 0x3fb   : > { %v3273_v37 = vadd.f32 %v3269_v24, %v3245_v9  ;;  %v3275_v8 = vadd.f32 %v3271_v20, %v3247_v47  ;;  %v10297_v24 = vld [vmem:[#allocation58_spill] sm:$0xff]  ;;  %v10301_v9 = vld [vmem:[#allocation175_spill] sm:$0xff]  ;;  %v10319_v14 = vld [vmem:[#allocation57_spill] sm:$0xff] }
 0x3fc   : > { %v10298_v20 = vld [vmem:[#allocation70_spill] sm:$0xff] }
 0x3fd   : > { %v3283_v59 = vadd.f32 %v3279_v1, %v3273_v37  ;;  %v3285_v33 = vadd.f32 %v3281_v15, %v3275_v8  ;;  %v5170_v1 = vld [vmem:[%s6425_s6 + $0x48] sm:$0xff]  ;;  %v10306_v37 = vld [vmem:[#allocation62_spill] sm:$0xff] }
 0x3fe   : > { %v10307_v8 = vld [vmem:[#allocation56_spill] sm:$0xff]  ;;  %v10308_v15 = vld [vmem:[#allocation54_spill] sm:$0xff] }
 0x3ff   : > { %v3303_v56 = vadd.f32 %v3299_v11, %v3283_v59  ;;  %v3305_v60 = vadd.f32 %v3301_v46, %v3285_v33  ;;  %v10311_v11 = vld [vmem:[#allocation39_spill] sm:$0xff]  ;;  %v10314_v59 = vld [vmem:[#allocation30_spill] sm:$0xff] }
 0x400   : > { %v10312_v46 = vld [vmem:[#allocation63_spill] sm:$0xff]  ;;  %v10315_v33 = vld [vmem:[#allocation26_spill] sm:$0xff] }
 0x401   : > { %v3313_v35 = vadd.f32 %v3309_v63, %v3303_v56  ;;  %v3315_v43 = vadd.f32 %v3311_v30, %v3305_v60  ;;  %v10317_v63 = vld [vmem:[#allocation170_spill] sm:$0xff]  ;;  %v10318_v56 = vld [vmem:[#allocation49_spill] sm:$0xff]  ;;  %v5392_v60 = vld [vmem:[%s6763_s7 + $0x40] sm:$0xff] }
 0x402   : > { %v10331_v49 = vld [vmem:[#allocation182_spill] sm:$0xff] }
 0x403   : > { %v8563_v7 = vadd.f32 %v3319_v5, %v3315_v43  ;;  %v8572_v44 = vadd.f32 %v3317_v41, %v3313_v35 }
 0x405   : > { %10283 = vst [vmem:[#allocation64_spill] sm:$0xff] %v8563_v7  ;;  %3366 = vmatpush.msrb.mxu1 %v8563_v7  ;;  %v10333_v7 = vld [vmem:[#allocation162_spill] sm:$0xff] }
 0x406   : > { %10285 = vst [vmem:[#allocation23_spill] sm:$0xff] %v8572_v44 }
 0x407   : > { %3367 = vmatpush.msrb.mxu1 %v8572_v44 }
 0x408   : > { %5158 = vmatmul.msk.f32.vlgmr.msrb.gmra.mxu1 %vm1234_vm6, %v8476_v32  ;;  %v10292_v32 = vld [vmem:[#allocation77_spill] sm:$0xff] }
 0x409   : > { %3761 = vmatpush.msra.mxu1 %v8569_v3 }
 0x40b   : > { %3762 = vmatpush.msra.mxu1 %v8576_v22 }
 0x40d   : > { %3863 = vmatpush.msrb.mxu1 %v10287_v18  ;;  %v10337_v18 = vld [vmem:[#allocation37_spill] sm:$0xff] }
 0x40f   : > { %3864 = vmatpush.msrb.mxu1 %v10288_v42  ;;  %v10351_v42 = vld [vmem:[#allocation94_spill] sm:$0xff] }
 0x410   : > { %5179 = vmatmul.msk.f32.vlgmr.msra.gmra.mxu1 %vm1234_vm6, %v8586_v58 }
 0x411   : > { %3865 = vmatpush.msrb.mxu1 %v10289_v31  ;;  %v5169_v31 = vld [vmem:[%s6425_s6 + $0x40] sm:$0xff] }
 0x413   : > { %3866 = vmatpush.msrb.mxu1 %v10290_v62  ;;  %v10352_v62 = vld [vmem:[#allocation185_spill] sm:$0xff] }
 0x415   : > { %3867 = vmatpush.msrb.mxu1 %v10291_v51  ;;  %v10354_v51 = vld [vmem:[#allocation19_spill] sm:$0xff] }
 0x417   : > { %3868 = vmatpush.msrb.mxu1 %v10292_v32  ;;  %v10355_v32 = vld [vmem:[#allocation68_spill] sm:$0xff] }
 0x418   : > { %5180 = vmatmul.msk.f32.gmra.mxu1 %vm1234_vm6, %v8595_v0 }
 0x419   : > { %3869 = vmatpush.msrb.mxu1 %v8422_v17  ;;  %v8610_v17 = vld [vmem:[%s9316_s2 + $0x58] ss:$0 sm:$0xff] }
 0x41a   : > { %v8616_v47 = vmul.f32 %v8610_v17, %v10301_v9  ;;  %v8622_v26 = vmul.f32 %v8610_v17, %v10303_v28  ;;  %v8655_v9 = vmul.f32 %v8180_v61, %v10319_v14  ;;  %v8659_v28 = vld [vmem:[%s5703_s15] sm:$0xff]  ;;  %v5156_v61 = vld [vmem:[%s8153_s3 + $0x18] sm:$0xff] }
 0x41b   : > { %3870 = vmatpush.msrb.mxu1 %v8465_v34  ;;  %v10299_v34 = vld [vmem:[#allocation172_spill] sm:$0xff]  ;;  %10321 = vst [vmem:[#allocation18_spill] sm:$0xff] %v8659_v28  ;;  %v8689_v44 = vmul.f32 %v8659_v28, %v10330_v39 }
 0x41c   : > { %10302 = vst [vmem:[#allocation165_spill] sm:$0xff] %v8616_v47 }
 0x41d   : > { %3871 = vmatpush.msrb.mxu1 %v10293_v21  ;;  %10304 = vst [vmem:[#allocation38_spill] sm:$0xff] %v8622_v26 }
 0x41e   : > { %10320 = vst [vmem:[#allocation53_spill] sm:$0xff] %v8655_v9 }
 0x41f   : > { %3872 = vmatpush.msrb.mxu1 %v10294_v54 }
 0x421   : > { %3873 = vmatpush.msrb.mxu1 %v10295_v50 }
 0x423   : > { %3874 = vmatpush.msrb.mxu1 %v10296_v38 }
 0x425   : > { %3875 = vmatpush.msrb.mxu1 %v10297_v24 }
 0x427   : > { %3876 = vmatpush.msrb.mxu1 %v10298_v20 }
 0x429   : > { %3877 = vmatpush.msrb.mxu1 %v10299_v34 }
 0x42b   : > { %3878 = vmatpush.msrb.mxu1 %v10300_v13  ;;  %v8806_v13 = vpop.permute.xlu0 %4058 }
 0x42c   : > { %3879 = vmatmul.f32.vlgmr.msrb.gmra.mxu1 %v5390_v52 }
 0x42d   : > { %3998 = vmatpush.msra.mxu1 %v8569_v3 }
 0x42f   : > { %3999 = vmatpush.msra.mxu1 %v8576_v22 }
 0x431   : > { %4044 = vmatpush.msrb.mxu1 %v8616_v47 }
 0x433   : > { %4045 = vmatpush.msrb.mxu1 %v8622_v26 }
 0x434   : > { %3882 = vmatmul.f32.gmra.mxu1 %v5391_v19  ;;  %v8663_v19 = vmul.f32 %v8659_v28, %v10319_v14  ;;  %v10327_v14 = vld [vmem:[#allocation156_spill] sm:$0xff] }
 0x436   : > { %10322 = vst [vmem:[#allocation50_spill] sm:$0xff] %v8663_v19 }
 0x43c   : > { %5191 = vmatmul.msk.f32.vlgmr.msra.gmra.mxu1 %vm1234_vm6, %v5170_v1 }
 0x43d   : > { %4140 = vmatpush.msra.mxu1 %v10305_v4  ;;  %v5171_v4 = vld [vmem:[%s6425_s6 + $0x50] sm:$0x1] }
 0x43f   : > { %4141 = vmatpush.msra.mxu1 %v10306_v37  ;;  %v10350_v37 = vld [vmem:[#allocation43_spill] sm:$0xff] }
 0x441   : > { %4142 = vmatpush.msra.mxu1 %v10307_v8  ;;  %v10356_v8 = vld [vmem:[#allocation22_spill] sm:$0xff] }
 0x443   : > { %4143 = vmatpush.msra.mxu1 %v10308_v15 }
 0x444   : > { %5192 = vmatmul.msk.f32.gmra.mxu1 %vm1234_vm6, %v5172_v55 }
 0x445   : > { %4144 = vmatpush.msra.mxu1 %v10309_v23 }
 0x447   : > { %4145 = vmatpush.msra.mxu1 %v10310_v45 }
 0x449   : > { %4146 = vmatpush.msra.mxu1 %v8518_v12  ;;  %v3711_v12 = vpop.permute.xlu1 %3710 }
 0x44b   : > { %4147 = vmatpush.msra.mxu1 %v8513_v2 }
 0x44c   : > { %5193 = vmatmul.msk.f32.vlgmr.msrb.gmra.mxu1 %vm1234_vm6, %v5170_v1 }
 0x44d   : > { %4148 = vmatpush.msra.mxu1 %v10311_v11 }
 0x44f   : > { %4149 = vmatpush.msra.mxu1 %v10312_v46 }
 0x451   : > { %4150 = vmatpush.msra.mxu1 %v10313_v16  ;;  %v3716_v20 = vpop.permute.xlu1 %3715 }
 0x453   : > { %4151 = vmatpush.msra.mxu1 %v10314_v59 }
 0x454   : > { %5194 = vmatmul.msk.f32.gmra.mxu1 %vm1234_vm6, %v5172_v55  ;;  %v10323_v55 = vld [vmem:[#allocation158_spill] sm:$0xff] }
 0x455   : > { %4152 = vmatpush.msra.mxu1 %v10315_v33 }
 0x457   : > { %4153 = vmatpush.msra.mxu1 %v10316_v6 }
 0x459   : > { %4154 = vmatpush.msra.mxu1 %v10317_v63 }
 0x45b   : > { %4155 = vmatpush.msra.mxu1 %v10318_v56 }
 0x45c   : > { %4156 = vmatmul.f32.vlgmr.msra.gmra.mxu1 %v5392_v60 }
 0x45f   : > { %v3349_v30 = vpop.f32.mrf.mxu3 }
 0x460   : > { %v3372_v35 = vsub.f32 0.0, %v3349_v30 }
 0x462   : > { %v3374_v43 = vmul.f32 1.442695, %v3372_v35  ;;  %v10325_v35 = vld [vmem:[#allocation179_spill] sm:$0xff] }
 0x464   : > { %4159 = vmatmul.f32.gmra.mxu1 %v5393_v53  ;;  %5348 = vpow2.f32 %v3374_v43  ;;  %v10324_v53 = vld [vmem:[#allocation169_spill] sm:$0xff]  ;;  %v10326_v43 = vld [vmem:[#allocation184_spill] sm:$0xff] }
 0x46a   : > { %v5349_v5 = vpop.eup %5348 }
 0x46b   : > { %v3378_v41 = vadd.f32 1.0, %v5349_v5 }
 0x46d   : > { %5350 = vrcp.f32 %v3378_v41 }
 0x473   : > { %v5351_v52 = vpop.eup %5350 }
 0x474   : > { %5159 = vmatpush.msk.msrb.mxu3 %vm2104_vm0, %v5351_v52  ;;  %v10328_v52 = vld [vmem:[#allocation167_spill] sm:$0xff] }
 0x475   : > { %5160 = vmatmul.msk.f32.vlgmr.msrb.gmra.mxu3 %vm2097_vm1, %v5155_v27 }
 0x476   : > { %3770 = vmatpush.msra.mxu3 %v8655_v9 }
 0x478   : > { %3771 = vmatpush.msra.mxu3 %v8663_v19 }
 0x47a   : > { %3772 = vmatpush.msra.mxu3 %v10323_v55 }
 0x47c   : > { %3773 = vmatpush.msra.mxu3 %v10324_v53 }
 0x47d   : > { %5161 = vmatmul.msk.f32.gmra.mxu3 %vm2097_vm1, %v5156_v61 }
 0x47e   : > { %3774 = vmatpush.msra.mxu3 %v10325_v35 }
 0x480   : > { %3775 = vmatpush.msra.mxu3 %v10326_v43 }
 0x482   : > { %3776 = vmatpush.msra.mxu3 %v8495_v40 }
 0x484   : > { %3777 = vmatpush.msra.mxu3 %v8504_v48 }
 0x485   : > { %v3369_v1 = vpop.f32.mrf.mxu1 }
 0x486   : > { %v3373_v60 = vsub.f32 0.0, %v3369_v1  ;;  %3778 = vmatpush.msra.mxu3 %v10327_v14  ;;  %v10329_v1 = vld [vmem:[#allocation177_spill] sm:$0xff] }
 0x488   : > { %v3376_v30 = vmul.f32 1.442695, %v3373_v60  ;;  %3779 = vmatpush.msra.mxu3 %v10328_v52  ;;  %v8680_v60 = vld [vmem:[%s5703_s15 + $0x10] sm:$0xff] }
 0x48a   : > { %5352 = vpow2.f32 %v3376_v30  ;;  %3780 = vmatpush.msra.mxu3 %v10329_v1  ;;  %v8684_v30 = vmul.f32 %v8680_v60, %v10330_v39  ;;  %v10336_v39 = vld [vmem:[#allocation166_spill] sm:$0xff] }
 0x48b   : > { %v8706_v25 = vmul.f32 %v10333_v7, %v10336_v39  ;;  %v5396_v39 = vld [vmem:[%s6206_s29 + $0x40] sm:$0xff] }
 0x48c   : > { %3781 = vmatpush.msra.mxu3 %v10331_v49 }
 0x48e   : > { %3782 = vmatpush.msra.mxu3 %v8684_v30 }
 0x490   : > { %v5353_v5 = vpop.eup %5352  ;;  %3783 = vmatpush.msra.mxu3 %v8689_v44 }
 0x491   : > { %v3379_v41 = vadd.f32 1.0, %v5353_v5 }
 0x493   : > { %5354 = vrcp.f32 %v3379_v41  ;;  %v10332_v41 = vld [vmem:[#allocation155_spill] sm:$0xff] }
 0x494   : > { %v8695_v29 = vmul.f32 %v10333_v7, %v10332_v41  ;;  %v10339_v41 = vld [vmem:[#allocation48_spill] sm:$0xff] }
 0x495   : > { %v8715_v36 = vmul.f32 %v8559_v57, %v10339_v41  ;;  %v5397_v57 = vld [vmem:[%s6206_s29 + $0x50] sm:$0x1]  ;;  %v10345_v41 = vld [vmem:[#allocation163_spill] sm:$0xff]  ;;  %s5224_s29 = sshll.u32 %s5489_s22, 3 }
 0x496   : > { %3784 = vmatpush.msra.mxu3 %v8695_v29 }
 0x497   : > { %10340 = vst [vmem:[#allocation47_spill] sm:$0xff] %v8715_v36 }
 0x498   : > { %3785 = vmatpush.msra.mxu3 %v8706_v25 }
 0x499   : > { %v5355_v5 = vpop.eup %5354  ;;  %3786 = vmatmul.f32.vlgmr.msra.gmra.mxu3 %v5396_v39  ;;  %v10348_v39 = vld [vmem:[#allocation183_spill] sm:$0xff] }
 0x49a   : > { %5162 = vmatpush.msk.msrb.mxu2 %vm2104_vm0, %v5355_v5  ;;  %v8710_v5 = vmul.f32 %v8610_v17, %v10337_v18  ;;  %v10343_v18 = vld [vmem:[#allocation160_spill] sm:$0xff] }
 0x49b   : > { %5163 = vmatmul.msk.f32.vlgmr.msrb.gmra.mxu2 %vm2097_vm1, %v5155_v27  ;;  %v10341_v27 = vld [vmem:[#allocation45_spill] sm:$0xff] }
 0x49c   : > { %3807 = vmatpush.msra.mxu2 %v8616_v47  ;;  %10338 = vst [vmem:[#allocation67_spill] sm:$0xff] %v8710_v5  ;;  %v8722_v7 = vmul.f32 %v8610_v17, %v10341_v27  ;;  %3946 = vmatpush.msrb.mxu3 %v8710_v5  ;;  %v10344_v17 = vld [vmem:[#allocation161_spill] sm:$0xff]  ;;  %v10346_v27 = vld [vmem:[#allocation168_spill] sm:$0xff] }
 0x49e   : > { %3808 = vmatpush.msra.mxu2 %v8622_v26  ;;  %10342 = vst [vmem:[#allocation152_spill] sm:$0xff] %v8722_v7  ;;  %3947 = vmatpush.msrb.mxu3 %v8722_v7 }
 0x4a0   : > { %3900 = vmatpush.msrb.mxu2 %v8699_v10  ;;  %4007 = vmatpush.msra.mxu3 %v8655_v9 }
 0x4a1   : > { %3789 = vmatmul.f32.gmra.mxu3 %v5397_v57  ;;  %v5186_v57 = vld [vmem:[%s6357_s8 + $0x58] sm:$0x1] }
 0x4a2   : > { %3901 = vmatpush.msrb.mxu2 %v8715_v36  ;;  %4008 = vmatpush.msra.mxu3 %v8663_v19 }
 0x4a3   : > { %5164 = vmatmul.msk.f32.gmra.mxu2 %vm2097_vm1, %v5156_v61  ;;  %v5184_v61 = vld [vmem:[%s6357_s8 + $0x48] sm:$0xff] }
 0x4a4   : > { %4009 = vmatpush.msra.mxu3 %v10323_v55 }
 0x4a6   : > { %4010 = vmatpush.msra.mxu3 %v10324_v53 }
 0x4a8   : > { %4011 = vmatpush.msra.mxu3 %v10325_v35 }
 0x4a9   : > { %5189 = vmatmul.msk.f32.vlgmr.msrb.gmra.mxu3 %vm1234_vm6, %v5184_v61 }
 0x4aa   : > { %4012 = vmatpush.msra.mxu3 %v10326_v43 }
 0x4ab   : > { %5181 = vmatmul.msk.f32.vlgmr.msra.gmra.mxu2 %vm1234_vm6, %v8586_v58  ;;  %v10347_v58 = vld [vmem:[#allocation178_spill] sm:$0xff] }
 0x4ac   : > { %3961 = vmatpush.msra.mxu2 %v10343_v18  ;;  %4013 = vmatpush.msra.mxu3 %v8495_v40 }
 0x4ae   : > { %3962 = vmatpush.msra.mxu2 %v10344_v17  ;;  %4014 = vmatpush.msra.mxu3 %v8504_v48 }
 0x4b0   : > { %3963 = vmatpush.msra.mxu2 %v10345_v41  ;;  %4015 = vmatpush.msra.mxu3 %v10327_v14 }
 0x4b1   : > { %5190 = vmatmul.msk.f32.gmra.mxu3 %vm1234_vm6, %v5186_v57 }
 0x4b2   : > { %3964 = vmatpush.msra.mxu2 %v10346_v27  ;;  %4016 = vmatpush.msra.mxu3 %v10328_v52 }
 0x4b3   : > { %5182 = vmatmul.msk.f32.gmra.mxu2 %vm1234_vm6, %v8595_v0  ;;  %v10349_v0 = vld [vmem:[#allocation60_spill] sm:$0xff] }
 0x4b4   : > { %3965 = vmatpush.msra.mxu2 %v10347_v58  ;;  %4017 = vmatpush.msra.mxu3 %v10329_v1 }
 0x4b6   : > { %3966 = vmatpush.msra.mxu2 %v10348_v39  ;;  %4018 = vmatpush.msra.mxu3 %v10331_v49 }
 0x4b8   : > { %3967 = vmatpush.msra.mxu2 %v8680_v60  ;;  %4019 = vmatpush.msra.mxu3 %v8684_v30 }
 0x4ba   : > { %3968 = vmatpush.msra.mxu2 %v8659_v28  ;;  %4020 = vmatpush.msra.mxu3 %v8689_v44 }
 0x4bb   : > { %5187 = vmatmul.msk.f32.vlgmr.msrb.gmra.mxu2 %vm1234_vm6, %v5184_v61  ;;  %v10353_v61 = vld [vmem:[#allocation66_spill] sm:$0xff] }
 0x4bc   : > { %3969 = vmatpush.msra.mxu2 %v10349_v0  ;;  %4021 = vmatpush.msra.mxu3 %v8695_v29 }
 0x4be   : > { %3970 = vmatpush.msra.mxu2 %v10350_v37  ;;  %4022 = vmatpush.msra.mxu3 %v8706_v25 }
 0x4bf   : > { %4023 = vmatmul.f32.vlgmr.msra.gmra.mxu3 %v5169_v31 }
 0x4c0   : > { %3971 = vmatpush.msra.mxu2 %v10351_v42  ;;  %4177 = vmatpush.msrb.mxu3 %v8710_v5  ;;  %v5200_v5 = vld [vmem:[%s6763_s7 + $0x58] sm:$0x1] }
 0x4c2   : > { %3972 = vmatpush.msra.mxu2 %v10352_v62  ;;  %4178 = vmatpush.msrb.mxu3 %v8722_v7  ;;  %v3764_v7 = vpop.f32.mrf.mxu1 }
 0x4c3   : > { %5188 = vmatmul.msk.f32.gmra.mxu2 %vm1234_vm6, %v5186_v57  ;;  %v5198_v57 = vld [vmem:[%s6763_s7 + $0x48] sm:$0xff] }
 0x4c4   : > { %3973 = vmatpush.msra.mxu2 %v10353_v61 }
 0x4c6   : > { %3974 = vmatpush.msra.mxu2 %v10354_v51 }
 0x4c7   : > { %4026 = vmatmul.f32.gmra.mxu3 %v5171_v4 }
 0x4c8   : > { %3975 = vmatpush.msra.mxu2 %v10355_v32 }
 0x4ca   : > { %3976 = vmatpush.msra.mxu2 %v10356_v8  ;;  %v3767_v15 = vpop.f32.mrf.mxu1 }
 0x4cb   : > { %3977 = vmatmul.f32.vlgmr.msra.gmra.mxu2 %v5169_v31 }
 0x4cc   : > { %4131 = vmatpush.msrb.mxu2 %v8699_v10 }
 0x4ce   : > { %4132 = vmatpush.msrb.mxu2 %v8715_v36  ;;  %v3741_v36 = vpop.f32.mrf.mxu0 }
 0x4cf   : > { %5205 = vmatmul.msk.f32.vlgmr.msrb.gmra.mxu3 %vm1234_vm6, %v5198_v57  ;;  %v3742_v33 = vadd.f32 %v3741_v36, %v3711_v12 }
 0x4d2   : > { %v8784_v21 = vpop.f32.mrf.mxu1 }
 0x4d3   : > { %3980 = vmatmul.f32.gmra.mxu2 %v5171_v4 }
 0x4d6   : > { %v3744_v4 = vpop.f32.mrf.mxu0 }
 0x4d7   : > { %5206 = vmatmul.msk.f32.gmra.mxu3 %vm1234_vm6, %v5200_v5 }
 0x4da   : > { %v8786_v10 = vpop.f32.mrf.mxu1 }
 0x4db   : > { %5203 = vmatmul.msk.f32.vlgmr.msrb.gmra.mxu2 %vm1234_vm6, %v5198_v57  ;;  %10357 = vst [vmem:[#allocation32_spill] sm:$0xff] %v8786_v10  ;;  %v4081_v10 = vpop.permute.xlu2 %4080 }
 0x4e2   : > { %v8790_v54 = vpop.f32.mrf.mxu1 }
 0x4e3   : > { %5204 = vmatmul.msk.f32.gmra.mxu2 %vm1234_vm6, %v5200_v5  ;;  %v3926_v5 = vpop.f32.mrf.mxu0 }
 0x4ea   : > { %v8796_v50 = vpop.f32.mrf.mxu1 }
 0x4eb   : > { %10361 = vst [vmem:[#allocation174_spill] sm:$0xff] %v8796_v50  ;;  %v8800_v11 = vpop.f32.mrf.mxu0  ;;  %v3745_v50 = vadd.f32 %v3744_v4, %v3716_v20 }
 0x4ed   : > { %v3768_v19 = vadd.f32 %v3767_v15, %v3745_v50 }
 0x4f2   : > { %v4047_v2 = vpop.f32.mrf.mxu1 }
 0x4f8   : > { %v8788_v31 = vpop.f32.mrf.mxu3 }
 0x4f9   : > { %10358 = vst [vmem:[#allocation157_spill] sm:$0xff] %v8788_v31 }
 0x4fa   : > { %v8802_v16 = vpop.f32.mrf.mxu1 }
 0x4fb   : > { %10363 = vst [vmem:[#allocation21_spill] sm:$0xff] %v8802_v16 }
 0x500   : > { %v8792_v23 = vpop.f32.mrf.mxu3 }
 0x501   : > { %10359 = vst [vmem:[#allocation44_spill] sm:$0xff] %v8792_v23 }
 0x502   : > { %v4157_v56 = vpop.f32.mrf.mxu1 }
 0x51c   : > { %v3787_v57 = vpop.f32.mrf.mxu3 }
 0x51d   : > { %v3788_v50 = vadd.f32 %v3787_v57, %v3711_v12  ;;  %v4160_v12 = vpop.f32.mrf.mxu1 }
 0x51e   : > { %v8794_v45 = vpop.f32.mrf.mxu2 }
 0x51f   : > { %10360 = vst [vmem:[#allocation27_spill] sm:$0xff] %v8794_v45  ;;  %v4111_v45 = vpop.f32.mrf.mxu0 }
 0x520   : > { %v8810_v55 = vadd.f32 %v4111_v45, %v4081_v10 }
 0x524   : > { %v3790_v24 = vpop.f32.mrf.mxu3 }
 0x525   : > { %v3791_v23 = vadd.f32 %v3790_v24, %v3716_v20  ;;  %v4086_v24 = vpop.permute.xlu0 %4085 }
 0x526   : > { %v8798_v38 = vpop.f32.mrf.mxu2 }
 0x527   : > { %10362 = vst [vmem:[#allocation41_spill] sm:$0xff] %v8798_v38  ;;  %v3765_v38 = vadd.f32 %v3764_v7, %v3742_v33  ;;  %v4114_v47 = vpop.f32.mrf.mxu0 }
 0x528   : > { %v8812_v53 = vadd.f32 %v4114_v47, %v4086_v24  ;;  %v4500_v47 = vperm.slane %v3768_v19, 0 }
 0x529   : > { %v4204_v26 = vperm.slane %v3765_v38, 0  ;;  %v4242_v9 = vperm.slane %v3765_v38, 1  ;;  %v4356_v36 = vperm.slane %v3765_v38, 4  ;;  %v4432_v35 = vperm.slane %v3765_v38, 6 }
 0x52a   : > { %10365 = vst [vmem:[#allocation15_spill] sm:$0xff] %v8812_v53 }
 0x52b   : > { %v8815_v33 = vmul.f32 %v4204_v26, %v10356_v8  ;;  %v8818_v20 = vmul.f32 %v4204_v26, %v10355_v32  ;;  %v8821_v7 = vmul.f32 %v4242_v9, %v10354_v51 }
 0x52c   : > { %v3949_v46 = vpop.f32.mrf.mxu3 }
 0x52d   : > { %v3950_v16 = vadd.f32 %v3949_v46, %v3926_v5  ;;  %10366 = vst [vmem:[#allocation173_spill] sm:$0xff] %v8815_v33  ;;  %v8826_v46 = vmul.f32 %v4242_v9, %v10353_v61  ;;  %v4470_v5 = vperm.slane %v3765_v38, 7  ;;  %v8843_v9 = vmul.f32 %v8659_v28, %v4356_v36 }
 0x52e   : > { %v3810_v31 = vpop.f32.mrf.mxu2  ;;  %10367 = vst [vmem:[#allocation71_spill] sm:$0xff] %v8821_v7 }
 0x52f   : > { %v8828_v53 = vadd.f32 %v3810_v31, %v3788_v50  ;;  %v8855_v31 = vmul.f32 %v4432_v35, %v10346_v27  ;;  %v8870_v50 = vmul.f32 %v4470_v5, %v10343_v18 }
 0x531   : > { %10370 = vst [vmem:[#allocation136_spill] sm:$0xff] %v8855_v31 }
 0x532   : > { %10374 = vst [vmem:[#allocation95_spill] sm:$0xff] %v8870_v50 }
 0x534   : > { %v8808_v6 = vpop.f32.mrf.mxu3 }
 0x536   : > { %v3813_v59 = vpop.f32.mrf.mxu2 }
 0x537   : > { %v8804_v34 = vadd.f32 %v3813_v59, %v3791_v23  ;;  %v4280_v23 = vperm.slane %v3765_v38, 2  ;;  %v4318_v59 = vperm.slane %v3765_v38, 3 }
 0x539   : > { %10364 = vst [vmem:[#allocation36_spill] sm:$0xff] %v8804_v34  ;;  %v4394_v34 = vperm.slane %v3765_v38, 5  ;;  %v8831_v33 = vmul.f32 %v4280_v23, %v10352_v62  ;;  %v8834_v26 = vmul.f32 %v4280_v23, %v10351_v42  ;;  %v8837_v51 = vmul.f32 %v4318_v59, %v10350_v37 }
 0x53a   : > { %v8840_v7 = vmul.f32 %v4318_v59, %v10349_v0  ;;  %v8846_v38 = vmul.f32 %v8680_v60, %v4356_v36  ;;  %v8861_v23 = vmul.f32 %v4500_v47, %v8576_v22  ;;  %v8867_v36 = vmul.f32 %v4470_v5, %v10344_v17 }
 0x53b   : > { %v8852_v19 = vmul.f32 %v4394_v34, %v10347_v58  ;;  %v4281_v5 = vperm.slane %v8828_v53, 2  ;;  %v4433_v17 = vperm.slane %v8828_v53, 6 }
 0x53c   : > { %10372 = vst [vmem:[#allocation72_spill] sm:$0xff] %v8861_v23  ;;  %v4243_v23 = vperm.slane %v8828_v53, 1 }
 0x53d   : > { %10369 = vst [vmem:[#allocation126_spill] sm:$0xff] %v8852_v19 }
 0x53e   : > { %v3903_v63 = vpop.f32.mrf.mxu2  ;;  %10373 = vst [vmem:[#allocation93_spill] sm:$0xff] %v8867_v36  ;;  %v4395_v36 = vperm.slane %v8828_v53, 5  ;;  %v8912_v37 = vmul.f32 %v4243_v23, %v8684_v30 }
 0x53f   : > { %v3904_v50 = vadd.f32 %v3903_v63, %v8784_v21 }
 0x542   : > { %v4024_v45 = vpop.f32.mrf.mxu3 }
 0x543   : > { %v4025_v4 = vadd.f32 %v4024_v45, %v3950_v16  ;;  %v8849_v16 = vmul.f32 %v4394_v34, %v10348_v39  ;;  %v8873_v34 = vmul.f32 %v4500_v47, %v8569_v3  ;;  %v8875_v45 = vadd.f32 %v4157_v56, %v4081_v10 }
 0x544   : > { %v4319_v10 = vperm.slane %v8828_v53, 3  ;;  %v4357_v56 = vperm.slane %v8828_v53, 4 }
 0x545   : > { %v4048_v57 = vadd.f32 %v4047_v2, %v4025_v4  ;;  %10368 = vst [vmem:[#allocation52_spill] sm:$0xff] %v8849_v16  ;;  %v8858_v2 = vmul.f32 %v4432_v35, %v10345_v41  ;;  %v8877_v4 = vadd.f32 %v4160_v12, %v4086_v24  ;;  %v4205_v35 = vperm.slane %v8828_v53, 0 }
 0x546   : > { %v8823_v15 = vpop.f32.mrf.mxu2  ;;  %10375 = vst [vmem:[#allocation97_spill] sm:$0xff] %v8873_v34 }
 0x547   : > { %10371 = vst [vmem:[#allocation91_spill] sm:$0xff] %v8858_v2  ;;  %v8864_v59 = vadd.f32 %v8806_v13, %v4048_v57  ;;  %v8897_v21 = vmul.f32 %v4205_v35, %v8706_v25  ;;  %v8900_v63 = vmul.f32 %v4205_v35, %v8695_v29  ;;  %v3953_v2 = vadd.f32 %v8808_v6, %v8800_v11 }
 0x548   : > { %v8916_v35 = vmul.f32 %v4281_v5, %v10331_v49  ;;  %v8919_v11 = vmul.f32 %v4281_v5, %v10329_v1 }
 0x549   : > { %v9740_v57 = vperm.slane %v8864_v59, 0  ;;  %v9742_v27 = vperm.slane %v8864_v59, 1  ;;  %v9745_v19 = vperm.slane %v8864_v59, 3 }
 0x54a   : > { %v4027_v47 = vpop.f32.mrf.mxu3 }
 0x54b   : > { %v4199_v12 = vmul.f32 %v9740_v57, %v8695_v29  ;;  %v4237_v34 = vmul.f32 %v9742_v27, %v8684_v30  ;;  %v8905_v57 = vmul.f32 %v4243_v23, %v8689_v44  ;;  %v10376_v27 = vperm.slane %v8864_v59, 2 }
 0x54c   : > { %v4028_v23 = vadd.f32 %v4027_v47, %v3953_v2 }
 0x54d   : > { %v4241_v39 = vadd.f32 %v4237_v34, %v4199_v12  ;;  %v4275_v28 = vmul.f32 %v10376_v27, %v10329_v1  ;;  %v8925_v34 = vmul.f32 %v4319_v10, %v10327_v14  ;;  %v4471_v27 = vperm.slane %v8828_v53, 7  ;;  %v10377_v53 = vld [vmem:[#allocation179_spill] sm:$0xff]  ;;  %v10382_v1 = vld [vmem:[#allocation50_spill] sm:$0xff] }
 0x54e   : > { %v3978_v24 = vpop.f32.mrf.mxu2  ;;  %v8945_v5 = vmul.f32 %v4395_v36, %v10377_v53 }
 0x54f   : > { %v3979_v31 = vadd.f32 %v3978_v24, %v3904_v50  ;;  %v4279_v6 = vadd.f32 %v4275_v28, %v4241_v39  ;;  %v8922_v50 = vmul.f32 %v4319_v10, %v10328_v52  ;;  %v4313_v28 = vmul.f32 %v9745_v19, %v10327_v14  ;;  %v10379_v10 = vld [vmem:[#allocation169_spill] sm:$0xff] }
 0x550   : > { %v8942_v39 = vmul.f32 %v4395_v36, %v10326_v43  ;;  %v8958_v43 = vmul.f32 %v4471_v27, %v10382_v1  ;;  %v10384_v36 = vld [vmem:[#allocation32_spill] sm:$0xff]  ;;  %v10385_v52 = vld [vmem:[#allocation21_spill] sm:$0xff] }
 0x551   : > { %v4002_v29 = vadd.f32 %v8790_v54, %v3979_v31  ;;  %v8932_v54 = vmul.f32 %v8504_v48, %v4357_v56  ;;  %v8935_v31 = vmul.f32 %v8495_v40, %v4357_v56  ;;  %v8951_v56 = vmul.f32 %v4433_v17, %v10379_v10 }
 0x552   : > { %v4317_v24 = vadd.f32 %v4313_v28, %v4279_v6  ;;  %10383 = vst [vmem:[#allocation101_spill] sm:$0xff] %v8958_v43  ;;  %v4051_v48 = vadd.f32 %v10385_v52, %v4028_v23  ;;  %v4180_v14 = vpop.f32.mrf.mxu3  ;;  %v10390_v52 = vld [vmem:[#allocation38_spill] sm:$0xff] }
 0x553   : > { %v8929_v30 = vadd.f32 %v8806_v13, %v4002_v29  ;;  %v10378_v13 = vld [vmem:[#allocation36_spill] sm:$0xff]  ;;  %10380 = vst [vmem:[#allocation98_spill] sm:$0xff] %v8951_v56  ;;  %v10381_v29 = vld [vmem:[#allocation158_spill] sm:$0xff]  ;;  %v8986_v43 = vadd.f32 %v4180_v14, %v8875_v45  ;;  %v10397_v45 = vperm.slane %v8864_v59, 6 }
 0x554   : > { %v4501_v2 = vperm.slane %v10378_v13, 0  ;;  %v8955_v19 = vmul.f32 %v4433_v17, %v10381_v29  ;;  %v3907_v13 = vadd.f32 %v8823_v15, %v10384_v36  ;;  %v10388_v17 = vperm.slane %v8864_v59, 4  ;;  %v10389_v15 = vld [vmem:[#allocation53_spill] sm:$0xff] }
 0x555   : > { %v10386_v47 = vperm.slane %v8929_v30, 0  ;;  %v10387_v6 = vperm.slane %v8929_v30, 1  ;;  %v8975_v36 = vmul.f32 %v4471_v27, %v10389_v15  ;;  %v10392_v62 = vperm.slane %v8929_v30, 2  ;;  %v10393_v27 = vld [vmem:[#allocation165_spill] sm:$0xff] }
 0x556   : > { %v3981_v12 = vpop.f32.mrf.mxu2  ;;  %v4351_v16 = vmul.f32 %v8495_v40, %v10388_v17  ;;  %v8978_v23 = vmul.f32 %v4501_v2, %v10390_v52  ;;  %v9751_v17 = vperm.slane %v8929_v30, 3  ;;  %v8989_v1 = vmul.f32 %v4501_v2, %v10393_v27 }
 0x557   : > { %v4198_v10 = vmul.f32 %v10386_v47, %v10355_v32  ;;  %v4236_v28 = vmul.f32 %v10387_v6, %v10353_v61  ;;  %v9749_v32 = vperm.slane %v8864_v59, 7  ;;  %v3982_v47 = vadd.f32 %v3981_v12, %v3907_v13  ;;  %v4064_v61 = vpop.permute.xlu2 %4063 }
 0x558   : > { %10391 = vst [vmem:[#allocation102_spill] sm:$0xff] %v8978_v23  ;;  %v4355_v6 = vadd.f32 %v4351_v16, %v4317_v24  ;;  %v4274_v40 = vmul.f32 %v10392_v62, %v10351_v42  ;;  %v8991_v52 = vadd.f32 %v4064_v61, %v4051_v48  ;;  %v10394_v12 = vperm.slane %v8864_v59, 0 }
 0x559   : > { %v4240_v56 = vadd.f32 %v4236_v28, %v4198_v10  ;;  %v10395_v16 = vperm.slane %v8864_v59, 1  ;;  %v10396_v42 = vperm.slane %v8864_v59, 5  ;;  %v4427_v14 = vmul.f32 %v10397_v45, %v10381_v29  ;;  %v10400_v29 = vld [vmem:[#allocation49_spill] sm:$0xff] }
 0x55a   : > { %v4197_v10 = vmul.f32 %v10394_v12, %v8706_v25  ;;  %v4215_v48 = vperm.slane %v8986_v43, 0  ;;  %v4465_v13 = vmul.f32 %v9749_v32, %v10389_v15  ;;  %v10398_v25 = vld [vmem:[#allocation174_spill] sm:$0xff]  ;;  %v9750_v12 = vperm.slane %v8929_v30, 4 }
 0x55b   : > { %v4235_v24 = vmul.f32 %v10395_v16, %v8689_v44  ;;  %v4389_v62 = vmul.f32 %v10396_v42, %v10377_v53  ;;  %v4278_v2 = vadd.f32 %v4274_v40, %v4240_v56  ;;  %v4005_v28 = vadd.f32 %v10398_v25, %v3982_v47  ;;  %v10401_v42 = vld [vmem:[#allocation170_spill] sm:$0xff] }
 0x55c   : > { %v10399_v44 = vperm.slane %v8864_v59, 2  ;;  %v4312_v56 = vmul.f32 %v9751_v17, %v10349_v0  ;;  %v4217_v40 = vmul.f32 %v4215_v48, %v10400_v29  ;;  %v4219_v45 = vmul.f32 %v4215_v48, %v10401_v42 }
 0x55d   : > { %v4393_v53 = vadd.f32 %v4389_v62, %v4355_v6  ;;  %v4384_v47 = vperm.slane %v8929_v30, 5  ;;  %v4253_v25 = vperm.slane %v8986_v43, 1  ;;  %v9024_v32 = vadd.f32 %v4235_v24, %v4197_v10 }
 0x55e   : > { %v9014_v16 = vmul.f32 %v10399_v44, %v10331_v49  ;;  %v4134_v23 = vpop.f32.mrf.mxu2  ;;  %v4316_v49 = vadd.f32 %v4312_v56, %v4278_v2  ;;  %v4221_v6 = vadd.f32 %v4217_v40, %v8897_v21  ;;  %v4223_v62 = vadd.f32 %v4219_v45, %v8900_v63  ;;  %v10402_v63 = vld [vmem:[#allocation154_spill] sm:$0xff]  ;;  %v10404_v56 = vld [vmem:[#allocation51_spill] sm:$0xff] }
 0x55f   : > { %v9029_v0 = vadd.f32 %v4134_v23, %v8810_v55  ;;  %v4068_v44 = vadd.f32 %v4064_v61, %v4005_v28  ;;  %v4350_v48 = vmul.f32 %v8680_v60, %v9750_v12  ;;  %v4422_v29 = vperm.slane %v8929_v30, 6  ;;  %v10403_v61 = vld [vmem:[#allocation26_spill] sm:$0xff] }
 0x560   : > { %v4460_v42 = vperm.slane %v8929_v30, 7  ;;  %v4431_v15 = vadd.f32 %v4427_v14, %v4393_v53  ;;  %v4291_v10 = vperm.slane %v8986_v43, 2  ;;  %v4249_v21 = vadd.f32 %v8905_v57, %v4221_v6  ;;  %v10405_v14 = vld [vmem:[#allocation172_spill] sm:$0xff] }
 0x561   : > { %v4214_v24 = vperm.slane %v9029_v0, 0  ;;  %v4388_v55 = vmul.f32 %v4384_v47, %v10347_v58  ;;  %v4255_v23 = vmul.f32 %v4253_v25, %v10402_v63  ;;  %v4257_v2 = vmul.f32 %v4253_v25, %v10403_v61 }
 0x562   : > { %v4251_v60 = vadd.f32 %v8912_v37, %v4223_v62  ;;  %v4354_v28 = vadd.f32 %v4350_v48, %v4316_v49  ;;  %v10406_v45 = vperm.slane %v8929_v30, 0  ;;  %v4490_v57 = vperm.slane %v4068_v44, 0  ;;  %v10407_v37 = vld [vmem:[#allocation173_spill] sm:$0xff]  ;;  %v10408_v48 = vld [vmem:[#allocation30_spill] sm:$0xff] }
 0x563   : > { %v4216_v40 = vmul.f32 %v4214_v24, %v10404_v56  ;;  %v4218_v53 = vmul.f32 %v4214_v24, %v10405_v14  ;;  %v4259_v6 = vadd.f32 %v4255_v23, %v4249_v21  ;;  %v4329_v58 = vperm.slane %v8986_v43, 3  ;;  %v10409_v21 = vld [vmem:[#allocation55_spill] sm:$0xff] }
 0x564   : > { %v9050_v12 = vmul.f32 %v10406_v45, %v10356_v8  ;;  %v4261_v17 = vadd.f32 %v4257_v2, %v4251_v60  ;;  %v4426_v25 = vmul.f32 %v4422_v29, %v10345_v41  ;;  %v4252_v62 = vperm.slane %v9029_v0, 1  ;;  %v10410_v14 = vld [vmem:[#allocation63_spill] sm:$0xff] }
 0x565   : > { %v4220_v49 = vadd.f32 %v4216_v40, %v10407_v37  ;;  %v4293_v24 = vmul.f32 %v4291_v10, %v10408_v48  ;;  %v4222_v63 = vadd.f32 %v4218_v53, %v8818_v20  ;;  %v4287_v8 = vadd.f32 %v8916_v35, %v4259_v6  ;;  %v10411_v53 = vld [vmem:[#allocation70_spill] sm:$0xff] }
 0x566   : > { %v4289_v44 = vadd.f32 %v8919_v11, %v4261_v17  ;;  %v4295_v23 = vmul.f32 %v4291_v10, %v10409_v21  ;;  %v9063_v61 = vadd.f32 %v4465_v13, %v4431_v15  ;;  %v4392_v2 = vadd.f32 %v4388_v55, %v4354_v28  ;;  %v10412_v13 = vld [vmem:[#allocation39_spill] sm:$0xff]  ;;  %v10414_v28 = vld [vmem:[#allocation58_spill] sm:$0xff]  ;;  %v4183_v21 = vpop.f32.mrf.mxu3 }
 0x567   : > { %v4464_v41 = vmul.f32 %v4460_v42, %v10343_v18  ;;  %v4367_v60 = vperm.slane %v8986_v43, 4  ;;  %v9070_v56 = vmul.f32 %v4490_v57, %v8576_v22  ;;  %v4297_v40 = vadd.f32 %v4293_v24, %v4287_v8  ;;  %v10413_v10 = vld [vmem:[#allocation71_spill] sm:$0xff]  ;;  %v10415_v24 = vld [vmem:[#allocation186_spill] sm:$0xff] }
 0x568   : > { %v4299_v20 = vadd.f32 %v4295_v23, %v4289_v44  ;;  %v4331_v35 = vmul.f32 %v4329_v58, %v10410_v14  ;;  %v4254_v11 = vmul.f32 %v4252_v62, %v10411_v53  ;;  %v4290_v17 = vperm.slane %v9029_v0, 2 }
 0x569   : > { %v4333_v15 = vmul.f32 %v4329_v58, %v10412_v13  ;;  %v4248_v55 = vadd.f32 %v10413_v10, %v4220_v49  ;;  %v4256_v45 = vmul.f32 %v4252_v62, %v10414_v28  ;;  %v4325_v18 = vadd.f32 %v8922_v50, %v4297_v40  ;;  %v10416_v62 = vld [vmem:[#allocation78_spill] sm:$0xff] }
 0x56a   : > { %v4327_v6 = vadd.f32 %v8925_v34, %v4299_v20  ;;  %v4250_v22 = vadd.f32 %v8826_v46, %v4222_v63  ;;  %v4430_v37 = vadd.f32 %v4426_v25, %v4392_v2  ;;  %v9082_v48 = vmul.f32 %v4490_v57, %v8569_v3  ;;  %v10417_v34 = vld [vmem:[#allocation75_spill] sm:$0xff]  ;;  %v10418_v63 = vld [vmem:[#allocation46_spill] sm:$0xff] }
 0x56b   : > { %v4369_v8 = vmul.f32 %v10415_v24, %v4367_v60  ;;  %v4258_v44 = vadd.f32 %v4254_v11, %v4248_v55  ;;  %v4335_v23 = vadd.f32 %v4331_v35, %v4325_v18  ;;  %v4405_v49 = vperm.slane %v8986_v43, 5 }
 0x56c   : > { %v4337_v58 = vadd.f32 %v4333_v15, %v4327_v6  ;;  %v4260_v14 = vadd.f32 %v4256_v45, %v4250_v22  ;;  %v4371_v53 = vmul.f32 %v10416_v62, %v4367_v60  ;;  %v4292_v40 = vmul.f32 %v4290_v17, %v10417_v34  ;;  %v10419_v15 = vld [vmem:[#allocation80_spill] sm:$0xff]  ;;  %v10422_v6 = vld [vmem:[#allocation65_spill] sm:$0xff] }
 0x56d   : > { %v4286_v50 = vadd.f32 %v8831_v33, %v4258_v44  ;;  %v4328_v46 = vperm.slane %v9029_v0, 3  ;;  %v4363_v3 = vadd.f32 %v8932_v54, %v4335_v23  ;;  %v4294_v2 = vmul.f32 %v4290_v17, %v10418_v63  ;;  %v10420_v54 = vld [vmem:[#allocation34_spill] sm:$0xff]  ;;  %v10426_v62 = vld [vmem:[#allocation56_spill] sm:$0xff] }
 0x56e   : > { %v4365_v57 = vadd.f32 %v8935_v31, %v4337_v58  ;;  %v4288_v25 = vadd.f32 %v8834_v26, %v4260_v14  ;;  %v9094_v20 = vadd.f32 %v4464_v41, %v4430_v37  ;;  %v9097_v35 = vadd.f32 %v4183_v21, %v8877_v4  ;;  %v10421_v26 = vld [vmem:[#allocation171_spill] sm:$0xff]  ;;  %v10423_v37 = vld [vmem:[#allocation54_spill] sm:$0xff]  ;;  %v4137_v14 = vpop.f32.mrf.mxu2 }
 0x56f   : > { %v4443_v60 = vperm.slane %v8986_v43, 6  ;;  %v4296_v33 = vadd.f32 %v4292_v40, %v4286_v50  ;;  %v4373_v11 = vadd.f32 %v4369_v8, %v4363_v3  ;;  %v4407_v10 = vmul.f32 %v4405_v49, %v10419_v15  ;;  %v9118_v50 = vld [vmem:[%s5684_s14] sm:$0xff] }
 0x570   : > { %v4375_v13 = vadd.f32 %v4371_v53, %v4365_v57  ;;  %v4298_v55 = vadd.f32 %v4294_v2, %v4288_v25  ;;  %v4409_v28 = vmul.f32 %v4405_v49, %v10420_v54  ;;  %v4330_v45 = vmul.f32 %v4328_v46, %v10421_v26  ;;  %v9125_v57 = vld [vmem:[%s5684_s14 + $0x10] sm:$0xff]  ;;  %v10427_v2 = vld [vmem:[#allocation84_spill] sm:$0xff] }
 0x571   : > { %v4324_v31 = vadd.f32 %v8837_v51, %v4296_v33  ;;  %v4366_v41 = vperm.slane %v9029_v0, 4  ;;  %v4401_v4 = vadd.f32 %v8942_v39, %v4373_v11  ;;  %v4332_v22 = vmul.f32 %v4328_v46, %v10422_v6  ;;  %v10424_v51 = vld [vmem:[#allocation19_spill] sm:$0xff]  ;;  %v10432_v54 = vld [vmem:[#allocation77_spill] sm:$0xff] }
 0x572   : > { %v4403_v17 = vadd.f32 %v8945_v5, %v4375_v13  ;;  %v4326_v18 = vadd.f32 %v8840_v7, %v4298_v55  ;;  %v4445_v24 = vmul.f32 %v4443_v60, %v10423_v37  ;;  %v4481_v8 = vperm.slane %v8986_v43, 7  ;;  %v10429_v13 = vld [vmem:[#allocation185_spill] sm:$0xff] }
 0x573   : > { %v4334_v44 = vadd.f32 %v4330_v45, %v4324_v31  ;;  %v10425_v21 = vperm.slane %v8929_v30, 1  ;;  %v4411_v58 = vadd.f32 %v4407_v10, %v4401_v4  ;;  %v4404_v5 = vperm.slane %v9029_v0, 5  ;;  %v10433_v31 = vld [vmem:[#allocation24_spill] sm:$0xff] }
 0x574   : > { %v4413_v49 = vadd.f32 %v4409_v28, %v4403_v17  ;;  %v4336_v39 = vadd.f32 %v4332_v22, %v4326_v18  ;;  %v4447_v7 = vmul.f32 %v4443_v60, %v10426_v62  ;;  %v4368_v34 = vmul.f32 %v9118_v50, %v4366_v41  ;;  %v10428_v60 = vld [vmem:[#allocation15_spill] sm:$0xff]  ;;  %v10434_v45 = vld [vmem:[#allocation52_spill] sm:$0xff] }
 0x575   : > { %v4234_v23 = vmul.f32 %v10425_v21, %v10424_v51  ;;  %v4362_v53 = vadd.f32 %v8843_v9, %v4334_v44  ;;  %v4442_v40 = vperm.slane %v9029_v0, 6  ;;  %v4370_v25 = vmul.f32 %v9125_v57, %v4366_v41  ;;  %v10435_v41 = vld [vmem:[#allocation187_spill] sm:$0xff]  ;;  %v10438_v44 = vld [vmem:[#allocation126_spill] sm:$0xff]  ;;  %v10439_v21 = vld [vmem:[#allocation76_spill] sm:$0xff] }
 0x576   : > { %v4441_v46 = vadd.f32 %v8955_v19, %v4413_v49  ;;  %v4364_v3 = vadd.f32 %v8846_v38, %v4336_v39  ;;  %v4485_v9 = vmul.f32 %v4481_v8, %v10427_v2  ;;  %v4138_v33 = vadd.f32 %v4137_v14, %v10428_v60  ;;  %v10431_v19 = vld [vmem:[#allocation98_spill] sm:$0xff]  ;;  %v10436_v18 = vld [vmem:[#allocation43_spill] sm:$0xff]  ;;  %v10445_v2 = vld [vmem:[#allocation136_spill] sm:$0xff] }
 0x577   : > { %v4238_v63 = vadd.f32 %v4234_v23, %v9050_v12  ;;  %v4372_v11 = vadd.f32 %v4368_v34, %v4362_v53  ;;  %v10430_v15 = vperm.slane %v8929_v30, 2  ;;  %v4439_v55 = vadd.f32 %v10431_v19, %v4411_v58  ;;  %v10442_v53 = vld [vmem:[#allocation167_spill] sm:$0xff] }
 0x578   : > { %v4374_v38 = vadd.f32 %v4370_v25, %v4364_v3  ;;  %v4406_v28 = vmul.f32 %v4404_v5, %v10432_v54  ;;  %v4408_v26 = vmul.f32 %v4404_v5, %v10433_v31  ;;  %v4444_v4 = vmul.f32 %v4442_v40, %v10435_v41  ;;  %v10441_v5 = vld [vmem:[#allocation18_spill] sm:$0xff]  ;;  %v10447_v19 = vld [vmem:[#allocation91_spill] sm:$0xff]  ;;  %v10449_v31 = vld [vmem:[#allocation184_spill] sm:$0xff] }
 0x579   : > { %v4272_v10 = vmul.f32 %v10430_v15, %v10429_v13  ;;  %v4400_v12 = vadd.f32 %v10434_v45, %v4372_v11  ;;  %v10437_v6 = vperm.slane %v8929_v30, 3  ;;  %v4451_v37 = vadd.f32 %v4447_v7, %v4441_v46  ;;  %v10444_v46 = vld [vmem:[#allocation183_spill] sm:$0xff]  ;;  %v5400_v11 = vld [vmem:[%s5703_s15 + $0x8] sm:$0xff]  ;;  %s5223_s15 = sshll.u32 %s5485_s21, 2 }
 0x57a   : > { %v4402_v51 = vadd.f32 %v10438_v44, %v4374_v38  ;;  %v4446_v23 = vmul.f32 %v4442_v40, %v10439_v21  ;;  %v4277_v58 = vadd.f32 %v9014_v16, %v9024_v32  ;;  %v10440_v39 = vperm.slane %v8929_v30, 4  ;;  %s4767_s7 = sadd.s32 %s5224_s29, %s5223_s15 }
 0x57b   : > { %v4276_v17 = vadd.f32 %v4272_v10, %v4238_v63  ;;  %v4310_v22 = vmul.f32 %v10437_v6, %v10436_v18  ;;  %v4410_v49 = vadd.f32 %v4406_v28, %v4400_v12  ;;  %v10443_v34 = vperm.slane %v8864_v59, 3  ;;  %v10451_v12 = vld [vmem:[#allocation101_spill] sm:$0xff] }
 0x57c   : > { %v4348_v62 = vmul.f32 %v10441_v5, %v10440_v39  ;;  %v4449_v25 = vadd.f32 %v4445_v24, %v4439_v55  ;;  %v4412_v63 = vadd.f32 %v4408_v26, %v4402_v51  ;;  %v4480_v7 = vperm.slane %v9029_v0, 7  ;;  %v10448_v55 = vld [vmem:[#allocation168_spill] sm:$0xff]  ;;  %v10452_v18 = vld [vmem:[#allocation17_spill] sm:$0xff] }
 0x57d   : > { %v4314_v14 = vadd.f32 %v4310_v22, %v4276_v17  ;;  %v4311_v3 = vmul.f32 %v10443_v34, %v10442_v53  ;;  %v4386_v40 = vmul.f32 %v4384_v47, %v10444_v46  ;;  %v4438_v32 = vadd.f32 %v10445_v2, %v4410_v49  ;;  %v10454_v22 = vld [vmem:[#allocation93_spill] sm:$0xff]  ;;  %v10459_v5 = vld [vmem:[#allocation16_spill] sm:$0xff]  ;;  %v10460_v46 = vld [vmem:[#allocation50_spill] sm:$0xff] }
 0x57e   : > { %v10446_v13 = vperm.slane %v8864_v59, 4  ;;  %v4479_v10 = vadd.f32 %v8975_v36, %v4451_v37  ;;  %v4440_v38 = vadd.f32 %v10447_v19, %v4412_v63  ;;  %v4510_v24 = vperm.slane %v4138_v33, 0  ;;  %v10453_v36 = vld [vmem:[#allocation161_spill] sm:$0xff] }
 0x57f   : > { %v4352_v16 = vadd.f32 %v4348_v62, %v4314_v14  ;;  %v4315_v60 = vadd.f32 %v4311_v3, %v4277_v58  ;;  %v4424_v0 = vmul.f32 %v4422_v29, %v10448_v55  ;;  %v4448_v54 = vadd.f32 %v4444_v4, %v4438_v32  ;;  %v10455_v4 = vld [vmem:[#allocation169_spill] sm:$0xff]  ;;  %v10457_v58 = vld [vmem:[#allocation62_spill] sm:$0xff] }
 0x580   : > { %v4349_v15 = vmul.f32 %v5400_v11, %v10446_v13  ;;  %v10450_v26 = vperm.slane %v8864_v59, 5  ;;  %v4477_v41 = vadd.f32 %v10451_v12, %v4449_v25  ;;  %v4450_v17 = vadd.f32 %v4446_v23, %v4440_v38  ;;  %v10458_v23 = vld [vmem:[#allocation95_spill] sm:$0xff]  ;;  %v5401_v12 = vld [vmem:[%s5684_s14 + $0x18] sm:$0xff] }
 0x581   : > { %v4390_v28 = vadd.f32 %v4386_v40, %v4352_v16  ;;  %v4482_v6 = vmul.f32 %v4480_v7, %v10452_v18  ;;  %v4462_v33 = vmul.f32 %v4460_v42, %v10453_v36  ;;  %v4476_v37 = vadd.f32 %v10454_v22, %v4448_v54  ;;  %v10465_v16 = vld [vmem:[#allocation69_spill] sm:$0xff]  ;;  %v10469_v38 = vld [vmem:[#allocation67_spill] sm:$0xff]  ;;  %v5207_v18 = vld [vmem:[%s7973_s17 + $0x8] sm:$0x7]  ;;  %s5225_s17 = sshll.u32 %s4767_s7, 3 }
 0x582   : > { %v4353_v47 = vadd.f32 %v4349_v15, %v4315_v60  ;;  %v4387_v45 = vmul.f32 %v10450_v26, %v10449_v31  ;;  %v10456_v51 = vperm.slane %v8864_v59, 6  ;;  %v4483_v49 = vmul.f32 %v4481_v8, %v10457_v58  ;;  %v5402_v36 = vld [vmem:[%s5684_s14 + $0x8] sm:$0xff]  ;;  %s4769_s0 = scalar_lea.hbm %s10489_s26, %s5225_s17 }
 0x583   : > { %v4428_v44 = vadd.f32 %v4424_v0, %v4390_v28  ;;  %v4489_v14 = vadd.f32 %v4485_v9, %v4479_v10  ;;  %v4478_v39 = vadd.f32 %v10458_v23, %v4450_v17  ;;  %v4484_v62 = vmul.f32 %v4480_v7, %v10459_v5  ;;  %v10463_v7 = vld [vmem:[#allocation72_spill] sm:$0xff]  ;;  %v10470_v0 = vld [vmem:[#allocation102_spill] sm:$0xff]  ;;  %s4772_s20 = sshll.u32 %s4769_s0, 4  ;;  %s4773_s20 = int_to_ptr.hbm [resolvable:$true] %s4772_s20 }
 0x584   : > { %v4391_v29 = vadd.f32 %v4387_v45, %v4353_v47  ;;  %v4425_v21 = vmul.f32 %v10456_v51, %v10455_v4  ;;  %v4511_v30 = vperm.slane %v9097_v35, 0  ;;  %v4486_v42 = vadd.f32 %v4482_v6, %v4476_v37  ;;  %v10464_v35 = vld [vmem:[#allocation47_spill] sm:$0xff]  ;;  %s5421_s6 = sshra.s32 %s4773_s20, 4  ;;  %s5422_s6 = int_to_ptr.hbm [resolvable:$true] %s5421_s6 }
 0x585   : > { %v4466_v53 = vadd.f32 %v4462_v33, %v4428_v44  ;;  %v9187_v3 = vadd.f32 %v9082_v48, %v9094_v20  ;;  %v4487_v25 = vadd.f32 %v4483_v49, %v4477_v41  ;;  %v4488_v63 = vadd.f32 %v4484_v62, %v4478_v39  ;;  %v10466_v48 = vld [vmem:[#allocation97_spill] sm:$0xff]  ;;  %v5208_v49 = vld [vmem:[%s8153_s3 + $0x20] sm:$0xff]  ;;  %v5209_v39 = vld [vmem:[%s8153_s3 + $0x28] sm:$0xff]  ;;  %s10478_s3 = sshll.u32 %s5677_s23, 4  ;;  %s4770_s23 = sshll.u32 %s8256_s24, 4  ;;  %s4771_s23 = int_to_ptr.vmem [resolvable:$true] %s4770_s23 }
 0x586   : > { %v4429_v34 = vadd.f32 %v4425_v21, %v4391_v29  ;;  %v10461_v43 = vperm.slane %v8864_v59, 7  ;;  %v10462_v9 = vperm.slane %v8991_v52, 0  ;;  %v4506_v2 = vadd.f32 %v10463_v7, %v4486_v42  ;;  %v10467_v59 = vld [vmem:[#allocation38_spill] sm:$0xff]  ;;  %s797_s14 = scalar_lea.vmem %s9326_s12, %s10478_s3  ;;  %s4753_s3 = scalar_lea.sflag [#allocation6], %s723_s27 }
 0x587   : > { %v4512_v32 = vmul.f32 %v4510_v24, %v10464_v35  ;;  %v4514_v60 = vmul.f32 %v4510_v24, %v10465_v16  ;;  %v4509_v11 = vadd.f32 %v8989_v1, %v4489_v14  ;;  %v4508_v20 = vadd.f32 %v10466_v48, %v4488_v63  ;;  %v10473_v63 = vld [vmem:[#allocation44_spill] sm:$0xff]  ;;  %v10477_v16 = vld [vmem:[#allocation33_spill] sm:$0xff]  ;;  %s5423_s8 = scalar_lea.hbm %s5422_s6, 32  ;;  %p5428_p4 = scmp.lt.s32.totalorder %s5422_s6, %s10489_s26 }
 0x588   : > { %v4463_v8 = vmul.f32 %v10461_v43, %v10460_v46  ;;  %v4495_v40 = vmul.f32 %v10462_v9, %v10393_v27  ;;  %v4496_v13 = vadd.f32 %v9070_v56, %v4466_v53  ;;  %v10468_v10 = vmov %v10462_v9  ;;  %v10471_v56 = vld [vmem:[#allocation152_spill] sm:$0xff]  ;;  %v10475_v9 = vld [vmem:[#allocation157_spill] sm:$0xff]  ;;  %p5424_p0 = scmp.ne.s32.totalorder %s5422_s6, %s5423_s8 }
 0x589   : > { %v4493_v19 = vmul.f32 %v10468_v10, %v10467_v59  ;;  %v4515_v55 = vmul.f32 %v4511_v30, %v10469_v38  ;;  %v4507_v24 = vadd.f32 %v10470_v0, %v4487_v25  ;;  %v4516_v54 = vadd.f32 %v4512_v32, %v4506_v2  ;;  %v10472_v25 = vld [vmem:[#allocation29_spill] sm:$0xff]  ;;  %v10480_v59 = vld [vmem:[#allocation64_spill] sm:$0xff]  ;;  %v5404_v38 = vld [vmem:[%s8256_s24] sm:$0xff] }
 0x58a   : > { %v4467_v15 = vadd.f32 %v4463_v8, %v4429_v34  ;;  %v9205_v27 = vadd.f32 %v4495_v40, %v9063_v61  ;;  %v4518_v1 = vadd.f32 %v4514_v60, %v4508_v20  ;;  %v4522_v28 = vmul.f32 %v9125_v57, %v9187_v3  ;;  %v10474_v8 = vld [vmem:[#allocation40_spill] sm:$0xff]  ;;  %v10476_v2 = vld [vmem:[#allocation153_spill] sm:$0xff]  ;;  %p5425_p1 = pnand %p5424_p0, %p5651_p3 }
 0x58b   : > { %v4513_v47 = vmul.f32 %v4511_v30, %v10471_v56  ;;  %v4519_v31 = vadd.f32 %v4515_v55, %v4509_v11  ;;  %v4520_v52 = vmul.f32 %v9118_v50, %v4496_v13  ;;  %v3442_v46 = vmul.f32 %v10473_v63, %v10472_v25  ;;  %v10479_v20 = vld [vmem:[#allocation20_spill] sm:$0xff]  ;;  %v10482_v55 = vld [vmem:[#allocation74_spill] sm:$0xff]  ;;  %v4656_v56 = vld [vmem:[%s797_s14] sm:$0xff] }
 0x58c   : > { %v4526_v26 = vadd.f32 %v4522_v28, %v4518_v1  ;;  %v9213_v45 = vadd.f32 %v4493_v19, %v4467_v15  ;;  %v4523_v41 = vmul.f32 %v5401_v12, %v9205_v27  ;;  %v3440_v40 = vmul.f32 %v10475_v9, %v10474_v8  ;;  %p5426_p2 = pneg %p5425_p1 }
 0x58d   : > { %v4517_v61 = vadd.f32 %v4513_v47, %v4507_v24  ;;  %v4524_v17 = vadd.f32 %v4520_v52, %v4516_v54  ;;  %v3446_v35 = vmul.f32 %v3442_v46, %v10476_v2  ;;  %v2161_v0 = vmul.f32 %v5404_v38, %v10482_v55  ;;  %v10483_v24 = vld [vmem:[#allocation23_spill] sm:$0xff]  ;;  %v10485_v47 = vld [vmem:[#allocation28_spill] sm:$0xff]  ;;  %v5405_v52 = vld [vmem:[%s8256_s24 + $0x18] sm:$0xff] }
 0x58e   : > { %4550 = vmatpush.msra.mxu2 %v4526_v26  ;;  %v4527_v6 = vadd.f32 %v4523_v41, %v4519_v31  ;;  %v4521_v57 = vmul.f32 %v5402_v36, %v9213_v45  ;;  %v3444_v60 = vmul.f32 %v3440_v40, %v10477_v16  ;;  %v10484_v54 = vld [vmem:[#allocation27_spill] sm:$0xff]  ;;  %v10488_v41 = vld [vmem:[#allocation25_spill] sm:$0xff] }
 0x58f   : > { %v3441_v1 = vmul.f32 %v10484_v54, %v10483_v24 }
 0x590   : > { %4551 = vmatpush.msra.mxu2 %v4524_v17  ;;  %v4525_v33 = vadd.f32 %v4521_v57, %v4517_v61  ;;  %v10487_v61 = vld [vmem:[#allocation85_spill] sm:$0xff] }
 0x591   : > { %5210 = vmatmul.msk.f32.vlgmr.msra.gmra.mxu2 %vm1234_vm6, %v5207_v18  ;;  %v2164_v12 = vmul.f32 %v5405_v52, %v10487_v61 }
 0x592   : > { %4570 = vmatpush.msrb.mxu2 %v4527_v6 }
 0x594   : > { %4571 = vmatpush.msrb.mxu2 %v4525_v33 }
 0x599   : > { %5211 = vmatmul.msk.f32.vlgmr.msrb.gmra.mxu2 %vm1234_vm6, %v5207_v18  ;;  %v4657_v18 = vld [vmem:[%s797_s14 + $0x8] sm:$0xff] }
 0x614   : > { %v4553_v50 = vpop.f32.mrf.mxu2 }
 0x615   : > { %v4576_v22 = vsub.f32 0.0, %v4553_v50 }
 0x617   : > { %v4578_v37 = vmul.f32 1.442695, %v4576_v22 }
 0x619   : > { %5356 = vpow2.f32 %v4578_v37 }
 0x61c   : > { %v4573_v44 = vpop.f32.mrf.mxu2 }
 0x61d   : > { %v4577_v29 = vsub.f32 0.0, %v4573_v44 }
 0x61f   : > { %v5357_v4 = vpop.eup %5356  ;;  %v4580_v51 = vmul.f32 1.442695, %v4577_v29 }
 0x620   : > { %v4582_v21 = vadd.f32 1.0, %v5357_v4 }
 0x621   : > { %5358 = vpow2.f32 %v4580_v51 }
 0x622   : > { %5360 = vrcp.f32 %v4582_v21 }
 0x627   : > { %v5359_v58 = vpop.eup %5358 }
 0x628   : > { %v5361_v14 = vpop.eup %5360  ;;  %v4583_v23 = vadd.f32 1.0, %v5359_v58 }
 0x629   : > { %5212 = vmatpush.msk.msra.mxu2 %vm2104_vm0, %v5361_v14 }
 0x62a   : > { %5362 = vrcp.f32 %v4583_v23  ;;  %5213 = vmatmul.msk.f32.vlgmr.msra.gmra.mxu2 %vm2097_vm1, %v5208_v49 }
 0x630   : > { %v5363_v5 = vpop.eup %5362 }
 0x631   : > { %5215 = vmatpush.msk.msra.mxu3 %vm2104_vm0, %v5363_v5 }
 0x632   : > { %5214 = vmatmul.msk.f32.gmra.mxu2 %vm2097_vm1, %v5209_v39  ;;  %5216 = vmatmul.msk.f32.vlgmr.msra.gmra.mxu3 %vm2097_vm1, %v5208_v49 }
 0x63a   : > { %5217 = vmatmul.msk.f32.gmra.mxu3 %vm2097_vm1, %v5209_v39 }
 0x6ad   : > { %v4615_v62 = vpop.f32.mrf.mxu2 }
 0x6ae   : > { %v4644_v53 = vmul.f32 %v4615_v62, %v4524_v17 }
 0x6b0   : > { %v4648_v7 = vmul.f32 %v4644_v53, %v4496_v13  ;;  %v10481_v13 = vld [vmem:[#allocation41_spill] sm:$0xff] }
 0x6b1   : > { %v3443_v10 = vmul.f32 %v10481_v13, %v10480_v59 }
 0x6b3   : > { %v3447_v31 = vmul.f32 %v3443_v10, %v10485_v47 }
 0x6b5   : > { %v4618_v30 = vpop.f32.mrf.mxu2  ;;  %v4638_v42 = vpop.f32.mrf.mxu3 }
 0x6b6   : > { %v4646_v34 = vmul.f32 %v4618_v30, %v4526_v26  ;;  %v4645_v11 = vmul.f32 %v4638_v42, %v4525_v33 }
 0x6b8   : > { %v4650_v43 = vmul.f32 %v4646_v34, %v9187_v3  ;;  %v5403_v3 = vld [vmem:[%s8256_s24 + $0x10] sm:$0xff]  ;;  %v4649_v28 = vmul.f32 %v4645_v11, %v9213_v45  ;;  %v5406_v45 = vld [vmem:[%s8256_s24 + $0x8] sm:$0xff]  ;;  %s5427_s24 = scalar_lea.hbm %s10489_s26, 192 }
 0x6b9   : > { %v2163_v15 = vmul.f32 %v5403_v3, %v10479_v20  ;;  %v2162_v17 = vmul.f32 %v5406_v45, %v10488_v41  ;;  %p5429_p5 = scmp.lt.s32.totalorder %s5427_s24, %s5423_s8 }
 0x6ba   : > { %4699 = vmatpush.msrb.mxu0 %v4650_v43 }
 0x6bb   : > { %p5430_p6 = por %p5429_p5, %p5428_p4 }
 0x6bc   : > { %4700 = vmatpush.msrb.mxu0 %v4648_v7 }
 0x6bd   : > { %v4641_v32 = vpop.f32.mrf.mxu3  ;;  %p5431_p7 = pnand %p5430_p6, %p5426_p2 }
 0x6be   : > { %v4647_v48 = vmul.f32 %v4641_v32, %v4527_v6  ;;  %4701 = vmatpush.msrb.mxu0 %v3446_v35 }
 0x6c0   : > { %v4651_v19 = vmul.f32 %v4647_v48, %v9205_v27  ;;  %4702 = vmatpush.msrb.mxu0 %v3444_v60  ;;  %v10486_v27 = vld [vmem:[#allocation73_spill] sm:$0xff] }
 0x6c1   : > { %v3445_v26 = vmul.f32 %v3441_v1, %v10486_v27 }
 0x6c2   : > { %4703 = vmatpush.msrb.mxu0 %v2163_v15  ;;  %5231 = vmatpush.msrb.mxu1 %v4651_v19 }
 0x6c4   : > { %4704 = vmatpush.msrb.mxu0 %v2161_v0  ;;  %5232 = vmatpush.msrb.mxu1 %v4649_v28 }
 0x6c5   : > { %5218 = vmatmul.msk.f32.vlgmr.msrb.gmra.mxu0 %vm4682_vm2, %v4656_v56 }
 0x6c6   : > { %4722 = vmatpush.msra.mxu0 %v4651_v19  ;;  %5233 = vmatpush.msrb.mxu1 %v3447_v31 }
 0x6c8   : > { %4723 = vmatpush.msra.mxu0 %v4649_v28  ;;  %5234 = vmatpush.msrb.mxu1 %v3445_v26 }
 0x6ca   : > { %4724 = vmatpush.msra.mxu0 %v3447_v31  ;;  %5235 = vmatpush.msrb.mxu1 %v2164_v12 }
 0x6cc   : > { %4725 = vmatpush.msra.mxu0 %v3445_v26  ;;  %5236 = vmatpush.msrb.mxu1 %v2162_v17 }
 0x6cd   : > { %5219 = vmatmul.msk.f32.gmra.mxu0 %vm4682_vm2, %v4657_v18  ;;  %5221 = vmatmul.msk.f32.vlgmr.msrb.gmra.mxu1 %vm4682_vm2, %v4657_v18 }
 0x6ce   : > { %4726 = vmatpush.msra.mxu0 %v2164_v12 }
 0x6d0   : > { %4727 = vmatpush.msra.mxu0 %v2162_v17 }
 0x6d5   : > { %5220 = vmatmul.msk.f32.vlgmr.msra.gmra.mxu0 %vm4682_vm2, %v4656_v56 }
 0x6d6   : > { %5434 = shalt.err (!%p5431_p7)
}
 0x6d7   : > { %s5519_s27 = smov 256   ;;  %s10490_s29 = smov 16   ;;  %v4675_v6 = vpop.permute.xlu1 %4674  ;;  %v4680_v50 = vpop.permute.xlu2 %4679 }
 0x6d8   : > { %5243 = dma.vmem_to_hbm [thread:$0]  (%p5651_p3), %s4771_s23, 512, %s4773_s20, %s4753_s3, %s5519_s27, %s5519_s27, %s10490_s29  }
 0x6d9   : > { %s10491_s7 = sshll.u32 %s5690_s28, 3  ;;  %s10492_s30 = sld [smem:[#allocation194_spill]] }
 0x6df   : > { %s811_s0 = scalar_lea.vmem %s10492_s30, %s10491_s7 }
 0x742   : > { %v4706_v36 = vpop.f32.mrf.mxu0 }
 0x743   : > { %v4707_v57 = vadd.f32 %v4706_v36, %v4675_v6 }
 0x745   : > { %v4735_v33 = vmax.f32 %v4707_v57, 0.0 }
 0x747   : > { %4739 = vst [vmem:[%s811_s0] sm:$0xff] %v4735_v33 }
 0x74a   : > { %v4709_v22 = vpop.f32.mrf.mxu0  ;;  %v4732_v37 = vpop.f32.mrf.mxu1 }
 0x74b   : > { %v4710_v44 = vadd.f32 %v4709_v22, %v4680_v50  ;;  %v4733_v29 = vadd.f32 %v4732_v37, %v4680_v50 }
 0x74d   : > { %v4737_v4 = vmax.f32 %v4710_v44, 0.0  ;;  %v4738_v51 = vmax.f32 %v4733_v29, 0.0 }
 0x74f   : > { %4741 = vst [vmem:[%s811_s0 + $0x10] sm:$0xff] %v4737_v4 }
 0x750   : > { %4742 = vst [vmem:[%s811_s0 + $0x18] sm:$0xff] %v4738_v51 }
 0x752   : > { %v4729_v21 = vpop.f32.mrf.mxu0 }
 0x753   : > { %v4730_v58 = vadd.f32 %v4729_v21, %v4675_v6 }
 0x755   : > { %v4736_v49 = vmax.f32 %v4730_v58, 0.0 }
 0x757   : > { %4740 = vst [vmem:[%s811_s0 + $0x8] sm:$0xff] %v4736_v49 }
 0x758 PF: > { %p5249_p3 = scmp.ge.s32.totalorder %s5501_s25, 2  ;;  %s4799_s16 = sand.u32 1, %s5473_s18  }
 0x759   : > { %s4800_s23 = scalar_lea.sflag [#allocation6], %s4799_s16 }
 0x75a   : > { %p5246_p9 = pnand %p5249_p3, %p5660_p8 }
 0x75c   : > { %p5247_p10 = pneg %p5246_p9 }
 0x75e   : > { %5468 = dma.done.wait (%p5247_p10), %s4800_s23, 512  }
 0x75f   : > { %5470 = vsyncadd (%p5247_p10), %s4800_s23, 4294966784  ;;  %s29_s25 = sadd.s32 1, %s5501_s25   ;;  %s10494_s20 = sld [smem:[#allocation8_spill]] }
 0x760   : > { %p26_p11 = scmp.ge.s32.totalorder %s29_s25, 8   ;;  %s10495_s3 = sld [smem:[#allocation14_spill]] }
 0x761   : > { %s10496_s21 = sld [smem:[#allocation9_spill]]  ;;  %s10500_s18 = smov %s5477_s19 }
 0x762   : > { %s10497_s22 = sld [smem:[#allocation10_spill]]  ;;  %28 = sbr.rel (!%p26_p11) target bundleno = 14 (0xe), region = 179 }
 0x763   : > { %s10498_s23 = sld [smem:[#allocation11_spill]] }
 0x764   : > { %s10499_s24 = sld [smem:[#allocation12_spill]] }
 0x765   : > { %s10501_s19 = smov %s10494_s20 }
 0x766   : > { %s10502_s20 = smov %s10495_s3 }
 0x767   :  { %4806 = vsyncpa [#allocation6], 1 }
 0x768   :  { %4808 = vsyncpa [#allocation6 + $0x1], 1 }

// kernel: _lambda_.10
= control target key start
LH: loop header
LB: loop body
LE: loop exit
PB: predicated region body
PF: predicated region fallthrough
CT: control target
= control target key end

     0   :  { %v957_v6 = vmov 0   ;;  %vm475_vm0 = vcmask 523264   ;;  %s1264_s1 = inlined_call_operand.vmem [shape: bf16[576,128], index: 1, kind: input, shape index: {}]   ;;  %s1265_s2 = inlined_call_operand.vmem [shape: f32[64,1], index: 2, kind: input, shape index: {}]   ;;  %s1266_s0 = inlined_call_operand.vmem [shape: bf16[64,576], index: 0, kind: input, shape index: {}]   ;;  %s1267_s3 = inlined_call_operand.vmem [shape: f32[64,128], index: 3, kind: output, shape index: {}]  }
   0x1   :  { %v908_v0 = vld [vmem:[%s1264_s1 + $0x38] sm:$0xff]  ;;  %v907_v1 = vld [vmem:[%s1264_s1 + $0x30] sm:$0xff]  ;;  %v906_v4 = vld [vmem:[%s1264_s1 + $0x28] sm:$0xff]  ;;  %955 = vset.pattern.permute.xlu1 %v957_v6  ;;  %954 = vset.pattern.permute.xlu0 %v957_v6 }
   0x2   :  { %937 = vmatpush.bf16.msra.mxu1 %v908_v0  ;;  %938 = vmatpush.bf16.msra.mxu2 %v908_v0  ;;  %v932_v2 = vld [vmem:[%s1264_s1 + $0xf8] sm:$0xff]  ;;  %v931_v3 = vld [vmem:[%s1264_s1 + $0xf0] sm:$0xff]  ;;  %v930_v5 = vld [vmem:[%s1264_s1 + $0xe8] sm:$0xff] }
   0x3   :  { %488 = vmatpush.bf16.msra.mxu0 %v908_v0  ;;  %575 = vmatpush.bf16.msra.mxu3 %v932_v2  ;;  %v905_v7 = vld [vmem:[%s1264_s1 + $0x20] sm:$0xff]  ;;  %v113_v8 = vld [vmem:[%s1265_s2 + $0x10] sm:$0xff]  ;;  %v904_v11 = vld [vmem:[%s1264_s1 + $0x18] sm:$0xff] }
   0x4   :  { %956 = vset.pattern.permute.xlu2 %v957_v6  ;;  %v929_v9 = vld [vmem:[%s1264_s1 + $0xe0] sm:$0xff]  ;;  %131 = vperm.xlu1 %955, %v113_v8   ;;  %v928_v12 = vld [vmem:[%s1264_s1 + $0xd8] sm:$0xff]  ;;  %v903_v13 = vld [vmem:[%s1264_s1 + $0x10] sm:$0xff] }
   0x5   :  { %v111_v10 = vld [vmem:[%s1265_s2] sm:$0xff]  ;;  %v114_v14 = vld [vmem:[%s1265_s2 + $0x18] sm:$0xff]  ;;  %v927_v15 = vld [vmem:[%s1264_s1 + $0xd0] sm:$0xff] }
   0x6   :  { %939 = vmatpush.bf16.msra.mxu1 %v907_v1  ;;  %940 = vmatpush.bf16.msra.mxu2 %v907_v1  ;;  %v112_v16 = vld [vmem:[%s1265_s2 + $0x8] sm:$0xff]  ;;  %v901_v19 = vld [vmem:[%s1264_s1] sm:$0xff]  ;;  %v888_v21 = vld [vmem:[%s1266_s0 + $0x38] sm:$0xf0] }
   0x7   :  { %489 = vmatpush.bf16.msra.mxu0 %v907_v1  ;;  %576 = vmatpush.bf16.msra.mxu3 %v931_v3  ;;  %v902_v17 = vld [vmem:[%s1264_s1 + $0x8] sm:$0xff]  ;;  %v715_v22 = vld [vmem:[%s1266_s0 + $0x78] sm:$0xf]  ;;  %v655_v26 = vld [vmem:[%s1266_s0] sm:$0xf] }
   0x8   :  { %121 = vperm.xlu0 %954, %v111_v10   ;;  %v926_v18 = vld [vmem:[%s1264_s1 + $0xc8] sm:$0xff]  ;;  %v924_v24 = vld [vmem:[%s1264_s1 + $0xb8] sm:$0xff]  ;;  %v925_v27 = vld [vmem:[%s1264_s1 + $0xc0] sm:$0xff] }
   0x9   :  { %v675_v20 = vld [vmem:[%s1266_s0 + $0x28] sm:$0xf]  ;;  %v898_v23 = vld [vmem:[%s1266_s0 + $0x88] sm:$0xf0]  ;;  %v916_v25 = vld [vmem:[%s1264_s1 + $0x78] sm:$0xff] }
   0xa   :  { %941 = vmatpush.bf16.msra.mxu1 %v906_v4  ;;  %942 = vmatpush.bf16.msra.mxu2 %v906_v4  ;;  %v676_v28 = vor.u32 %v888_v21, %v675_v20  ;;  %v716_v29 = vor.u32 %v898_v23, %v715_v22  ;;  %v883_v30 = vld [vmem:[%s1266_s0 + $0x10] sm:$0xf0]  ;;  %v882_v31 = vld [vmem:[%s1266_s0 + $0xc] sm:$0xf]  ;;  %v665_v32 = vld [vmem:[%s1266_s0 + $0x1c] sm:$0xf0] }
   0xb   :  { %490 = vmatpush.bf16.msra.mxu0 %v906_v4  ;;  %577 = vmatpush.bf16.msra.mxu3 %v930_v5  ;;  %v936_v33 = vld [vmem:[%s1264_s1 + $0x118] sm:$0xff]  ;;  %v923_v34 = vld [vmem:[%s1264_s1 + $0xb0] sm:$0xff]  ;;  %v656_v37 = vor.u32 %v883_v30, %v655_v26  ;;  %v668_v38 = vor.u32 %v882_v31, %v665_v32  ;;  %v922_v41 = vld [vmem:[%s1264_s1 + $0xa8] sm:$0xff] }
   0xc   :  { %136 = vperm.xlu1 %955, %v114_v14   ;;  %v915_v35 = vld [vmem:[%s1264_s1 + $0x70] sm:$0xff]  ;;  %v118_v36 = vld [vmem:[%s1265_s2 + $0x38] sm:$0xff]  ;;  %v914_v42 = vld [vmem:[%s1264_s1 + $0x68] sm:$0xff] }
   0xd   :  { %v935_v39 = vld [vmem:[%s1264_s1 + $0x110] sm:$0xff]  ;;  %v934_v43 = vld [vmem:[%s1264_s1 + $0x108] sm:$0xff]  ;;  %v921_v44 = vld [vmem:[%s1264_s1 + $0xa0] sm:$0xff] }
   0xe   :  { %943 = vmatpush.bf16.msra.mxu1 %v905_v7  ;;  %944 = vmatpush.bf16.msra.mxu2 %v905_v7  ;;  %v117_v40 = vld [vmem:[%s1265_s2 + $0x30] sm:$0xff]  ;;  %v913_v45 = vld [vmem:[%s1264_s1 + $0x60] sm:$0xff]  ;;  %v920_v49 = vld [vmem:[%s1264_s1 + $0x98] sm:$0xff] }
   0xf   :  { %491 = vmatpush.bf16.msra.mxu0 %v905_v7  ;;  %578 = vmatpush.bf16.msra.mxu3 %v929_v9  ;;  %v695_v46 = vld [vmem:[%s1266_s0 + $0x50] sm:$0xf]  ;;  %v893_v47 = vld [vmem:[%s1266_s0 + $0x60] sm:$0xf0]  ;;  %v912_v50 = vld [vmem:[%s1264_s1 + $0x58] sm:$0xff] }
  0x10   :  { %126 = vperm.xlu0 %954, %v112_v16   ;;  %v933_v48 = vld [vmem:[%s1264_s1 + $0x100] sm:$0xff]  ;;  %v671_v51 = vld [vmem:[%s1266_s0 + $0x10] sm:$0xf]  ;;  %v696_v52 = vor.u32 %v893_v47, %v695_v46  ;;  %v887_v54 = vld [vmem:[%s1266_s0 + $0x34] sm:$0xf] }
  0x11   :  { %v885_v53 = vld [vmem:[%s1266_s0 + $0x20] sm:$0xf0]  ;;  %v685_v55 = vld [vmem:[%s1266_s0 + $0x44] sm:$0xf0]  ;;  %v919_v56 = vld [vmem:[%s1264_s1 + $0x90] sm:$0xff] }
  0x12   :  { %945 = vmatpush.bf16.msra.mxu1 %v904_v11  ;;  %946 = vmatpush.bf16.msra.mxu2 %v904_v11  ;;  %v911_v57 = vld [vmem:[%s1264_s1 + $0x50] sm:$0xff]  ;;  %v672_v58 = vor.u32 %v885_v53, %v671_v51  ;;  %v688_v59 = vor.u32 %v887_v54, %v685_v55  ;;  %v115_v60 = vld [vmem:[%s1265_s2 + $0x20] sm:$0xff]  ;;  %v918_v61 = vld [vmem:[%s1264_s1 + $0x88] sm:$0xff] }
  0x13   :  { %492 = vmatpush.bf16.msra.mxu0 %v904_v11  ;;  %579 = vmatpush.bf16.msra.mxu3 %v928_v12  ;;  %v910_v62 = vld [vmem:[%s1264_s1 + $0x48] sm:$0xff]  ;;  %v917_v63 = vld [vmem:[%s1264_s1 + $0x80] sm:$0xff]  ;;  %v884_v2 = vld [vmem:[%s1266_s0 + $0x18] sm:$0xf0] }
  0x14   :  { %156 = vperm.xlu1 %955, %v118_v36   ;;  %141 = vperm.xlu2 %956, %v115_v60   ;;  %v909_v0 = vld [vmem:[%s1264_s1 + $0x40] sm:$0xff]  ;;  %v663_v1 = vld [vmem:[%s1266_s0 + $0x8] sm:$0xf]  ;;  %v657_v6 = vld [vmem:[%s1266_s0 + $0x14] sm:$0xf0] }
  0x15   :  { %v116_v3 = vld [vmem:[%s1265_s2 + $0x28] sm:$0xff]  ;;  %v664_v4 = vor.u32 %v884_v2, %v663_v1  ;;  %v881_v5 = vld [vmem:[%s1266_s0 + $0x4] sm:$0xf]  ;;  %v691_v7 = vld [vmem:[%s1266_s0 + $0x38] sm:$0xf] }
  0x16   :  { %947 = vmatpush.bf16.msra.mxu1 %v903_v13  ;;  %948 = vmatpush.bf16.msra.mxu2 %v903_v13  ;;  %v660_v8 = vor.u32 %v881_v5, %v657_v6  ;;  %v890_v9 = vld [vmem:[%s1266_s0 + $0x48] sm:$0xf0]  ;;  %v892_v10 = vld [vmem:[%s1266_s0 + $0x5c] sm:$0xf]  ;;  %v705_v11 = vld [vmem:[%s1266_s0 + $0x6c] sm:$0xf0] }
  0x17   :  { %493 = vmatpush.bf16.msra.mxu0 %v903_v13  ;;  %580 = vmatpush.bf16.msra.mxu3 %v927_v15  ;;  %v692_v12 = vor.u32 %v890_v9, %v691_v7  ;;  %v708_v13 = vor.u32 %v892_v10, %v705_v11  ;;  %v683_v14 = vld [vmem:[%s1266_s0 + $0x30] sm:$0xf]  ;;  %v889_v15 = vld [vmem:[%s1266_s0 + $0x40] sm:$0xf0]  ;;  %v895_v21 = vld [vmem:[%s1266_s0 + $0x70] sm:$0xf0] }
  0x18   :  { %151 = vperm.xlu0 %954, %v117_v40   ;;  %v684_v16 = vor.u32 %v889_v15, %v683_v14  ;;  %v897_v22 = vld [vmem:[%s1266_s0 + $0x84] sm:$0xf]  ;;  %v725_v23 = vld [vmem:[%s1266_s0 + $0x94] sm:$0xf0]  ;;  %v697_v30 = vld [vmem:[%s1266_s0 + $0x64] sm:$0xf0] }
  0x19   :  { %v703_v26 = vld [vmem:[%s1266_s0 + $0x58] sm:$0xf]  ;;  %v731_v32 = vld [vmem:[%s1266_s0 + $0x88] sm:$0xf]  ;;  %v899_v36 = vld [vmem:[%s1266_s0 + $0x90] sm:$0xf0] }
  0x1a   :  { %949 = vmatpush.bf16.msra.mxu1 %v902_v17  ;;  %950 = vmatpush.bf16.msra.mxu2 %v902_v17 }
  0x1b   :  { %494 = vmatpush.bf16.msra.mxu0 %v902_v17  ;;  %581 = vmatpush.bf16.msra.mxu3 %v926_v18  ;;  %v886_v17 = vld [vmem:[%s1266_s0 + $0x2c] sm:$0xf]  ;;  %v677_v18 = vld [vmem:[%s1266_s0 + $0x3c] sm:$0xf0] }
  0x1c   :  { %146 = vperm.xlu2 %956, %v116_v3   ;;  %v680_v20 = vor.u32 %v886_v17, %v677_v18 }
  0x1e   :  { %951 = vmatpush.bf16.msra.mxu1 %v901_v19  ;;  %952 = vmatpush.bf16.msra.mxu2 %v901_v19 }
  0x1f   :  { %495 = vmatpush.bf16.msra.mxu0 %v901_v19  ;;  %582 = vmatpush.bf16.msra.mxu3 %v925_v27  ;;  %v711_v19 = vld [vmem:[%s1266_s0 + $0x60] sm:$0xf]  ;;  %v894_v27 = vld [vmem:[%s1266_s0 + $0x68] sm:$0xf0] }
  0x21   :  { %501 = vmatmul.bf16.vlgmr.msra.gmra.mxu1 %v676_v28  ;;  %511 = vmatmul.bf16.vlgmr.msra.gmra.mxu2 %v716_v29  ;;  %v704_v28 = vor.u32 %v894_v27, %v703_v26  ;;  %v891_v29 = vld [vmem:[%s1266_s0 + $0x54] sm:$0xf] }
  0x22   :  { %546 = vmatpush.bf16.msrb.mxu2 %v924_v24  ;;  %517 = vmatpush.bf16.msrb.mxu1 %v916_v25  ;;  %v712_v24 = vor.u32 %v895_v21, %v711_v19  ;;  %v728_v25 = vor.u32 %v897_v22, %v725_v23  ;;  %v700_v31 = vor.u32 %v891_v29, %v697_v30 }
  0x23   :  { %608 = vmatpush.bf16.msrb.mxu0 %v936_v33  ;;  %583 = vmatmul.bf16.vlgmr.msra.gmra.mxu3 %v668_v38  ;;  %v900_v33 = vld [vmem:[%s1266_s0 + $0x98] sm:$0xf0] }
  0x24   :  { %496 = vmatmul.bf16.vlgmr.msra.gmra.mxu0 %v656_v37  ;;  %v896_v38 = vld [vmem:[%s1266_s0 + $0x7c] sm:$0xf] }
  0x26   :  { %547 = vmatpush.bf16.msrb.mxu2 %v923_v34  ;;  %518 = vmatpush.bf16.msrb.mxu1 %v915_v35  ;;  %v732_v34 = vor.u32 %v900_v33, %v731_v32  ;;  %v723_v35 = vld [vmem:[%s1266_s0 + $0x80] sm:$0xf] }
  0x27   :  { %609 = vmatpush.bf16.msrb.mxu0 %v935_v39  ;;  %v724_v37 = vor.u32 %v899_v36, %v723_v35  ;;  %v717_v39 = vld [vmem:[%s1266_s0 + $0x8c] sm:$0xf0] }
  0x28   :  { %v720_v40 = vor.u32 %v896_v38, %v717_v39 }
  0x2a   :  { %548 = vmatpush.bf16.msrb.mxu2 %v922_v41  ;;  %519 = vmatpush.bf16.msrb.mxu1 %v914_v42 }
  0x2b   :  { %610 = vmatpush.bf16.msrb.mxu0 %v934_v43 }
  0x2e   :  { %549 = vmatpush.bf16.msrb.mxu2 %v921_v44  ;;  %520 = vmatpush.bf16.msrb.mxu1 %v913_v45 }
  0x2f   :  { %611 = vmatpush.bf16.msrb.mxu0 %v933_v48 }
  0x31   :  { %506 = vmatmul.bf16.gmra.mxu1 %v696_v52 }
  0x32   :  { %550 = vmatpush.bf16.msrb.mxu2 %v920_v49  ;;  %521 = vmatpush.bf16.msrb.mxu1 %v912_v50 }
  0x33   :  { %588 = vmatmul.bf16.gmra.mxu3 %v688_v59 }
  0x34   :  { %877 = vmatmul.msk.bf16.vlgmr.msrb.gmra.mxu0 %vm475_vm0, %v672_v58 }
  0x36   :  { %551 = vmatpush.bf16.msrb.mxu2 %v919_v56  ;;  %522 = vmatpush.bf16.msrb.mxu1 %v911_v57 }
  0x3a   :  { %552 = vmatpush.bf16.msrb.mxu2 %v918_v61  ;;  %523 = vmatpush.bf16.msrb.mxu1 %v910_v62 }
  0x3e   :  { %553 = vmatpush.bf16.msrb.mxu2 %v917_v63  ;;  %524 = vmatpush.bf16.msrb.mxu1 %v909_v0 }
  0x41   :  { %554 = vmatmul.bf16.vlgmr.msrb.gmra.mxu2 %v664_v4  ;;  %525 = vmatmul.bf16.vlgmr.msrb.gmra.mxu1 %v660_v8 }
  0x43   :  { %593 = vmatmul.bf16.gmra.mxu3 %v708_v13 }
  0x44   :  { %878 = vmatmul.msk.bf16.gmra.mxu0 %vm475_vm0, %v692_v12 }
  0x51   :  { %559 = vmatmul.bf16.gmra.mxu2 %v684_v16  ;;  %530 = vmatmul.bf16.gmra.mxu1 %v680_v20 }
  0x53   :  { %598 = vmatmul.bf16.gmra.mxu3 %v728_v25 }
  0x54   :  { %879 = vmatmul.msk.bf16.gmra.mxu0 %vm475_vm0, %v712_v24 }
  0x61   :  { %564 = vmatmul.bf16.gmra.mxu2 %v704_v28  ;;  %535 = vmatmul.bf16.gmra.mxu1 %v700_v31 }
  0x64   :  { %880 = vmatmul.msk.bf16.gmra.mxu0 %vm475_vm0, %v732_v34 }
  0x6e   :  { %v142_v23 = vpop.permute.xlu2 %141 }
  0x71   :  { %569 = vmatmul.bf16.gmra.mxu2 %v724_v37  ;;  %540 = vmatmul.bf16.gmra.mxu1 %v720_v40 }
  0x76   :  { %v132_v1 = vpop.permute.xlu1 %131  ;;  %v147_v36 = vpop.permute.xlu2 %146 }
  0x7a   :  { %v122_v51 = vpop.permute.xlu0 %121 }
  0x7e   :  { %v137_v14 = vpop.permute.xlu1 %136 }
  0x82   :  { %v127_v59 = vpop.permute.xlu0 %126 }
  0x9e   :  { %v502_v41 = vpop.f32.mrf.mxu1 }
  0x9f   :  { %v503_v8 = vadd.f32 %v502_v41, %v132_v1 }
  0xa1   :  { %v497_v42 = vpop.f32.mrf.mxu0 }
  0xa2   :  { %v498_v52 = vadd.f32 %v497_v42, %v122_v51 }
  0xa4   :  { %v1234_v46 = vpop.f32.mrf.mxu2 }
  0xa6   :  { %v504_v43 = vpop.f32.mrf.mxu1  ;;  %v584_v47 = vpop.f32.mrf.mxu3 }
  0xa7   :  { %v505_v18 = vadd.f32 %v504_v43, %v137_v14 }
  0xa9   :  { %v499_v44 = vpop.f32.mrf.mxu0 }
  0xaa   :  { %v500_v61 = vadd.f32 %v499_v44, %v127_v59  ;;  %v157_v59 = vpop.permute.xlu1 %156 }
  0xac   :  { %v1236_v50 = vpop.f32.mrf.mxu2 }
  0xae   :  { %v507_v45 = vpop.f32.mrf.mxu1  ;;  %v586_v55 = vpop.f32.mrf.mxu3 }
  0xaf   :  { %v508_v28 = vadd.f32 %v507_v45, %v142_v23 }
  0xb1   :  { %v613_v49 = vpop.f32.mrf.mxu0 }
  0xb6   :  { %v509_v48 = vpop.f32.mrf.mxu1  ;;  %v589_v4 = vpop.f32.mrf.mxu3 }
  0xb7   :  { %v510_v39 = vadd.f32 %v509_v48, %v147_v36 }
  0xb9   :  { %v615_v57 = vpop.f32.mrf.mxu0 }
  0xbe   :  { %v526_v53 = vpop.f32.mrf.mxu1  ;;  %v591_v16 = vpop.f32.mrf.mxu3 }
  0xbf   :  { %v527_v54 = vadd.f32 %v526_v53, %v498_v52 }
  0xc1   :  { %v618_v6 = vpop.f32.mrf.mxu0 }
  0xc4   :  { %v555_v56 = vpop.f32.mrf.mxu2 }
  0xc5   :  { %v556_v58 = vadd.f32 %v555_v56, %v527_v54 }
  0xc6   :  { %v528_v63 = vpop.f32.mrf.mxu1  ;;  %v594_v29 = vpop.f32.mrf.mxu3 }
  0xc7   :  { %v585_v60 = vadd.f32 %v584_v47, %v556_v58  ;;  %v529_v0 = vadd.f32 %v528_v63, %v500_v61  ;;  %v515_v63 = vadd.f32 %v1236_v50, %v157_v59 }
  0xc9   :  { %v614_v62 = vadd.f32 %v613_v49, %v585_v60  ;;  %v620_v19 = vpop.f32.mrf.mxu0  ;;  %v152_v49 = vpop.permute.xlu0 %151 }
  0xca   :  { %v513_v53 = vadd.f32 %v1234_v46, %v152_v49 }
  0xcb   :  { %v633_v2 = vmax.f32 %v614_v62, 0.0 }
  0xcc   :  { %v557_v3 = vpop.f32.mrf.mxu2 }
  0xcd   :  { %641 = vst [vmem:[%s1267_s3] sm:$0xff] %v633_v2  ;;  %v558_v5 = vadd.f32 %v557_v3, %v529_v0 }
  0xce   :  { %v531_v10 = vpop.f32.mrf.mxu1  ;;  %v596_v42 = vpop.f32.mrf.mxu3 }
  0xcf   :  { %v587_v7 = vadd.f32 %v586_v55, %v558_v5  ;;  %v532_v11 = vadd.f32 %v531_v10, %v503_v8 }
  0xd1   :  { %v616_v9 = vadd.f32 %v615_v57, %v587_v7  ;;  %v623_v32 = vpop.f32.mrf.mxu0 }
  0xd3   :  { %v634_v12 = vmax.f32 %v616_v9, 0.0 }
  0xd4   :  { %v560_v13 = vpop.f32.mrf.mxu2 }
  0xd5   :  { %642 = vst [vmem:[%s1267_s3 + $0x8] sm:$0xff] %v634_v12  ;;  %v561_v15 = vadd.f32 %v560_v13, %v532_v11 }
  0xd6   :  { %v533_v21 = vpop.f32.mrf.mxu1  ;;  %v599_v57 = vpop.f32.mrf.mxu3 }
  0xd7   :  { %v590_v17 = vadd.f32 %v589_v4, %v561_v15  ;;  %v534_v22 = vadd.f32 %v533_v21, %v505_v18 }
  0xd9   :  { %v619_v20 = vadd.f32 %v618_v6, %v590_v17  ;;  %v625_v45 = vpop.f32.mrf.mxu0 }
  0xdb   :  { %v635_v24 = vmax.f32 %v619_v20, 0.0 }
  0xdc   :  { %v562_v25 = vpop.f32.mrf.mxu2 }
  0xdd   :  { %643 = vst [vmem:[%s1267_s3 + $0x10] sm:$0xff] %v635_v24  ;;  %v563_v26 = vadd.f32 %v562_v25, %v534_v22 }
  0xde   :  { %v536_v31 = vpop.f32.mrf.mxu1  ;;  %v601_v5 = vpop.f32.mrf.mxu3 }
  0xdf   :  { %v592_v27 = vadd.f32 %v591_v16, %v563_v26  ;;  %v537_v33 = vadd.f32 %v536_v31, %v508_v28 }
  0xe1   :  { %v621_v30 = vadd.f32 %v620_v19, %v592_v27  ;;  %v628_v61 = vpop.f32.mrf.mxu0 }
  0xe3   :  { %v636_v34 = vmax.f32 %v621_v30, 0.0 }
  0xe4   :  { %v565_v35 = vpop.f32.mrf.mxu2 }
  0xe5   :  { %644 = vst [vmem:[%s1267_s3 + $0x18] sm:$0xff] %v636_v34  ;;  %v566_v37 = vadd.f32 %v565_v35, %v537_v33 }
  0xe6   :  { %v538_v41 = vpop.f32.mrf.mxu1 }
  0xe7   :  { %v595_v38 = vadd.f32 %v594_v29, %v566_v37  ;;  %v539_v43 = vadd.f32 %v538_v41, %v510_v39 }
  0xe9   :  { %v624_v40 = vadd.f32 %v623_v32, %v595_v38  ;;  %v630_v7 = vpop.f32.mrf.mxu0 }
  0xeb   :  { %v637_v44 = vmax.f32 %v624_v40, 0.0 }
  0xec   :  { %v567_v47 = vpop.f32.mrf.mxu2 }
  0xed   :  { %645 = vst [vmem:[%s1267_s3 + $0x20] sm:$0xff] %v637_v44  ;;  %v568_v51 = vadd.f32 %v567_v47, %v539_v43 }
  0xee   :  { %v541_v55 = vpop.f32.mrf.mxu1 }
  0xef   :  { %v597_v52 = vadd.f32 %v596_v42, %v568_v51  ;;  %v542_v56 = vadd.f32 %v541_v55, %v513_v53 }
  0xf1   :  { %v626_v54 = vadd.f32 %v625_v45, %v597_v52 }
  0xf3   :  { %v638_v48 = vmax.f32 %v626_v54, 0.0 }
  0xf4   :  { %v570_v58 = vpop.f32.mrf.mxu2 }
  0xf5   :  { %646 = vst [vmem:[%s1267_s3 + $0x28] sm:$0xff] %v638_v48  ;;  %v571_v60 = vadd.f32 %v570_v58, %v542_v56 }
  0xf6   :  { %v543_v1 = vpop.f32.mrf.mxu1 }
  0xf7   :  { %v600_v62 = vadd.f32 %v599_v57, %v571_v60  ;;  %v544_v2 = vadd.f32 %v543_v1, %v515_v63 }
  0xf9   :  { %v629_v0 = vadd.f32 %v628_v61, %v600_v62 }
  0xfb   :  { %v639_v46 = vmax.f32 %v629_v0, 0.0 }
  0xfc   :  { %v572_v3 = vpop.f32.mrf.mxu2 }
  0xfd   :  { %647 = vst [vmem:[%s1267_s3 + $0x30] sm:$0xff] %v639_v46  ;;  %v573_v4 = vadd.f32 %v572_v3, %v544_v2 }
  0xff   :  { %v602_v6 = vadd.f32 %v601_v5, %v573_v4 }
 0x101   :  { %v631_v8 = vadd.f32 %v630_v7, %v602_v6 }
 0x103   :  { %v640_v9 = vmax.f32 %v631_v8, 0.0 }
 0x105   :  { %648 = vst [vmem:[%s1267_s3 + $0x38] sm:$0xff] %v640_v9 }

// kernel: _lambda_.11
= control target key start
LH: loop header
LB: loop body
LE: loop exit
PB: predicated region body
PF: predicated region fallthrough
CT: control target
= control target key end

     0   :  { %v958_v6 = vmov 0   ;;  %vm475_vm0 = vcmask 523264   ;;  %vm641_vm1 = vcmask 261120   ;;  %s1273_s1 = inlined_call_operand.vmem [shape: bf16[576,32], index: 1, kind: input, shape index: {}]   ;;  %s1274_s2 = inlined_call_operand.vmem [shape: f32[64,1], index: 2, kind: input, shape index: {}]   ;;  %s1275_s0 = inlined_call_operand.vmem [shape: bf16[64,576], index: 0, kind: input, shape index: {}]   ;;  %s1276_s3 = inlined_call_operand.vmem [shape: f32[64,32], index: 3, kind: output, shape index: {}]  }
   0x1   :  { %v909_v0 = vld [vmem:[%s1273_s1 + $0x38] sm:$0xff]  ;;  %v908_v1 = vld [vmem:[%s1273_s1 + $0x30] sm:$0xff]  ;;  %v907_v4 = vld [vmem:[%s1273_s1 + $0x28] sm:$0xff]  ;;  %956 = vset.pattern.permute.xlu1 %v958_v6  ;;  %955 = vset.pattern.permute.xlu0 %v958_v6 }
   0x2   :  { %938 = vmatpush.bf16.msra.mxu1 %v909_v0  ;;  %939 = vmatpush.bf16.msra.mxu2 %v909_v0  ;;  %v933_v2 = vld [vmem:[%s1273_s1 + $0xf8] sm:$0xff]  ;;  %v932_v3 = vld [vmem:[%s1273_s1 + $0xf0] sm:$0xff]  ;;  %v931_v5 = vld [vmem:[%s1273_s1 + $0xe8] sm:$0xff] }
   0x3   :  { %488 = vmatpush.bf16.msra.mxu0 %v909_v0  ;;  %575 = vmatpush.bf16.msra.mxu3 %v933_v2  ;;  %v906_v7 = vld [vmem:[%s1273_s1 + $0x20] sm:$0xff]  ;;  %v113_v8 = vld [vmem:[%s1274_s2 + $0x10] sm:$0xff]  ;;  %v905_v11 = vld [vmem:[%s1273_s1 + $0x18] sm:$0xff] }
   0x4   :  { %957 = vset.pattern.permute.xlu2 %v958_v6  ;;  %v930_v9 = vld [vmem:[%s1273_s1 + $0xe0] sm:$0xff]  ;;  %131 = vperm.xlu1 %956, %v113_v8   ;;  %v929_v12 = vld [vmem:[%s1273_s1 + $0xd8] sm:$0xff]  ;;  %v904_v13 = vld [vmem:[%s1273_s1 + $0x10] sm:$0xff] }
   0x5   :  { %v111_v10 = vld [vmem:[%s1274_s2] sm:$0xff]  ;;  %v114_v14 = vld [vmem:[%s1274_s2 + $0x18] sm:$0xff]  ;;  %v928_v15 = vld [vmem:[%s1273_s1 + $0xd0] sm:$0xff] }
   0x6   :  { %940 = vmatpush.bf16.msra.mxu1 %v908_v1  ;;  %941 = vmatpush.bf16.msra.mxu2 %v908_v1  ;;  %v112_v16 = vld [vmem:[%s1274_s2 + $0x8] sm:$0xff]  ;;  %v902_v19 = vld [vmem:[%s1273_s1] sm:$0xff]  ;;  %v889_v21 = vld [vmem:[%s1275_s0 + $0x38] sm:$0xf0] }
   0x7   :  { %489 = vmatpush.bf16.msra.mxu0 %v908_v1  ;;  %576 = vmatpush.bf16.msra.mxu3 %v932_v3  ;;  %v903_v17 = vld [vmem:[%s1273_s1 + $0x8] sm:$0xff]  ;;  %v716_v22 = vld [vmem:[%s1275_s0 + $0x78] sm:$0xf]  ;;  %v656_v26 = vld [vmem:[%s1275_s0] sm:$0xf] }
   0x8   :  { %121 = vperm.xlu0 %955, %v111_v10   ;;  %v927_v18 = vld [vmem:[%s1273_s1 + $0xc8] sm:$0xff]  ;;  %v925_v24 = vld [vmem:[%s1273_s1 + $0xb8] sm:$0xff]  ;;  %v926_v27 = vld [vmem:[%s1273_s1 + $0xc0] sm:$0xff] }
   0x9   :  { %v676_v20 = vld [vmem:[%s1275_s0 + $0x28] sm:$0xf]  ;;  %v899_v23 = vld [vmem:[%s1275_s0 + $0x88] sm:$0xf0]  ;;  %v917_v25 = vld [vmem:[%s1273_s1 + $0x78] sm:$0xff] }
   0xa   :  { %942 = vmatpush.bf16.msra.mxu1 %v907_v4  ;;  %943 = vmatpush.bf16.msra.mxu2 %v907_v4  ;;  %v677_v28 = vor.u32 %v889_v21, %v676_v20  ;;  %v717_v29 = vor.u32 %v899_v23, %v716_v22  ;;  %v884_v30 = vld [vmem:[%s1275_s0 + $0x10] sm:$0xf0]  ;;  %v883_v31 = vld [vmem:[%s1275_s0 + $0xc] sm:$0xf]  ;;  %v666_v32 = vld [vmem:[%s1275_s0 + $0x1c] sm:$0xf0] }
   0xb   :  { %490 = vmatpush.bf16.msra.mxu0 %v907_v4  ;;  %577 = vmatpush.bf16.msra.mxu3 %v931_v5  ;;  %v937_v33 = vld [vmem:[%s1273_s1 + $0x118] sm:$0xff]  ;;  %v924_v34 = vld [vmem:[%s1273_s1 + $0xb0] sm:$0xff]  ;;  %v657_v37 = vor.u32 %v884_v30, %v656_v26  ;;  %v669_v38 = vor.u32 %v883_v31, %v666_v32  ;;  %v923_v41 = vld [vmem:[%s1273_s1 + $0xa8] sm:$0xff] }
   0xc   :  { %136 = vperm.xlu1 %956, %v114_v14   ;;  %v916_v35 = vld [vmem:[%s1273_s1 + $0x70] sm:$0xff]  ;;  %v118_v36 = vld [vmem:[%s1274_s2 + $0x38] sm:$0xff]  ;;  %v915_v42 = vld [vmem:[%s1273_s1 + $0x68] sm:$0xff] }
   0xd   :  { %v936_v39 = vld [vmem:[%s1273_s1 + $0x110] sm:$0xff]  ;;  %v935_v43 = vld [vmem:[%s1273_s1 + $0x108] sm:$0xff]  ;;  %v922_v44 = vld [vmem:[%s1273_s1 + $0xa0] sm:$0xff] }
   0xe   :  { %944 = vmatpush.bf16.msra.mxu1 %v906_v7  ;;  %945 = vmatpush.bf16.msra.mxu2 %v906_v7  ;;  %v117_v40 = vld [vmem:[%s1274_s2 + $0x30] sm:$0xff]  ;;  %v914_v45 = vld [vmem:[%s1273_s1 + $0x60] sm:$0xff]  ;;  %v921_v49 = vld [vmem:[%s1273_s1 + $0x98] sm:$0xff] }
   0xf   :  { %491 = vmatpush.bf16.msra.mxu0 %v906_v7  ;;  %578 = vmatpush.bf16.msra.mxu3 %v930_v9  ;;  %v696_v46 = vld [vmem:[%s1275_s0 + $0x50] sm:$0xf]  ;;  %v894_v47 = vld [vmem:[%s1275_s0 + $0x60] sm:$0xf0]  ;;  %v913_v50 = vld [vmem:[%s1273_s1 + $0x58] sm:$0xff] }
  0x10   :  { %126 = vperm.xlu0 %955, %v112_v16   ;;  %v934_v48 = vld [vmem:[%s1273_s1 + $0x100] sm:$0xff]  ;;  %v672_v51 = vld [vmem:[%s1275_s0 + $0x10] sm:$0xf]  ;;  %v697_v52 = vor.u32 %v894_v47, %v696_v46  ;;  %v888_v54 = vld [vmem:[%s1275_s0 + $0x34] sm:$0xf] }
  0x11   :  { %v886_v53 = vld [vmem:[%s1275_s0 + $0x20] sm:$0xf0]  ;;  %v686_v55 = vld [vmem:[%s1275_s0 + $0x44] sm:$0xf0]  ;;  %v920_v56 = vld [vmem:[%s1273_s1 + $0x90] sm:$0xff] }
  0x12   :  { %946 = vmatpush.bf16.msra.mxu1 %v905_v11  ;;  %947 = vmatpush.bf16.msra.mxu2 %v905_v11  ;;  %v912_v57 = vld [vmem:[%s1273_s1 + $0x50] sm:$0xff]  ;;  %v673_v58 = vor.u32 %v886_v53, %v672_v51  ;;  %v689_v59 = vor.u32 %v888_v54, %v686_v55  ;;  %v115_v60 = vld [vmem:[%s1274_s2 + $0x20] sm:$0xff]  ;;  %v919_v61 = vld [vmem:[%s1273_s1 + $0x88] sm:$0xff] }
  0x13   :  { %492 = vmatpush.bf16.msra.mxu0 %v905_v11  ;;  %579 = vmatpush.bf16.msra.mxu3 %v929_v12  ;;  %v911_v62 = vld [vmem:[%s1273_s1 + $0x48] sm:$0xff]  ;;  %v918_v63 = vld [vmem:[%s1273_s1 + $0x80] sm:$0xff]  ;;  %v885_v2 = vld [vmem:[%s1275_s0 + $0x18] sm:$0xf0] }
  0x14   :  { %156 = vperm.xlu1 %956, %v118_v36   ;;  %141 = vperm.xlu2 %957, %v115_v60   ;;  %v910_v0 = vld [vmem:[%s1273_s1 + $0x40] sm:$0xff]  ;;  %v664_v1 = vld [vmem:[%s1275_s0 + $0x8] sm:$0xf]  ;;  %v658_v6 = vld [vmem:[%s1275_s0 + $0x14] sm:$0xf0] }
  0x15   :  { %v116_v3 = vld [vmem:[%s1274_s2 + $0x28] sm:$0xff]  ;;  %v665_v4 = vor.u32 %v885_v2, %v664_v1  ;;  %v882_v5 = vld [vmem:[%s1275_s0 + $0x4] sm:$0xf]  ;;  %v692_v7 = vld [vmem:[%s1275_s0 + $0x38] sm:$0xf] }
  0x16   :  { %948 = vmatpush.bf16.msra.mxu1 %v904_v13  ;;  %949 = vmatpush.bf16.msra.mxu2 %v904_v13  ;;  %v661_v8 = vor.u32 %v882_v5, %v658_v6  ;;  %v891_v9 = vld [vmem:[%s1275_s0 + $0x48] sm:$0xf0]  ;;  %v893_v10 = vld [vmem:[%s1275_s0 + $0x5c] sm:$0xf]  ;;  %v706_v11 = vld [vmem:[%s1275_s0 + $0x6c] sm:$0xf0] }
  0x17   :  { %493 = vmatpush.bf16.msra.mxu0 %v904_v13  ;;  %580 = vmatpush.bf16.msra.mxu3 %v928_v15  ;;  %v693_v12 = vor.u32 %v891_v9, %v692_v7  ;;  %v709_v13 = vor.u32 %v893_v10, %v706_v11  ;;  %v684_v14 = vld [vmem:[%s1275_s0 + $0x30] sm:$0xf]  ;;  %v890_v15 = vld [vmem:[%s1275_s0 + $0x40] sm:$0xf0]  ;;  %v896_v21 = vld [vmem:[%s1275_s0 + $0x70] sm:$0xf0] }
  0x18   :  { %151 = vperm.xlu0 %955, %v117_v40   ;;  %v685_v16 = vor.u32 %v890_v15, %v684_v14  ;;  %v898_v22 = vld [vmem:[%s1275_s0 + $0x84] sm:$0xf]  ;;  %v726_v23 = vld [vmem:[%s1275_s0 + $0x94] sm:$0xf0]  ;;  %v698_v30 = vld [vmem:[%s1275_s0 + $0x64] sm:$0xf0] }
  0x19   :  { %v704_v26 = vld [vmem:[%s1275_s0 + $0x58] sm:$0xf]  ;;  %v732_v32 = vld [vmem:[%s1275_s0 + $0x88] sm:$0xf]  ;;  %v900_v36 = vld [vmem:[%s1275_s0 + $0x90] sm:$0xf0] }
  0x1a   :  { %950 = vmatpush.bf16.msra.mxu1 %v903_v17  ;;  %951 = vmatpush.bf16.msra.mxu2 %v903_v17 }
  0x1b   :  { %494 = vmatpush.bf16.msra.mxu0 %v903_v17  ;;  %581 = vmatpush.bf16.msra.mxu3 %v927_v18  ;;  %v887_v17 = vld [vmem:[%s1275_s0 + $0x2c] sm:$0xf]  ;;  %v678_v18 = vld [vmem:[%s1275_s0 + $0x3c] sm:$0xf0] }
  0x1c   :  { %146 = vperm.xlu2 %957, %v116_v3   ;;  %v681_v20 = vor.u32 %v887_v17, %v678_v18 }
  0x1e   :  { %952 = vmatpush.bf16.msra.mxu1 %v902_v19  ;;  %953 = vmatpush.bf16.msra.mxu2 %v902_v19 }
  0x1f   :  { %495 = vmatpush.bf16.msra.mxu0 %v902_v19  ;;  %582 = vmatpush.bf16.msra.mxu3 %v926_v27  ;;  %v712_v19 = vld [vmem:[%s1275_s0 + $0x60] sm:$0xf]  ;;  %v895_v27 = vld [vmem:[%s1275_s0 + $0x68] sm:$0xf0] }
  0x21   :  { %501 = vmatmul.bf16.vlgmr.msra.gmra.mxu1 %v677_v28  ;;  %511 = vmatmul.bf16.vlgmr.msra.gmra.mxu2 %v717_v29  ;;  %v705_v28 = vor.u32 %v895_v27, %v704_v26  ;;  %v892_v29 = vld [vmem:[%s1275_s0 + $0x54] sm:$0xf] }
  0x22   :  { %546 = vmatpush.bf16.msrb.mxu2 %v925_v24  ;;  %517 = vmatpush.bf16.msrb.mxu1 %v917_v25  ;;  %v713_v24 = vor.u32 %v896_v21, %v712_v19  ;;  %v729_v25 = vor.u32 %v898_v22, %v726_v23  ;;  %v701_v31 = vor.u32 %v892_v29, %v698_v30 }
  0x23   :  { %608 = vmatpush.bf16.msrb.mxu0 %v937_v33  ;;  %583 = vmatmul.bf16.vlgmr.msra.gmra.mxu3 %v669_v38  ;;  %v901_v33 = vld [vmem:[%s1275_s0 + $0x98] sm:$0xf0] }
  0x24   :  { %496 = vmatmul.bf16.vlgmr.msra.gmra.mxu0 %v657_v37  ;;  %v897_v38 = vld [vmem:[%s1275_s0 + $0x7c] sm:$0xf] }
  0x26   :  { %547 = vmatpush.bf16.msrb.mxu2 %v924_v34  ;;  %518 = vmatpush.bf16.msrb.mxu1 %v916_v35  ;;  %v733_v34 = vor.u32 %v901_v33, %v732_v32  ;;  %v724_v35 = vld [vmem:[%s1275_s0 + $0x80] sm:$0xf] }
  0x27   :  { %609 = vmatpush.bf16.msrb.mxu0 %v936_v39  ;;  %v725_v37 = vor.u32 %v900_v36, %v724_v35  ;;  %v718_v39 = vld [vmem:[%s1275_s0 + $0x8c] sm:$0xf0] }
  0x28   :  { %v721_v40 = vor.u32 %v897_v38, %v718_v39 }
  0x2a   :  { %548 = vmatpush.bf16.msrb.mxu2 %v923_v41  ;;  %519 = vmatpush.bf16.msrb.mxu1 %v915_v42 }
  0x2b   :  { %610 = vmatpush.bf16.msrb.mxu0 %v935_v43 }
  0x2e   :  { %549 = vmatpush.bf16.msrb.mxu2 %v922_v44  ;;  %520 = vmatpush.bf16.msrb.mxu1 %v914_v45 }
  0x2f   :  { %611 = vmatpush.bf16.msrb.mxu0 %v934_v48 }
  0x31   :  { %506 = vmatmul.bf16.gmra.mxu1 %v697_v52 }
  0x32   :  { %550 = vmatpush.bf16.msrb.mxu2 %v921_v49  ;;  %521 = vmatpush.bf16.msrb.mxu1 %v913_v50 }
  0x33   :  { %588 = vmatmul.bf16.gmra.mxu3 %v689_v59 }
  0x34   :  { %878 = vmatmul.msk.bf16.vlgmr.msrb.gmra.mxu0 %vm475_vm0, %v673_v58 }
  0x36   :  { %551 = vmatpush.bf16.msrb.mxu2 %v920_v56  ;;  %522 = vmatpush.bf16.msrb.mxu1 %v912_v57 }
  0x3a   :  { %552 = vmatpush.bf16.msrb.mxu2 %v919_v61  ;;  %523 = vmatpush.bf16.msrb.mxu1 %v911_v62 }
  0x3e   :  { %553 = vmatpush.bf16.msrb.mxu2 %v918_v63  ;;  %524 = vmatpush.bf16.msrb.mxu1 %v910_v0 }
  0x41   :  { %554 = vmatmul.bf16.vlgmr.msrb.gmra.mxu2 %v665_v4  ;;  %525 = vmatmul.bf16.vlgmr.msrb.gmra.mxu1 %v661_v8 }
  0x43   :  { %593 = vmatmul.bf16.gmra.mxu3 %v709_v13 }
  0x44   :  { %879 = vmatmul.msk.bf16.gmra.mxu0 %vm475_vm0, %v693_v12 }
  0x51   :  { %559 = vmatmul.bf16.gmra.mxu2 %v685_v16  ;;  %530 = vmatmul.bf16.gmra.mxu1 %v681_v20 }
  0x53   :  { %598 = vmatmul.bf16.gmra.mxu3 %v729_v25 }
  0x54   :  { %880 = vmatmul.msk.bf16.gmra.mxu0 %vm475_vm0, %v713_v24 }
  0x61   :  { %564 = vmatmul.bf16.gmra.mxu2 %v705_v28  ;;  %535 = vmatmul.bf16.gmra.mxu1 %v701_v31 }
  0x64   :  { %881 = vmatmul.msk.bf16.gmra.mxu0 %vm475_vm0, %v733_v34 }
  0x6e   :  { %v142_v23 = vpop.permute.xlu2 %141 }
  0x71   :  { %569 = vmatmul.bf16.gmra.mxu2 %v725_v37  ;;  %540 = vmatmul.bf16.gmra.mxu1 %v721_v40 }
  0x76   :  { %v132_v1 = vpop.permute.xlu1 %131  ;;  %v147_v36 = vpop.permute.xlu2 %146 }
  0x7a   :  { %v122_v51 = vpop.permute.xlu0 %121 }
  0x7e   :  { %v137_v14 = vpop.permute.xlu1 %136 }
  0x82   :  { %v127_v59 = vpop.permute.xlu0 %126 }
  0x9e   :  { %v502_v41 = vpop.f32.mrf.mxu1 }
  0x9f   :  { %v503_v8 = vadd.f32 %v502_v41, %v132_v1 }
  0xa1   :  { %v497_v42 = vpop.f32.mrf.mxu0 }
  0xa2   :  { %v498_v52 = vadd.f32 %v497_v42, %v122_v51 }
  0xa4   :  { %v1235_v46 = vpop.f32.mrf.mxu2 }
  0xa6   :  { %v504_v43 = vpop.f32.mrf.mxu1  ;;  %v584_v47 = vpop.f32.mrf.mxu3 }
  0xa7   :  { %v505_v18 = vadd.f32 %v504_v43, %v137_v14 }
  0xa9   :  { %v499_v44 = vpop.f32.mrf.mxu0 }
  0xaa   :  { %v500_v61 = vadd.f32 %v499_v44, %v127_v59  ;;  %v157_v59 = vpop.permute.xlu1 %156 }
  0xac   :  { %v1237_v50 = vpop.f32.mrf.mxu2 }
  0xae   :  { %v507_v45 = vpop.f32.mrf.mxu1  ;;  %v586_v55 = vpop.f32.mrf.mxu3 }
  0xaf   :  { %v508_v28 = vadd.f32 %v507_v45, %v142_v23 }
  0xb1   :  { %v613_v49 = vpop.f32.mrf.mxu0 }
  0xb6   :  { %v509_v48 = vpop.f32.mrf.mxu1  ;;  %v589_v4 = vpop.f32.mrf.mxu3 }
  0xb7   :  { %v510_v39 = vadd.f32 %v509_v48, %v147_v36 }
  0xb9   :  { %v615_v57 = vpop.f32.mrf.mxu0 }
  0xbe   :  { %v526_v53 = vpop.f32.mrf.mxu1  ;;  %v591_v16 = vpop.f32.mrf.mxu3 }
  0xbf   :  { %v527_v54 = vadd.f32 %v526_v53, %v498_v52 }
  0xc1   :  { %v618_v6 = vpop.f32.mrf.mxu0 }
  0xc4   :  { %v555_v56 = vpop.f32.mrf.mxu2 }
  0xc5   :  { %v556_v58 = vadd.f32 %v555_v56, %v527_v54 }
  0xc6   :  { %v528_v63 = vpop.f32.mrf.mxu1  ;;  %v594_v29 = vpop.f32.mrf.mxu3 }
  0xc7   :  { %v585_v60 = vadd.f32 %v584_v47, %v556_v58  ;;  %v529_v0 = vadd.f32 %v528_v63, %v500_v61  ;;  %v515_v63 = vadd.f32 %v1237_v50, %v157_v59 }
  0xc9   :  { %v614_v62 = vadd.f32 %v613_v49, %v585_v60  ;;  %v620_v19 = vpop.f32.mrf.mxu0  ;;  %v152_v49 = vpop.permute.xlu0 %151 }
  0xca   :  { %v513_v53 = vadd.f32 %v1235_v46, %v152_v49 }
  0xcb   :  { %v633_v2 = vmax.f32 %v614_v62, 0.0 }
  0xcc   :  { %v557_v3 = vpop.f32.mrf.mxu2 }
  0xcd   :  { %642 = vst.msk [vmem:[%s1276_s3] sm:$0xff] %vm641_vm1, %v633_v2  ;;  %v558_v5 = vadd.f32 %v557_v3, %v529_v0 }
  0xce   :  { %v531_v10 = vpop.f32.mrf.mxu1  ;;  %v596_v42 = vpop.f32.mrf.mxu3 }
  0xcf   :  { %v587_v7 = vadd.f32 %v586_v55, %v558_v5  ;;  %v532_v11 = vadd.f32 %v531_v10, %v503_v8 }
  0xd1   :  { %v616_v9 = vadd.f32 %v615_v57, %v587_v7  ;;  %v623_v32 = vpop.f32.mrf.mxu0 }
  0xd3   :  { %v634_v12 = vmax.f32 %v616_v9, 0.0 }
  0xd4   :  { %v560_v13 = vpop.f32.mrf.mxu2 }
  0xd5   :  { %643 = vst.msk [vmem:[%s1276_s3 + $0x8] sm:$0xff] %vm641_vm1, %v634_v12  ;;  %v561_v15 = vadd.f32 %v560_v13, %v532_v11 }
  0xd6   :  { %v533_v21 = vpop.f32.mrf.mxu1  ;;  %v599_v57 = vpop.f32.mrf.mxu3 }
  0xd7   :  { %v590_v17 = vadd.f32 %v589_v4, %v561_v15  ;;  %v534_v22 = vadd.f32 %v533_v21, %v505_v18 }
  0xd9   :  { %v619_v20 = vadd.f32 %v618_v6, %v590_v17  ;;  %v625_v45 = vpop.f32.mrf.mxu0 }
  0xdb   :  { %v635_v24 = vmax.f32 %v619_v20, 0.0 }
  0xdc   :  { %v562_v25 = vpop.f32.mrf.mxu2 }
  0xdd   :  { %644 = vst.msk [vmem:[%s1276_s3 + $0x10] sm:$0xff] %vm641_vm1, %v635_v24  ;;  %v563_v26 = vadd.f32 %v562_v25, %v534_v22 }
  0xde   :  { %v536_v31 = vpop.f32.mrf.mxu1  ;;  %v601_v5 = vpop.f32.mrf.mxu3 }
  0xdf   :  { %v592_v27 = vadd.f32 %v591_v16, %v563_v26  ;;  %v537_v33 = vadd.f32 %v536_v31, %v508_v28 }
  0xe1   :  { %v621_v30 = vadd.f32 %v620_v19, %v592_v27  ;;  %v628_v61 = vpop.f32.mrf.mxu0 }
  0xe3   :  { %v636_v34 = vmax.f32 %v621_v30, 0.0 }
  0xe4   :  { %v565_v35 = vpop.f32.mrf.mxu2 }
  0xe5   :  { %645 = vst.msk [vmem:[%s1276_s3 + $0x18] sm:$0xff] %vm641_vm1, %v636_v34  ;;  %v566_v37 = vadd.f32 %v565_v35, %v537_v33 }
  0xe6   :  { %v538_v41 = vpop.f32.mrf.mxu1 }
  0xe7   :  { %v595_v38 = vadd.f32 %v594_v29, %v566_v37  ;;  %v539_v43 = vadd.f32 %v538_v41, %v510_v39 }
  0xe9   :  { %v624_v40 = vadd.f32 %v623_v32, %v595_v38  ;;  %v630_v7 = vpop.f32.mrf.mxu0 }
  0xeb   :  { %v637_v44 = vmax.f32 %v624_v40, 0.0 }
  0xec   :  { %v567_v47 = vpop.f32.mrf.mxu2 }
  0xed   :  { %646 = vst.msk [vmem:[%s1276_s3 + $0x20] sm:$0xff] %vm641_vm1, %v637_v44  ;;  %v568_v51 = vadd.f32 %v567_v47, %v539_v43 }
  0xee   :  { %v541_v55 = vpop.f32.mrf.mxu1 }
  0xef   :  { %v597_v52 = vadd.f32 %v596_v42, %v568_v51  ;;  %v542_v48 = vadd.f32 %v541_v55, %v513_v53 }
  0xf1   :  { %v626_v54 = vadd.f32 %v625_v45, %v597_v52 }
  0xf3   :  { %v638_v56 = vmax.f32 %v626_v54, 0.0 }
  0xf4   :  { %v570_v58 = vpop.f32.mrf.mxu2 }
  0xf5   :  { %647 = vst.msk [vmem:[%s1276_s3 + $0x28] sm:$0xff] %vm641_vm1, %v638_v56  ;;  %v571_v60 = vadd.f32 %v570_v58, %v542_v48 }
  0xf6   :  { %v543_v1 = vpop.f32.mrf.mxu1 }
  0xf7   :  { %v600_v62 = vadd.f32 %v599_v57, %v571_v60  ;;  %v544_v46 = vadd.f32 %v543_v1, %v515_v63 }
  0xf9   :  { %v629_v0 = vadd.f32 %v628_v61, %v600_v62 }
  0xfb   :  { %v639_v2 = vmax.f32 %v629_v0, 0.0 }
  0xfc   :  { %v572_v3 = vpop.f32.mrf.mxu2 }
  0xfd   :  { %648 = vst.msk [vmem:[%s1276_s3 + $0x30] sm:$0xff] %vm641_vm1, %v639_v2  ;;  %v573_v4 = vadd.f32 %v572_v3, %v544_v46 }
  0xff   :  { %v602_v6 = vadd.f32 %v601_v5, %v573_v4 }
 0x101   :  { %v631_v8 = vadd.f32 %v630_v7, %v602_v6 }
 0x103   :  { %v640_v9 = vmax.f32 %v631_v8, 0.0 }
 0x105   :  { %649 = vst.msk [vmem:[%s1276_s3 + $0x38] sm:$0xff] %vm641_vm1, %v640_v9 }

</bundles_post_ra>
